<compile_context>
chip_gen: v7x
topology: tpu7x:2x2x1
jax: 0.10.0
libtpu: 0.0.40
codegen_flags: <defaults>
</compile_context>

<pallas_src>
import numpy as np
import jax
import jax.numpy as jnp
from jax import lax
from jax.experimental import pallas as pl
from jax.experimental.pallas import tpu as pltpu

try:
    import ml_dtypes

    def _round_bf16(x):
        return np.asarray(x, np.float32).astype(ml_dtypes.bfloat16).astype(np.float32)
except ImportError:  # pragma: no cover - ml_dtypes ships with jax
    def _round_bf16(x):
        return np.asarray(jnp.asarray(np.asarray(x, np.float32), jnp.bfloat16)).astype(np.float32)


def _softplus(x):
    # numerically stable softplus: log(1 + exp(x))
    return jnp.maximum(x, 0.0) + jnp.log(1.0 + jnp.exp(-jnp.abs(x)))


def _make_kernel(*, n_init, n_deriv_batches, n_eval_batches, B, M, debug_zero_store):
    """Builds the fused m1+m2 kernel for a fixed host-side schedule."""

    def kernel(
        # SMEM schedule / scalars
        inode_s, ithax_s, isine_s,                 # init clauses: node, thax, sine
        drule_s, dnode_s, dpar1_s, dpar2_s,        # deriv batches: rule / node / parents
        enode_s, posw_s,                           # eval node ids, pos_weight
        # VMEM tensors
        elab_ref,                                  # (n_eval_batches, B, 2) f32 pos/neg
        init_ref, sine_ref,                        # (T,M,D), (S,M,D) f32
        w1a_ref, w1b_ref, b1_ref, w2_ref, b2_ref,  # (R*M,D,D) bf16 / (R*M,1,D) f32
        e1w_ref, e1b_ref, e2w_ref, e2b_ref,        # (M,D,D) bf16, (M,D) f32, (M,D) f32, (M,1) f32
        # outputs
        loss_ref, posok_ref, negok_ref,            # (M, B, 1) f32 accumulators
        # scratch
        store_ref,                                 # (N+1, M, D) f32 clause store (+1 dummy slot)
        *gbufs,                                    # 2*M gather buffers, each (B, D) f32
    ):
        g1 = list(gbufs[:M])
        g2 = list(gbufs[M:2 * M])

        # Outputs are accumulated over eval batches -> zero once up front.
        loss_ref[...] = jnp.zeros_like(loss_ref)
        posok_ref[...] = jnp.zeros_like(posok_ref)
        negok_ref[...] = jnp.zeros_like(negok_ref)

        if debug_zero_store:
            # Only needed to make a topological-order violation deterministic; the
            # wrapper validates ordering host-side, so this is off by default (review:
            # the full-store zero sweep is pure vst traffic, worst on v5e).
            store_ref[...] = jnp.zeros_like(store_ref)

        # ---------------- phase 1: init clauses -------------------------------
        # store[i] = init_embeds[thax] + sine_embellisher[sine]
        def init_body(i, c):
            store_ref[inode_s[i]] = init_ref[ithax_s[i]] + sine_ref[isine_s[i]]
            return c

        if n_init > 0:
            lax.fori_loop(0, n_init, init_body, 0)

        # ---------------- phase 2: derived clauses (level/rule batched) -------
        def deriv_body(b, c):
            r = drule_s[b]
            base = b * B
            # Gather the two parent embeddings of each row into per-model (B, D)
            # buffers (only dynamic *leading*-dim indexing of the store is used).
            for j in range(B):
                e1 = store_ref[dpar1_s[base + j]]          # (M, D) f32
                e2 = store_ref[dpar2_s[base + j]]          # (M, D) f32
                for k in range(M):
                    g1[k][j:j + 1, :] = e1[k:k + 1, :]
                    g2[k][j:j + 1, :] = e2[k:k + 1, :]
            # Per-model batched 2-layer MLP (bf16 operands, f32 accumulation).
            outs = []
            for k in range(M):
                widx = r * M + k                            # lazy per-model weight loads
                a1 = g1[k][...].astype(jnp.bfloat16)
                a2 = g2[k][...].astype(jnp.bfloat16)
                h = jnp.dot(a1, w1a_ref[widx], preferred_element_type=jnp.float32)
                h = h + jnp.dot(a2, w1b_ref[widx], preferred_element_type=jnp.float32)
                h = jnp.maximum(h + b1_ref[widx], 0.0)
                o = jnp.dot(h.astype(jnp.bfloat16), w2_ref[widx],
                            preferred_element_type=jnp.float32)
                outs.append(o + b2_ref[widx])               # (B, D) f32
            # Scatter each row back into the clause store (padded rows -> dummy slot).
            for j in range(B):
                if M > 1:
                    node_val = jnp.concatenate([o[j:j + 1, :] for o in outs], axis=0)
                else:
                    node_val = outs[0][j:j + 1, :]
                store_ref[dnode_s[base + j]] = node_val
            return c

        if n_deriv_batches > 0:
            lax.fori_loop(0, n_deriv_batches, deriv_body, 0)

        # ---------------- phase 3: eval head over labeled clauses only --------
        pw = posw_s[0]

        def eval_body(b, c):
            base = b * B
            for j in range(B):
                e = store_ref[enode_s[base + j]]            # (M, D) f32
                for k in range(M):
                    g1[k][j:j + 1, :] = e[k:k + 1, :]
            lab = elab_ref[b]                               # (B, 2) f32
            pos = lab[:, 0:1]
            neg = lab[:, 1:2]
            denom = pos + neg
            gold = pos / jnp.where(denom > 0.0, denom, 1.0)  # guard 0/0 (padded rows)
            for k in range(M):
                emb = g1[k][...].astype(jnp.bfloat16)
                h = jnp.dot(emb, e1w_ref[k], preferred_element_type=jnp.float32)
                h = jnp.maximum(h + e1b_ref[k:k + 1, :], 0.0)
                val = (jnp.sum(h * e2w_ref[k:k + 1, :], axis=-1, keepdims=True)
                       + e2b_ref[k:k + 1, :])               # (B, 1)
                log_sig = -_softplus(-val)                  # log sigmoid(val)
                log_1ms = -_softplus(val)                   # log(1 - sigmoid(val))
                bce = -(pw * gold * log_sig + (1.0 - gold) * log_1ms)
                loss_ref[k] = loss_ref[k] + denom * bce
                posok_ref[k] = posok_ref[k] + jnp.where(val >= 0.0, pos, 0.0)
                negok_ref[k] = negok_ref[k] + jnp.where(val < 0.0, neg, 0.0)
            return c

        if n_eval_batches > 0:
            lax.fori_loop(0, n_eval_batches, eval_body, 0)

    return kernel


def _padded_bytes(shape, dtype):
    """Bytes of an array after TPU tiling pad of the last two dims."""
    s = tuple(int(x) for x in shape)
    if not s:
        s = (1, 1)
    if len(s) == 1:
        s = (1,) + s
    lead = 1
    for x in s[:-2]:
        lead *= x
    item = np.dtype(dtype).itemsize
    sub = 8 * max(1, 4 // item)        # f32: 8 sublanes, bf16: 16
    rows = -(-s[-2] // sub) * sub
    cols = -(-s[-1] // 128) * 128
    return lead * rows * cols * item


def _vmem_capacity_bytes():
    try:
        cap = getattr(pltpu.get_tpu_info(), "vmem_capacity_bytes", None)
        if cap:
            return int(cap)
    except Exception:
        pass
    return 64 * 2**20  # conservative fallback = v7x per-TensorCore VMEM


def eval_multi_forward(meta, labels, pos_weight, params, *, batch_rows=32,
                       debug_zero_store=False):
    """Fused PairUp forward. meta rows: type, thax, sine, rule, par1, par2, has_label."""
    meta_np = np.asarray(meta, np.int64)
    labels_np = np.asarray(labels, np.float32)
    prms = [jnp.asarray(p, jnp.float32) for p in params]
    init_tab, sine_tab, w1a, w1b, b1, w2, b2, E1, eb1, E2, eb2 = prms
    T, M, D = (int(x) for x in init_tab.shape)
    S = int(sine_tab.shape[0])
    R = int(w1a.shape[0])
    N = int(meta_np.shape[1])
    B = int(batch_rows)

    # MXU-feeding weight tables -> bf16 (single-pass MXU + half the VMEM/vregs).
    # Biases, init/sine tables and activations stay f32 (VPU path; v5e has no bf16 VPU).
    w1a_k = w1a.reshape(R * M, D, D).astype(jnp.bfloat16)   # index = rule * M + model
    w1b_k = w1b.reshape(R * M, D, D).astype(jnp.bfloat16)
    w2_k = w2.reshape(R * M, D, D).astype(jnp.bfloat16)
    b1_k = b1.reshape(R * M, 1, D)
    b2_k = b2.reshape(R * M, 1, D)
    E1_k = E1.astype(jnp.bfloat16)
    eb2_k = eb2.reshape(M, 1)

    # ---- host-side schedule (mirrors deepire's DAG preprocessing) -----------------
    node_type = meta_np[0]
    level = np.zeros(N, np.int64)
    for i in range(N):
        if node_type[i] == 1:
            p1, p2 = int(meta_np[4, i]), int(meta_np[5, i])
            assert 0 <= p1 < i and 0 <= p2 < i, "meta must be topologically ordered"
            assert 0 <= meta_np[3, i] < R, "rule index out of range"
            level[i] = 1 + max(level[p1], level[p2])
        else:
            assert 0 <= meta_np[1, i] < T and 0 <= meta_np[2, i] < S, "init index out of range"

    init_ids = np.nonzero(node_type == 0)[0]
    n_init = int(init_ids.size)
    inode = np.zeros(max(n_init, 1), np.int32)
    ithax = np.zeros(max(n_init, 1), np.int32)
    isine = np.zeros(max(n_init, 1), np.int32)
    inode[:n_init] = init_ids
    ithax[:n_init] = meta_np[1, init_ids]
    isine[:n_init] = meta_np[2, init_ids]

    # Derived clauses grouped by (topological level, rule), split into B-row batches.
    buckets = {}
    for i in range(N):
        if node_type[i] == 1:
            buckets.setdefault((int(level[i]), int(meta_np[3, i])), []).append(int(i))
    chunks = []
    for key in sorted(buckets):
        nodes = buckets[key]
        for s in range(0, len(nodes), B):
            chunks.append((key[1], nodes[s:s + B]))
    n_db = len(chunks)
    nb = max(n_db, 1)
    drule = np.zeros(nb, np.int32)
    dnode = np.full(nb * B, N, np.int32)    # padded rows scatter into the dummy slot N
    dpar1 = np.zeros(nb * B, np.int32)      # padded rows gather node 0 (always valid)
    dpar2 = np.zeros(nb * B, np.int32)
    for bi, (rule, nodes) in enumerate(chunks):
        drule[bi] = rule
        for j, ci in enumerate(nodes):
            dnode[bi * B + j] = ci
            dpar1[bi * B + j] = meta_np[4, ci]
            dpar2[bi * B + j] = meta_np[5, ci]

    # Labeled clauses only (batched eval pass); padded rows have pos = neg = 0.
    lab_ids = np.nonzero(meta_np[6] == 1)[0]
    n_lab = int(lab_ids.size)
    n_eb = -(-n_lab // B) if n_lab else 0
    ne = max(n_eb, 1)
    enode = np.zeros(ne * B, np.int32)
    elab = np.zeros((ne, B, 2), np.float32)
    for j, ci in enumerate(lab_ids):
        enode[j] = ci
        elab[j // B, j % B, 0] = labels_np[0, ci]
        elab[j // B, j % B, 1] = labels_np[1, ci]

    posw = jnp.asarray(np.asarray(pos_weight, np.float32).reshape(-1)[:1])

    smem = pl.BlockSpec(memory_space=pltpu.MemorySpace.SMEM)
    vmem = pl.BlockSpec(memory_space=pltpu.MemorySpace.VMEM)

    vmem_inputs = [jnp.asarray(elab), init_tab, sine_tab, w1a_k, w1b_k, b1_k, w2_k,
                   b2_k, E1_k, eb1, E2, eb2_k]
    scratch_shapes = ([pltpu.VMEM((N + 1, M, D), jnp.float32)]
                      + [pltpu.VMEM((B, D), jnp.float32)] * (2 * M))
    out_shape = tuple(jax.ShapeDtypeStruct((M, B, 1), jnp.float32) for _ in range(3))

    # Generation-aware VMEM budget (64 MiB v7x vs 128 MiB v5e/v6e), 16 MiB headroom.
    est = (sum(_padded_bytes(t.shape, t.dtype) for t in vmem_inputs)
           + _padded_bytes((N + 1, M, D), jnp.float32)
           + 2 * M * _padded_bytes((B, D), jnp.float32)
           + 3 * _padded_bytes((M, B, 1), jnp.float32)
           + (4 << 20))
    cap = _vmem_capacity_bytes()
    vmem_limit = int(min(cap - (16 << 20), max(est, 32 << 20)))

    kernel = _make_kernel(n_init=n_init, n_deriv_batches=n_db, n_eval_batches=n_eb,
                          B=B, M=M, debug_zero_store=debug_zero_store)
    fn = pl.pallas_call(
        kernel,
        out_shape=out_shape,
        in_specs=[smem] * 9 + [vmem] * len(vmem_inputs),
        out_specs=(vmem, vmem, vmem),
        scratch_shapes=scratch_shapes,
        compiler_params=pltpu.CompilerParams(vmem_limit_bytes=vmem_limit),
    )
    loss_b, posok_b, negok_b = fn(
        jnp.asarray(inode), jnp.asarray(ithax), jnp.asarray(isine),
        jnp.asarray(drule), jnp.asarray(dnode), jnp.asarray(dpar1), jnp.asarray(dpar2),
        jnp.asarray(enode), posw, *vmem_inputs)
    return (jnp.sum(loss_b, axis=(1, 2)),
            jnp.sum(posok_b, axis=(1, 2)),
            jnp.sum(negok_b, axis=(1, 2)))


def reference_forward(meta, labels, pos_weight, params):
    """Pure-numpy mirror of the PyTorch forward, emulating the kernel's bf16 MXU
    operand rounding (weights w1a/w1b/w2/E1 and the activation operand of each dot)."""
    p = [np.asarray(x, np.float32) for x in params]
    init_tab, sine_tab, w1a, w1b, b1, w2, b2, E1, eb1, E2, eb2 = p
    w1a, w1b, w2, E1 = _round_bf16(w1a), _round_bf16(w1b), _round_bf16(w2), _round_bf16(E1)
    N = meta.shape[1]
    M, D = E2.shape

    def sp(x):
        return np.maximum(x, 0.0) + np.log(1.0 + np.exp(-np.abs(x)))

    store = np.zeros((N, M, D), np.float32)
    loss = np.zeros(M, np.float32)
    posok = np.zeros(M, np.float32)
    negok = np.zeros(M, np.float32)
    vals_l, pos_l, neg_l = [], [], []
    for i in range(N):
        if meta[0, i] == 0:
            emb = init_tab[meta[1, i]] + sine_tab[meta[2, i]]
        else:
            r = meta[3, i]
            e1, e2 = store[meta[4, i]], store[meta[5, i]]
            emb = np.zeros((M, D), np.float32)
            for k in range(M):
                h = np.maximum(_round_bf16(e1[k]) @ w1a[r, k]
                               + _round_bf16(e2[k]) @ w1b[r, k] + b1[r, k], 0.0)
                emb[k] = _round_bf16(h) @ w2[r, k] + b2[r, k]
        store[i] = emb
        if meta[6, i] == 1:
            val = np.zeros(M, np.float32)
            for k in range(M):
                h = np.maximum(_round_bf16(emb[k]) @ E1[k] + eb1[k], 0.0)
                val[k] = np.sum(h * E2[k]) + eb2[k, 0]
            pos, neg = labels[0, i], labels[1, i]
            gold = pos / (pos + neg)
            bce = -(pos_weight * gold * (-sp(-val)) + (1.0 - gold) * (-sp(val)))
            loss += (pos + neg) * bce
            posok += np.where(val >= 0.0, pos, 0.0)
            negok += np.where(val < 0.0, neg, 0.0)
            vals_l.append(val)
            pos_l.append(pos)
            neg_l.append(neg)
    vals = np.array(vals_l, np.float32).reshape(-1, M)
    return loss, posok, negok, vals, np.asarray(pos_l, np.float32), np.asarray(neg_l, np.float32)


if __name__ == "__main__":
    # Small synthetic configuration: M=2 models, D=32 embed dim, 3 thax entries,
    # 2 sine levels, 2 derivation rules, 4 init + 4 derived clauses.
    M, D = 2, 32
    T, S, R = 3, 2, 2

    key = jax.random.PRNGKey(0)
    ks = jax.random.split(key, 11)
    sc = 0.3
    init_tab = sc * jax.random.normal(ks[0], (T, M, D), jnp.float32)
    sine_tab = sc * jax.random.normal(ks[1], (S, M, D), jnp.float32)
    w1a = sc * jax.random.normal(ks[2], (R, M, D, D), jnp.float32)
    w1b = sc * jax.random.normal(ks[3], (R, M, D, D), jnp.float32)
    b1 = sc * jax.random.normal(ks[4], (R, M, D), jnp.float32)
    w2 = sc * jax.random.normal(ks[5], (R, M, D, D), jnp.float32)
    b2 = sc * jax.random.normal(ks[6], (R, M, D), jnp.float32)
    E1 = sc * jax.random.normal(ks[7], (M, D, D), jnp.float32)
    eb1 = sc * jax.random.normal(ks[8], (M, D), jnp.float32)
    E2 = sc * jax.random.normal(ks[9], (M, D), jnp.float32)
    eb2 = sc * jax.random.normal(ks[10], (M, 1), jnp.float32)
    params = (init_tab, sine_tab, w1a, w1b, b1, w2, b2, E1, eb1, E2, eb2)

    # Problem instance (Python glue mirroring __init__ arguments).
    thax_number_mapping = {0: 0, 1: 1, 2: 2}
    init = [(0, (0, 0)), (1, (1, 1)), (2, (2, 0)), (3, (0, 1))]
    deriv = [(4, 0), (5, 1), (6, 0), (7, 1)]
    pars = {4: [0, 1], 5: [2, 3], 6: [4, 5], 7: [6, 4]}
    pos_vals = {1: 2.0, 4: 1.0, 6: 0.0, 7: 3.0}
    neg_vals = {1: 1.0, 4: 4.0, 6: 2.0, 7: 0.0}
    tot_pos, tot_neg = sum(pos_vals.values()), sum(neg_vals.values())
    HP_POS_WEIGHT_EXTRA = 1.0
    pos_weight = HP_POS_WEIGHT_EXTRA * tot_neg / tot_pos if tot_pos > 0.0 else 1.0

    N = len(init) + len(deriv)
    meta_np = np.zeros((7, N), np.int32)     # rows: type, thax, sine, rule, par1, par2, has_label
    labels_np = np.ones((2, N), np.float32)  # rows: pos, neg (defaults ignored for unlabeled ids)
    for idx, (cid, (thax, sine)) in enumerate(init):
        assert cid == idx
        meta_np[1, idx] = thax_number_mapping[thax]
        meta_np[2, idx] = sine
    for k, (cid, rule) in enumerate(deriv):
        idx = len(init) + k
        assert cid == idx
        meta_np[0, idx] = 1
        meta_np[3, idx] = rule
        meta_np[4, idx] = pars[cid][0]
        meta_np[5, idx] = pars[cid][1]
    for cid in range(N):
        if cid in pos_vals or cid in neg_vals:
            meta_np[6, cid] = 1
            labels_np[0, cid] = pos_vals.get(cid, 0.0)
            labels_np[1, cid] = neg_vals.get(cid, 0.0)

    loss, posok, negok = eval_multi_forward(meta_np, labels_np, pos_weight, params)
    jax.block_until_ready((loss, posok, negok))

    ref_loss, ref_posok, ref_negok, ref_vals, ref_pos, ref_neg = reference_forward(
        meta_np, labels_np, np.float32(pos_weight), params)

    loss_np = np.asarray(loss)
    posok_np = np.asarray(posok)
    negok_np = np.asarray(negok)

    assert np.allclose(loss_np, ref_loss, rtol=2e-2, atol=2e-2), (loss_np, ref_loss)
    # posOK/negOK are decision counts: allow nodes whose eval logit sits within a small
    # margin of 0 to fall on either side (bf16 operand rounding differences), otherwise
    # the check is exact.
    margin = 0.05
    for k in range(M):
        p_lo = float(np.sum(ref_pos[ref_vals[:, k] >= margin]))
        p_hi = float(np.sum(ref_pos[ref_vals[:, k] >= -margin]))
        n_lo = float(np.sum(ref_neg[ref_vals[:, k] < -margin]))
        n_hi = float(np.sum(ref_neg[ref_vals[:, k] < margin]))
        assert p_lo - 1e-3 <= posok_np[k] <= p_hi + 1e-3, (k, posok_np[k], ref_posok[k])
        assert n_lo - 1e-3 <= negok_np[k] <= n_hi + 1e-3, (k, negok_np[k], ref_negok[k])
    print("KERNEL_OK")
</pallas_src>

<mosaic_0001>
module attributes {stable_mosaic.version = 11 : i64} {
  func.func @kernel(%arg0: memref<4xi32, #tpu.memory_space<smem>>, %arg1: memref<4xi32, #tpu.memory_space<smem>>, %arg2: memref<4xi32, #tpu.memory_space<smem>>, %arg3: memref<4xi32, #tpu.memory_space<smem>>, %arg4: memref<128xi32, #tpu.memory_space<smem>>, %arg5: memref<128xi32, #tpu.memory_space<smem>>, %arg6: memref<128xi32, #tpu.memory_space<smem>>, %arg7: memref<32xi32, #tpu.memory_space<smem>>, %arg8: memref<1xf32, #tpu.memory_space<smem>>, %arg9: memref<1x32x2xf32, #tpu.memory_space<vmem>>, %arg10: memref<3x2x32xf32, #tpu.memory_space<vmem>>, %arg11: memref<2x2x32xf32, #tpu.memory_space<vmem>>, %arg12: memref<4x32x32xbf16, #tpu.memory_space<vmem>>, %arg13: memref<4x32x32xbf16, #tpu.memory_space<vmem>>, %arg14: memref<4x1x32xf32, #tpu.memory_space<vmem>>, %arg15: memref<4x32x32xbf16, #tpu.memory_space<vmem>>, %arg16: memref<4x1x32xf32, #tpu.memory_space<vmem>>, %arg17: memref<2x32x32xbf16, #tpu.memory_space<vmem>>, %arg18: memref<2x32xf32, #tpu.memory_space<vmem>>, %arg19: memref<2x32xf32, #tpu.memory_space<vmem>>, %arg20: memref<2x1xf32, #tpu.memory_space<vmem>>, %arg21: memref<2x32x1xf32, #tpu.memory_space<vmem>>, %arg22: memref<2x32x1xf32, #tpu.memory_space<vmem>>, %arg23: memref<2x32x1xf32, #tpu.memory_space<vmem>>, %arg24: memref<9x2x32xf32, #tpu.memory_space<vmem>>, %arg25: memref<32x32xf32, #tpu.memory_space<vmem>>, %arg26: memref<32x32xf32, #tpu.memory_space<vmem>>, %arg27: memref<32x32xf32, #tpu.memory_space<vmem>>, %arg28: memref<32x32xf32, #tpu.memory_space<vmem>>) attributes {dimension_semantics = [], scalar_prefetch = 0 : i64, scratch_operands = 5 : i64, tpu.core_type = #tpu.core_type<tc>} {
    %cst = arith.constant 0.000000e+00 : f32
    %0 = vector.broadcast %cst : f32 to vector<2x32x1xf32>
    %c0 = arith.constant 0 : index
    %c0_0 = arith.constant 0 : index
    %c0_1 = arith.constant 0 : index
    %1 = vector.load %arg21[%c0, %c0_0, %c0_1] : memref<2x32x1xf32, #tpu.memory_space<vmem>>, vector<2x32x1xf32>
    tpu.vector_store %arg21[%c0, %c0_0, %c0_1], %0 {strides = array<i32>} : memref<2x32x1xf32, #tpu.memory_space<vmem>>, vector<2x32x1xf32>,
    %cst_2 = arith.constant 0.000000e+00 : f32
    %2 = vector.broadcast %cst_2 : f32 to vector<2x32x1xf32>
    %c0_3 = arith.constant 0 : index
    %c0_4 = arith.constant 0 : index
    %c0_5 = arith.constant 0 : index
    %3 = vector.load %arg22[%c0_3, %c0_4, %c0_5] : memref<2x32x1xf32, #tpu.memory_space<vmem>>, vector<2x32x1xf32>
    tpu.vector_store %arg22[%c0_3, %c0_4, %c0_5], %2 {strides = array<i32>} : memref<2x32x1xf32, #tpu.memory_space<vmem>>, vector<2x32x1xf32>,
    %cst_6 = arith.constant 0.000000e+00 : f32
    %4 = vector.broadcast %cst_6 : f32 to vector<2x32x1xf32>
    %c0_7 = arith.constant 0 : index
    %c0_8 = arith.constant 0 : index
    %c0_9 = arith.constant 0 : index
    %5 = vector.load %arg23[%c0_7, %c0_8, %c0_9] : memref<2x32x1xf32, #tpu.memory_space<vmem>>, vector<2x32x1xf32>
    tpu.vector_store %arg23[%c0_7, %c0_8, %c0_9], %4 {strides = array<i32>} : memref<2x32x1xf32, #tpu.memory_space<vmem>>, vector<2x32x1xf32>,
    %c0_i32 = arith.constant 0 : i32
    %c4_i32 = arith.constant 4 : i32
    %6 = arith.addi %c0_i32, %c4_i32 : i32
    %c1_i32 = arith.constant 1 : i32
    scf.for %arg29 = %c0_i32 to %6 step %c1_i32  : i32 {
      %501 = arith.index_cast %arg29 : i32 to index
      %502 = memref.load %arg1[%501] : memref<4xi32, #tpu.memory_space<smem>>
      %503 = arith.index_cast %502 : i32 to index
      %c0_280 = arith.constant 0 : index
      %c0_281 = arith.constant 0 : index
      %504 = vector.load %arg10[%503, %c0_280, %c0_281] : memref<3x2x32xf32, #tpu.memory_space<vmem>>, vector<1x2x32xf32>
      %505 = vector.shape_cast %504 : vector<1x2x32xf32> to vector<2x32xf32>
      %506 = arith.index_cast %arg29 : i32 to index
      %507 = memref.load %arg2[%506] : memref<4xi32, #tpu.memory_space<smem>>
      %508 = arith.index_cast %507 : i32 to index
      %c0_282 = arith.constant 0 : index
      %c0_283 = arith.constant 0 : index
      %509 = vector.load %arg11[%508, %c0_282, %c0_283] : memref<2x2x32xf32, #tpu.memory_space<vmem>>, vector<1x2x32xf32>
      %510 = vector.shape_cast %509 : vector<1x2x32xf32> to vector<2x32xf32>
      %511 = arith.addf %505, %510 : vector<2x32xf32>
      %512 = arith.index_cast %arg29 : i32 to index
      %513 = memref.load %arg0[%512] : memref<4xi32, #tpu.memory_space<smem>>
      %514 = arith.index_cast %513 : i32 to index
      %c0_284 = arith.constant 0 : index
      %c0_285 = arith.constant 0 : index
      %515 = vector.load %arg24[%514, %c0_284, %c0_285] : memref<9x2x32xf32, #tpu.memory_space<vmem>>, vector<1x2x32xf32>
      %516 = vector.shape_cast %515 : vector<1x2x32xf32> to vector<2x32xf32>
      %517 = vector.shape_cast %511 : vector<2x32xf32> to vector<1x2x32xf32>
      tpu.vector_store %arg24[%514, %c0_284, %c0_285], %517 {strides = array<i32>} : memref<9x2x32xf32, #tpu.memory_space<vmem>>, vector<1x2x32xf32>,
    }
    %c4_i32_10 = arith.constant 4 : i32
    %c0_i32_11 = arith.constant 0 : i32
    %c4_i32_12 = arith.constant 4 : i32
    %7 = arith.addi %c0_i32_11, %c4_i32_12 : i32
    %c1_i32_13 = arith.constant 1 : i32
    scf.for %arg29 = %c0_i32_11 to %7 step %c1_i32_13  : i32 {
      %501 = arith.index_cast %arg29 : i32 to index
      %502 = memref.load %arg3[%501] : memref<4xi32, #tpu.memory_space<smem>>
      %c32_i32_280 = arith.constant 32 : i32
      %503 = arith.muli %arg29, %c32_i32_280 : i32
      %c0_i32_281 = arith.constant 0 : i32
      %504 = arith.addi %503, %c0_i32_281 : i32
      %505 = arith.index_cast %504 : i32 to index
      %506 = memref.load %arg5[%505] : memref<128xi32, #tpu.memory_space<smem>>
      %507 = arith.index_cast %506 : i32 to index
      %c0_282 = arith.constant 0 : index
      %c0_283 = arith.constant 0 : index
      %508 = vector.load %arg24[%507, %c0_282, %c0_283] : memref<9x2x32xf32, #tpu.memory_space<vmem>>, vector<1x2x32xf32>
      %509 = vector.shape_cast %508 : vector<1x2x32xf32> to vector<2x32xf32>
      %c0_i32_284 = arith.constant 0 : i32
      %510 = arith.addi %503, %c0_i32_284 : i32
      %511 = arith.index_cast %510 : i32 to index
      %512 = memref.load %arg6[%511] : memref<128xi32, #tpu.memory_space<smem>>
      %513 = arith.index_cast %512 : i32 to index
      %c0_285 = arith.constant 0 : index
      %c0_286 = arith.constant 0 : index
      %514 = vector.load %arg24[%513, %c0_285, %c0_286] : memref<9x2x32xf32, #tpu.memory_space<vmem>>, vector<1x2x32xf32>
      %515 = vector.shape_cast %514 : vector<1x2x32xf32> to vector<2x32xf32>
      %516 = vector.extract_strided_slice %509 {offsets = [0, 0], sizes = [1, 32], strides = [1, 1]} : vector<2x32xf32> to vector<1x32xf32>
      %c0_287 = arith.constant 0 : index
      %c0_288 = arith.constant 0 : index
      %517 = vector.load %arg25[%c0_287, %c0_288] : memref<32x32xf32, #tpu.memory_space<vmem>>, vector<1x32xf32>
      tpu.vector_store %arg25[%c0_287, %c0_288], %516 {strides = array<i32>} : memref<32x32xf32, #tpu.memory_space<vmem>>, vector<1x32xf32>,
      %518 = vector.extract_strided_slice %515 {offsets = [0, 0], sizes = [1, 32], strides = [1, 1]} : vector<2x32xf32> to vector<1x32xf32>
      %c0_289 = arith.constant 0 : index
      %c0_290 = arith.constant 0 : index
      %519 = vector.load %arg27[%c0_289, %c0_290] : memref<32x32xf32, #tpu.memory_space<vmem>>, vector<1x32xf32>
      tpu.vector_store %arg27[%c0_289, %c0_290], %518 {strides = array<i32>} : memref<32x32xf32, #tpu.memory_space<vmem>>, vector<1x32xf32>,
      %520 = vector.extract_strided_slice %509 {offsets = [1, 0], sizes = [1, 32], strides = [1, 1]} : vector<2x32xf32> to vector<1x32xf32>
      %c0_291 = arith.constant 0 : index
      %c0_292 = arith.constant 0 : index
      %521 = vector.load %arg26[%c0_291, %c0_292] : memref<32x32xf32, #tpu.memory_space<vmem>>, vector<1x32xf32>
      tpu.vector_store %arg26[%c0_291, %c0_292], %520 {strides = array<i32>} : memref<32x32xf32, #tpu.memory_space<vmem>>, vector<1x32xf32>,
      %522 = vector.extract_strided_slice %515 {offsets = [1, 0], sizes = [1, 32], strides = [1, 1]} : vector<2x32xf32> to vector<1x32xf32>
      %c0_293 = arith.constant 0 : index
      %c0_294 = arith.constant 0 : index
      %523 = vector.load %arg28[%c0_293, %c0_294] : memref<32x32xf32, #tpu.memory_space<vmem>>, vector<1x32xf32>
      tpu.vector_store %arg28[%c0_293, %c0_294], %522 {strides = array<i32>} : memref<32x32xf32, #tpu.memory_space<vmem>>, vector<1x32xf32>,
      %c1_i32_295 = arith.constant 1 : i32
      %524 = arith.addi %503, %c1_i32_295 : i32
      %525 = arith.index_cast %524 : i32 to index
      %526 = memref.load %arg5[%525] : memref<128xi32, #tpu.memory_space<smem>>
      %527 = arith.index_cast %526 : i32 to index
      %c0_296 = arith.constant 0 : index
      %c0_297 = arith.constant 0 : index
      %528 = vector.load %arg24[%527, %c0_296, %c0_297] : memref<9x2x32xf32, #tpu.memory_space<vmem>>, vector<1x2x32xf32>
      %529 = vector.shape_cast %528 : vector<1x2x32xf32> to vector<2x32xf32>
      %c1_i32_298 = arith.constant 1 : i32
      %530 = arith.addi %503, %c1_i32_298 : i32
      %531 = arith.index_cast %530 : i32 to index
      %532 = memref.load %arg6[%531] : memref<128xi32, #tpu.memory_space<smem>>
      %533 = arith.index_cast %532 : i32 to index
      %c0_299 = arith.constant 0 : index
      %c0_300 = arith.constant 0 : index
      %534 = vector.load %arg24[%533, %c0_299, %c0_300] : memref<9x2x32xf32, #tpu.memory_space<vmem>>, vector<1x2x32xf32>
      %535 = vector.shape_cast %534 : vector<1x2x32xf32> to vector<2x32xf32>
      %536 = vector.extract_strided_slice %529 {offsets = [0, 0], sizes = [1, 32], strides = [1, 1]} : vector<2x32xf32> to vector<1x32xf32>
      %c1_301 = arith.constant 1 : index
      %c0_302 = arith.constant 0 : index
      %537 = vector.load %arg25[%c1_301, %c0_302] : memref<32x32xf32, #tpu.memory_space<vmem>>, vector<1x32xf32>
      tpu.vector_store %arg25[%c1_301, %c0_302], %536 {strides = array<i32>} : memref<32x32xf32, #tpu.memory_space<vmem>>, vector<1x32xf32>,
      %538 = vector.extract_strided_slice %535 {offsets = [0, 0], sizes = [1, 32], strides = [1, 1]} : vector<2x32xf32> to vector<1x32xf32>
      %c1_303 = arith.constant 1 : index
      %c0_304 = arith.constant 0 : index
      %539 = vector.load %arg27[%c1_303, %c0_304] : memref<32x32xf32, #tpu.memory_space<vmem>>, vector<1x32xf32>
      tpu.vector_store %arg27[%c1_303, %c0_304], %538 {strides = array<i32>} : memref<32x32xf32, #tpu.memory_space<vmem>>, vector<1x32xf32>,
      %540 = vector.extract_strided_slice %529 {offsets = [1, 0], sizes = [1, 32], strides = [1, 1]} : vector<2x32xf32> to vector<1x32xf32>
      %c1_305 = arith.constant 1 : index
      %c0_306 = arith.constant 0 : index
      %541 = vector.load %arg26[%c1_305, %c0_306] : memref<32x32xf32, #tpu.memory_space<vmem>>, vector<1x32xf32>
      tpu.vector_store %arg26[%c1_305, %c0_306], %540 {strides = array<i32>} : memref<32x32xf32, #tpu.memory_space<vmem>>, vector<1x32xf32>,
      %542 = vector.extract_strided_slice %535 {offsets = [1, 0], sizes = [1, 32], strides = [1, 1]} : vector<2x32xf32> to vector<1x32xf32>
      %c1_307 = arith.constant 1 : index
      %c0_308 = arith.constant 0 : index
      %543 = vector.load %arg28[%c1_307, %c0_308] : memref<32x32xf32, #tpu.memory_space<vmem>>, vector<1x32xf32>
      tpu.vector_store %arg28[%c1_307, %c0_308], %542 {strides = array<i32>} : memref<32x32xf32, #tpu.memory_space<vmem>>, vector<1x32xf32>,
      %c2_i32_309 = arith.constant 2 : i32
      %544 = arith.addi %503, %c2_i32_309 : i32
      %545 = arith.index_cast %544 : i32 to index
      %546 = memref.load %arg5[%545] : memref<128xi32, #tpu.memory_space<smem>>
      %547 = arith.index_cast %546 : i32 to index
      %c0_310 = arith.constant 0 : index
      %c0_311 = arith.constant 0 : index
      %548 = vector.load %arg24[%547, %c0_310, %c0_311] : memref<9x2x32xf32, #tpu.memory_space<vmem>>, vector<1x2x32xf32>
      %549 = vector.shape_cast %548 : vector<1x2x32xf32> to vector<2x32xf32>
      %c2_i32_312 = arith.constant 2 : i32
      %550 = arith.addi %503, %c2_i32_312 : i32
      %551 = arith.index_cast %550 : i32 to index
      %552 = memref.load %arg6[%551] : memref<128xi32, #tpu.memory_space<smem>>
      %553 = arith.index_cast %552 : i32 to index
      %c0_313 = arith.constant 0 : index
      %c0_314 = arith.constant 0 : index
      %554 = vector.load %arg24[%553, %c0_313, %c0_314] : memref<9x2x32xf32, #tpu.memory_space<vmem>>, vector<1x2x32xf32>
      %555 = vector.shape_cast %554 : vector<1x2x32xf32> to vector<2x32xf32>
      %556 = vector.extract_strided_slice %549 {offsets = [0, 0], sizes = [1, 32], strides = [1, 1]} : vector<2x32xf32> to vector<1x32xf32>
      %c2_315 = arith.constant 2 : index
      %c0_316 = arith.constant 0 : index
      %557 = vector.load %arg25[%c2_315, %c0_316] : memref<32x32xf32, #tpu.memory_space<vmem>>, vector<1x32xf32>
      tpu.vector_store %arg25[%c2_315, %c0_316], %556 {strides = array<i32>} : memref<32x32xf32, #tpu.memory_space<vmem>>, vector<1x32xf32>,
      %558 = vector.extract_strided_slice %555 {offsets = [0, 0], sizes = [1, 32], strides = [1, 1]} : vector<2x32xf32> to vector<1x32xf32>
      %c2_317 = arith.constant 2 : index
      %c0_318 = arith.constant 0 : index
      %559 = vector.load %arg27[%c2_317, %c0_318] : memref<32x32xf32, #tpu.memory_space<vmem>>, vector<1x32xf32>
      tpu.vector_store %arg27[%c2_317, %c0_318], %558 {strides = array<i32>} : memref<32x32xf32, #tpu.memory_space<vmem>>, vector<1x32xf32>,
      %560 = vector.extract_strided_slice %549 {offsets = [1, 0], sizes = [1, 32], strides = [1, 1]} : vector<2x32xf32> to vector<1x32xf32>
      %c2_319 = arith.constant 2 : index
      %c0_320 = arith.constant 0 : index
      %561 = vector.load %arg26[%c2_319, %c0_320] : memref<32x32xf32, #tpu.memory_space<vmem>>, vector<1x32xf32>
      tpu.vector_store %arg26[%c2_319, %c0_320], %560 {strides = array<i32>} : memref<32x32xf32, #tpu.memory_space<vmem>>, vector<1x32xf32>,
      %562 = vector.extract_strided_slice %555 {offsets = [1, 0], sizes = [1, 32], strides = [1, 1]} : vector<2x32xf32> to vector<1x32xf32>
      %c2_321 = arith.constant 2 : index
      %c0_322 = arith.constant 0 : index
      %563 = vector.load %arg28[%c2_321, %c0_322] : memref<32x32xf32, #tpu.memory_space<vmem>>, vector<1x32xf32>
      tpu.vector_store %arg28[%c2_321, %c0_322], %562 {strides = array<i32>} : memref<32x32xf32, #tpu.memory_space<vmem>>, vector<1x32xf32>,
      %c3_i32_323 = arith.constant 3 : i32
      %564 = arith.addi %503, %c3_i32_323 : i32
      %565 = arith.index_cast %564 : i32 to index
      %566 = memref.load %arg5[%565] : memref<128xi32, #tpu.memory_space<smem>>
      %567 = arith.index_cast %566 : i32 to index
      %c0_324 = arith.constant 0 : index
      %c0_325 = arith.constant 0 : index
      %568 = vector.load %arg24[%567, %c0_324, %c0_325] : memref<9x2x32xf32, #tpu.memory_space<vmem>>, vector<1x2x32xf32>
      %569 = vector.shape_cast %568 : vector<1x2x32xf32> to vector<2x32xf32>
      %c3_i32_326 = arith.constant 3 : i32
      %570 = arith.addi %503, %c3_i32_326 : i32
      %571 = arith.index_cast %570 : i32 to index
      %572 = memref.load %arg6[%571] : memref<128xi32, #tpu.memory_space<smem>>
      %573 = arith.index_cast %572 : i32 to index
      %c0_327 = arith.constant 0 : index
      %c0_328 = arith.constant 0 : index
      %574 = vector.load %arg24[%573, %c0_327, %c0_328] : memref<9x2x32xf32, #tpu.memory_space<vmem>>, vector<1x2x32xf32>
      %575 = vector.shape_cast %574 : vector<1x2x32xf32> to vector<2x32xf32>
      %576 = vector.extract_strided_slice %569 {offsets = [0, 0], sizes = [1, 32], strides = [1, 1]} : vector<2x32xf32> to vector<1x32xf32>
      %c3_329 = arith.constant 3 : index
      %c0_330 = arith.constant 0 : index
      %577 = vector.load %arg25[%c3_329, %c0_330] : memref<32x32xf32, #tpu.memory_space<vmem>>, vector<1x32xf32>
      tpu.vector_store %arg25[%c3_329, %c0_330], %576 {strides = array<i32>} : memref<32x32xf32, #tpu.memory_space<vmem>>, vector<1x32xf32>,
      %578 = vector.extract_strided_slice %575 {offsets = [0, 0], sizes = [1, 32], strides = [1, 1]} : vector<2x32xf32> to vector<1x32xf32>
      %c3_331 = arith.constant 3 : index
      %c0_332 = arith.constant 0 : index
      %579 = vector.load %arg27[%c3_331, %c0_332] : memref<32x32xf32, #tpu.memory_space<vmem>>, vector<1x32xf32>
      tpu.vector_store %arg27[%c3_331, %c0_332], %578 {strides = array<i32>} : memref<32x32xf32, #tpu.memory_space<vmem>>, vector<1x32xf32>,
      %580 = vector.extract_strided_slice %569 {offsets = [1, 0], sizes = [1, 32], strides = [1, 1]} : vector<2x32xf32> to vector<1x32xf32>
      %c3_333 = arith.constant 3 : index
      %c0_334 = arith.constant 0 : index
      %581 = vector.load %arg26[%c3_333, %c0_334] : memref<32x32xf32, #tpu.memory_space<vmem>>, vector<1x32xf32>
      tpu.vector_store %arg26[%c3_333, %c0_334], %580 {strides = array<i32>} : memref<32x32xf32, #tpu.memory_space<vmem>>, vector<1x32xf32>,
      %582 = vector.extract_strided_slice %575 {offsets = [1, 0], sizes = [1, 32], strides = [1, 1]} : vector<2x32xf32> to vector<1x32xf32>
      %c3_335 = arith.constant 3 : index
      %c0_336 = arith.constant 0 : index
      %583 = vector.load %arg28[%c3_335, %c0_336] : memref<32x32xf32, #tpu.memory_space<vmem>>, vector<1x32xf32>
      tpu.vector_store %arg28[%c3_335, %c0_336], %582 {strides = array<i32>} : memref<32x32xf32, #tpu.memory_space<vmem>>, vector<1x32xf32>,
      %c4_i32_337 = arith.constant 4 : i32
      %584 = arith.addi %503, %c4_i32_337 : i32
      %585 = arith.index_cast %584 : i32 to index
      %586 = memref.load %arg5[%585] : memref<128xi32, #tpu.memory_space<smem>>
      %587 = arith.index_cast %586 : i32 to index
      %c0_338 = arith.constant 0 : index
      %c0_339 = arith.constant 0 : index
      %588 = vector.load %arg24[%587, %c0_338, %c0_339] : memref<9x2x32xf32, #tpu.memory_space<vmem>>, vector<1x2x32xf32>
      %589 = vector.shape_cast %588 : vector<1x2x32xf32> to vector<2x32xf32>
      %c4_i32_340 = arith.constant 4 : i32
      %590 = arith.addi %503, %c4_i32_340 : i32
      %591 = arith.index_cast %590 : i32 to index
      %592 = memref.load %arg6[%591] : memref<128xi32, #tpu.memory_space<smem>>
      %593 = arith.index_cast %592 : i32 to index
      %c0_341 = arith.constant 0 : index
      %c0_342 = arith.constant 0 : index
      %594 = vector.load %arg24[%593, %c0_341, %c0_342] : memref<9x2x32xf32, #tpu.memory_space<vmem>>, vector<1x2x32xf32>
      %595 = vector.shape_cast %594 : vector<1x2x32xf32> to vector<2x32xf32>
      %596 = vector.extract_strided_slice %589 {offsets = [0, 0], sizes = [1, 32], strides = [1, 1]} : vector<2x32xf32> to vector<1x32xf32>
      %c4_343 = arith.constant 4 : index
      %c0_344 = arith.constant 0 : index
      %597 = vector.load %arg25[%c4_343, %c0_344] : memref<32x32xf32, #tpu.memory_space<vmem>>, vector<1x32xf32>
      tpu.vector_store %arg25[%c4_343, %c0_344], %596 {strides = array<i32>} : memref<32x32xf32, #tpu.memory_space<vmem>>, vector<1x32xf32>,
      %598 = vector.extract_strided_slice %595 {offsets = [0, 0], sizes = [1, 32], strides = [1, 1]} : vector<2x32xf32> to vector<1x32xf32>
      %c4_345 = arith.constant 4 : index
      %c0_346 = arith.constant 0 : index
      %599 = vector.load %arg27[%c4_345, %c0_346] : memref<32x32xf32, #tpu.memory_space<vmem>>, vector<1x32xf32>
      tpu.vector_store %arg27[%c4_345, %c0_346], %598 {strides = array<i32>} : memref<32x32xf32, #tpu.memory_space<vmem>>, vector<1x32xf32>,
      %600 = vector.extract_strided_slice %589 {offsets = [1, 0], sizes = [1, 32], strides = [1, 1]} : vector<2x32xf32> to vector<1x32xf32>
      %c4_347 = arith.constant 4 : index
      %c0_348 = arith.constant 0 : index
      %601 = vector.load %arg26[%c4_347, %c0_348] : memref<32x32xf32, #tpu.memory_space<vmem>>, vector<1x32xf32>
      tpu.vector_store %arg26[%c4_347, %c0_348], %600 {strides = array<i32>} : memref<32x32xf32, #tpu.memory_space<vmem>>, vector<1x32xf32>,
      %602 = vector.extract_strided_slice %595 {offsets = [1, 0], sizes = [1, 32], strides = [1, 1]} : vector<2x32xf32> to vector<1x32xf32>
      %c4_349 = arith.constant 4 : index
      %c0_350 = arith.constant 0 : index
      %603 = vector.load %arg28[%c4_349, %c0_350] : memref<32x32xf32, #tpu.memory_space<vmem>>, vector<1x32xf32>
      tpu.vector_store %arg28[%c4_349, %c0_350], %602 {strides = array<i32>} : memref<32x32xf32, #tpu.memory_space<vmem>>, vector<1x32xf32>,
      %c5_i32_351 = arith.constant 5 : i32
      %604 = arith.addi %503, %c5_i32_351 : i32
      %605 = arith.index_cast %604 : i32 to index
      %606 = memref.load %arg5[%605] : memref<128xi32, #tpu.memory_space<smem>>
      %607 = arith.index_cast %606 : i32 to index
      %c0_352 = arith.constant 0 : index
      %c0_353 = arith.constant 0 : index
      %608 = vector.load %arg24[%607, %c0_352, %c0_353] : memref<9x2x32xf32, #tpu.memory_space<vmem>>, vector<1x2x32xf32>
      %609 = vector.shape_cast %608 : vector<1x2x32xf32> to vector<2x32xf32>
      %c5_i32_354 = arith.constant 5 : i32
      %610 = arith.addi %503, %c5_i32_354 : i32
      %611 = arith.index_cast %610 : i32 to index
      %612 = memref.load %arg6[%611] : memref<128xi32, #tpu.memory_space<smem>>
      %613 = arith.index_cast %612 : i32 to index
      %c0_355 = arith.constant 0 : index
      %c0_356 = arith.constant 0 : index
      %614 = vector.load %arg24[%613, %c0_355, %c0_356] : memref<9x2x32xf32, #tpu.memory_space<vmem>>, vector<1x2x32xf32>
      %615 = vector.shape_cast %614 : vector<1x2x32xf32> to vector<2x32xf32>
      %616 = vector.extract_strided_slice %609 {offsets = [0, 0], sizes = [1, 32], strides = [1, 1]} : vector<2x32xf32> to vector<1x32xf32>
      %c5_357 = arith.constant 5 : index
      %c0_358 = arith.constant 0 : index
      %617 = vector.load %arg25[%c5_357, %c0_358] : memref<32x32xf32, #tpu.memory_space<vmem>>, vector<1x32xf32>
      tpu.vector_store %arg25[%c5_357, %c0_358], %616 {strides = array<i32>} : memref<32x32xf32, #tpu.memory_space<vmem>>, vector<1x32xf32>,
      %618 = vector.extract_strided_slice %615 {offsets = [0, 0], sizes = [1, 32], strides = [1, 1]} : vector<2x32xf32> to vector<1x32xf32>
      %c5_359 = arith.constant 5 : index
      %c0_360 = arith.constant 0 : index
      %619 = vector.load %arg27[%c5_359, %c0_360] : memref<32x32xf32, #tpu.memory_space<vmem>>, vector<1x32xf32>
      tpu.vector_store %arg27[%c5_359, %c0_360], %618 {strides = array<i32>} : memref<32x32xf32, #tpu.memory_space<vmem>>, vector<1x32xf32>,
      %620 = vector.extract_strided_slice %609 {offsets = [1, 0], sizes = [1, 32], strides = [1, 1]} : vector<2x32xf32> to vector<1x32xf32>
      %c5_361 = arith.constant 5 : index
      %c0_362 = arith.constant 0 : index
      %621 = vector.load %arg26[%c5_361, %c0_362] : memref<32x32xf32, #tpu.memory_space<vmem>>, vector<1x32xf32>
      tpu.vector_store %arg26[%c5_361, %c0_362], %620 {strides = array<i32>} : memref<32x32xf32, #tpu.memory_space<vmem>>, vector<1x32xf32>,
      %622 = vector.extract_strided_slice %615 {offsets = [1, 0], sizes = [1, 32], strides = [1, 1]} : vector<2x32xf32> to vector<1x32xf32>
      %c5_363 = arith.constant 5 : index
      %c0_364 = arith.constant 0 : index
      %623 = vector.load %arg28[%c5_363, %c0_364] : memref<32x32xf32, #tpu.memory_space<vmem>>, vector<1x32xf32>
      tpu.vector_store %arg28[%c5_363, %c0_364], %622 {strides = array<i32>} : memref<32x32xf32, #tpu.memory_space<vmem>>, vector<1x32xf32>,
      %c6_i32_365 = arith.constant 6 : i32
      %624 = arith.addi %503, %c6_i32_365 : i32
      %625 = arith.index_cast %624 : i32 to index
      %626 = memref.load %arg5[%625] : memref<128xi32, #tpu.memory_space<smem>>
      %627 = arith.index_cast %626 : i32 to index
      %c0_366 = arith.constant 0 : index
      %c0_367 = arith.constant 0 : index
      %628 = vector.load %arg24[%627, %c0_366, %c0_367] : memref<9x2x32xf32, #tpu.memory_space<vmem>>, vector<1x2x32xf32>
      %629 = vector.shape_cast %628 : vector<1x2x32xf32> to vector<2x32xf32>
      %c6_i32_368 = arith.constant 6 : i32
      %630 = arith.addi %503, %c6_i32_368 : i32
      %631 = arith.index_cast %630 : i32 to index
      %632 = memref.load %arg6[%631] : memref<128xi32, #tpu.memory_space<smem>>
      %633 = arith.index_cast %632 : i32 to index
      %c0_369 = arith.constant 0 : index
      %c0_370 = arith.constant 0 : index
      %634 = vector.load %arg24[%633, %c0_369, %c0_370] : memref<9x2x32xf32, #tpu.memory_space<vmem>>, vector<1x2x32xf32>
      %635 = vector.shape_cast %634 : vector<1x2x32xf32> to vector<2x32xf32>
      %636 = vector.extract_strided_slice %629 {offsets = [0, 0], sizes = [1, 32], strides = [1, 1]} : vector<2x32xf32> to vector<1x32xf32>
      %c6_371 = arith.constant 6 : index
      %c0_372 = arith.constant 0 : index
      %637 = vector.load %arg25[%c6_371, %c0_372] : memref<32x32xf32, #tpu.memory_space<vmem>>, vector<1x32xf32>
      tpu.vector_store %arg25[%c6_371, %c0_372], %636 {strides = array<i32>} : memref<32x32xf32, #tpu.memory_space<vmem>>, vector<1x32xf32>,
      %638 = vector.extract_strided_slice %635 {offsets = [0, 0], sizes = [1, 32], strides = [1, 1]} : vector<2x32xf32> to vector<1x32xf32>
      %c6_373 = arith.constant 6 : index
      %c0_374 = arith.constant 0 : index
      %639 = vector.load %arg27[%c6_373, %c0_374] : memref<32x32xf32, #tpu.memory_space<vmem>>, vector<1x32xf32>
      tpu.vector_store %arg27[%c6_373, %c0_374], %638 {strides = array<i32>} : memref<32x32xf32, #tpu.memory_space<vmem>>, vector<1x32xf32>,
      %640 = vector.extract_strided_slice %629 {offsets = [1, 0], sizes = [1, 32], strides = [1, 1]} : vector<2x32xf32> to vector<1x32xf32>
      %c6_375 = arith.constant 6 : index
      %c0_376 = arith.constant 0 : index
      %641 = vector.load %arg26[%c6_375, %c0_376] : memref<32x32xf32, #tpu.memory_space<vmem>>, vector<1x32xf32>
      tpu.vector_store %arg26[%c6_375, %c0_376], %640 {strides = array<i32>} : memref<32x32xf32, #tpu.memory_space<vmem>>, vector<1x32xf32>,
      %642 = vector.extract_strided_slice %635 {offsets = [1, 0], sizes = [1, 32], strides = [1, 1]} : vector<2x32xf32> to vector<1x32xf32>
      %c6_377 = arith.constant 6 : index
      %c0_378 = arith.constant 0 : index
      %643 = vector.load %arg28[%c6_377, %c0_378] : memref<32x32xf32, #tpu.memory_space<vmem>>, vector<1x32xf32>
      tpu.vector_store %arg28[%c6_377, %c0_378], %642 {strides = array<i32>} : memref<32x32xf32, #tpu.memory_space<vmem>>, vector<1x32xf32>,
      %c7_i32_379 = arith.constant 7 : i32
      %644 = arith.addi %503, %c7_i32_379 : i32
      %645 = arith.index_cast %644 : i32 to index
      %646 = memref.load %arg5[%645] : memref<128xi32, #tpu.memory_space<smem>>
      %647 = arith.index_cast %646 : i32 to index
      %c0_380 = arith.constant 0 : index
      %c0_381 = arith.constant 0 : index
      %648 = vector.load %arg24[%647, %c0_380, %c0_381] : memref<9x2x32xf32, #tpu.memory_space<vmem>>, vector<1x2x32xf32>
      %649 = vector.shape_cast %648 : vector<1x2x32xf32> to vector<2x32xf32>
      %c7_i32_382 = arith.constant 7 : i32
      %650 = arith.addi %503, %c7_i32_382 : i32
      %651 = arith.index_cast %650 : i32 to index
      %652 = memref.load %arg6[%651] : memref<128xi32, #tpu.memory_space<smem>>
      %653 = arith.index_cast %652 : i32 to index
      %c0_383 = arith.constant 0 : index
      %c0_384 = arith.constant 0 : index
      %654 = vector.load %arg24[%653, %c0_383, %c0_384] : memref<9x2x32xf32, #tpu.memory_space<vmem>>, vector<1x2x32xf32>
      %655 = vector.shape_cast %654 : vector<1x2x32xf32> to vector<2x32xf32>
      %656 = vector.extract_strided_slice %649 {offsets = [0, 0], sizes = [1, 32], strides = [1, 1]} : vector<2x32xf32> to vector<1x32xf32>
      %c7_385 = arith.constant 7 : index
      %c0_386 = arith.constant 0 : index
      %657 = vector.load %arg25[%c7_385, %c0_386] : memref<32x32xf32, #tpu.memory_space<vmem>>, vector<1x32xf32>
      tpu.vector_store %arg25[%c7_385, %c0_386], %656 {strides = array<i32>} : memref<32x32xf32, #tpu.memory_space<vmem>>, vector<1x32xf32>,
      %658 = vector.extract_strided_slice %655 {offsets = [0, 0], sizes = [1, 32], strides = [1, 1]} : vector<2x32xf32> to vector<1x32xf32>
      %c7_387 = arith.constant 7 : index
      %c0_388 = arith.constant 0 : index
      %659 = vector.load %arg27[%c7_387, %c0_388] : memref<32x32xf32, #tpu.memory_space<vmem>>, vector<1x32xf32>
      tpu.vector_store %arg27[%c7_387, %c0_388], %658 {strides = array<i32>} : memref<32x32xf32, #tpu.memory_space<vmem>>, vector<1x32xf32>,
      %660 = vector.extract_strided_slice %649 {offsets = [1, 0], sizes = [1, 32], strides = [1, 1]} : vector<2x32xf32> to vector<1x32xf32>
      %c7_389 = arith.constant 7 : index
      %c0_390 = arith.constant 0 : index
      %661 = vector.load %arg26[%c7_389, %c0_390] : memref<32x32xf32, #tpu.memory_space<vmem>>, vector<1x32xf32>
      tpu.vector_store %arg26[%c7_389, %c0_390], %660 {strides = array<i32>} : memref<32x32xf32, #tpu.memory_space<vmem>>, vector<1x32xf32>,
      %662 = vector.extract_strided_slice %655 {offsets = [1, 0], sizes = [1, 32], strides = [1, 1]} : vector<2x32xf32> to vector<1x32xf32>
      %c7_391 = arith.constant 7 : index
      %c0_392 = arith.constant 0 : index
      %663 = vector.load %arg28[%c7_391, %c0_392] : memref<32x32xf32, #tpu.memory_space<vmem>>, vector<1x32xf32>
      tpu.vector_store %arg28[%c7_391, %c0_392], %662 {strides = array<i32>} : memref<32x32xf32, #tpu.memory_space<vmem>>, vector<1x32xf32>,
      %c8_i32_393 = arith.constant 8 : i32
      %664 = arith.addi %503, %c8_i32_393 : i32
      %665 = arith.index_cast %664 : i32 to index
      %666 = memref.load %arg5[%665] : memref<128xi32, #tpu.memory_space<smem>>
      %667 = arith.index_cast %666 : i32 to index
      %c0_394 = arith.constant 0 : index
      %c0_395 = arith.constant 0 : index
      %668 = vector.load %arg24[%667, %c0_394, %c0_395] : memref<9x2x32xf32, #tpu.memory_space<vmem>>, vector<1x2x32xf32>
      %669 = vector.shape_cast %668 : vector<1x2x32xf32> to vector<2x32xf32>
      %c8_i32_396 = arith.constant 8 : i32
      %670 = arith.addi %503, %c8_i32_396 : i32
      %671 = arith.index_cast %670 : i32 to index
      %672 = memref.load %arg6[%671] : memref<128xi32, #tpu.memory_space<smem>>
      %673 = arith.index_cast %672 : i32 to index
      %c0_397 = arith.constant 0 : index
      %c0_398 = arith.constant 0 : index
      %674 = vector.load %arg24[%673, %c0_397, %c0_398] : memref<9x2x32xf32, #tpu.memory_space<vmem>>, vector<1x2x32xf32>
      %675 = vector.shape_cast %674 : vector<1x2x32xf32> to vector<2x32xf32>
      %676 = vector.extract_strided_slice %669 {offsets = [0, 0], sizes = [1, 32], strides = [1, 1]} : vector<2x32xf32> to vector<1x32xf32>
      %c8_399 = arith.constant 8 : index
      %c0_400 = arith.constant 0 : index
      %677 = vector.load %arg25[%c8_399, %c0_400] : memref<32x32xf32, #tpu.memory_space<vmem>>, vector<1x32xf32>
      tpu.vector_store %arg25[%c8_399, %c0_400], %676 {strides = array<i32>} : memref<32x32xf32, #tpu.memory_space<vmem>>, vector<1x32xf32>,
      %678 = vector.extract_strided_slice %675 {offsets = [0, 0], sizes = [1, 32], strides = [1, 1]} : vector<2x32xf32> to vector<1x32xf32>
      %c8_401 = arith.constant 8 : index
      %c0_402 = arith.constant 0 : index
      %679 = vector.load %arg27[%c8_401, %c0_402] : memref<32x32xf32, #tpu.memory_space<vmem>>, vector<1x32xf32>
      tpu.vector_store %arg27[%c8_401, %c0_402], %678 {strides = array<i32>} : memref<32x32xf32, #tpu.memory_space<vmem>>, vector<1x32xf32>,
      %680 = vector.extract_strided_slice %669 {offsets = [1, 0], sizes = [1, 32], strides = [1, 1]} : vector<2x32xf32> to vector<1x32xf32>
      %c8_403 = arith.constant 8 : index
      %c0_404 = arith.constant 0 : index
      %681 = vector.load %arg26[%c8_403, %c0_404] : memref<32x32xf32, #tpu.memory_space<vmem>>, vector<1x32xf32>
      tpu.vector_store %arg26[%c8_403, %c0_404], %680 {strides = array<i32>} : memref<32x32xf32, #tpu.memory_space<vmem>>, vector<1x32xf32>,
      %682 = vector.extract_strided_slice %675 {offsets = [1, 0], sizes = [1, 32], strides = [1, 1]} : vector<2x32xf32> to vector<1x32xf32>
      %c8_405 = arith.constant 8 : index
      %c0_406 = arith.constant 0 : index
      %683 = vector.load %arg28[%c8_405, %c0_406] : memref<32x32xf32, #tpu.memory_space<vmem>>, vector<1x32xf32>
      tpu.vector_store %arg28[%c8_405, %c0_406], %682 {strides = array<i32>} : memref<32x32xf32, #tpu.memory_space<vmem>>, vector<1x32xf32>,
      %c9_i32_407 = arith.constant 9 : i32
      %684 = arith.addi %503, %c9_i32_407 : i32
      %685 = arith.index_cast %684 : i32 to index
      %686 = memref.load %arg5[%685] : memref<128xi32, #tpu.memory_space<smem>>
      %687 = arith.index_cast %686 : i32 to index
      %c0_408 = arith.constant 0 : index
      %c0_409 = arith.constant 0 : index
      %688 = vector.load %arg24[%687, %c0_408, %c0_409] : memref<9x2x32xf32, #tpu.memory_space<vmem>>, vector<1x2x32xf32>
      %689 = vector.shape_cast %688 : vector<1x2x32xf32> to vector<2x32xf32>
      %c9_i32_410 = arith.constant 9 : i32
      %690 = arith.addi %503, %c9_i32_410 : i32
      %691 = arith.index_cast %690 : i32 to index
      %692 = memref.load %arg6[%691] : memref<128xi32, #tpu.memory_space<smem>>
      %693 = arith.index_cast %692 : i32 to index
      %c0_411 = arith.constant 0 : index
      %c0_412 = arith.constant 0 : index
      %694 = vector.load %arg24[%693, %c0_411, %c0_412] : memref<9x2x32xf32, #tpu.memory_space<vmem>>, vector<1x2x32xf32>
      %695 = vector.shape_cast %694 : vector<1x2x32xf32> to vector<2x32xf32>
      %696 = vector.extract_strided_slice %689 {offsets = [0, 0], sizes = [1, 32], strides = [1, 1]} : vector<2x32xf32> to vector<1x32xf32>
      %c9_413 = arith.constant 9 : index
      %c0_414 = arith.constant 0 : index
      %697 = vector.load %arg25[%c9_413, %c0_414] : memref<32x32xf32, #tpu.memory_space<vmem>>, vector<1x32xf32>
      tpu.vector_store %arg25[%c9_413, %c0_414], %696 {strides = array<i32>} : memref<32x32xf32, #tpu.memory_space<vmem>>, vector<1x32xf32>,
      %698 = vector.extract_strided_slice %695 {offsets = [0, 0], sizes = [1, 32], strides = [1, 1]} : vector<2x32xf32> to vector<1x32xf32>
      %c9_415 = arith.constant 9 : index
      %c0_416 = arith.constant 0 : index
      %699 = vector.load %arg27[%c9_415, %c0_416] : memref<32x32xf32, #tpu.memory_space<vmem>>, vector<1x32xf32>
      tpu.vector_store %arg27[%c9_415, %c0_416], %698 {strides = array<i32>} : memref<32x32xf32, #tpu.memory_space<vmem>>, vector<1x32xf32>,
      %700 = vector.extract_strided_slice %689 {offsets = [1, 0], sizes = [1, 32], strides = [1, 1]} : vector<2x32xf32> to vector<1x32xf32>
      %c9_417 = arith.constant 9 : index
      %c0_418 = arith.constant 0 : index
      %701 = vector.load %arg26[%c9_417, %c0_418] : memref<32x32xf32, #tpu.memory_space<vmem>>, vector<1x32xf32>
      tpu.vector_store %arg26[%c9_417, %c0_418], %700 {strides = array<i32>} : memref<32x32xf32, #tpu.memory_space<vmem>>, vector<1x32xf32>,
      %702 = vector.extract_strided_slice %695 {offsets = [1, 0], sizes = [1, 32], strides = [1, 1]} : vector<2x32xf32> to vector<1x32xf32>
      %c9_419 = arith.constant 9 : index
      %c0_420 = arith.constant 0 : index
      %703 = vector.load %arg28[%c9_419, %c0_420] : memref<32x32xf32, #tpu.memory_space<vmem>>, vector<1x32xf32>
      tpu.vector_store %arg28[%c9_419, %c0_420], %702 {strides = array<i32>} : memref<32x32xf32, #tpu.memory_space<vmem>>, vector<1x32xf32>,
      %c10_i32_421 = arith.constant 10 : i32
      %704 = arith.addi %503, %c10_i32_421 : i32
      %705 = arith.index_cast %704 : i32 to index
      %706 = memref.load %arg5[%705] : memref<128xi32, #tpu.memory_space<smem>>
      %707 = arith.index_cast %706 : i32 to index
      %c0_422 = arith.constant 0 : index
      %c0_423 = arith.constant 0 : index
      %708 = vector.load %arg24[%707, %c0_422, %c0_423] : memref<9x2x32xf32, #tpu.memory_space<vmem>>, vector<1x2x32xf32>
      %709 = vector.shape_cast %708 : vector<1x2x32xf32> to vector<2x32xf32>
      %c10_i32_424 = arith.constant 10 : i32
      %710 = arith.addi %503, %c10_i32_424 : i32
      %711 = arith.index_cast %710 : i32 to index
      %712 = memref.load %arg6[%711] : memref<128xi32, #tpu.memory_space<smem>>
      %713 = arith.index_cast %712 : i32 to index
      %c0_425 = arith.constant 0 : index
      %c0_426 = arith.constant 0 : index
      %714 = vector.load %arg24[%713, %c0_425, %c0_426] : memref<9x2x32xf32, #tpu.memory_space<vmem>>, vector<1x2x32xf32>
      %715 = vector.shape_cast %714 : vector<1x2x32xf32> to vector<2x32xf32>
      %716 = vector.extract_strided_slice %709 {offsets = [0, 0], sizes = [1, 32], strides = [1, 1]} : vector<2x32xf32> to vector<1x32xf32>
      %c10_427 = arith.constant 10 : index
      %c0_428 = arith.constant 0 : index
      %717 = vector.load %arg25[%c10_427, %c0_428] : memref<32x32xf32, #tpu.memory_space<vmem>>, vector<1x32xf32>
      tpu.vector_store %arg25[%c10_427, %c0_428], %716 {strides = array<i32>} : memref<32x32xf32, #tpu.memory_space<vmem>>, vector<1x32xf32>,
      %718 = vector.extract_strided_slice %715 {offsets = [0, 0], sizes = [1, 32], strides = [1, 1]} : vector<2x32xf32> to vector<1x32xf32>
      %c10_429 = arith.constant 10 : index
      %c0_430 = arith.constant 0 : index
      %719 = vector.load %arg27[%c10_429, %c0_430] : memref<32x32xf32, #tpu.memory_space<vmem>>, vector<1x32xf32>
      tpu.vector_store %arg27[%c10_429, %c0_430], %718 {strides = array<i32>} : memref<32x32xf32, #tpu.memory_space<vmem>>, vector<1x32xf32>,
      %720 = vector.extract_strided_slice %709 {offsets = [1, 0], sizes = [1, 32], strides = [1, 1]} : vector<2x32xf32> to vector<1x32xf32>
      %c10_431 = arith.constant 10 : index
      %c0_432 = arith.constant 0 : index
      %721 = vector.load %arg26[%c10_431, %c0_432] : memref<32x32xf32, #tpu.memory_space<vmem>>, vector<1x32xf32>
      tpu.vector_store %arg26[%c10_431, %c0_432], %720 {strides = array<i32>} : memref<32x32xf32, #tpu.memory_space<vmem>>, vector<1x32xf32>,
      %722 = vector.extract_strided_slice %715 {offsets = [1, 0], sizes = [1, 32], strides = [1, 1]} : vector<2x32xf32> to vector<1x32xf32>
      %c10_433 = arith.constant 10 : index
      %c0_434 = arith.constant 0 : index
      %723 = vector.load %arg28[%c10_433, %c0_434] : memref<32x32xf32, #tpu.memory_space<vmem>>, vector<1x32xf32>
      tpu.vector_store %arg28[%c10_433, %c0_434], %722 {strides = array<i32>} : memref<32x32xf32, #tpu.memory_space<vmem>>, vector<1x32xf32>,
      %c11_i32_435 = arith.constant 11 : i32
      %724 = arith.addi %503, %c11_i32_435 : i32
      %725 = arith.index_cast %724 : i32 to index
      %726 = memref.load %arg5[%725] : memref<128xi32, #tpu.memory_space<smem>>
      %727 = arith.index_cast %726 : i32 to index
      %c0_436 = arith.constant 0 : index
      %c0_437 = arith.constant 0 : index
      %728 = vector.load %arg24[%727, %c0_436, %c0_437] : memref<9x2x32xf32, #tpu.memory_space<vmem>>, vector<1x2x32xf32>
      %729 = vector.shape_cast %728 : vector<1x2x32xf32> to vector<2x32xf32>
      %c11_i32_438 = arith.constant 11 : i32
      %730 = arith.addi %503, %c11_i32_438 : i32
      %731 = arith.index_cast %730 : i32 to index
      %732 = memref.load %arg6[%731] : memref<128xi32, #tpu.memory_space<smem>>
      %733 = arith.index_cast %732 : i32 to index
      %c0_439 = arith.constant 0 : index
      %c0_440 = arith.constant 0 : index
      %734 = vector.load %arg24[%733, %c0_439, %c0_440] : memref<9x2x32xf32, #tpu.memory_space<vmem>>, vector<1x2x32xf32>
      %735 = vector.shape_cast %734 : vector<1x2x32xf32> to vector<2x32xf32>
      %736 = vector.extract_strided_slice %729 {offsets = [0, 0], sizes = [1, 32], strides = [1, 1]} : vector<2x32xf32> to vector<1x32xf32>
      %c11_441 = arith.constant 11 : index
      %c0_442 = arith.constant 0 : index
      %737 = vector.load %arg25[%c11_441, %c0_442] : memref<32x32xf32, #tpu.memory_space<vmem>>, vector<1x32xf32>
      tpu.vector_store %arg25[%c11_441, %c0_442], %736 {strides = array<i32>} : memref<32x32xf32, #tpu.memory_space<vmem>>, vector<1x32xf32>,
      %738 = vector.extract_strided_slice %735 {offsets = [0, 0], sizes = [1, 32], strides = [1, 1]} : vector<2x32xf32> to vector<1x32xf32>
      %c11_443 = arith.constant 11 : index
      %c0_444 = arith.constant 0 : index
      %739 = vector.load %arg27[%c11_443, %c0_444] : memref<32x32xf32, #tpu.memory_space<vmem>>, vector<1x32xf32>
      tpu.vector_store %arg27[%c11_443, %c0_444], %738 {strides = array<i32>} : memref<32x32xf32, #tpu.memory_space<vmem>>, vector<1x32xf32>,
      %740 = vector.extract_strided_slice %729 {offsets = [1, 0], sizes = [1, 32], strides = [1, 1]} : vector<2x32xf32> to vector<1x32xf32>
      %c11_445 = arith.constant 11 : index
      %c0_446 = arith.constant 0 : index
      %741 = vector.load %arg26[%c11_445, %c0_446] : memref<32x32xf32, #tpu.memory_space<vmem>>, vector<1x32xf32>
      tpu.vector_store %arg26[%c11_445, %c0_446], %740 {strides = array<i32>} : memref<32x32xf32, #tpu.memory_space<vmem>>, vector<1x32xf32>,
      %742 = vector.extract_strided_slice %735 {offsets = [1, 0], sizes = [1, 32], strides = [1, 1]} : vector<2x32xf32> to vector<1x32xf32>
      %c11_447 = arith.constant 11 : index
      %c0_448 = arith.constant 0 : index
      %743 = vector.load %arg28[%c11_447, %c0_448] : memref<32x32xf32, #tpu.memory_space<vmem>>, vector<1x32xf32>
      tpu.vector_store %arg28[%c11_447, %c0_448], %742 {strides = array<i32>} : memref<32x32xf32, #tpu.memory_space<vmem>>, vector<1x32xf32>,
      %c12_i32_449 = arith.constant 12 : i32
      %744 = arith.addi %503, %c12_i32_449 : i32
      %745 = arith.index_cast %744 : i32 to index
      %746 = memref.load %arg5[%745] : memref<128xi32, #tpu.memory_space<smem>>
      %747 = arith.index_cast %746 : i32 to index
      %c0_450 = arith.constant 0 : index
      %c0_451 = arith.constant 0 : index
      %748 = vector.load %arg24[%747, %c0_450, %c0_451] : memref<9x2x32xf32, #tpu.memory_space<vmem>>, vector<1x2x32xf32>
      %749 = vector.shape_cast %748 : vector<1x2x32xf32> to vector<2x32xf32>
      %c12_i32_452 = arith.constant 12 : i32
      %750 = arith.addi %503, %c12_i32_452 : i32
      %751 = arith.index_cast %750 : i32 to index
      %752 = memref.load %arg6[%751] : memref<128xi32, #tpu.memory_space<smem>>
      %753 = arith.index_cast %752 : i32 to index
      %c0_453 = arith.constant 0 : index
      %c0_454 = arith.constant 0 : index
      %754 = vector.load %arg24[%753, %c0_453, %c0_454] : memref<9x2x32xf32, #tpu.memory_space<vmem>>, vector<1x2x32xf32>
      %755 = vector.shape_cast %754 : vector<1x2x32xf32> to vector<2x32xf32>
      %756 = vector.extract_strided_slice %749 {offsets = [0, 0], sizes = [1, 32], strides = [1, 1]} : vector<2x32xf32> to vector<1x32xf32>
      %c12_455 = arith.constant 12 : index
      %c0_456 = arith.constant 0 : index
      %757 = vector.load %arg25[%c12_455, %c0_456] : memref<32x32xf32, #tpu.memory_space<vmem>>, vector<1x32xf32>
      tpu.vector_store %arg25[%c12_455, %c0_456], %756 {strides = array<i32>} : memref<32x32xf32, #tpu.memory_space<vmem>>, vector<1x32xf32>,
      %758 = vector.extract_strided_slice %755 {offsets = [0, 0], sizes = [1, 32], strides = [1, 1]} : vector<2x32xf32> to vector<1x32xf32>
      %c12_457 = arith.constant 12 : index
      %c0_458 = arith.constant 0 : index
      %759 = vector.load %arg27[%c12_457, %c0_458] : memref<32x32xf32, #tpu.memory_space<vmem>>, vector<1x32xf32>
      tpu.vector_store %arg27[%c12_457, %c0_458], %758 {strides = array<i32>} : memref<32x32xf32, #tpu.memory_space<vmem>>, vector<1x32xf32>,
      %760 = vector.extract_strided_slice %749 {offsets = [1, 0], sizes = [1, 32], strides = [1, 1]} : vector<2x32xf32> to vector<1x32xf32>
      %c12_459 = arith.constant 12 : index
      %c0_460 = arith.constant 0 : index
      %761 = vector.load %arg26[%c12_459, %c0_460] : memref<32x32xf32, #tpu.memory_space<vmem>>, vector<1x32xf32>
      tpu.vector_store %arg26[%c12_459, %c0_460], %760 {strides = array<i32>} : memref<32x32xf32, #tpu.memory_space<vmem>>, vector<1x32xf32>,
      %762 = vector.extract_strided_slice %755 {offsets = [1, 0], sizes = [1, 32], strides = [1, 1]} : vector<2x32xf32> to vector<1x32xf32>
      %c12_461 = arith.constant 12 : index
      %c0_462 = arith.constant 0 : index
      %763 = vector.load %arg28[%c12_461, %c0_462] : memref<32x32xf32, #tpu.memory_space<vmem>>, vector<1x32xf32>
      tpu.vector_store %arg28[%c12_461, %c0_462], %762 {strides = array<i32>} : memref<32x32xf32, #tpu.memory_space<vmem>>, vector<1x32xf32>,
      %c13_i32_463 = arith.constant 13 : i32
      %764 = arith.addi %503, %c13_i32_463 : i32
      %765 = arith.index_cast %764 : i32 to index
      %766 = memref.load %arg5[%765] : memref<128xi32, #tpu.memory_space<smem>>
      %767 = arith.index_cast %766 : i32 to index
      %c0_464 = arith.constant 0 : index
      %c0_465 = arith.constant 0 : index
      %768 = vector.load %arg24[%767, %c0_464, %c0_465] : memref<9x2x32xf32, #tpu.memory_space<vmem>>, vector<1x2x32xf32>
      %769 = vector.shape_cast %768 : vector<1x2x32xf32> to vector<2x32xf32>
      %c13_i32_466 = arith.constant 13 : i32
      %770 = arith.addi %503, %c13_i32_466 : i32
      %771 = arith.index_cast %770 : i32 to index
      %772 = memref.load %arg6[%771] : memref<128xi32, #tpu.memory_space<smem>>
      %773 = arith.index_cast %772 : i32 to index
      %c0_467 = arith.constant 0 : index
      %c0_468 = arith.constant 0 : index
      %774 = vector.load %arg24[%773, %c0_467, %c0_468] : memref<9x2x32xf32, #tpu.memory_space<vmem>>, vector<1x2x32xf32>
      %775 = vector.shape_cast %774 : vector<1x2x32xf32> to vector<2x32xf32>
      %776 = vector.extract_strided_slice %769 {offsets = [0, 0], sizes = [1, 32], strides = [1, 1]} : vector<2x32xf32> to vector<1x32xf32>
      %c13_469 = arith.constant 13 : index
      %c0_470 = arith.constant 0 : index
      %777 = vector.load %arg25[%c13_469, %c0_470] : memref<32x32xf32, #tpu.memory_space<vmem>>, vector<1x32xf32>
      tpu.vector_store %arg25[%c13_469, %c0_470], %776 {strides = array<i32>} : memref<32x32xf32, #tpu.memory_space<vmem>>, vector<1x32xf32>,
      %778 = vector.extract_strided_slice %775 {offsets = [0, 0], sizes = [1, 32], strides = [1, 1]} : vector<2x32xf32> to vector<1x32xf32>
      %c13_471 = arith.constant 13 : index
      %c0_472 = arith.constant 0 : index
      %779 = vector.load %arg27[%c13_471, %c0_472] : memref<32x32xf32, #tpu.memory_space<vmem>>, vector<1x32xf32>
      tpu.vector_store %arg27[%c13_471, %c0_472], %778 {strides = array<i32>} : memref<32x32xf32, #tpu.memory_space<vmem>>, vector<1x32xf32>,
      %780 = vector.extract_strided_slice %769 {offsets = [1, 0], sizes = [1, 32], strides = [1, 1]} : vector<2x32xf32> to vector<1x32xf32>
      %c13_473 = arith.constant 13 : index
      %c0_474 = arith.constant 0 : index
      %781 = vector.load %arg26[%c13_473, %c0_474] : memref<32x32xf32, #tpu.memory_space<vmem>>, vector<1x32xf32>
      tpu.vector_store %arg26[%c13_473, %c0_474], %780 {strides = array<i32>} : memref<32x32xf32, #tpu.memory_space<vmem>>, vector<1x32xf32>,
      %782 = vector.extract_strided_slice %775 {offsets = [1, 0], sizes = [1, 32], strides = [1, 1]} : vector<2x32xf32> to vector<1x32xf32>
      %c13_475 = arith.constant 13 : index
      %c0_476 = arith.constant 0 : index
      %783 = vector.load %arg28[%c13_475, %c0_476] : memref<32x32xf32, #tpu.memory_space<vmem>>, vector<1x32xf32>
      tpu.vector_store %arg28[%c13_475, %c0_476], %782 {strides = array<i32>} : memref<32x32xf32, #tpu.memory_space<vmem>>, vector<1x32xf32>,
      %c14_i32_477 = arith.constant 14 : i32
      %784 = arith.addi %503, %c14_i32_477 : i32
      %785 = arith.index_cast %784 : i32 to index
      %786 = memref.load %arg5[%785] : memref<128xi32, #tpu.memory_space<smem>>
      %787 = arith.index_cast %786 : i32 to index
      %c0_478 = arith.constant 0 : index
      %c0_479 = arith.constant 0 : index
      %788 = vector.load %arg24[%787, %c0_478, %c0_479] : memref<9x2x32xf32, #tpu.memory_space<vmem>>, vector<1x2x32xf32>
      %789 = vector.shape_cast %788 : vector<1x2x32xf32> to vector<2x32xf32>
      %c14_i32_480 = arith.constant 14 : i32
      %790 = arith.addi %503, %c14_i32_480 : i32
      %791 = arith.index_cast %790 : i32 to index
      %792 = memref.load %arg6[%791] : memref<128xi32, #tpu.memory_space<smem>>
      %793 = arith.index_cast %792 : i32 to index
      %c0_481 = arith.constant 0 : index
      %c0_482 = arith.constant 0 : index
      %794 = vector.load %arg24[%793, %c0_481, %c0_482] : memref<9x2x32xf32, #tpu.memory_space<vmem>>, vector<1x2x32xf32>
      %795 = vector.shape_cast %794 : vector<1x2x32xf32> to vector<2x32xf32>
      %796 = vector.extract_strided_slice %789 {offsets = [0, 0], sizes = [1, 32], strides = [1, 1]} : vector<2x32xf32> to vector<1x32xf32>
      %c14_483 = arith.constant 14 : index
      %c0_484 = arith.constant 0 : index
      %797 = vector.load %arg25[%c14_483, %c0_484] : memref<32x32xf32, #tpu.memory_space<vmem>>, vector<1x32xf32>
      tpu.vector_store %arg25[%c14_483, %c0_484], %796 {strides = array<i32>} : memref<32x32xf32, #tpu.memory_space<vmem>>, vector<1x32xf32>,
      %798 = vector.extract_strided_slice %795 {offsets = [0, 0], sizes = [1, 32], strides = [1, 1]} : vector<2x32xf32> to vector<1x32xf32>
      %c14_485 = arith.constant 14 : index
      %c0_486 = arith.constant 0 : index
      %799 = vector.load %arg27[%c14_485, %c0_486] : memref<32x32xf32, #tpu.memory_space<vmem>>, vector<1x32xf32>
      tpu.vector_store %arg27[%c14_485, %c0_486], %798 {strides = array<i32>} : memref<32x32xf32, #tpu.memory_space<vmem>>, vector<1x32xf32>,
      %800 = vector.extract_strided_slice %789 {offsets = [1, 0], sizes = [1, 32], strides = [1, 1]} : vector<2x32xf32> to vector<1x32xf32>
      %c14_487 = arith.constant 14 : index
      %c0_488 = arith.constant 0 : index
      %801 = vector.load %arg26[%c14_487, %c0_488] : memref<32x32xf32, #tpu.memory_space<vmem>>, vector<1x32xf32>
      tpu.vector_store %arg26[%c14_487, %c0_488], %800 {strides = array<i32>} : memref<32x32xf32, #tpu.memory_space<vmem>>, vector<1x32xf32>,
      %802 = vector.extract_strided_slice %795 {offsets = [1, 0], sizes = [1, 32], strides = [1, 1]} : vector<2x32xf32> to vector<1x32xf32>
      %c14_489 = arith.constant 14 : index
      %c0_490 = arith.constant 0 : index
      %803 = vector.load %arg28[%c14_489, %c0_490] : memref<32x32xf32, #tpu.memory_space<vmem>>, vector<1x32xf32>
      tpu.vector_store %arg28[%c14_489, %c0_490], %802 {strides = array<i32>} : memref<32x32xf32, #tpu.memory_space<vmem>>, vector<1x32xf32>,
      %c15_i32_491 = arith.constant 15 : i32
      %804 = arith.addi %503, %c15_i32_491 : i32
      %805 = arith.index_cast %804 : i32 to index
      %806 = memref.load %arg5[%805] : memref<128xi32, #tpu.memory_space<smem>>
      %807 = arith.index_cast %806 : i32 to index
      %c0_492 = arith.constant 0 : index
      %c0_493 = arith.constant 0 : index
      %808 = vector.load %arg24[%807, %c0_492, %c0_493] : memref<9x2x32xf32, #tpu.memory_space<vmem>>, vector<1x2x32xf32>
      %809 = vector.shape_cast %808 : vector<1x2x32xf32> to vector<2x32xf32>
      %c15_i32_494 = arith.constant 15 : i32
      %810 = arith.addi %503, %c15_i32_494 : i32
      %811 = arith.index_cast %810 : i32 to index
      %812 = memref.load %arg6[%811] : memref<128xi32, #tpu.memory_space<smem>>
      %813 = arith.index_cast %812 : i32 to index
      %c0_495 = arith.constant 0 : index
      %c0_496 = arith.constant 0 : index
      %814 = vector.load %arg24[%813, %c0_495, %c0_496] : memref<9x2x32xf32, #tpu.memory_space<vmem>>, vector<1x2x32xf32>
      %815 = vector.shape_cast %814 : vector<1x2x32xf32> to vector<2x32xf32>
      %816 = vector.extract_strided_slice %809 {offsets = [0, 0], sizes = [1, 32], strides = [1, 1]} : vector<2x32xf32> to vector<1x32xf32>
      %c15_497 = arith.constant 15 : index
      %c0_498 = arith.constant 0 : index
      %817 = vector.load %arg25[%c15_497, %c0_498] : memref<32x32xf32, #tpu.memory_space<vmem>>, vector<1x32xf32>
      tpu.vector_store %arg25[%c15_497, %c0_498], %816 {strides = array<i32>} : memref<32x32xf32, #tpu.memory_space<vmem>>, vector<1x32xf32>,
      %818 = vector.extract_strided_slice %815 {offsets = [0, 0], sizes = [1, 32], strides = [1, 1]} : vector<2x32xf32> to vector<1x32xf32>
      %c15_499 = arith.constant 15 : index
      %c0_500 = arith.constant 0 : index
      %819 = vector.load %arg27[%c15_499, %c0_500] : memref<32x32xf32, #tpu.memory_space<vmem>>, vector<1x32xf32>
      tpu.vector_store %arg27[%c15_499, %c0_500], %818 {strides = array<i32>} : memref<32x32xf32, #tpu.memory_space<vmem>>, vector<1x32xf32>,
      %820 = vector.extract_strided_slice %809 {offsets = [1, 0], sizes = [1, 32], strides = [1, 1]} : vector<2x32xf32> to vector<1x32xf32>
      %c15_501 = arith.constant 15 : index
      %c0_502 = arith.constant 0 : index
      %821 = vector.load %arg26[%c15_501, %c0_502] : memref<32x32xf32, #tpu.memory_space<vmem>>, vector<1x32xf32>
      tpu.vector_store %arg26[%c15_501, %c0_502], %820 {strides = array<i32>} : memref<32x32xf32, #tpu.memory_space<vmem>>, vector<1x32xf32>,
      %822 = vector.extract_strided_slice %815 {offsets = [1, 0], sizes = [1, 32], strides = [1, 1]} : vector<2x32xf32> to vector<1x32xf32>
      %c15_503 = arith.constant 15 : index
      %c0_504 = arith.constant 0 : index
      %823 = vector.load %arg28[%c15_503, %c0_504] : memref<32x32xf32, #tpu.memory_space<vmem>>, vector<1x32xf32>
      tpu.vector_store %arg28[%c15_503, %c0_504], %822 {strides = array<i32>} : memref<32x32xf32, #tpu.memory_space<vmem>>, vector<1x32xf32>,
      %c16_i32_505 = arith.constant 16 : i32
      %824 = arith.addi %503, %c16_i32_505 : i32
      %825 = arith.index_cast %824 : i32 to index
      %826 = memref.load %arg5[%825] : memref<128xi32, #tpu.memory_space<smem>>
      %827 = arith.index_cast %826 : i32 to index
      %c0_506 = arith.constant 0 : index
      %c0_507 = arith.constant 0 : index
      %828 = vector.load %arg24[%827, %c0_506, %c0_507] : memref<9x2x32xf32, #tpu.memory_space<vmem>>, vector<1x2x32xf32>
      %829 = vector.shape_cast %828 : vector<1x2x32xf32> to vector<2x32xf32>
      %c16_i32_508 = arith.constant 16 : i32
      %830 = arith.addi %503, %c16_i32_508 : i32
      %831 = arith.index_cast %830 : i32 to index
      %832 = memref.load %arg6[%831] : memref<128xi32, #tpu.memory_space<smem>>
      %833 = arith.index_cast %832 : i32 to index
      %c0_509 = arith.constant 0 : index
      %c0_510 = arith.constant 0 : index
      %834 = vector.load %arg24[%833, %c0_509, %c0_510] : memref<9x2x32xf32, #tpu.memory_space<vmem>>, vector<1x2x32xf32>
      %835 = vector.shape_cast %834 : vector<1x2x32xf32> to vector<2x32xf32>
      %836 = vector.extract_strided_slice %829 {offsets = [0, 0], sizes = [1, 32], strides = [1, 1]} : vector<2x32xf32> to vector<1x32xf32>
      %c16_511 = arith.constant 16 : index
      %c0_512 = arith.constant 0 : index
      %837 = vector.load %arg25[%c16_511, %c0_512] : memref<32x32xf32, #tpu.memory_space<vmem>>, vector<1x32xf32>
      tpu.vector_store %arg25[%c16_511, %c0_512], %836 {strides = array<i32>} : memref<32x32xf32, #tpu.memory_space<vmem>>, vector<1x32xf32>,
      %838 = vector.extract_strided_slice %835 {offsets = [0, 0], sizes = [1, 32], strides = [1, 1]} : vector<2x32xf32> to vector<1x32xf32>
      %c16_513 = arith.constant 16 : index
      %c0_514 = arith.constant 0 : index
      %839 = vector.load %arg27[%c16_513, %c0_514] : memref<32x32xf32, #tpu.memory_space<vmem>>, vector<1x32xf32>
      tpu.vector_store %arg27[%c16_513, %c0_514], %838 {strides = array<i32>} : memref<32x32xf32, #tpu.memory_space<vmem>>, vector<1x32xf32>,
      %840 = vector.extract_strided_slice %829 {offsets = [1, 0], sizes = [1, 32], strides = [1, 1]} : vector<2x32xf32> to vector<1x32xf32>
      %c16_515 = arith.constant 16 : index
      %c0_516 = arith.constant 0 : index
      %841 = vector.load %arg26[%c16_515, %c0_516] : memref<32x32xf32, #tpu.memory_space<vmem>>, vector<1x32xf32>
      tpu.vector_store %arg26[%c16_515, %c0_516], %840 {strides = array<i32>} : memref<32x32xf32, #tpu.memory_space<vmem>>, vector<1x32xf32>,
      %842 = vector.extract_strided_slice %835 {offsets = [1, 0], sizes = [1, 32], strides = [1, 1]} : vector<2x32xf32> to vector<1x32xf32>
      %c16_517 = arith.constant 16 : index
      %c0_518 = arith.constant 0 : index
      %843 = vector.load %arg28[%c16_517, %c0_518] : memref<32x32xf32, #tpu.memory_space<vmem>>, vector<1x32xf32>
      tpu.vector_store %arg28[%c16_517, %c0_518], %842 {strides = array<i32>} : memref<32x32xf32, #tpu.memory_space<vmem>>, vector<1x32xf32>,
      %c17_i32_519 = arith.constant 17 : i32
      %844 = arith.addi %503, %c17_i32_519 : i32
      %845 = arith.index_cast %844 : i32 to index
      %846 = memref.load %arg5[%845] : memref<128xi32, #tpu.memory_space<smem>>
      %847 = arith.index_cast %846 : i32 to index
      %c0_520 = arith.constant 0 : index
      %c0_521 = arith.constant 0 : index
      %848 = vector.load %arg24[%847, %c0_520, %c0_521] : memref<9x2x32xf32, #tpu.memory_space<vmem>>, vector<1x2x32xf32>
      %849 = vector.shape_cast %848 : vector<1x2x32xf32> to vector<2x32xf32>
      %c17_i32_522 = arith.constant 17 : i32
      %850 = arith.addi %503, %c17_i32_522 : i32
      %851 = arith.index_cast %850 : i32 to index
      %852 = memref.load %arg6[%851] : memref<128xi32, #tpu.memory_space<smem>>
      %853 = arith.index_cast %852 : i32 to index
      %c0_523 = arith.constant 0 : index
      %c0_524 = arith.constant 0 : index
      %854 = vector.load %arg24[%853, %c0_523, %c0_524] : memref<9x2x32xf32, #tpu.memory_space<vmem>>, vector<1x2x32xf32>
      %855 = vector.shape_cast %854 : vector<1x2x32xf32> to vector<2x32xf32>
      %856 = vector.extract_strided_slice %849 {offsets = [0, 0], sizes = [1, 32], strides = [1, 1]} : vector<2x32xf32> to vector<1x32xf32>
      %c17_525 = arith.constant 17 : index
      %c0_526 = arith.constant 0 : index
      %857 = vector.load %arg25[%c17_525, %c0_526] : memref<32x32xf32, #tpu.memory_space<vmem>>, vector<1x32xf32>
      tpu.vector_store %arg25[%c17_525, %c0_526], %856 {strides = array<i32>} : memref<32x32xf32, #tpu.memory_space<vmem>>, vector<1x32xf32>,
      %858 = vector.extract_strided_slice %855 {offsets = [0, 0], sizes = [1, 32], strides = [1, 1]} : vector<2x32xf32> to vector<1x32xf32>
      %c17_527 = arith.constant 17 : index
      %c0_528 = arith.constant 0 : index
      %859 = vector.load %arg27[%c17_527, %c0_528] : memref<32x32xf32, #tpu.memory_space<vmem>>, vector<1x32xf32>
      tpu.vector_store %arg27[%c17_527, %c0_528], %858 {strides = array<i32>} : memref<32x32xf32, #tpu.memory_space<vmem>>, vector<1x32xf32>,
      %860 = vector.extract_strided_slice %849 {offsets = [1, 0], sizes = [1, 32], strides = [1, 1]} : vector<2x32xf32> to vector<1x32xf32>
      %c17_529 = arith.constant 17 : index
      %c0_530 = arith.constant 0 : index
      %861 = vector.load %arg26[%c17_529, %c0_530] : memref<32x32xf32, #tpu.memory_space<vmem>>, vector<1x32xf32>
      tpu.vector_store %arg26[%c17_529, %c0_530], %860 {strides = array<i32>} : memref<32x32xf32, #tpu.memory_space<vmem>>, vector<1x32xf32>,
      %862 = vector.extract_strided_slice %855 {offsets = [1, 0], sizes = [1, 32], strides = [1, 1]} : vector<2x32xf32> to vector<1x32xf32>
      %c17_531 = arith.constant 17 : index
      %c0_532 = arith.constant 0 : index
      %863 = vector.load %arg28[%c17_531, %c0_532] : memref<32x32xf32, #tpu.memory_space<vmem>>, vector<1x32xf32>
      tpu.vector_store %arg28[%c17_531, %c0_532], %862 {strides = array<i32>} : memref<32x32xf32, #tpu.memory_space<vmem>>, vector<1x32xf32>,
      %c18_i32_533 = arith.constant 18 : i32
      %864 = arith.addi %503, %c18_i32_533 : i32
      %865 = arith.index_cast %864 : i32 to index
      %866 = memref.load %arg5[%865] : memref<128xi32, #tpu.memory_space<smem>>
      %867 = arith.index_cast %866 : i32 to index
      %c0_534 = arith.constant 0 : index
      %c0_535 = arith.constant 0 : index
      %868 = vector.load %arg24[%867, %c0_534, %c0_535] : memref<9x2x32xf32, #tpu.memory_space<vmem>>, vector<1x2x32xf32>
      %869 = vector.shape_cast %868 : vector<1x2x32xf32> to vector<2x32xf32>
      %c18_i32_536 = arith.constant 18 : i32
      %870 = arith.addi %503, %c18_i32_536 : i32
      %871 = arith.index_cast %870 : i32 to index
      %872 = memref.load %arg6[%871] : memref<128xi32, #tpu.memory_space<smem>>
      %873 = arith.index_cast %872 : i32 to index
      %c0_537 = arith.constant 0 : index
      %c0_538 = arith.constant 0 : index
      %874 = vector.load %arg24[%873, %c0_537, %c0_538] : memref<9x2x32xf32, #tpu.memory_space<vmem>>, vector<1x2x32xf32>
      %875 = vector.shape_cast %874 : vector<1x2x32xf32> to vector<2x32xf32>
      %876 = vector.extract_strided_slice %869 {offsets = [0, 0], sizes = [1, 32], strides = [1, 1]} : vector<2x32xf32> to vector<1x32xf32>
      %c18_539 = arith.constant 18 : index
      %c0_540 = arith.constant 0 : index
      %877 = vector.load %arg25[%c18_539, %c0_540] : memref<32x32xf32, #tpu.memory_space<vmem>>, vector<1x32xf32>
      tpu.vector_store %arg25[%c18_539, %c0_540], %876 {strides = array<i32>} : memref<32x32xf32, #tpu.memory_space<vmem>>, vector<1x32xf32>,
      %878 = vector.extract_strided_slice %875 {offsets = [0, 0], sizes = [1, 32], strides = [1, 1]} : vector<2x32xf32> to vector<1x32xf32>
      %c18_541 = arith.constant 18 : index
      %c0_542 = arith.constant 0 : index
      %879 = vector.load %arg27[%c18_541, %c0_542] : memref<32x32xf32, #tpu.memory_space<vmem>>, vector<1x32xf32>
      tpu.vector_store %arg27[%c18_541, %c0_542], %878 {strides = array<i32>} : memref<32x32xf32, #tpu.memory_space<vmem>>, vector<1x32xf32>,
      %880 = vector.extract_strided_slice %869 {offsets = [1, 0], sizes = [1, 32], strides = [1, 1]} : vector<2x32xf32> to vector<1x32xf32>
      %c18_543 = arith.constant 18 : index
      %c0_544 = arith.constant 0 : index
      %881 = vector.load %arg26[%c18_543, %c0_544] : memref<32x32xf32, #tpu.memory_space<vmem>>, vector<1x32xf32>
      tpu.vector_store %arg26[%c18_543, %c0_544], %880 {strides = array<i32>} : memref<32x32xf32, #tpu.memory_space<vmem>>, vector<1x32xf32>,
      %882 = vector.extract_strided_slice %875 {offsets = [1, 0], sizes = [1, 32], strides = [1, 1]} : vector<2x32xf32> to vector<1x32xf32>
      %c18_545 = arith.constant 18 : index
      %c0_546 = arith.constant 0 : index
      %883 = vector.load %arg28[%c18_545, %c0_546] : memref<32x32xf32, #tpu.memory_space<vmem>>, vector<1x32xf32>
      tpu.vector_store %arg28[%c18_545, %c0_546], %882 {strides = array<i32>} : memref<32x32xf32, #tpu.memory_space<vmem>>, vector<1x32xf32>,
      %c19_i32_547 = arith.constant 19 : i32
      %884 = arith.addi %503, %c19_i32_547 : i32
      %885 = arith.index_cast %884 : i32 to index
      %886 = memref.load %arg5[%885] : memref<128xi32, #tpu.memory_space<smem>>
      %887 = arith.index_cast %886 : i32 to index
      %c0_548 = arith.constant 0 : index
      %c0_549 = arith.constant 0 : index
      %888 = vector.load %arg24[%887, %c0_548, %c0_549] : memref<9x2x32xf32, #tpu.memory_space<vmem>>, vector<1x2x32xf32>
      %889 = vector.shape_cast %888 : vector<1x2x32xf32> to vector<2x32xf32>
      %c19_i32_550 = arith.constant 19 : i32
      %890 = arith.addi %503, %c19_i32_550 : i32
      %891 = arith.index_cast %890 : i32 to index
      %892 = memref.load %arg6[%891] : memref<128xi32, #tpu.memory_space<smem>>
      %893 = arith.index_cast %892 : i32 to index
      %c0_551 = arith.constant 0 : index
      %c0_552 = arith.constant 0 : index
      %894 = vector.load %arg24[%893, %c0_551, %c0_552] : memref<9x2x32xf32, #tpu.memory_space<vmem>>, vector<1x2x32xf32>
      %895 = vector.shape_cast %894 : vector<1x2x32xf32> to vector<2x32xf32>
      %896 = vector.extract_strided_slice %889 {offsets = [0, 0], sizes = [1, 32], strides = [1, 1]} : vector<2x32xf32> to vector<1x32xf32>
      %c19_553 = arith.constant 19 : index
      %c0_554 = arith.constant 0 : index
      %897 = vector.load %arg25[%c19_553, %c0_554] : memref<32x32xf32, #tpu.memory_space<vmem>>, vector<1x32xf32>
      tpu.vector_store %arg25[%c19_553, %c0_554], %896 {strides = array<i32>} : memref<32x32xf32, #tpu.memory_space<vmem>>, vector<1x32xf32>,
      %898 = vector.extract_strided_slice %895 {offsets = [0, 0], sizes = [1, 32], strides = [1, 1]} : vector<2x32xf32> to vector<1x32xf32>
      %c19_555 = arith.constant 19 : index
      %c0_556 = arith.constant 0 : index
      %899 = vector.load %arg27[%c19_555, %c0_556] : memref<32x32xf32, #tpu.memory_space<vmem>>, vector<1x32xf32>
      tpu.vector_store %arg27[%c19_555, %c0_556], %898 {strides = array<i32>} : memref<32x32xf32, #tpu.memory_space<vmem>>, vector<1x32xf32>,
      %900 = vector.extract_strided_slice %889 {offsets = [1, 0], sizes = [1, 32], strides = [1, 1]} : vector<2x32xf32> to vector<1x32xf32>
      %c19_557 = arith.constant 19 : index
      %c0_558 = arith.constant 0 : index
      %901 = vector.load %arg26[%c19_557, %c0_558] : memref<32x32xf32, #tpu.memory_space<vmem>>, vector<1x32xf32>
      tpu.vector_store %arg26[%c19_557, %c0_558], %900 {strides = array<i32>} : memref<32x32xf32, #tpu.memory_space<vmem>>, vector<1x32xf32>,
      %902 = vector.extract_strided_slice %895 {offsets = [1, 0], sizes = [1, 32], strides = [1, 1]} : vector<2x32xf32> to vector<1x32xf32>
      %c19_559 = arith.constant 19 : index
      %c0_560 = arith.constant 0 : index
      %903 = vector.load %arg28[%c19_559, %c0_560] : memref<32x32xf32, #tpu.memory_space<vmem>>, vector<1x32xf32>
      tpu.vector_store %arg28[%c19_559, %c0_560], %902 {strides = array<i32>} : memref<32x32xf32, #tpu.memory_space<vmem>>, vector<1x32xf32>,
      %c20_i32_561 = arith.constant 20 : i32
      %904 = arith.addi %503, %c20_i32_561 : i32
      %905 = arith.index_cast %904 : i32 to index
      %906 = memref.load %arg5[%905] : memref<128xi32, #tpu.memory_space<smem>>
      %907 = arith.index_cast %906 : i32 to index
      %c0_562 = arith.constant 0 : index
      %c0_563 = arith.constant 0 : index
      %908 = vector.load %arg24[%907, %c0_562, %c0_563] : memref<9x2x32xf32, #tpu.memory_space<vmem>>, vector<1x2x32xf32>
      %909 = vector.shape_cast %908 : vector<1x2x32xf32> to vector<2x32xf32>
      %c20_i32_564 = arith.constant 20 : i32
      %910 = arith.addi %503, %c20_i32_564 : i32
      %911 = arith.index_cast %910 : i32 to index
      %912 = memref.load %arg6[%911] : memref<128xi32, #tpu.memory_space<smem>>
      %913 = arith.index_cast %912 : i32 to index
      %c0_565 = arith.constant 0 : index
      %c0_566 = arith.constant 0 : index
      %914 = vector.load %arg24[%913, %c0_565, %c0_566] : memref<9x2x32xf32, #tpu.memory_space<vmem>>, vector<1x2x32xf32>
      %915 = vector.shape_cast %914 : vector<1x2x32xf32> to vector<2x32xf32>
      %916 = vector.extract_strided_slice %909 {offsets = [0, 0], sizes = [1, 32], strides = [1, 1]} : vector<2x32xf32> to vector<1x32xf32>
      %c20_567 = arith.constant 20 : index
      %c0_568 = arith.constant 0 : index
      %917 = vector.load %arg25[%c20_567, %c0_568] : memref<32x32xf32, #tpu.memory_space<vmem>>, vector<1x32xf32>
      tpu.vector_store %arg25[%c20_567, %c0_568], %916 {strides = array<i32>} : memref<32x32xf32, #tpu.memory_space<vmem>>, vector<1x32xf32>,
      %918 = vector.extract_strided_slice %915 {offsets = [0, 0], sizes = [1, 32], strides = [1, 1]} : vector<2x32xf32> to vector<1x32xf32>
      %c20_569 = arith.constant 20 : index
      %c0_570 = arith.constant 0 : index
      %919 = vector.load %arg27[%c20_569, %c0_570] : memref<32x32xf32, #tpu.memory_space<vmem>>, vector<1x32xf32>
      tpu.vector_store %arg27[%c20_569, %c0_570], %918 {strides = array<i32>} : memref<32x32xf32, #tpu.memory_space<vmem>>, vector<1x32xf32>,
      %920 = vector.extract_strided_slice %909 {offsets = [1, 0], sizes = [1, 32], strides = [1, 1]} : vector<2x32xf32> to vector<1x32xf32>
      %c20_571 = arith.constant 20 : index
      %c0_572 = arith.constant 0 : index
      %921 = vector.load %arg26[%c20_571, %c0_572] : memref<32x32xf32, #tpu.memory_space<vmem>>, vector<1x32xf32>
      tpu.vector_store %arg26[%c20_571, %c0_572], %920 {strides = array<i32>} : memref<32x32xf32, #tpu.memory_space<vmem>>, vector<1x32xf32>,
      %922 = vector.extract_strided_slice %915 {offsets = [1, 0], sizes = [1, 32], strides = [1, 1]} : vector<2x32xf32> to vector<1x32xf32>
      %c20_573 = arith.constant 20 : index
      %c0_574 = arith.constant 0 : index
      %923 = vector.load %arg28[%c20_573, %c0_574] : memref<32x32xf32, #tpu.memory_space<vmem>>, vector<1x32xf32>
      tpu.vector_store %arg28[%c20_573, %c0_574], %922 {strides = array<i32>} : memref<32x32xf32, #tpu.memory_space<vmem>>, vector<1x32xf32>,
      %c21_i32_575 = arith.constant 21 : i32
      %924 = arith.addi %503, %c21_i32_575 : i32
      %925 = arith.index_cast %924 : i32 to index
      %926 = memref.load %arg5[%925] : memref<128xi32, #tpu.memory_space<smem>>
      %927 = arith.index_cast %926 : i32 to index
      %c0_576 = arith.constant 0 : index
      %c0_577 = arith.constant 0 : index
      %928 = vector.load %arg24[%927, %c0_576, %c0_577] : memref<9x2x32xf32, #tpu.memory_space<vmem>>, vector<1x2x32xf32>
      %929 = vector.shape_cast %928 : vector<1x2x32xf32> to vector<2x32xf32>
      %c21_i32_578 = arith.constant 21 : i32
      %930 = arith.addi %503, %c21_i32_578 : i32
      %931 = arith.index_cast %930 : i32 to index
      %932 = memref.load %arg6[%931] : memref<128xi32, #tpu.memory_space<smem>>
      %933 = arith.index_cast %932 : i32 to index
      %c0_579 = arith.constant 0 : index
      %c0_580 = arith.constant 0 : index
      %934 = vector.load %arg24[%933, %c0_579, %c0_580] : memref<9x2x32xf32, #tpu.memory_space<vmem>>, vector<1x2x32xf32>
      %935 = vector.shape_cast %934 : vector<1x2x32xf32> to vector<2x32xf32>
      %936 = vector.extract_strided_slice %929 {offsets = [0, 0], sizes = [1, 32], strides = [1, 1]} : vector<2x32xf32> to vector<1x32xf32>
      %c21_581 = arith.constant 21 : index
      %c0_582 = arith.constant 0 : index
      %937 = vector.load %arg25[%c21_581, %c0_582] : memref<32x32xf32, #tpu.memory_space<vmem>>, vector<1x32xf32>
      tpu.vector_store %arg25[%c21_581, %c0_582], %936 {strides = array<i32>} : memref<32x32xf32, #tpu.memory_space<vmem>>, vector<1x32xf32>,
      %938 = vector.extract_strided_slice %935 {offsets = [0, 0], sizes = [1, 32], strides = [1, 1]} : vector<2x32xf32> to vector<1x32xf32>
      %c21_583 = arith.constant 21 : index
      %c0_584 = arith.constant 0 : index
      %939 = vector.load %arg27[%c21_583, %c0_584] : memref<32x32xf32, #tpu.memory_space<vmem>>, vector<1x32xf32>
      tpu.vector_store %arg27[%c21_583, %c0_584], %938 {strides = array<i32>} : memref<32x32xf32, #tpu.memory_space<vmem>>, vector<1x32xf32>,
      %940 = vector.extract_strided_slice %929 {offsets = [1, 0], sizes = [1, 32], strides = [1, 1]} : vector<2x32xf32> to vector<1x32xf32>
      %c21_585 = arith.constant 21 : index
      %c0_586 = arith.constant 0 : index
      %941 = vector.load %arg26[%c21_585, %c0_586] : memref<32x32xf32, #tpu.memory_space<vmem>>, vector<1x32xf32>
      tpu.vector_store %arg26[%c21_585, %c0_586], %940 {strides = array<i32>} : memref<32x32xf32, #tpu.memory_space<vmem>>, vector<1x32xf32>,
      %942 = vector.extract_strided_slice %935 {offsets = [1, 0], sizes = [1, 32], strides = [1, 1]} : vector<2x32xf32> to vector<1x32xf32>
      %c21_587 = arith.constant 21 : index
      %c0_588 = arith.constant 0 : index
      %943 = vector.load %arg28[%c21_587, %c0_588] : memref<32x32xf32, #tpu.memory_space<vmem>>, vector<1x32xf32>
      tpu.vector_store %arg28[%c21_587, %c0_588], %942 {strides = array<i32>} : memref<32x32xf32, #tpu.memory_space<vmem>>, vector<1x32xf32>,
      %c22_i32_589 = arith.constant 22 : i32
      %944 = arith.addi %503, %c22_i32_589 : i32
      %945 = arith.index_cast %944 : i32 to index
      %946 = memref.load %arg5[%945] : memref<128xi32, #tpu.memory_space<smem>>
      %947 = arith.index_cast %946 : i32 to index
      %c0_590 = arith.constant 0 : index
      %c0_591 = arith.constant 0 : index
      %948 = vector.load %arg24[%947, %c0_590, %c0_591] : memref<9x2x32xf32, #tpu.memory_space<vmem>>, vector<1x2x32xf32>
      %949 = vector.shape_cast %948 : vector<1x2x32xf32> to vector<2x32xf32>
      %c22_i32_592 = arith.constant 22 : i32
      %950 = arith.addi %503, %c22_i32_592 : i32
      %951 = arith.index_cast %950 : i32 to index
      %952 = memref.load %arg6[%951] : memref<128xi32, #tpu.memory_space<smem>>
      %953 = arith.index_cast %952 : i32 to index
      %c0_593 = arith.constant 0 : index
      %c0_594 = arith.constant 0 : index
      %954 = vector.load %arg24[%953, %c0_593, %c0_594] : memref<9x2x32xf32, #tpu.memory_space<vmem>>, vector<1x2x32xf32>
      %955 = vector.shape_cast %954 : vector<1x2x32xf32> to vector<2x32xf32>
      %956 = vector.extract_strided_slice %949 {offsets = [0, 0], sizes = [1, 32], strides = [1, 1]} : vector<2x32xf32> to vector<1x32xf32>
      %c22_595 = arith.constant 22 : index
      %c0_596 = arith.constant 0 : index
      %957 = vector.load %arg25[%c22_595, %c0_596] : memref<32x32xf32, #tpu.memory_space<vmem>>, vector<1x32xf32>
      tpu.vector_store %arg25[%c22_595, %c0_596], %956 {strides = array<i32>} : memref<32x32xf32, #tpu.memory_space<vmem>>, vector<1x32xf32>,
      %958 = vector.extract_strided_slice %955 {offsets = [0, 0], sizes = [1, 32], strides = [1, 1]} : vector<2x32xf32> to vector<1x32xf32>
      %c22_597 = arith.constant 22 : index
      %c0_598 = arith.constant 0 : index
      %959 = vector.load %arg27[%c22_597, %c0_598] : memref<32x32xf32, #tpu.memory_space<vmem>>, vector<1x32xf32>
      tpu.vector_store %arg27[%c22_597, %c0_598], %958 {strides = array<i32>} : memref<32x32xf32, #tpu.memory_space<vmem>>, vector<1x32xf32>,
      %960 = vector.extract_strided_slice %949 {offsets = [1, 0], sizes = [1, 32], strides = [1, 1]} : vector<2x32xf32> to vector<1x32xf32>
      %c22_599 = arith.constant 22 : index
      %c0_600 = arith.constant 0 : index
      %961 = vector.load %arg26[%c22_599, %c0_600] : memref<32x32xf32, #tpu.memory_space<vmem>>, vector<1x32xf32>
      tpu.vector_store %arg26[%c22_599, %c0_600], %960 {strides = array<i32>} : memref<32x32xf32, #tpu.memory_space<vmem>>, vector<1x32xf32>,
      %962 = vector.extract_strided_slice %955 {offsets = [1, 0], sizes = [1, 32], strides = [1, 1]} : vector<2x32xf32> to vector<1x32xf32>
      %c22_601 = arith.constant 22 : index
      %c0_602 = arith.constant 0 : index
      %963 = vector.load %arg28[%c22_601, %c0_602] : memref<32x32xf32, #tpu.memory_space<vmem>>, vector<1x32xf32>
      tpu.vector_store %arg28[%c22_601, %c0_602], %962 {strides = array<i32>} : memref<32x32xf32, #tpu.memory_space<vmem>>, vector<1x32xf32>,
      %c23_i32_603 = arith.constant 23 : i32
      %964 = arith.addi %503, %c23_i32_603 : i32
      %965 = arith.index_cast %964 : i32 to index
      %966 = memref.load %arg5[%965] : memref<128xi32, #tpu.memory_space<smem>>
      %967 = arith.index_cast %966 : i32 to index
      %c0_604 = arith.constant 0 : index
      %c0_605 = arith.constant 0 : index
      %968 = vector.load %arg24[%967, %c0_604, %c0_605] : memref<9x2x32xf32, #tpu.memory_space<vmem>>, vector<1x2x32xf32>
      %969 = vector.shape_cast %968 : vector<1x2x32xf32> to vector<2x32xf32>
      %c23_i32_606 = arith.constant 23 : i32
      %970 = arith.addi %503, %c23_i32_606 : i32
      %971 = arith.index_cast %970 : i32 to index
      %972 = memref.load %arg6[%971] : memref<128xi32, #tpu.memory_space<smem>>
      %973 = arith.index_cast %972 : i32 to index
      %c0_607 = arith.constant 0 : index
      %c0_608 = arith.constant 0 : index
      %974 = vector.load %arg24[%973, %c0_607, %c0_608] : memref<9x2x32xf32, #tpu.memory_space<vmem>>, vector<1x2x32xf32>
      %975 = vector.shape_cast %974 : vector<1x2x32xf32> to vector<2x32xf32>
      %976 = vector.extract_strided_slice %969 {offsets = [0, 0], sizes = [1, 32], strides = [1, 1]} : vector<2x32xf32> to vector<1x32xf32>
      %c23_609 = arith.constant 23 : index
      %c0_610 = arith.constant 0 : index
      %977 = vector.load %arg25[%c23_609, %c0_610] : memref<32x32xf32, #tpu.memory_space<vmem>>, vector<1x32xf32>
      tpu.vector_store %arg25[%c23_609, %c0_610], %976 {strides = array<i32>} : memref<32x32xf32, #tpu.memory_space<vmem>>, vector<1x32xf32>,
      %978 = vector.extract_strided_slice %975 {offsets = [0, 0], sizes = [1, 32], strides = [1, 1]} : vector<2x32xf32> to vector<1x32xf32>
      %c23_611 = arith.constant 23 : index
      %c0_612 = arith.constant 0 : index
      %979 = vector.load %arg27[%c23_611, %c0_612] : memref<32x32xf32, #tpu.memory_space<vmem>>, vector<1x32xf32>
      tpu.vector_store %arg27[%c23_611, %c0_612], %978 {strides = array<i32>} : memref<32x32xf32, #tpu.memory_space<vmem>>, vector<1x32xf32>,
      %980 = vector.extract_strided_slice %969 {offsets = [1, 0], sizes = [1, 32], strides = [1, 1]} : vector<2x32xf32> to vector<1x32xf32>
      %c23_613 = arith.constant 23 : index
      %c0_614 = arith.constant 0 : index
      %981 = vector.load %arg26[%c23_613, %c0_614] : memref<32x32xf32, #tpu.memory_space<vmem>>, vector<1x32xf32>
      tpu.vector_store %arg26[%c23_613, %c0_614], %980 {strides = array<i32>} : memref<32x32xf32, #tpu.memory_space<vmem>>, vector<1x32xf32>,
      %982 = vector.extract_strided_slice %975 {offsets = [1, 0], sizes = [1, 32], strides = [1, 1]} : vector<2x32xf32> to vector<1x32xf32>
      %c23_615 = arith.constant 23 : index
      %c0_616 = arith.constant 0 : index
      %983 = vector.load %arg28[%c23_615, %c0_616] : memref<32x32xf32, #tpu.memory_space<vmem>>, vector<1x32xf32>
      tpu.vector_store %arg28[%c23_615, %c0_616], %982 {strides = array<i32>} : memref<32x32xf32, #tpu.memory_space<vmem>>, vector<1x32xf32>,
      %c24_i32_617 = arith.constant 24 : i32
      %984 = arith.addi %503, %c24_i32_617 : i32
      %985 = arith.index_cast %984 : i32 to index
      %986 = memref.load %arg5[%985] : memref<128xi32, #tpu.memory_space<smem>>
      %987 = arith.index_cast %986 : i32 to index
      %c0_618 = arith.constant 0 : index
      %c0_619 = arith.constant 0 : index
      %988 = vector.load %arg24[%987, %c0_618, %c0_619] : memref<9x2x32xf32, #tpu.memory_space<vmem>>, vector<1x2x32xf32>
      %989 = vector.shape_cast %988 : vector<1x2x32xf32> to vector<2x32xf32>
      %c24_i32_620 = arith.constant 24 : i32
      %990 = arith.addi %503, %c24_i32_620 : i32
      %991 = arith.index_cast %990 : i32 to index
      %992 = memref.load %arg6[%991] : memref<128xi32, #tpu.memory_space<smem>>
      %993 = arith.index_cast %992 : i32 to index
      %c0_621 = arith.constant 0 : index
      %c0_622 = arith.constant 0 : index
      %994 = vector.load %arg24[%993, %c0_621, %c0_622] : memref<9x2x32xf32, #tpu.memory_space<vmem>>, vector<1x2x32xf32>
      %995 = vector.shape_cast %994 : vector<1x2x32xf32> to vector<2x32xf32>
      %996 = vector.extract_strided_slice %989 {offsets = [0, 0], sizes = [1, 32], strides = [1, 1]} : vector<2x32xf32> to vector<1x32xf32>
      %c24_623 = arith.constant 24 : index
      %c0_624 = arith.constant 0 : index
      %997 = vector.load %arg25[%c24_623, %c0_624] : memref<32x32xf32, #tpu.memory_space<vmem>>, vector<1x32xf32>
      tpu.vector_store %arg25[%c24_623, %c0_624], %996 {strides = array<i32>} : memref<32x32xf32, #tpu.memory_space<vmem>>, vector<1x32xf32>,
      %998 = vector.extract_strided_slice %995 {offsets = [0, 0], sizes = [1, 32], strides = [1, 1]} : vector<2x32xf32> to vector<1x32xf32>
      %c24_625 = arith.constant 24 : index
      %c0_626 = arith.constant 0 : index
      %999 = vector.load %arg27[%c24_625, %c0_626] : memref<32x32xf32, #tpu.memory_space<vmem>>, vector<1x32xf32>
      tpu.vector_store %arg27[%c24_625, %c0_626], %998 {strides = array<i32>} : memref<32x32xf32, #tpu.memory_space<vmem>>, vector<1x32xf32>,
      %1000 = vector.extract_strided_slice %989 {offsets = [1, 0], sizes = [1, 32], strides = [1, 1]} : vector<2x32xf32> to vector<1x32xf32>
      %c24_627 = arith.constant 24 : index
      %c0_628 = arith.constant 0 : index
      %1001 = vector.load %arg26[%c24_627, %c0_628] : memref<32x32xf32, #tpu.memory_space<vmem>>, vector<1x32xf32>
      tpu.vector_store %arg26[%c24_627, %c0_628], %1000 {strides = array<i32>} : memref<32x32xf32, #tpu.memory_space<vmem>>, vector<1x32xf32>,
      %1002 = vector.extract_strided_slice %995 {offsets = [1, 0], sizes = [1, 32], strides = [1, 1]} : vector<2x32xf32> to vector<1x32xf32>
      %c24_629 = arith.constant 24 : index
      %c0_630 = arith.constant 0 : index
      %1003 = vector.load %arg28[%c24_629, %c0_630] : memref<32x32xf32, #tpu.memory_space<vmem>>, vector<1x32xf32>
      tpu.vector_store %arg28[%c24_629, %c0_630], %1002 {strides = array<i32>} : memref<32x32xf32, #tpu.memory_space<vmem>>, vector<1x32xf32>,
      %c25_i32_631 = arith.constant 25 : i32
      %1004 = arith.addi %503, %c25_i32_631 : i32
      %1005 = arith.index_cast %1004 : i32 to index
      %1006 = memref.load %arg5[%1005] : memref<128xi32, #tpu.memory_space<smem>>
      %1007 = arith.index_cast %1006 : i32 to index
      %c0_632 = arith.constant 0 : index
      %c0_633 = arith.constant 0 : index
      %1008 = vector.load %arg24[%1007, %c0_632, %c0_633] : memref<9x2x32xf32, #tpu.memory_space<vmem>>, vector<1x2x32xf32>
      %1009 = vector.shape_cast %1008 : vector<1x2x32xf32> to vector<2x32xf32>
      %c25_i32_634 = arith.constant 25 : i32
      %1010 = arith.addi %503, %c25_i32_634 : i32
      %1011 = arith.index_cast %1010 : i32 to index
      %1012 = memref.load %arg6[%1011] : memref<128xi32, #tpu.memory_space<smem>>
      %1013 = arith.index_cast %1012 : i32 to index
      %c0_635 = arith.constant 0 : index
      %c0_636 = arith.constant 0 : index
      %1014 = vector.load %arg24[%1013, %c0_635, %c0_636] : memref<9x2x32xf32, #tpu.memory_space<vmem>>, vector<1x2x32xf32>
      %1015 = vector.shape_cast %1014 : vector<1x2x32xf32> to vector<2x32xf32>
      %1016 = vector.extract_strided_slice %1009 {offsets = [0, 0], sizes = [1, 32], strides = [1, 1]} : vector<2x32xf32> to vector<1x32xf32>
      %c25_637 = arith.constant 25 : index
      %c0_638 = arith.constant 0 : index
      %1017 = vector.load %arg25[%c25_637, %c0_638] : memref<32x32xf32, #tpu.memory_space<vmem>>, vector<1x32xf32>
      tpu.vector_store %arg25[%c25_637, %c0_638], %1016 {strides = array<i32>} : memref<32x32xf32, #tpu.memory_space<vmem>>, vector<1x32xf32>,
      %1018 = vector.extract_strided_slice %1015 {offsets = [0, 0], sizes = [1, 32], strides = [1, 1]} : vector<2x32xf32> to vector<1x32xf32>
      %c25_639 = arith.constant 25 : index
      %c0_640 = arith.constant 0 : index
      %1019 = vector.load %arg27[%c25_639, %c0_640] : memref<32x32xf32, #tpu.memory_space<vmem>>, vector<1x32xf32>
      tpu.vector_store %arg27[%c25_639, %c0_640], %1018 {strides = array<i32>} : memref<32x32xf32, #tpu.memory_space<vmem>>, vector<1x32xf32>,
      %1020 = vector.extract_strided_slice %1009 {offsets = [1, 0], sizes = [1, 32], strides = [1, 1]} : vector<2x32xf32> to vector<1x32xf32>
      %c25_641 = arith.constant 25 : index
      %c0_642 = arith.constant 0 : index
      %1021 = vector.load %arg26[%c25_641, %c0_642] : memref<32x32xf32, #tpu.memory_space<vmem>>, vector<1x32xf32>
      tpu.vector_store %arg26[%c25_641, %c0_642], %1020 {strides = array<i32>} : memref<32x32xf32, #tpu.memory_space<vmem>>, vector<1x32xf32>,
      %1022 = vector.extract_strided_slice %1015 {offsets = [1, 0], sizes = [1, 32], strides = [1, 1]} : vector<2x32xf32> to vector<1x32xf32>
      %c25_643 = arith.constant 25 : index
      %c0_644 = arith.constant 0 : index
      %1023 = vector.load %arg28[%c25_643, %c0_644] : memref<32x32xf32, #tpu.memory_space<vmem>>, vector<1x32xf32>
      tpu.vector_store %arg28[%c25_643, %c0_644], %1022 {strides = array<i32>} : memref<32x32xf32, #tpu.memory_space<vmem>>, vector<1x32xf32>,
      %c26_i32_645 = arith.constant 26 : i32
      %1024 = arith.addi %503, %c26_i32_645 : i32
      %1025 = arith.index_cast %1024 : i32 to index
      %1026 = memref.load %arg5[%1025] : memref<128xi32, #tpu.memory_space<smem>>
      %1027 = arith.index_cast %1026 : i32 to index
      %c0_646 = arith.constant 0 : index
      %c0_647 = arith.constant 0 : index
      %1028 = vector.load %arg24[%1027, %c0_646, %c0_647] : memref<9x2x32xf32, #tpu.memory_space<vmem>>, vector<1x2x32xf32>
      %1029 = vector.shape_cast %1028 : vector<1x2x32xf32> to vector<2x32xf32>
      %c26_i32_648 = arith.constant 26 : i32
      %1030 = arith.addi %503, %c26_i32_648 : i32
      %1031 = arith.index_cast %1030 : i32 to index
      %1032 = memref.load %arg6[%1031] : memref<128xi32, #tpu.memory_space<smem>>
      %1033 = arith.index_cast %1032 : i32 to index
      %c0_649 = arith.constant 0 : index
      %c0_650 = arith.constant 0 : index
      %1034 = vector.load %arg24[%1033, %c0_649, %c0_650] : memref<9x2x32xf32, #tpu.memory_space<vmem>>, vector<1x2x32xf32>
      %1035 = vector.shape_cast %1034 : vector<1x2x32xf32> to vector<2x32xf32>
      %1036 = vector.extract_strided_slice %1029 {offsets = [0, 0], sizes = [1, 32], strides = [1, 1]} : vector<2x32xf32> to vector<1x32xf32>
      %c26_651 = arith.constant 26 : index
      %c0_652 = arith.constant 0 : index
      %1037 = vector.load %arg25[%c26_651, %c0_652] : memref<32x32xf32, #tpu.memory_space<vmem>>, vector<1x32xf32>
      tpu.vector_store %arg25[%c26_651, %c0_652], %1036 {strides = array<i32>} : memref<32x32xf32, #tpu.memory_space<vmem>>, vector<1x32xf32>,
      %1038 = vector.extract_strided_slice %1035 {offsets = [0, 0], sizes = [1, 32], strides = [1, 1]} : vector<2x32xf32> to vector<1x32xf32>
      %c26_653 = arith.constant 26 : index
      %c0_654 = arith.constant 0 : index
      %1039 = vector.load %arg27[%c26_653, %c0_654] : memref<32x32xf32, #tpu.memory_space<vmem>>, vector<1x32xf32>
      tpu.vector_store %arg27[%c26_653, %c0_654], %1038 {strides = array<i32>} : memref<32x32xf32, #tpu.memory_space<vmem>>, vector<1x32xf32>,
      %1040 = vector.extract_strided_slice %1029 {offsets = [1, 0], sizes = [1, 32], strides = [1, 1]} : vector<2x32xf32> to vector<1x32xf32>
      %c26_655 = arith.constant 26 : index
      %c0_656 = arith.constant 0 : index
      %1041 = vector.load %arg26[%c26_655, %c0_656] : memref<32x32xf32, #tpu.memory_space<vmem>>, vector<1x32xf32>
      tpu.vector_store %arg26[%c26_655, %c0_656], %1040 {strides = array<i32>} : memref<32x32xf32, #tpu.memory_space<vmem>>, vector<1x32xf32>,
      %1042 = vector.extract_strided_slice %1035 {offsets = [1, 0], sizes = [1, 32], strides = [1, 1]} : vector<2x32xf32> to vector<1x32xf32>
      %c26_657 = arith.constant 26 : index
      %c0_658 = arith.constant 0 : index
      %1043 = vector.load %arg28[%c26_657, %c0_658] : memref<32x32xf32, #tpu.memory_space<vmem>>, vector<1x32xf32>
      tpu.vector_store %arg28[%c26_657, %c0_658], %1042 {strides = array<i32>} : memref<32x32xf32, #tpu.memory_space<vmem>>, vector<1x32xf32>,
      %c27_i32_659 = arith.constant 27 : i32
      %1044 = arith.addi %503, %c27_i32_659 : i32
      %1045 = arith.index_cast %1044 : i32 to index
      %1046 = memref.load %arg5[%1045] : memref<128xi32, #tpu.memory_space<smem>>
      %1047 = arith.index_cast %1046 : i32 to index
      %c0_660 = arith.constant 0 : index
      %c0_661 = arith.constant 0 : index
      %1048 = vector.load %arg24[%1047, %c0_660, %c0_661] : memref<9x2x32xf32, #tpu.memory_space<vmem>>, vector<1x2x32xf32>
      %1049 = vector.shape_cast %1048 : vector<1x2x32xf32> to vector<2x32xf32>
      %c27_i32_662 = arith.constant 27 : i32
      %1050 = arith.addi %503, %c27_i32_662 : i32
      %1051 = arith.index_cast %1050 : i32 to index
      %1052 = memref.load %arg6[%1051] : memref<128xi32, #tpu.memory_space<smem>>
      %1053 = arith.index_cast %1052 : i32 to index
      %c0_663 = arith.constant 0 : index
      %c0_664 = arith.constant 0 : index
      %1054 = vector.load %arg24[%1053, %c0_663, %c0_664] : memref<9x2x32xf32, #tpu.memory_space<vmem>>, vector<1x2x32xf32>
      %1055 = vector.shape_cast %1054 : vector<1x2x32xf32> to vector<2x32xf32>
      %1056 = vector.extract_strided_slice %1049 {offsets = [0, 0], sizes = [1, 32], strides = [1, 1]} : vector<2x32xf32> to vector<1x32xf32>
      %c27_665 = arith.constant 27 : index
      %c0_666 = arith.constant 0 : index
      %1057 = vector.load %arg25[%c27_665, %c0_666] : memref<32x32xf32, #tpu.memory_space<vmem>>, vector<1x32xf32>
      tpu.vector_store %arg25[%c27_665, %c0_666], %1056 {strides = array<i32>} : memref<32x32xf32, #tpu.memory_space<vmem>>, vector<1x32xf32>,
      %1058 = vector.extract_strided_slice %1055 {offsets = [0, 0], sizes = [1, 32], strides = [1, 1]} : vector<2x32xf32> to vector<1x32xf32>
      %c27_667 = arith.constant 27 : index
      %c0_668 = arith.constant 0 : index
      %1059 = vector.load %arg27[%c27_667, %c0_668] : memref<32x32xf32, #tpu.memory_space<vmem>>, vector<1x32xf32>
      tpu.vector_store %arg27[%c27_667, %c0_668], %1058 {strides = array<i32>} : memref<32x32xf32, #tpu.memory_space<vmem>>, vector<1x32xf32>,
      %1060 = vector.extract_strided_slice %1049 {offsets = [1, 0], sizes = [1, 32], strides = [1, 1]} : vector<2x32xf32> to vector<1x32xf32>
      %c27_669 = arith.constant 27 : index
      %c0_670 = arith.constant 0 : index
      %1061 = vector.load %arg26[%c27_669, %c0_670] : memref<32x32xf32, #tpu.memory_space<vmem>>, vector<1x32xf32>
      tpu.vector_store %arg26[%c27_669, %c0_670], %1060 {strides = array<i32>} : memref<32x32xf32, #tpu.memory_space<vmem>>, vector<1x32xf32>,
      %1062 = vector.extract_strided_slice %1055 {offsets = [1, 0], sizes = [1, 32], strides = [1, 1]} : vector<2x32xf32> to vector<1x32xf32>
      %c27_671 = arith.constant 27 : index
      %c0_672 = arith.constant 0 : index
      %1063 = vector.load %arg28[%c27_671, %c0_672] : memref<32x32xf32, #tpu.memory_space<vmem>>, vector<1x32xf32>
      tpu.vector_store %arg28[%c27_671, %c0_672], %1062 {strides = array<i32>} : memref<32x32xf32, #tpu.memory_space<vmem>>, vector<1x32xf32>,
      %c28_i32_673 = arith.constant 28 : i32
      %1064 = arith.addi %503, %c28_i32_673 : i32
      %1065 = arith.index_cast %1064 : i32 to index
      %1066 = memref.load %arg5[%1065] : memref<128xi32, #tpu.memory_space<smem>>
      %1067 = arith.index_cast %1066 : i32 to index
      %c0_674 = arith.constant 0 : index
      %c0_675 = arith.constant 0 : index
      %1068 = vector.load %arg24[%1067, %c0_674, %c0_675] : memref<9x2x32xf32, #tpu.memory_space<vmem>>, vector<1x2x32xf32>
      %1069 = vector.shape_cast %1068 : vector<1x2x32xf32> to vector<2x32xf32>
      %c28_i32_676 = arith.constant 28 : i32
      %1070 = arith.addi %503, %c28_i32_676 : i32
      %1071 = arith.index_cast %1070 : i32 to index
      %1072 = memref.load %arg6[%1071] : memref<128xi32, #tpu.memory_space<smem>>
      %1073 = arith.index_cast %1072 : i32 to index
      %c0_677 = arith.constant 0 : index
      %c0_678 = arith.constant 0 : index
      %1074 = vector.load %arg24[%1073, %c0_677, %c0_678] : memref<9x2x32xf32, #tpu.memory_space<vmem>>, vector<1x2x32xf32>
      %1075 = vector.shape_cast %1074 : vector<1x2x32xf32> to vector<2x32xf32>
      %1076 = vector.extract_strided_slice %1069 {offsets = [0, 0], sizes = [1, 32], strides = [1, 1]} : vector<2x32xf32> to vector<1x32xf32>
      %c28_679 = arith.constant 28 : index
      %c0_680 = arith.constant 0 : index
      %1077 = vector.load %arg25[%c28_679, %c0_680] : memref<32x32xf32, #tpu.memory_space<vmem>>, vector<1x32xf32>
      tpu.vector_store %arg25[%c28_679, %c0_680], %1076 {strides = array<i32>} : memref<32x32xf32, #tpu.memory_space<vmem>>, vector<1x32xf32>,
      %1078 = vector.extract_strided_slice %1075 {offsets = [0, 0], sizes = [1, 32], strides = [1, 1]} : vector<2x32xf32> to vector<1x32xf32>
      %c28_681 = arith.constant 28 : index
      %c0_682 = arith.constant 0 : index
      %1079 = vector.load %arg27[%c28_681, %c0_682] : memref<32x32xf32, #tpu.memory_space<vmem>>, vector<1x32xf32>
      tpu.vector_store %arg27[%c28_681, %c0_682], %1078 {strides = array<i32>} : memref<32x32xf32, #tpu.memory_space<vmem>>, vector<1x32xf32>,
      %1080 = vector.extract_strided_slice %1069 {offsets = [1, 0], sizes = [1, 32], strides = [1, 1]} : vector<2x32xf32> to vector<1x32xf32>
      %c28_683 = arith.constant 28 : index
      %c0_684 = arith.constant 0 : index
      %1081 = vector.load %arg26[%c28_683, %c0_684] : memref<32x32xf32, #tpu.memory_space<vmem>>, vector<1x32xf32>
      tpu.vector_store %arg26[%c28_683, %c0_684], %1080 {strides = array<i32>} : memref<32x32xf32, #tpu.memory_space<vmem>>, vector<1x32xf32>,
      %1082 = vector.extract_strided_slice %1075 {offsets = [1, 0], sizes = [1, 32], strides = [1, 1]} : vector<2x32xf32> to vector<1x32xf32>
      %c28_685 = arith.constant 28 : index
      %c0_686 = arith.constant 0 : index
      %1083 = vector.load %arg28[%c28_685, %c0_686] : memref<32x32xf32, #tpu.memory_space<vmem>>, vector<1x32xf32>
      tpu.vector_store %arg28[%c28_685, %c0_686], %1082 {strides = array<i32>} : memref<32x32xf32, #tpu.memory_space<vmem>>, vector<1x32xf32>,
      %c29_i32_687 = arith.constant 29 : i32
      %1084 = arith.addi %503, %c29_i32_687 : i32
      %1085 = arith.index_cast %1084 : i32 to index
      %1086 = memref.load %arg5[%1085] : memref<128xi32, #tpu.memory_space<smem>>
      %1087 = arith.index_cast %1086 : i32 to index
      %c0_688 = arith.constant 0 : index
      %c0_689 = arith.constant 0 : index
      %1088 = vector.load %arg24[%1087, %c0_688, %c0_689] : memref<9x2x32xf32, #tpu.memory_space<vmem>>, vector<1x2x32xf32>
      %1089 = vector.shape_cast %1088 : vector<1x2x32xf32> to vector<2x32xf32>
      %c29_i32_690 = arith.constant 29 : i32
      %1090 = arith.addi %503, %c29_i32_690 : i32
      %1091 = arith.index_cast %1090 : i32 to index
      %1092 = memref.load %arg6[%1091] : memref<128xi32, #tpu.memory_space<smem>>
      %1093 = arith.index_cast %1092 : i32 to index
      %c0_691 = arith.constant 0 : index
      %c0_692 = arith.constant 0 : index
      %1094 = vector.load %arg24[%1093, %c0_691, %c0_692] : memref<9x2x32xf32, #tpu.memory_space<vmem>>, vector<1x2x32xf32>
      %1095 = vector.shape_cast %1094 : vector<1x2x32xf32> to vector<2x32xf32>
      %1096 = vector.extract_strided_slice %1089 {offsets = [0, 0], sizes = [1, 32], strides = [1, 1]} : vector<2x32xf32> to vector<1x32xf32>
      %c29_693 = arith.constant 29 : index
      %c0_694 = arith.constant 0 : index
      %1097 = vector.load %arg25[%c29_693, %c0_694] : memref<32x32xf32, #tpu.memory_space<vmem>>, vector<1x32xf32>
      tpu.vector_store %arg25[%c29_693, %c0_694], %1096 {strides = array<i32>} : memref<32x32xf32, #tpu.memory_space<vmem>>, vector<1x32xf32>,
      %1098 = vector.extract_strided_slice %1095 {offsets = [0, 0], sizes = [1, 32], strides = [1, 1]} : vector<2x32xf32> to vector<1x32xf32>
      %c29_695 = arith.constant 29 : index
      %c0_696 = arith.constant 0 : index
      %1099 = vector.load %arg27[%c29_695, %c0_696] : memref<32x32xf32, #tpu.memory_space<vmem>>, vector<1x32xf32>
      tpu.vector_store %arg27[%c29_695, %c0_696], %1098 {strides = array<i32>} : memref<32x32xf32, #tpu.memory_space<vmem>>, vector<1x32xf32>,
      %1100 = vector.extract_strided_slice %1089 {offsets = [1, 0], sizes = [1, 32], strides = [1, 1]} : vector<2x32xf32> to vector<1x32xf32>
      %c29_697 = arith.constant 29 : index
      %c0_698 = arith.constant 0 : index
      %1101 = vector.load %arg26[%c29_697, %c0_698] : memref<32x32xf32, #tpu.memory_space<vmem>>, vector<1x32xf32>
      tpu.vector_store %arg26[%c29_697, %c0_698], %1100 {strides = array<i32>} : memref<32x32xf32, #tpu.memory_space<vmem>>, vector<1x32xf32>,
      %1102 = vector.extract_strided_slice %1095 {offsets = [1, 0], sizes = [1, 32], strides = [1, 1]} : vector<2x32xf32> to vector<1x32xf32>
      %c29_699 = arith.constant 29 : index
      %c0_700 = arith.constant 0 : index
      %1103 = vector.load %arg28[%c29_699, %c0_700] : memref<32x32xf32, #tpu.memory_space<vmem>>, vector<1x32xf32>
      tpu.vector_store %arg28[%c29_699, %c0_700], %1102 {strides = array<i32>} : memref<32x32xf32, #tpu.memory_space<vmem>>, vector<1x32xf32>,
      %c30_i32_701 = arith.constant 30 : i32
      %1104 = arith.addi %503, %c30_i32_701 : i32
      %1105 = arith.index_cast %1104 : i32 to index
      %1106 = memref.load %arg5[%1105] : memref<128xi32, #tpu.memory_space<smem>>
      %1107 = arith.index_cast %1106 : i32 to index
      %c0_702 = arith.constant 0 : index
      %c0_703 = arith.constant 0 : index
      %1108 = vector.load %arg24[%1107, %c0_702, %c0_703] : memref<9x2x32xf32, #tpu.memory_space<vmem>>, vector<1x2x32xf32>
      %1109 = vector.shape_cast %1108 : vector<1x2x32xf32> to vector<2x32xf32>
      %c30_i32_704 = arith.constant 30 : i32
      %1110 = arith.addi %503, %c30_i32_704 : i32
      %1111 = arith.index_cast %1110 : i32 to index
      %1112 = memref.load %arg6[%1111] : memref<128xi32, #tpu.memory_space<smem>>
      %1113 = arith.index_cast %1112 : i32 to index
      %c0_705 = arith.constant 0 : index
      %c0_706 = arith.constant 0 : index
      %1114 = vector.load %arg24[%1113, %c0_705, %c0_706] : memref<9x2x32xf32, #tpu.memory_space<vmem>>, vector<1x2x32xf32>
      %1115 = vector.shape_cast %1114 : vector<1x2x32xf32> to vector<2x32xf32>
      %1116 = vector.extract_strided_slice %1109 {offsets = [0, 0], sizes = [1, 32], strides = [1, 1]} : vector<2x32xf32> to vector<1x32xf32>
      %c30_707 = arith.constant 30 : index
      %c0_708 = arith.constant 0 : index
      %1117 = vector.load %arg25[%c30_707, %c0_708] : memref<32x32xf32, #tpu.memory_space<vmem>>, vector<1x32xf32>
      tpu.vector_store %arg25[%c30_707, %c0_708], %1116 {strides = array<i32>} : memref<32x32xf32, #tpu.memory_space<vmem>>, vector<1x32xf32>,
      %1118 = vector.extract_strided_slice %1115 {offsets = [0, 0], sizes = [1, 32], strides = [1, 1]} : vector<2x32xf32> to vector<1x32xf32>
      %c30_709 = arith.constant 30 : index
      %c0_710 = arith.constant 0 : index
      %1119 = vector.load %arg27[%c30_709, %c0_710] : memref<32x32xf32, #tpu.memory_space<vmem>>, vector<1x32xf32>
      tpu.vector_store %arg27[%c30_709, %c0_710], %1118 {strides = array<i32>} : memref<32x32xf32, #tpu.memory_space<vmem>>, vector<1x32xf32>,
      %1120 = vector.extract_strided_slice %1109 {offsets = [1, 0], sizes = [1, 32], strides = [1, 1]} : vector<2x32xf32> to vector<1x32xf32>
      %c30_711 = arith.constant 30 : index
      %c0_712 = arith.constant 0 : index
      %1121 = vector.load %arg26[%c30_711, %c0_712] : memref<32x32xf32, #tpu.memory_space<vmem>>, vector<1x32xf32>
      tpu.vector_store %arg26[%c30_711, %c0_712], %1120 {strides = array<i32>} : memref<32x32xf32, #tpu.memory_space<vmem>>, vector<1x32xf32>,
      %1122 = vector.extract_strided_slice %1115 {offsets = [1, 0], sizes = [1, 32], strides = [1, 1]} : vector<2x32xf32> to vector<1x32xf32>
      %c30_713 = arith.constant 30 : index
      %c0_714 = arith.constant 0 : index
      %1123 = vector.load %arg28[%c30_713, %c0_714] : memref<32x32xf32, #tpu.memory_space<vmem>>, vector<1x32xf32>
      tpu.vector_store %arg28[%c30_713, %c0_714], %1122 {strides = array<i32>} : memref<32x32xf32, #tpu.memory_space<vmem>>, vector<1x32xf32>,
      %c31_i32_715 = arith.constant 31 : i32
      %1124 = arith.addi %503, %c31_i32_715 : i32
      %1125 = arith.index_cast %1124 : i32 to index
      %1126 = memref.load %arg5[%1125] : memref<128xi32, #tpu.memory_space<smem>>
      %1127 = arith.index_cast %1126 : i32 to index
      %c0_716 = arith.constant 0 : index
      %c0_717 = arith.constant 0 : index
      %1128 = vector.load %arg24[%1127, %c0_716, %c0_717] : memref<9x2x32xf32, #tpu.memory_space<vmem>>, vector<1x2x32xf32>
      %1129 = vector.shape_cast %1128 : vector<1x2x32xf32> to vector<2x32xf32>
      %c31_i32_718 = arith.constant 31 : i32
      %1130 = arith.addi %503, %c31_i32_718 : i32
      %1131 = arith.index_cast %1130 : i32 to index
      %1132 = memref.load %arg6[%1131] : memref<128xi32, #tpu.memory_space<smem>>
      %1133 = arith.index_cast %1132 : i32 to index
      %c0_719 = arith.constant 0 : index
      %c0_720 = arith.constant 0 : index
      %1134 = vector.load %arg24[%1133, %c0_719, %c0_720] : memref<9x2x32xf32, #tpu.memory_space<vmem>>, vector<1x2x32xf32>
      %1135 = vector.shape_cast %1134 : vector<1x2x32xf32> to vector<2x32xf32>
      %1136 = vector.extract_strided_slice %1129 {offsets = [0, 0], sizes = [1, 32], strides = [1, 1]} : vector<2x32xf32> to vector<1x32xf32>
      %c31_721 = arith.constant 31 : index
      %c0_722 = arith.constant 0 : index
      %1137 = vector.load %arg25[%c31_721, %c0_722] : memref<32x32xf32, #tpu.memory_space<vmem>>, vector<1x32xf32>
      tpu.vector_store %arg25[%c31_721, %c0_722], %1136 {strides = array<i32>} : memref<32x32xf32, #tpu.memory_space<vmem>>, vector<1x32xf32>,
      %1138 = vector.extract_strided_slice %1135 {offsets = [0, 0], sizes = [1, 32], strides = [1, 1]} : vector<2x32xf32> to vector<1x32xf32>
      %c31_723 = arith.constant 31 : index
      %c0_724 = arith.constant 0 : index
      %1139 = vector.load %arg27[%c31_723, %c0_724] : memref<32x32xf32, #tpu.memory_space<vmem>>, vector<1x32xf32>
      tpu.vector_store %arg27[%c31_723, %c0_724], %1138 {strides = array<i32>} : memref<32x32xf32, #tpu.memory_space<vmem>>, vector<1x32xf32>,
      %1140 = vector.extract_strided_slice %1129 {offsets = [1, 0], sizes = [1, 32], strides = [1, 1]} : vector<2x32xf32> to vector<1x32xf32>
      %c31_725 = arith.constant 31 : index
      %c0_726 = arith.constant 0 : index
      %1141 = vector.load %arg26[%c31_725, %c0_726] : memref<32x32xf32, #tpu.memory_space<vmem>>, vector<1x32xf32>
      tpu.vector_store %arg26[%c31_725, %c0_726], %1140 {strides = array<i32>} : memref<32x32xf32, #tpu.memory_space<vmem>>, vector<1x32xf32>,
      %1142 = vector.extract_strided_slice %1135 {offsets = [1, 0], sizes = [1, 32], strides = [1, 1]} : vector<2x32xf32> to vector<1x32xf32>
      %c31_727 = arith.constant 31 : index
      %c0_728 = arith.constant 0 : index
      %1143 = vector.load %arg28[%c31_727, %c0_728] : memref<32x32xf32, #tpu.memory_space<vmem>>, vector<1x32xf32>
      tpu.vector_store %arg28[%c31_727, %c0_728], %1142 {strides = array<i32>} : memref<32x32xf32, #tpu.memory_space<vmem>>, vector<1x32xf32>,
      %c2_i32_729 = arith.constant 2 : i32
      %1144 = arith.muli %502, %c2_i32_729 : i32
      %c0_i32_730 = arith.constant 0 : i32
      %1145 = arith.addi %1144, %c0_i32_730 : i32
      %c0_731 = arith.constant 0 : index
      %c0_732 = arith.constant 0 : index
      %1146 = vector.load %arg25[%c0_731, %c0_732] : memref<32x32xf32, #tpu.memory_space<vmem>>, vector<32x32xf32>
      %1147 = arith.truncf %1146 : vector<32x32xf32> to vector<32x32xbf16>
      %c0_733 = arith.constant 0 : index
      %c0_734 = arith.constant 0 : index
      %1148 = vector.load %arg27[%c0_733, %c0_734] : memref<32x32xf32, #tpu.memory_space<vmem>>, vector<32x32xf32>
      %1149 = arith.truncf %1148 : vector<32x32xf32> to vector<32x32xbf16>
      %1150 = arith.index_cast %1145 : i32 to index
      %c0_735 = arith.constant 0 : index
      %c0_736 = arith.constant 0 : index
      %1151 = vector.load %arg12[%1150, %c0_735, %c0_736] : memref<4x32x32xbf16, #tpu.memory_space<vmem>>, vector<1x32x32xbf16>
      %1152 = vector.shape_cast %1151 : vector<1x32x32xbf16> to vector<32x32xbf16>
      %cst_737 = arith.constant dense<0.000000e+00> : vector<32x32xf32>
      %1153 = tpu.matmul %1147, %1152, %cst_737 {dimension_numbers = #tpu.dot_dimension_numbers<[1], [0], [0], [1], [0, 0, 1, 1], [], []>} : vector<32x32xbf16>, vector<32x32xbf16>, vector<32x32xf32> -> vector<32x32xf32>
      %1154 = arith.index_cast %1145 : i32 to index
      %c0_738 = arith.constant 0 : index
      %c0_739 = arith.constant 0 : index
      %1155 = vector.load %arg13[%1154, %c0_738, %c0_739] : memref<4x32x32xbf16, #tpu.memory_space<vmem>>, vector<1x32x32xbf16>
      %1156 = vector.shape_cast %1155 : vector<1x32x32xbf16> to vector<32x32xbf16>
      %cst_740 = arith.constant dense<0.000000e+00> : vector<32x32xf32>
      %1157 = tpu.matmul %1149, %1156, %cst_740 {dimension_numbers = #tpu.dot_dimension_numbers<[1], [0], [0], [1], [0, 0, 1, 1], [], []>} : vector<32x32xbf16>, vector<32x32xbf16>, vector<32x32xf32> -> vector<32x32xf32>
      %1158 = arith.addf %1153, %1157 : vector<32x32xf32>
      %1159 = arith.index_cast %1145 : i32 to index
      %c0_741 = arith.constant 0 : index
      %c0_742 = arith.constant 0 : index
      %1160 = vector.load %arg14[%1159, %c0_741, %c0_742] : memref<4x1x32xf32, #tpu.memory_space<vmem>>, vector<1x1x32xf32>
      %1161 = vector.shape_cast %1160 : vector<1x1x32xf32> to vector<1x32xf32>
      %1162 = vector.broadcast %1161 : vector<1x32xf32> to vector<32x32xf32>
      %1163 = arith.addf %1158, %1162 : vector<32x32xf32>
      %cst_743 = arith.constant 0.000000e+00 : f32
      %1164 = vector.broadcast %cst_743 : f32 to vector<32x32xf32>
      %1165 = arith.maximumf %1163, %1164 : vector<32x32xf32>
      %1166 = arith.truncf %1165 : vector<32x32xf32> to vector<32x32xbf16>
      %1167 = arith.index_cast %1145 : i32 to index
      %c0_744 = arith.constant 0 : index
      %c0_745 = arith.constant 0 : index
      %1168 = vector.load %arg15[%1167, %c0_744, %c0_745] : memref<4x32x32xbf16, #tpu.memory_space<vmem>>, vector<1x32x32xbf16>
      %1169 = vector.shape_cast %1168 : vector<1x32x32xbf16> to vector<32x32xbf16>
      %cst_746 = arith.constant dense<0.000000e+00> : vector<32x32xf32>
      %1170 = tpu.matmul %1166, %1169, %cst_746 {dimension_numbers = #tpu.dot_dimension_numbers<[1], [0], [0], [1], [0, 0, 1, 1], [], []>} : vector<32x32xbf16>, vector<32x32xbf16>, vector<32x32xf32> -> vector<32x32xf32>
      %1171 = arith.index_cast %1145 : i32 to index
      %c0_747 = arith.constant 0 : index
      %c0_748 = arith.constant 0 : index
      %1172 = vector.load %arg16[%1171, %c0_747, %c0_748] : memref<4x1x32xf32, #tpu.memory_space<vmem>>, vector<1x1x32xf32>
      %1173 = vector.shape_cast %1172 : vector<1x1x32xf32> to vector<1x32xf32>
      %1174 = vector.broadcast %1173 : vector<1x32xf32> to vector<32x32xf32>
      %1175 = arith.addf %1170, %1174 : vector<32x32xf32>
      %c2_i32_749 = arith.constant 2 : i32
      %1176 = arith.muli %502, %c2_i32_749 : i32
      %c1_i32_750 = arith.constant 1 : i32
      %1177 = arith.addi %1176, %c1_i32_750 : i32
      %c0_751 = arith.constant 0 : index
      %c0_752 = arith.constant 0 : index
      %1178 = vector.load %arg26[%c0_751, %c0_752] : memref<32x32xf32, #tpu.memory_space<vmem>>, vector<32x32xf32>
      %1179 = arith.truncf %1178 : vector<32x32xf32> to vector<32x32xbf16>
      %c0_753 = arith.constant 0 : index
      %c0_754 = arith.constant 0 : index
      %1180 = vector.load %arg28[%c0_753, %c0_754] : memref<32x32xf32, #tpu.memory_space<vmem>>, vector<32x32xf32>
      %1181 = arith.truncf %1180 : vector<32x32xf32> to vector<32x32xbf16>
      %1182 = arith.index_cast %1177 : i32 to index
      %c0_755 = arith.constant 0 : index
      %c0_756 = arith.constant 0 : index
      %1183 = vector.load %arg12[%1182, %c0_755, %c0_756] : memref<4x32x32xbf16, #tpu.memory_space<vmem>>, vector<1x32x32xbf16>
      %1184 = vector.shape_cast %1183 : vector<1x32x32xbf16> to vector<32x32xbf16>
      %cst_757 = arith.constant dense<0.000000e+00> : vector<32x32xf32>
      %1185 = tpu.matmul %1179, %1184, %cst_757 {dimension_numbers = #tpu.dot_dimension_numbers<[1], [0], [0], [1], [0, 0, 1, 1], [], []>} : vector<32x32xbf16>, vector<32x32xbf16>, vector<32x32xf32> -> vector<32x32xf32>
      %1186 = arith.index_cast %1177 : i32 to index
      %c0_758 = arith.constant 0 : index
      %c0_759 = arith.constant 0 : index
      %1187 = vector.load %arg13[%1186, %c0_758, %c0_759] : memref<4x32x32xbf16, #tpu.memory_space<vmem>>, vector<1x32x32xbf16>
      %1188 = vector.shape_cast %1187 : vector<1x32x32xbf16> to vector<32x32xbf16>
      %cst_760 = arith.constant dense<0.000000e+00> : vector<32x32xf32>
      %1189 = tpu.matmul %1181, %1188, %cst_760 {dimension_numbers = #tpu.dot_dimension_numbers<[1], [0], [0], [1], [0, 0, 1, 1], [], []>} : vector<32x32xbf16>, vector<32x32xbf16>, vector<32x32xf32> -> vector<32x32xf32>
      %1190 = arith.addf %1185, %1189 : vector<32x32xf32>
      %1191 = arith.index_cast %1177 : i32 to index
      %c0_761 = arith.constant 0 : index
      %c0_762 = arith.constant 0 : index
      %1192 = vector.load %arg14[%1191, %c0_761, %c0_762] : memref<4x1x32xf32, #tpu.memory_space<vmem>>, vector<1x1x32xf32>
      %1193 = vector.shape_cast %1192 : vector<1x1x32xf32> to vector<1x32xf32>
      %1194 = vector.broadcast %1193 : vector<1x32xf32> to vector<32x32xf32>
      %1195 = arith.addf %1190, %1194 : vector<32x32xf32>
      %cst_763 = arith.constant 0.000000e+00 : f32
      %1196 = vector.broadcast %cst_763 : f32 to vector<32x32xf32>
      %1197 = arith.maximumf %1195, %1196 : vector<32x32xf32>
      %1198 = arith.truncf %1197 : vector<32x32xf32> to vector<32x32xbf16>
      %1199 = arith.index_cast %1177 : i32 to index
      %c0_764 = arith.constant 0 : index
      %c0_765 = arith.constant 0 : index
      %1200 = vector.load %arg15[%1199, %c0_764, %c0_765] : memref<4x32x32xbf16, #tpu.memory_space<vmem>>, vector<1x32x32xbf16>
      %1201 = vector.shape_cast %1200 : vector<1x32x32xbf16> to vector<32x32xbf16>
      %cst_766 = arith.constant dense<0.000000e+00> : vector<32x32xf32>
      %1202 = tpu.matmul %1198, %1201, %cst_766 {dimension_numbers = #tpu.dot_dimension_numbers<[1], [0], [0], [1], [0, 0, 1, 1], [], []>} : vector<32x32xbf16>, vector<32x32xbf16>, vector<32x32xf32> -> vector<32x32xf32>
      %1203 = arith.index_cast %1177 : i32 to index
      %c0_767 = arith.constant 0 : index
      %c0_768 = arith.constant 0 : index
      %1204 = vector.load %arg16[%1203, %c0_767, %c0_768] : memref<4x1x32xf32, #tpu.memory_space<vmem>>, vector<1x1x32xf32>
      %1205 = vector.shape_cast %1204 : vector<1x1x32xf32> to vector<1x32xf32>
      %1206 = vector.broadcast %1205 : vector<1x32xf32> to vector<32x32xf32>
      %1207 = arith.addf %1202, %1206 : vector<32x32xf32>
      %1208 = vector.extract_strided_slice %1175 {offsets = [0, 0], sizes = [1, 32], strides = [1, 1]} : vector<32x32xf32> to vector<1x32xf32>
      %1209 = vector.extract_strided_slice %1207 {offsets = [0, 0], sizes = [1, 32], strides = [1, 1]} : vector<32x32xf32> to vector<1x32xf32>
      %1210 = tpu.concatenate %1208, %1209 in 0 : vector<1x32xf32>, vector<1x32xf32> -> vector<2x32xf32>
      %c0_i32_769 = arith.constant 0 : i32
      %1211 = arith.addi %503, %c0_i32_769 : i32
      %1212 = arith.index_cast %1211 : i32 to index
      %1213 = memref.load %arg4[%1212] : memref<128xi32, #tpu.memory_space<smem>>
      %1214 = arith.index_cast %1213 : i32 to index
      %c0_770 = arith.constant 0 : index
      %c0_771 = arith.constant 0 : index
      %1215 = vector.load %arg24[%1214, %c0_770, %c0_771] : memref<9x2x32xf32, #tpu.memory_space<vmem>>, vector<1x2x32xf32>
      %1216 = vector.shape_cast %1215 : vector<1x2x32xf32> to vector<2x32xf32>
      %1217 = vector.shape_cast %1210 : vector<2x32xf32> to vector<1x2x32xf32>
      tpu.vector_store %arg24[%1214, %c0_770, %c0_771], %1217 {strides = array<i32>} : memref<9x2x32xf32, #tpu.memory_space<vmem>>, vector<1x2x32xf32>,
      %1218 = vector.extract_strided_slice %1175 {offsets = [1, 0], sizes = [1, 32], strides = [1, 1]} : vector<32x32xf32> to vector<1x32xf32>
      %1219 = vector.extract_strided_slice %1207 {offsets = [1, 0], sizes = [1, 32], strides = [1, 1]} : vector<32x32xf32> to vector<1x32xf32>
      %1220 = tpu.concatenate %1218, %1219 in 0 : vector<1x32xf32>, vector<1x32xf32> -> vector<2x32xf32>
      %c1_i32_772 = arith.constant 1 : i32
      %1221 = arith.addi %503, %c1_i32_772 : i32
      %1222 = arith.index_cast %1221 : i32 to index
      %1223 = memref.load %arg4[%1222] : memref<128xi32, #tpu.memory_space<smem>>
      %1224 = arith.index_cast %1223 : i32 to index
      %c0_773 = arith.constant 0 : index
      %c0_774 = arith.constant 0 : index
      %1225 = vector.load %arg24[%1224, %c0_773, %c0_774] : memref<9x2x32xf32, #tpu.memory_space<vmem>>, vector<1x2x32xf32>
      %1226 = vector.shape_cast %1225 : vector<1x2x32xf32> to vector<2x32xf32>
      %1227 = vector.shape_cast %1220 : vector<2x32xf32> to vector<1x2x32xf32>
      tpu.vector_store %arg24[%1224, %c0_773, %c0_774], %1227 {strides = array<i32>} : memref<9x2x32xf32, #tpu.memory_space<vmem>>, vector<1x2x32xf32>,
      %1228 = vector.extract_strided_slice %1175 {offsets = [2, 0], sizes = [1, 32], strides = [1, 1]} : vector<32x32xf32> to vector<1x32xf32>
      %1229 = vector.extract_strided_slice %1207 {offsets = [2, 0], sizes = [1, 32], strides = [1, 1]} : vector<32x32xf32> to vector<1x32xf32>
      %1230 = tpu.concatenate %1228, %1229 in 0 : vector<1x32xf32>, vector<1x32xf32> -> vector<2x32xf32>
      %c2_i32_775 = arith.constant 2 : i32
      %1231 = arith.addi %503, %c2_i32_775 : i32
      %1232 = arith.index_cast %1231 : i32 to index
      %1233 = memref.load %arg4[%1232] : memref<128xi32, #tpu.memory_space<smem>>
      %1234 = arith.index_cast %1233 : i32 to index
      %c0_776 = arith.constant 0 : index
      %c0_777 = arith.constant 0 : index
      %1235 = vector.load %arg24[%1234, %c0_776, %c0_777] : memref<9x2x32xf32, #tpu.memory_space<vmem>>, vector<1x2x32xf32>
      %1236 = vector.shape_cast %1235 : vector<1x2x32xf32> to vector<2x32xf32>
      %1237 = vector.shape_cast %1230 : vector<2x32xf32> to vector<1x2x32xf32>
      tpu.vector_store %arg24[%1234, %c0_776, %c0_777], %1237 {strides = array<i32>} : memref<9x2x32xf32, #tpu.memory_space<vmem>>, vector<1x2x32xf32>,
      %1238 = vector.extract_strided_slice %1175 {offsets = [3, 0], sizes = [1, 32], strides = [1, 1]} : vector<32x32xf32> to vector<1x32xf32>
      %1239 = vector.extract_strided_slice %1207 {offsets = [3, 0], sizes = [1, 32], strides = [1, 1]} : vector<32x32xf32> to vector<1x32xf32>
      %1240 = tpu.concatenate %1238, %1239 in 0 : vector<1x32xf32>, vector<1x32xf32> -> vector<2x32xf32>
      %c3_i32_778 = arith.constant 3 : i32
      %1241 = arith.addi %503, %c3_i32_778 : i32
      %1242 = arith.index_cast %1241 : i32 to index
      %1243 = memref.load %arg4[%1242] : memref<128xi32, #tpu.memory_space<smem>>
      %1244 = arith.index_cast %1243 : i32 to index
      %c0_779 = arith.constant 0 : index
      %c0_780 = arith.constant 0 : index
      %1245 = vector.load %arg24[%1244, %c0_779, %c0_780] : memref<9x2x32xf32, #tpu.memory_space<vmem>>, vector<1x2x32xf32>
      %1246 = vector.shape_cast %1245 : vector<1x2x32xf32> to vector<2x32xf32>
      %1247 = vector.shape_cast %1240 : vector<2x32xf32> to vector<1x2x32xf32>
      tpu.vector_store %arg24[%1244, %c0_779, %c0_780], %1247 {strides = array<i32>} : memref<9x2x32xf32, #tpu.memory_space<vmem>>, vector<1x2x32xf32>,
      %1248 = vector.extract_strided_slice %1175 {offsets = [4, 0], sizes = [1, 32], strides = [1, 1]} : vector<32x32xf32> to vector<1x32xf32>
      %1249 = vector.extract_strided_slice %1207 {offsets = [4, 0], sizes = [1, 32], strides = [1, 1]} : vector<32x32xf32> to vector<1x32xf32>
      %1250 = tpu.concatenate %1248, %1249 in 0 : vector<1x32xf32>, vector<1x32xf32> -> vector<2x32xf32>
      %c4_i32_781 = arith.constant 4 : i32
      %1251 = arith.addi %503, %c4_i32_781 : i32
      %1252 = arith.index_cast %1251 : i32 to index
      %1253 = memref.load %arg4[%1252] : memref<128xi32, #tpu.memory_space<smem>>
      %1254 = arith.index_cast %1253 : i32 to index
      %c0_782 = arith.constant 0 : index
      %c0_783 = arith.constant 0 : index
      %1255 = vector.load %arg24[%1254, %c0_782, %c0_783] : memref<9x2x32xf32, #tpu.memory_space<vmem>>, vector<1x2x32xf32>
      %1256 = vector.shape_cast %1255 : vector<1x2x32xf32> to vector<2x32xf32>
      %1257 = vector.shape_cast %1250 : vector<2x32xf32> to vector<1x2x32xf32>
      tpu.vector_store %arg24[%1254, %c0_782, %c0_783], %1257 {strides = array<i32>} : memref<9x2x32xf32, #tpu.memory_space<vmem>>, vector<1x2x32xf32>,
      %1258 = vector.extract_strided_slice %1175 {offsets = [5, 0], sizes = [1, 32], strides = [1, 1]} : vector<32x32xf32> to vector<1x32xf32>
      %1259 = vector.extract_strided_slice %1207 {offsets = [5, 0], sizes = [1, 32], strides = [1, 1]} : vector<32x32xf32> to vector<1x32xf32>
      %1260 = tpu.concatenate %1258, %1259 in 0 : vector<1x32xf32>, vector<1x32xf32> -> vector<2x32xf32>
      %c5_i32_784 = arith.constant 5 : i32
      %1261 = arith.addi %503, %c5_i32_784 : i32
      %1262 = arith.index_cast %1261 : i32 to index
      %1263 = memref.load %arg4[%1262] : memref<128xi32, #tpu.memory_space<smem>>
      %1264 = arith.index_cast %1263 : i32 to index
      %c0_785 = arith.constant 0 : index
      %c0_786 = arith.constant 0 : index
      %1265 = vector.load %arg24[%1264, %c0_785, %c0_786] : memref<9x2x32xf32, #tpu.memory_space<vmem>>, vector<1x2x32xf32>
      %1266 = vector.shape_cast %1265 : vector<1x2x32xf32> to vector<2x32xf32>
      %1267 = vector.shape_cast %1260 : vector<2x32xf32> to vector<1x2x32xf32>
      tpu.vector_store %arg24[%1264, %c0_785, %c0_786], %1267 {strides = array<i32>} : memref<9x2x32xf32, #tpu.memory_space<vmem>>, vector<1x2x32xf32>,
      %1268 = vector.extract_strided_slice %1175 {offsets = [6, 0], sizes = [1, 32], strides = [1, 1]} : vector<32x32xf32> to vector<1x32xf32>
      %1269 = vector.extract_strided_slice %1207 {offsets = [6, 0], sizes = [1, 32], strides = [1, 1]} : vector<32x32xf32> to vector<1x32xf32>
      %1270 = tpu.concatenate %1268, %1269 in 0 : vector<1x32xf32>, vector<1x32xf32> -> vector<2x32xf32>
      %c6_i32_787 = arith.constant 6 : i32
      %1271 = arith.addi %503, %c6_i32_787 : i32
      %1272 = arith.index_cast %1271 : i32 to index
      %1273 = memref.load %arg4[%1272] : memref<128xi32, #tpu.memory_space<smem>>
      %1274 = arith.index_cast %1273 : i32 to index
      %c0_788 = arith.constant 0 : index
      %c0_789 = arith.constant 0 : index
      %1275 = vector.load %arg24[%1274, %c0_788, %c0_789] : memref<9x2x32xf32, #tpu.memory_space<vmem>>, vector<1x2x32xf32>
      %1276 = vector.shape_cast %1275 : vector<1x2x32xf32> to vector<2x32xf32>
      %1277 = vector.shape_cast %1270 : vector<2x32xf32> to vector<1x2x32xf32>
      tpu.vector_store %arg24[%1274, %c0_788, %c0_789], %1277 {strides = array<i32>} : memref<9x2x32xf32, #tpu.memory_space<vmem>>, vector<1x2x32xf32>,
      %1278 = vector.extract_strided_slice %1175 {offsets = [7, 0], sizes = [1, 32], strides = [1, 1]} : vector<32x32xf32> to vector<1x32xf32>
      %1279 = vector.extract_strided_slice %1207 {offsets = [7, 0], sizes = [1, 32], strides = [1, 1]} : vector<32x32xf32> to vector<1x32xf32>
      %1280 = tpu.concatenate %1278, %1279 in 0 : vector<1x32xf32>, vector<1x32xf32> -> vector<2x32xf32>
      %c7_i32_790 = arith.constant 7 : i32
      %1281 = arith.addi %503, %c7_i32_790 : i32
      %1282 = arith.index_cast %1281 : i32 to index
      %1283 = memref.load %arg4[%1282] : memref<128xi32, #tpu.memory_space<smem>>
      %1284 = arith.index_cast %1283 : i32 to index
      %c0_791 = arith.constant 0 : index
      %c0_792 = arith.constant 0 : index
      %1285 = vector.load %arg24[%1284, %c0_791, %c0_792] : memref<9x2x32xf32, #tpu.memory_space<vmem>>, vector<1x2x32xf32>
      %1286 = vector.shape_cast %1285 : vector<1x2x32xf32> to vector<2x32xf32>
      %1287 = vector.shape_cast %1280 : vector<2x32xf32> to vector<1x2x32xf32>
      tpu.vector_store %arg24[%1284, %c0_791, %c0_792], %1287 {strides = array<i32>} : memref<9x2x32xf32, #tpu.memory_space<vmem>>, vector<1x2x32xf32>,
      %1288 = vector.extract_strided_slice %1175 {offsets = [8, 0], sizes = [1, 32], strides = [1, 1]} : vector<32x32xf32> to vector<1x32xf32>
      %1289 = vector.extract_strided_slice %1207 {offsets = [8, 0], sizes = [1, 32], strides = [1, 1]} : vector<32x32xf32> to vector<1x32xf32>
      %1290 = tpu.concatenate %1288, %1289 in 0 : vector<1x32xf32>, vector<1x32xf32> -> vector<2x32xf32>
      %c8_i32_793 = arith.constant 8 : i32
      %1291 = arith.addi %503, %c8_i32_793 : i32
      %1292 = arith.index_cast %1291 : i32 to index
      %1293 = memref.load %arg4[%1292] : memref<128xi32, #tpu.memory_space<smem>>
      %1294 = arith.index_cast %1293 : i32 to index
      %c0_794 = arith.constant 0 : index
      %c0_795 = arith.constant 0 : index
      %1295 = vector.load %arg24[%1294, %c0_794, %c0_795] : memref<9x2x32xf32, #tpu.memory_space<vmem>>, vector<1x2x32xf32>
      %1296 = vector.shape_cast %1295 : vector<1x2x32xf32> to vector<2x32xf32>
      %1297 = vector.shape_cast %1290 : vector<2x32xf32> to vector<1x2x32xf32>
      tpu.vector_store %arg24[%1294, %c0_794, %c0_795], %1297 {strides = array<i32>} : memref<9x2x32xf32, #tpu.memory_space<vmem>>, vector<1x2x32xf32>,
      %1298 = vector.extract_strided_slice %1175 {offsets = [9, 0], sizes = [1, 32], strides = [1, 1]} : vector<32x32xf32> to vector<1x32xf32>
      %1299 = vector.extract_strided_slice %1207 {offsets = [9, 0], sizes = [1, 32], strides = [1, 1]} : vector<32x32xf32> to vector<1x32xf32>
      %1300 = tpu.concatenate %1298, %1299 in 0 : vector<1x32xf32>, vector<1x32xf32> -> vector<2x32xf32>
      %c9_i32_796 = arith.constant 9 : i32
      %1301 = arith.addi %503, %c9_i32_796 : i32
      %1302 = arith.index_cast %1301 : i32 to index
      %1303 = memref.load %arg4[%1302] : memref<128xi32, #tpu.memory_space<smem>>
      %1304 = arith.index_cast %1303 : i32 to index
      %c0_797 = arith.constant 0 : index
      %c0_798 = arith.constant 0 : index
      %1305 = vector.load %arg24[%1304, %c0_797, %c0_798] : memref<9x2x32xf32, #tpu.memory_space<vmem>>, vector<1x2x32xf32>
      %1306 = vector.shape_cast %1305 : vector<1x2x32xf32> to vector<2x32xf32>
      %1307 = vector.shape_cast %1300 : vector<2x32xf32> to vector<1x2x32xf32>
      tpu.vector_store %arg24[%1304, %c0_797, %c0_798], %1307 {strides = array<i32>} : memref<9x2x32xf32, #tpu.memory_space<vmem>>, vector<1x2x32xf32>,
      %1308 = vector.extract_strided_slice %1175 {offsets = [10, 0], sizes = [1, 32], strides = [1, 1]} : vector<32x32xf32> to vector<1x32xf32>
      %1309 = vector.extract_strided_slice %1207 {offsets = [10, 0], sizes = [1, 32], strides = [1, 1]} : vector<32x32xf32> to vector<1x32xf32>
      %1310 = tpu.concatenate %1308, %1309 in 0 : vector<1x32xf32>, vector<1x32xf32> -> vector<2x32xf32>
      %c10_i32_799 = arith.constant 10 : i32
      %1311 = arith.addi %503, %c10_i32_799 : i32
      %1312 = arith.index_cast %1311 : i32 to index
      %1313 = memref.load %arg4[%1312] : memref<128xi32, #tpu.memory_space<smem>>
      %1314 = arith.index_cast %1313 : i32 to index
      %c0_800 = arith.constant 0 : index
      %c0_801 = arith.constant 0 : index
      %1315 = vector.load %arg24[%1314, %c0_800, %c0_801] : memref<9x2x32xf32, #tpu.memory_space<vmem>>, vector<1x2x32xf32>
      %1316 = vector.shape_cast %1315 : vector<1x2x32xf32> to vector<2x32xf32>
      %1317 = vector.shape_cast %1310 : vector<2x32xf32> to vector<1x2x32xf32>
      tpu.vector_store %arg24[%1314, %c0_800, %c0_801], %1317 {strides = array<i32>} : memref<9x2x32xf32, #tpu.memory_space<vmem>>, vector<1x2x32xf32>,
      %1318 = vector.extract_strided_slice %1175 {offsets = [11, 0], sizes = [1, 32], strides = [1, 1]} : vector<32x32xf32> to vector<1x32xf32>
      %1319 = vector.extract_strided_slice %1207 {offsets = [11, 0], sizes = [1, 32], strides = [1, 1]} : vector<32x32xf32> to vector<1x32xf32>
      %1320 = tpu.concatenate %1318, %1319 in 0 : vector<1x32xf32>, vector<1x32xf32> -> vector<2x32xf32>
      %c11_i32_802 = arith.constant 11 : i32
      %1321 = arith.addi %503, %c11_i32_802 : i32
      %1322 = arith.index_cast %1321 : i32 to index
      %1323 = memref.load %arg4[%1322] : memref<128xi32, #tpu.memory_space<smem>>
      %1324 = arith.index_cast %1323 : i32 to index
      %c0_803 = arith.constant 0 : index
      %c0_804 = arith.constant 0 : index
      %1325 = vector.load %arg24[%1324, %c0_803, %c0_804] : memref<9x2x32xf32, #tpu.memory_space<vmem>>, vector<1x2x32xf32>
      %1326 = vector.shape_cast %1325 : vector<1x2x32xf32> to vector<2x32xf32>
      %1327 = vector.shape_cast %1320 : vector<2x32xf32> to vector<1x2x32xf32>
      tpu.vector_store %arg24[%1324, %c0_803, %c0_804], %1327 {strides = array<i32>} : memref<9x2x32xf32, #tpu.memory_space<vmem>>, vector<1x2x32xf32>,
      %1328 = vector.extract_strided_slice %1175 {offsets = [12, 0], sizes = [1, 32], strides = [1, 1]} : vector<32x32xf32> to vector<1x32xf32>
      %1329 = vector.extract_strided_slice %1207 {offsets = [12, 0], sizes = [1, 32], strides = [1, 1]} : vector<32x32xf32> to vector<1x32xf32>
      %1330 = tpu.concatenate %1328, %1329 in 0 : vector<1x32xf32>, vector<1x32xf32> -> vector<2x32xf32>
      %c12_i32_805 = arith.constant 12 : i32
      %1331 = arith.addi %503, %c12_i32_805 : i32
      %1332 = arith.index_cast %1331 : i32 to index
      %1333 = memref.load %arg4[%1332] : memref<128xi32, #tpu.memory_space<smem>>
      %1334 = arith.index_cast %1333 : i32 to index
      %c0_806 = arith.constant 0 : index
      %c0_807 = arith.constant 0 : index
      %1335 = vector.load %arg24[%1334, %c0_806, %c0_807] : memref<9x2x32xf32, #tpu.memory_space<vmem>>, vector<1x2x32xf32>
      %1336 = vector.shape_cast %1335 : vector<1x2x32xf32> to vector<2x32xf32>
      %1337 = vector.shape_cast %1330 : vector<2x32xf32> to vector<1x2x32xf32>
      tpu.vector_store %arg24[%1334, %c0_806, %c0_807], %1337 {strides = array<i32>} : memref<9x2x32xf32, #tpu.memory_space<vmem>>, vector<1x2x32xf32>,
      %1338 = vector.extract_strided_slice %1175 {offsets = [13, 0], sizes = [1, 32], strides = [1, 1]} : vector<32x32xf32> to vector<1x32xf32>
      %1339 = vector.extract_strided_slice %1207 {offsets = [13, 0], sizes = [1, 32], strides = [1, 1]} : vector<32x32xf32> to vector<1x32xf32>
      %1340 = tpu.concatenate %1338, %1339 in 0 : vector<1x32xf32>, vector<1x32xf32> -> vector<2x32xf32>
      %c13_i32_808 = arith.constant 13 : i32
      %1341 = arith.addi %503, %c13_i32_808 : i32
      %1342 = arith.index_cast %1341 : i32 to index
      %1343 = memref.load %arg4[%1342] : memref<128xi32, #tpu.memory_space<smem>>
      %1344 = arith.index_cast %1343 : i32 to index
      %c0_809 = arith.constant 0 : index
      %c0_810 = arith.constant 0 : index
      %1345 = vector.load %arg24[%1344, %c0_809, %c0_810] : memref<9x2x32xf32, #tpu.memory_space<vmem>>, vector<1x2x32xf32>
      %1346 = vector.shape_cast %1345 : vector<1x2x32xf32> to vector<2x32xf32>
      %1347 = vector.shape_cast %1340 : vector<2x32xf32> to vector<1x2x32xf32>
      tpu.vector_store %arg24[%1344, %c0_809, %c0_810], %1347 {strides = array<i32>} : memref<9x2x32xf32, #tpu.memory_space<vmem>>, vector<1x2x32xf32>,
      %1348 = vector.extract_strided_slice %1175 {offsets = [14, 0], sizes = [1, 32], strides = [1, 1]} : vector<32x32xf32> to vector<1x32xf32>
      %1349 = vector.extract_strided_slice %1207 {offsets = [14, 0], sizes = [1, 32], strides = [1, 1]} : vector<32x32xf32> to vector<1x32xf32>
      %1350 = tpu.concatenate %1348, %1349 in 0 : vector<1x32xf32>, vector<1x32xf32> -> vector<2x32xf32>
      %c14_i32_811 = arith.constant 14 : i32
      %1351 = arith.addi %503, %c14_i32_811 : i32
      %1352 = arith.index_cast %1351 : i32 to index
      %1353 = memref.load %arg4[%1352] : memref<128xi32, #tpu.memory_space<smem>>
      %1354 = arith.index_cast %1353 : i32 to index
      %c0_812 = arith.constant 0 : index
      %c0_813 = arith.constant 0 : index
      %1355 = vector.load %arg24[%1354, %c0_812, %c0_813] : memref<9x2x32xf32, #tpu.memory_space<vmem>>, vector<1x2x32xf32>
      %1356 = vector.shape_cast %1355 : vector<1x2x32xf32> to vector<2x32xf32>
      %1357 = vector.shape_cast %1350 : vector<2x32xf32> to vector<1x2x32xf32>
      tpu.vector_store %arg24[%1354, %c0_812, %c0_813], %1357 {strides = array<i32>} : memref<9x2x32xf32, #tpu.memory_space<vmem>>, vector<1x2x32xf32>,
      %1358 = vector.extract_strided_slice %1175 {offsets = [15, 0], sizes = [1, 32], strides = [1, 1]} : vector<32x32xf32> to vector<1x32xf32>
      %1359 = vector.extract_strided_slice %1207 {offsets = [15, 0], sizes = [1, 32], strides = [1, 1]} : vector<32x32xf32> to vector<1x32xf32>
      %1360 = tpu.concatenate %1358, %1359 in 0 : vector<1x32xf32>, vector<1x32xf32> -> vector<2x32xf32>
      %c15_i32_814 = arith.constant 15 : i32
      %1361 = arith.addi %503, %c15_i32_814 : i32
      %1362 = arith.index_cast %1361 : i32 to index
      %1363 = memref.load %arg4[%1362] : memref<128xi32, #tpu.memory_space<smem>>
      %1364 = arith.index_cast %1363 : i32 to index
      %c0_815 = arith.constant 0 : index
      %c0_816 = arith.constant 0 : index
      %1365 = vector.load %arg24[%1364, %c0_815, %c0_816] : memref<9x2x32xf32, #tpu.memory_space<vmem>>, vector<1x2x32xf32>
      %1366 = vector.shape_cast %1365 : vector<1x2x32xf32> to vector<2x32xf32>
      %1367 = vector.shape_cast %1360 : vector<2x32xf32> to vector<1x2x32xf32>
      tpu.vector_store %arg24[%1364, %c0_815, %c0_816], %1367 {strides = array<i32>} : memref<9x2x32xf32, #tpu.memory_space<vmem>>, vector<1x2x32xf32>,
      %1368 = vector.extract_strided_slice %1175 {offsets = [16, 0], sizes = [1, 32], strides = [1, 1]} : vector<32x32xf32> to vector<1x32xf32>
      %1369 = vector.extract_strided_slice %1207 {offsets = [16, 0], sizes = [1, 32], strides = [1, 1]} : vector<32x32xf32> to vector<1x32xf32>
      %1370 = tpu.concatenate %1368, %1369 in 0 : vector<1x32xf32>, vector<1x32xf32> -> vector<2x32xf32>
      %c16_i32_817 = arith.constant 16 : i32
      %1371 = arith.addi %503, %c16_i32_817 : i32
      %1372 = arith.index_cast %1371 : i32 to index
      %1373 = memref.load %arg4[%1372] : memref<128xi32, #tpu.memory_space<smem>>
      %1374 = arith.index_cast %1373 : i32 to index
      %c0_818 = arith.constant 0 : index
      %c0_819 = arith.constant 0 : index
      %1375 = vector.load %arg24[%1374, %c0_818, %c0_819] : memref<9x2x32xf32, #tpu.memory_space<vmem>>, vector<1x2x32xf32>
      %1376 = vector.shape_cast %1375 : vector<1x2x32xf32> to vector<2x32xf32>
      %1377 = vector.shape_cast %1370 : vector<2x32xf32> to vector<1x2x32xf32>
      tpu.vector_store %arg24[%1374, %c0_818, %c0_819], %1377 {strides = array<i32>} : memref<9x2x32xf32, #tpu.memory_space<vmem>>, vector<1x2x32xf32>,
      %1378 = vector.extract_strided_slice %1175 {offsets = [17, 0], sizes = [1, 32], strides = [1, 1]} : vector<32x32xf32> to vector<1x32xf32>
      %1379 = vector.extract_strided_slice %1207 {offsets = [17, 0], sizes = [1, 32], strides = [1, 1]} : vector<32x32xf32> to vector<1x32xf32>
      %1380 = tpu.concatenate %1378, %1379 in 0 : vector<1x32xf32>, vector<1x32xf32> -> vector<2x32xf32>
      %c17_i32_820 = arith.constant 17 : i32
      %1381 = arith.addi %503, %c17_i32_820 : i32
      %1382 = arith.index_cast %1381 : i32 to index
      %1383 = memref.load %arg4[%1382] : memref<128xi32, #tpu.memory_space<smem>>
      %1384 = arith.index_cast %1383 : i32 to index
      %c0_821 = arith.constant 0 : index
      %c0_822 = arith.constant 0 : index
      %1385 = vector.load %arg24[%1384, %c0_821, %c0_822] : memref<9x2x32xf32, #tpu.memory_space<vmem>>, vector<1x2x32xf32>
      %1386 = vector.shape_cast %1385 : vector<1x2x32xf32> to vector<2x32xf32>
      %1387 = vector.shape_cast %1380 : vector<2x32xf32> to vector<1x2x32xf32>
      tpu.vector_store %arg24[%1384, %c0_821, %c0_822], %1387 {strides = array<i32>} : memref<9x2x32xf32, #tpu.memory_space<vmem>>, vector<1x2x32xf32>,
      %1388 = vector.extract_strided_slice %1175 {offsets = [18, 0], sizes = [1, 32], strides = [1, 1]} : vector<32x32xf32> to vector<1x32xf32>
      %1389 = vector.extract_strided_slice %1207 {offsets = [18, 0], sizes = [1, 32], strides = [1, 1]} : vector<32x32xf32> to vector<1x32xf32>
      %1390 = tpu.concatenate %1388, %1389 in 0 : vector<1x32xf32>, vector<1x32xf32> -> vector<2x32xf32>
      %c18_i32_823 = arith.constant 18 : i32
      %1391 = arith.addi %503, %c18_i32_823 : i32
      %1392 = arith.index_cast %1391 : i32 to index
      %1393 = memref.load %arg4[%1392] : memref<128xi32, #tpu.memory_space<smem>>
      %1394 = arith.index_cast %1393 : i32 to index
      %c0_824 = arith.constant 0 : index
      %c0_825 = arith.constant 0 : index
      %1395 = vector.load %arg24[%1394, %c0_824, %c0_825] : memref<9x2x32xf32, #tpu.memory_space<vmem>>, vector<1x2x32xf32>
      %1396 = vector.shape_cast %1395 : vector<1x2x32xf32> to vector<2x32xf32>
      %1397 = vector.shape_cast %1390 : vector<2x32xf32> to vector<1x2x32xf32>
      tpu.vector_store %arg24[%1394, %c0_824, %c0_825], %1397 {strides = array<i32>} : memref<9x2x32xf32, #tpu.memory_space<vmem>>, vector<1x2x32xf32>,
      %1398 = vector.extract_strided_slice %1175 {offsets = [19, 0], sizes = [1, 32], strides = [1, 1]} : vector<32x32xf32> to vector<1x32xf32>
      %1399 = vector.extract_strided_slice %1207 {offsets = [19, 0], sizes = [1, 32], strides = [1, 1]} : vector<32x32xf32> to vector<1x32xf32>
      %1400 = tpu.concatenate %1398, %1399 in 0 : vector<1x32xf32>, vector<1x32xf32> -> vector<2x32xf32>
      %c19_i32_826 = arith.constant 19 : i32
      %1401 = arith.addi %503, %c19_i32_826 : i32
      %1402 = arith.index_cast %1401 : i32 to index
      %1403 = memref.load %arg4[%1402] : memref<128xi32, #tpu.memory_space<smem>>
      %1404 = arith.index_cast %1403 : i32 to index
      %c0_827 = arith.constant 0 : index
      %c0_828 = arith.constant 0 : index
      %1405 = vector.load %arg24[%1404, %c0_827, %c0_828] : memref<9x2x32xf32, #tpu.memory_space<vmem>>, vector<1x2x32xf32>
      %1406 = vector.shape_cast %1405 : vector<1x2x32xf32> to vector<2x32xf32>
      %1407 = vector.shape_cast %1400 : vector<2x32xf32> to vector<1x2x32xf32>
      tpu.vector_store %arg24[%1404, %c0_827, %c0_828], %1407 {strides = array<i32>} : memref<9x2x32xf32, #tpu.memory_space<vmem>>, vector<1x2x32xf32>,
      %1408 = vector.extract_strided_slice %1175 {offsets = [20, 0], sizes = [1, 32], strides = [1, 1]} : vector<32x32xf32> to vector<1x32xf32>
      %1409 = vector.extract_strided_slice %1207 {offsets = [20, 0], sizes = [1, 32], strides = [1, 1]} : vector<32x32xf32> to vector<1x32xf32>
      %1410 = tpu.concatenate %1408, %1409 in 0 : vector<1x32xf32>, vector<1x32xf32> -> vector<2x32xf32>
      %c20_i32_829 = arith.constant 20 : i32
      %1411 = arith.addi %503, %c20_i32_829 : i32
      %1412 = arith.index_cast %1411 : i32 to index
      %1413 = memref.load %arg4[%1412] : memref<128xi32, #tpu.memory_space<smem>>
      %1414 = arith.index_cast %1413 : i32 to index
      %c0_830 = arith.constant 0 : index
      %c0_831 = arith.constant 0 : index
      %1415 = vector.load %arg24[%1414, %c0_830, %c0_831] : memref<9x2x32xf32, #tpu.memory_space<vmem>>, vector<1x2x32xf32>
      %1416 = vector.shape_cast %1415 : vector<1x2x32xf32> to vector<2x32xf32>
      %1417 = vector.shape_cast %1410 : vector<2x32xf32> to vector<1x2x32xf32>
      tpu.vector_store %arg24[%1414, %c0_830, %c0_831], %1417 {strides = array<i32>} : memref<9x2x32xf32, #tpu.memory_space<vmem>>, vector<1x2x32xf32>,
      %1418 = vector.extract_strided_slice %1175 {offsets = [21, 0], sizes = [1, 32], strides = [1, 1]} : vector<32x32xf32> to vector<1x32xf32>
      %1419 = vector.extract_strided_slice %1207 {offsets = [21, 0], sizes = [1, 32], strides = [1, 1]} : vector<32x32xf32> to vector<1x32xf32>
      %1420 = tpu.concatenate %1418, %1419 in 0 : vector<1x32xf32>, vector<1x32xf32> -> vector<2x32xf32>
      %c21_i32_832 = arith.constant 21 : i32
      %1421 = arith.addi %503, %c21_i32_832 : i32
      %1422 = arith.index_cast %1421 : i32 to index
      %1423 = memref.load %arg4[%1422] : memref<128xi32, #tpu.memory_space<smem>>
      %1424 = arith.index_cast %1423 : i32 to index
      %c0_833 = arith.constant 0 : index
      %c0_834 = arith.constant 0 : index
      %1425 = vector.load %arg24[%1424, %c0_833, %c0_834] : memref<9x2x32xf32, #tpu.memory_space<vmem>>, vector<1x2x32xf32>
      %1426 = vector.shape_cast %1425 : vector<1x2x32xf32> to vector<2x32xf32>
      %1427 = vector.shape_cast %1420 : vector<2x32xf32> to vector<1x2x32xf32>
      tpu.vector_store %arg24[%1424, %c0_833, %c0_834], %1427 {strides = array<i32>} : memref<9x2x32xf32, #tpu.memory_space<vmem>>, vector<1x2x32xf32>,
      %1428 = vector.extract_strided_slice %1175 {offsets = [22, 0], sizes = [1, 32], strides = [1, 1]} : vector<32x32xf32> to vector<1x32xf32>
      %1429 = vector.extract_strided_slice %1207 {offsets = [22, 0], sizes = [1, 32], strides = [1, 1]} : vector<32x32xf32> to vector<1x32xf32>
      %1430 = tpu.concatenate %1428, %1429 in 0 : vector<1x32xf32>, vector<1x32xf32> -> vector<2x32xf32>
      %c22_i32_835 = arith.constant 22 : i32
      %1431 = arith.addi %503, %c22_i32_835 : i32
      %1432 = arith.index_cast %1431 : i32 to index
      %1433 = memref.load %arg4[%1432] : memref<128xi32, #tpu.memory_space<smem>>
      %1434 = arith.index_cast %1433 : i32 to index
      %c0_836 = arith.constant 0 : index
      %c0_837 = arith.constant 0 : index
      %1435 = vector.load %arg24[%1434, %c0_836, %c0_837] : memref<9x2x32xf32, #tpu.memory_space<vmem>>, vector<1x2x32xf32>
      %1436 = vector.shape_cast %1435 : vector<1x2x32xf32> to vector<2x32xf32>
      %1437 = vector.shape_cast %1430 : vector<2x32xf32> to vector<1x2x32xf32>
      tpu.vector_store %arg24[%1434, %c0_836, %c0_837], %1437 {strides = array<i32>} : memref<9x2x32xf32, #tpu.memory_space<vmem>>, vector<1x2x32xf32>,
      %1438 = vector.extract_strided_slice %1175 {offsets = [23, 0], sizes = [1, 32], strides = [1, 1]} : vector<32x32xf32> to vector<1x32xf32>
      %1439 = vector.extract_strided_slice %1207 {offsets = [23, 0], sizes = [1, 32], strides = [1, 1]} : vector<32x32xf32> to vector<1x32xf32>
      %1440 = tpu.concatenate %1438, %1439 in 0 : vector<1x32xf32>, vector<1x32xf32> -> vector<2x32xf32>
      %c23_i32_838 = arith.constant 23 : i32
      %1441 = arith.addi %503, %c23_i32_838 : i32
      %1442 = arith.index_cast %1441 : i32 to index
      %1443 = memref.load %arg4[%1442] : memref<128xi32, #tpu.memory_space<smem>>
      %1444 = arith.index_cast %1443 : i32 to index
      %c0_839 = arith.constant 0 : index
      %c0_840 = arith.constant 0 : index
      %1445 = vector.load %arg24[%1444, %c0_839, %c0_840] : memref<9x2x32xf32, #tpu.memory_space<vmem>>, vector<1x2x32xf32>
      %1446 = vector.shape_cast %1445 : vector<1x2x32xf32> to vector<2x32xf32>
      %1447 = vector.shape_cast %1440 : vector<2x32xf32> to vector<1x2x32xf32>
      tpu.vector_store %arg24[%1444, %c0_839, %c0_840], %1447 {strides = array<i32>} : memref<9x2x32xf32, #tpu.memory_space<vmem>>, vector<1x2x32xf32>,
      %1448 = vector.extract_strided_slice %1175 {offsets = [24, 0], sizes = [1, 32], strides = [1, 1]} : vector<32x32xf32> to vector<1x32xf32>
      %1449 = vector.extract_strided_slice %1207 {offsets = [24, 0], sizes = [1, 32], strides = [1, 1]} : vector<32x32xf32> to vector<1x32xf32>
      %1450 = tpu.concatenate %1448, %1449 in 0 : vector<1x32xf32>, vector<1x32xf32> -> vector<2x32xf32>
      %c24_i32_841 = arith.constant 24 : i32
      %1451 = arith.addi %503, %c24_i32_841 : i32
      %1452 = arith.index_cast %1451 : i32 to index
      %1453 = memref.load %arg4[%1452] : memref<128xi32, #tpu.memory_space<smem>>
      %1454 = arith.index_cast %1453 : i32 to index
      %c0_842 = arith.constant 0 : index
      %c0_843 = arith.constant 0 : index
      %1455 = vector.load %arg24[%1454, %c0_842, %c0_843] : memref<9x2x32xf32, #tpu.memory_space<vmem>>, vector<1x2x32xf32>
      %1456 = vector.shape_cast %1455 : vector<1x2x32xf32> to vector<2x32xf32>
      %1457 = vector.shape_cast %1450 : vector<2x32xf32> to vector<1x2x32xf32>
      tpu.vector_store %arg24[%1454, %c0_842, %c0_843], %1457 {strides = array<i32>} : memref<9x2x32xf32, #tpu.memory_space<vmem>>, vector<1x2x32xf32>,
      %1458 = vector.extract_strided_slice %1175 {offsets = [25, 0], sizes = [1, 32], strides = [1, 1]} : vector<32x32xf32> to vector<1x32xf32>
      %1459 = vector.extract_strided_slice %1207 {offsets = [25, 0], sizes = [1, 32], strides = [1, 1]} : vector<32x32xf32> to vector<1x32xf32>
      %1460 = tpu.concatenate %1458, %1459 in 0 : vector<1x32xf32>, vector<1x32xf32> -> vector<2x32xf32>
      %c25_i32_844 = arith.constant 25 : i32
      %1461 = arith.addi %503, %c25_i32_844 : i32
      %1462 = arith.index_cast %1461 : i32 to index
      %1463 = memref.load %arg4[%1462] : memref<128xi32, #tpu.memory_space<smem>>
      %1464 = arith.index_cast %1463 : i32 to index
      %c0_845 = arith.constant 0 : index
      %c0_846 = arith.constant 0 : index
      %1465 = vector.load %arg24[%1464, %c0_845, %c0_846] : memref<9x2x32xf32, #tpu.memory_space<vmem>>, vector<1x2x32xf32>
      %1466 = vector.shape_cast %1465 : vector<1x2x32xf32> to vector<2x32xf32>
      %1467 = vector.shape_cast %1460 : vector<2x32xf32> to vector<1x2x32xf32>
      tpu.vector_store %arg24[%1464, %c0_845, %c0_846], %1467 {strides = array<i32>} : memref<9x2x32xf32, #tpu.memory_space<vmem>>, vector<1x2x32xf32>,
      %1468 = vector.extract_strided_slice %1175 {offsets = [26, 0], sizes = [1, 32], strides = [1, 1]} : vector<32x32xf32> to vector<1x32xf32>
      %1469 = vector.extract_strided_slice %1207 {offsets = [26, 0], sizes = [1, 32], strides = [1, 1]} : vector<32x32xf32> to vector<1x32xf32>
      %1470 = tpu.concatenate %1468, %1469 in 0 : vector<1x32xf32>, vector<1x32xf32> -> vector<2x32xf32>
      %c26_i32_847 = arith.constant 26 : i32
      %1471 = arith.addi %503, %c26_i32_847 : i32
      %1472 = arith.index_cast %1471 : i32 to index
      %1473 = memref.load %arg4[%1472] : memref<128xi32, #tpu.memory_space<smem>>
      %1474 = arith.index_cast %1473 : i32 to index
      %c0_848 = arith.constant 0 : index
      %c0_849 = arith.constant 0 : index
      %1475 = vector.load %arg24[%1474, %c0_848, %c0_849] : memref<9x2x32xf32, #tpu.memory_space<vmem>>, vector<1x2x32xf32>
      %1476 = vector.shape_cast %1475 : vector<1x2x32xf32> to vector<2x32xf32>
      %1477 = vector.shape_cast %1470 : vector<2x32xf32> to vector<1x2x32xf32>
      tpu.vector_store %arg24[%1474, %c0_848, %c0_849], %1477 {strides = array<i32>} : memref<9x2x32xf32, #tpu.memory_space<vmem>>, vector<1x2x32xf32>,
      %1478 = vector.extract_strided_slice %1175 {offsets = [27, 0], sizes = [1, 32], strides = [1, 1]} : vector<32x32xf32> to vector<1x32xf32>
      %1479 = vector.extract_strided_slice %1207 {offsets = [27, 0], sizes = [1, 32], strides = [1, 1]} : vector<32x32xf32> to vector<1x32xf32>
      %1480 = tpu.concatenate %1478, %1479 in 0 : vector<1x32xf32>, vector<1x32xf32> -> vector<2x32xf32>
      %c27_i32_850 = arith.constant 27 : i32
      %1481 = arith.addi %503, %c27_i32_850 : i32
      %1482 = arith.index_cast %1481 : i32 to index
      %1483 = memref.load %arg4[%1482] : memref<128xi32, #tpu.memory_space<smem>>
      %1484 = arith.index_cast %1483 : i32 to index
      %c0_851 = arith.constant 0 : index
      %c0_852 = arith.constant 0 : index
      %1485 = vector.load %arg24[%1484, %c0_851, %c0_852] : memref<9x2x32xf32, #tpu.memory_space<vmem>>, vector<1x2x32xf32>
      %1486 = vector.shape_cast %1485 : vector<1x2x32xf32> to vector<2x32xf32>
      %1487 = vector.shape_cast %1480 : vector<2x32xf32> to vector<1x2x32xf32>
      tpu.vector_store %arg24[%1484, %c0_851, %c0_852], %1487 {strides = array<i32>} : memref<9x2x32xf32, #tpu.memory_space<vmem>>, vector<1x2x32xf32>,
      %1488 = vector.extract_strided_slice %1175 {offsets = [28, 0], sizes = [1, 32], strides = [1, 1]} : vector<32x32xf32> to vector<1x32xf32>
      %1489 = vector.extract_strided_slice %1207 {offsets = [28, 0], sizes = [1, 32], strides = [1, 1]} : vector<32x32xf32> to vector<1x32xf32>
      %1490 = tpu.concatenate %1488, %1489 in 0 : vector<1x32xf32>, vector<1x32xf32> -> vector<2x32xf32>
      %c28_i32_853 = arith.constant 28 : i32
      %1491 = arith.addi %503, %c28_i32_853 : i32
      %1492 = arith.index_cast %1491 : i32 to index
      %1493 = memref.load %arg4[%1492] : memref<128xi32, #tpu.memory_space<smem>>
      %1494 = arith.index_cast %1493 : i32 to index
      %c0_854 = arith.constant 0 : index
      %c0_855 = arith.constant 0 : index
      %1495 = vector.load %arg24[%1494, %c0_854, %c0_855] : memref<9x2x32xf32, #tpu.memory_space<vmem>>, vector<1x2x32xf32>
      %1496 = vector.shape_cast %1495 : vector<1x2x32xf32> to vector<2x32xf32>
      %1497 = vector.shape_cast %1490 : vector<2x32xf32> to vector<1x2x32xf32>
      tpu.vector_store %arg24[%1494, %c0_854, %c0_855], %1497 {strides = array<i32>} : memref<9x2x32xf32, #tpu.memory_space<vmem>>, vector<1x2x32xf32>,
      %1498 = vector.extract_strided_slice %1175 {offsets = [29, 0], sizes = [1, 32], strides = [1, 1]} : vector<32x32xf32> to vector<1x32xf32>
      %1499 = vector.extract_strided_slice %1207 {offsets = [29, 0], sizes = [1, 32], strides = [1, 1]} : vector<32x32xf32> to vector<1x32xf32>
      %1500 = tpu.concatenate %1498, %1499 in 0 : vector<1x32xf32>, vector<1x32xf32> -> vector<2x32xf32>
      %c29_i32_856 = arith.constant 29 : i32
      %1501 = arith.addi %503, %c29_i32_856 : i32
      %1502 = arith.index_cast %1501 : i32 to index
      %1503 = memref.load %arg4[%1502] : memref<128xi32, #tpu.memory_space<smem>>
      %1504 = arith.index_cast %1503 : i32 to index
      %c0_857 = arith.constant 0 : index
      %c0_858 = arith.constant 0 : index
      %1505 = vector.load %arg24[%1504, %c0_857, %c0_858] : memref<9x2x32xf32, #tpu.memory_space<vmem>>, vector<1x2x32xf32>
      %1506 = vector.shape_cast %1505 : vector<1x2x32xf32> to vector<2x32xf32>
      %1507 = vector.shape_cast %1500 : vector<2x32xf32> to vector<1x2x32xf32>
      tpu.vector_store %arg24[%1504, %c0_857, %c0_858], %1507 {strides = array<i32>} : memref<9x2x32xf32, #tpu.memory_space<vmem>>, vector<1x2x32xf32>,
      %1508 = vector.extract_strided_slice %1175 {offsets = [30, 0], sizes = [1, 32], strides = [1, 1]} : vector<32x32xf32> to vector<1x32xf32>
      %1509 = vector.extract_strided_slice %1207 {offsets = [30, 0], sizes = [1, 32], strides = [1, 1]} : vector<32x32xf32> to vector<1x32xf32>
      %1510 = tpu.concatenate %1508, %1509 in 0 : vector<1x32xf32>, vector<1x32xf32> -> vector<2x32xf32>
      %c30_i32_859 = arith.constant 30 : i32
      %1511 = arith.addi %503, %c30_i32_859 : i32
      %1512 = arith.index_cast %1511 : i32 to index
      %1513 = memref.load %arg4[%1512] : memref<128xi32, #tpu.memory_space<smem>>
      %1514 = arith.index_cast %1513 : i32 to index
      %c0_860 = arith.constant 0 : index
      %c0_861 = arith.constant 0 : index
      %1515 = vector.load %arg24[%1514, %c0_860, %c0_861] : memref<9x2x32xf32, #tpu.memory_space<vmem>>, vector<1x2x32xf32>
      %1516 = vector.shape_cast %1515 : vector<1x2x32xf32> to vector<2x32xf32>
      %1517 = vector.shape_cast %1510 : vector<2x32xf32> to vector<1x2x32xf32>
      tpu.vector_store %arg24[%1514, %c0_860, %c0_861], %1517 {strides = array<i32>} : memref<9x2x32xf32, #tpu.memory_space<vmem>>, vector<1x2x32xf32>,
      %1518 = vector.extract_strided_slice %1175 {offsets = [31, 0], sizes = [1, 32], strides = [1, 1]} : vector<32x32xf32> to vector<1x32xf32>
      %1519 = vector.extract_strided_slice %1207 {offsets = [31, 0], sizes = [1, 32], strides = [1, 1]} : vector<32x32xf32> to vector<1x32xf32>
      %1520 = tpu.concatenate %1518, %1519 in 0 : vector<1x32xf32>, vector<1x32xf32> -> vector<2x32xf32>
      %c31_i32_862 = arith.constant 31 : i32
      %1521 = arith.addi %503, %c31_i32_862 : i32
      %1522 = arith.index_cast %1521 : i32 to index
      %1523 = memref.load %arg4[%1522] : memref<128xi32, #tpu.memory_space<smem>>
      %1524 = arith.index_cast %1523 : i32 to index
      %c0_863 = arith.constant 0 : index
      %c0_864 = arith.constant 0 : index
      %1525 = vector.load %arg24[%1524, %c0_863, %c0_864] : memref<9x2x32xf32, #tpu.memory_space<vmem>>, vector<1x2x32xf32>
      %1526 = vector.shape_cast %1525 : vector<1x2x32xf32> to vector<2x32xf32>
      %1527 = vector.shape_cast %1520 : vector<2x32xf32> to vector<1x2x32xf32>
      tpu.vector_store %arg24[%1524, %c0_863, %c0_864], %1527 {strides = array<i32>} : memref<9x2x32xf32, #tpu.memory_space<vmem>>, vector<1x2x32xf32>,
    }
    %c4_i32_14 = arith.constant 4 : i32
    %c0_15 = arith.constant 0 : index
    %8 = memref.load %arg8[%c0_15] : memref<1xf32, #tpu.memory_space<smem>>
    %c0_i32_16 = arith.constant 0 : i32
    %c32_i32 = arith.constant 32 : i32
    %9 = arith.muli %c0_i32_16, %c32_i32 : i32
    %c0_i32_17 = arith.constant 0 : i32
    %10 = arith.addi %9, %c0_i32_17 : i32
    %11 = arith.index_cast %10 : i32 to index
    %12 = memref.load %arg7[%11] : memref<32xi32, #tpu.memory_space<smem>>
    %13 = arith.index_cast %12 : i32 to index
    %c0_18 = arith.constant 0 : index
    %c0_19 = arith.constant 0 : index
    %14 = vector.load %arg24[%13, %c0_18, %c0_19] : memref<9x2x32xf32, #tpu.memory_space<vmem>>, vector<1x2x32xf32>
    %15 = vector.shape_cast %14 : vector<1x2x32xf32> to vector<2x32xf32>
    %16 = vector.extract_strided_slice %15 {offsets = [0, 0], sizes = [1, 32], strides = [1, 1]} : vector<2x32xf32> to vector<1x32xf32>
    %c0_20 = arith.constant 0 : index
    %c0_21 = arith.constant 0 : index
    %17 = vector.load %arg25[%c0_20, %c0_21] : memref<32x32xf32, #tpu.memory_space<vmem>>, vector<1x32xf32>
    tpu.vector_store %arg25[%c0_20, %c0_21], %16 {strides = array<i32>} : memref<32x32xf32, #tpu.memory_space<vmem>>, vector<1x32xf32>,
    %18 = vector.extract_strided_slice %15 {offsets = [1, 0], sizes = [1, 32], strides = [1, 1]} : vector<2x32xf32> to vector<1x32xf32>
    %c0_22 = arith.constant 0 : index
    %c0_23 = arith.constant 0 : index
    %19 = vector.load %arg26[%c0_22, %c0_23] : memref<32x32xf32, #tpu.memory_space<vmem>>, vector<1x32xf32>
    tpu.vector_store %arg26[%c0_22, %c0_23], %18 {strides = array<i32>} : memref<32x32xf32, #tpu.memory_space<vmem>>, vector<1x32xf32>,
    %c1_i32_24 = arith.constant 1 : i32
    %20 = arith.addi %9, %c1_i32_24 : i32
    %21 = arith.index_cast %20 : i32 to index
    %22 = memref.load %arg7[%21] : memref<32xi32, #tpu.memory_space<smem>>
    %23 = arith.index_cast %22 : i32 to index
    %c0_25 = arith.constant 0 : index
    %c0_26 = arith.constant 0 : index
    %24 = vector.load %arg24[%23, %c0_25, %c0_26] : memref<9x2x32xf32, #tpu.memory_space<vmem>>, vector<1x2x32xf32>
    %25 = vector.shape_cast %24 : vector<1x2x32xf32> to vector<2x32xf32>
    %26 = vector.extract_strided_slice %25 {offsets = [0, 0], sizes = [1, 32], strides = [1, 1]} : vector<2x32xf32> to vector<1x32xf32>
    %c1 = arith.constant 1 : index
    %c0_27 = arith.constant 0 : index
    %27 = vector.load %arg25[%c1, %c0_27] : memref<32x32xf32, #tpu.memory_space<vmem>>, vector<1x32xf32>
    tpu.vector_store %arg25[%c1, %c0_27], %26 {strides = array<i32>} : memref<32x32xf32, #tpu.memory_space<vmem>>, vector<1x32xf32>,
    %28 = vector.extract_strided_slice %25 {offsets = [1, 0], sizes = [1, 32], strides = [1, 1]} : vector<2x32xf32> to vector<1x32xf32>
    %c1_28 = arith.constant 1 : index
    %c0_29 = arith.constant 0 : index
    %29 = vector.load %arg26[%c1_28, %c0_29] : memref<32x32xf32, #tpu.memory_space<vmem>>, vector<1x32xf32>
    tpu.vector_store %arg26[%c1_28, %c0_29], %28 {strides = array<i32>} : memref<32x32xf32, #tpu.memory_space<vmem>>, vector<1x32xf32>,
    %c2_i32 = arith.constant 2 : i32
    %30 = arith.addi %9, %c2_i32 : i32
    %31 = arith.index_cast %30 : i32 to index
    %32 = memref.load %arg7[%31] : memref<32xi32, #tpu.memory_space<smem>>
    %33 = arith.index_cast %32 : i32 to index
    %c0_30 = arith.constant 0 : index
    %c0_31 = arith.constant 0 : index
    %34 = vector.load %arg24[%33, %c0_30, %c0_31] : memref<9x2x32xf32, #tpu.memory_space<vmem>>, vector<1x2x32xf32>
    %35 = vector.shape_cast %34 : vector<1x2x32xf32> to vector<2x32xf32>
    %36 = vector.extract_strided_slice %35 {offsets = [0, 0], sizes = [1, 32], strides = [1, 1]} : vector<2x32xf32> to vector<1x32xf32>
    %c2 = arith.constant 2 : index
    %c0_32 = arith.constant 0 : index
    %37 = vector.load %arg25[%c2, %c0_32] : memref<32x32xf32, #tpu.memory_space<vmem>>, vector<1x32xf32>
    tpu.vector_store %arg25[%c2, %c0_32], %36 {strides = array<i32>} : memref<32x32xf32, #tpu.memory_space<vmem>>, vector<1x32xf32>,
    %38 = vector.extract_strided_slice %35 {offsets = [1, 0], sizes = [1, 32], strides = [1, 1]} : vector<2x32xf32> to vector<1x32xf32>
    %c2_33 = arith.constant 2 : index
    %c0_34 = arith.constant 0 : index
    %39 = vector.load %arg26[%c2_33, %c0_34] : memref<32x32xf32, #tpu.memory_space<vmem>>, vector<1x32xf32>
    tpu.vector_store %arg26[%c2_33, %c0_34], %38 {strides = array<i32>} : memref<32x32xf32, #tpu.memory_space<vmem>>, vector<1x32xf32>,
    %c3_i32 = arith.constant 3 : i32
    %40 = arith.addi %9, %c3_i32 : i32
    %41 = arith.index_cast %40 : i32 to index
    %42 = memref.load %arg7[%41] : memref<32xi32, #tpu.memory_space<smem>>
    %43 = arith.index_cast %42 : i32 to index
    %c0_35 = arith.constant 0 : index
    %c0_36 = arith.constant 0 : index
    %44 = vector.load %arg24[%43, %c0_35, %c0_36] : memref<9x2x32xf32, #tpu.memory_space<vmem>>, vector<1x2x32xf32>
    %45 = vector.shape_cast %44 : vector<1x2x32xf32> to vector<2x32xf32>
    %46 = vector.extract_strided_slice %45 {offsets = [0, 0], sizes = [1, 32], strides = [1, 1]} : vector<2x32xf32> to vector<1x32xf32>
    %c3 = arith.constant 3 : index
    %c0_37 = arith.constant 0 : index
    %47 = vector.load %arg25[%c3, %c0_37] : memref<32x32xf32, #tpu.memory_space<vmem>>, vector<1x32xf32>
    tpu.vector_store %arg25[%c3, %c0_37], %46 {strides = array<i32>} : memref<32x32xf32, #tpu.memory_space<vmem>>, vector<1x32xf32>,
    %48 = vector.extract_strided_slice %45 {offsets = [1, 0], sizes = [1, 32], strides = [1, 1]} : vector<2x32xf32> to vector<1x32xf32>
    %c3_38 = arith.constant 3 : index
    %c0_39 = arith.constant 0 : index
    %49 = vector.load %arg26[%c3_38, %c0_39] : memref<32x32xf32, #tpu.memory_space<vmem>>, vector<1x32xf32>
    tpu.vector_store %arg26[%c3_38, %c0_39], %48 {strides = array<i32>} : memref<32x32xf32, #tpu.memory_space<vmem>>, vector<1x32xf32>,
    %c4_i32_40 = arith.constant 4 : i32
    %50 = arith.addi %9, %c4_i32_40 : i32
    %51 = arith.index_cast %50 : i32 to index
    %52 = memref.load %arg7[%51] : memref<32xi32, #tpu.memory_space<smem>>
    %53 = arith.index_cast %52 : i32 to index
    %c0_41 = arith.constant 0 : index
    %c0_42 = arith.constant 0 : index
    %54 = vector.load %arg24[%53, %c0_41, %c0_42] : memref<9x2x32xf32, #tpu.memory_space<vmem>>, vector<1x2x32xf32>
    %55 = vector.shape_cast %54 : vector<1x2x32xf32> to vector<2x32xf32>
    %56 = vector.extract_strided_slice %55 {offsets = [0, 0], sizes = [1, 32], strides = [1, 1]} : vector<2x32xf32> to vector<1x32xf32>
    %c4 = arith.constant 4 : index
    %c0_43 = arith.constant 0 : index
    %57 = vector.load %arg25[%c4, %c0_43] : memref<32x32xf32, #tpu.memory_space<vmem>>, vector<1x32xf32>
    tpu.vector_store %arg25[%c4, %c0_43], %56 {strides = array<i32>} : memref<32x32xf32, #tpu.memory_space<vmem>>, vector<1x32xf32>,
    %58 = vector.extract_strided_slice %55 {offsets = [1, 0], sizes = [1, 32], strides = [1, 1]} : vector<2x32xf32> to vector<1x32xf32>
    %c4_44 = arith.constant 4 : index
    %c0_45 = arith.constant 0 : index
    %59 = vector.load %arg26[%c4_44, %c0_45] : memref<32x32xf32, #tpu.memory_space<vmem>>, vector<1x32xf32>
    tpu.vector_store %arg26[%c4_44, %c0_45], %58 {strides = array<i32>} : memref<32x32xf32, #tpu.memory_space<vmem>>, vector<1x32xf32>,
    %c5_i32 = arith.constant 5 : i32
    %60 = arith.addi %9, %c5_i32 : i32
    %61 = arith.index_cast %60 : i32 to index
    %62 = memref.load %arg7[%61] : memref<32xi32, #tpu.memory_space<smem>>
    %63 = arith.index_cast %62 : i32 to index
    %c0_46 = arith.constant 0 : index
    %c0_47 = arith.constant 0 : index
    %64 = vector.load %arg24[%63, %c0_46, %c0_47] : memref<9x2x32xf32, #tpu.memory_space<vmem>>, vector<1x2x32xf32>
    %65 = vector.shape_cast %64 : vector<1x2x32xf32> to vector<2x32xf32>
    %66 = vector.extract_strided_slice %65 {offsets = [0, 0], sizes = [1, 32], strides = [1, 1]} : vector<2x32xf32> to vector<1x32xf32>
    %c5 = arith.constant 5 : index
    %c0_48 = arith.constant 0 : index
    %67 = vector.load %arg25[%c5, %c0_48] : memref<32x32xf32, #tpu.memory_space<vmem>>, vector<1x32xf32>
    tpu.vector_store %arg25[%c5, %c0_48], %66 {strides = array<i32>} : memref<32x32xf32, #tpu.memory_space<vmem>>, vector<1x32xf32>,
    %68 = vector.extract_strided_slice %65 {offsets = [1, 0], sizes = [1, 32], strides = [1, 1]} : vector<2x32xf32> to vector<1x32xf32>
    %c5_49 = arith.constant 5 : index
    %c0_50 = arith.constant 0 : index
    %69 = vector.load %arg26[%c5_49, %c0_50] : memref<32x32xf32, #tpu.memory_space<vmem>>, vector<1x32xf32>
    tpu.vector_store %arg26[%c5_49, %c0_50], %68 {strides = array<i32>} : memref<32x32xf32, #tpu.memory_space<vmem>>, vector<1x32xf32>,
    %c6_i32 = arith.constant 6 : i32
    %70 = arith.addi %9, %c6_i32 : i32
    %71 = arith.index_cast %70 : i32 to index
    %72 = memref.load %arg7[%71] : memref<32xi32, #tpu.memory_space<smem>>
    %73 = arith.index_cast %72 : i32 to index
    %c0_51 = arith.constant 0 : index
    %c0_52 = arith.constant 0 : index
    %74 = vector.load %arg24[%73, %c0_51, %c0_52] : memref<9x2x32xf32, #tpu.memory_space<vmem>>, vector<1x2x32xf32>
    %75 = vector.shape_cast %74 : vector<1x2x32xf32> to vector<2x32xf32>
    %76 = vector.extract_strided_slice %75 {offsets = [0, 0], sizes = [1, 32], strides = [1, 1]} : vector<2x32xf32> to vector<1x32xf32>
    %c6 = arith.constant 6 : index
    %c0_53 = arith.constant 0 : index
    %77 = vector.load %arg25[%c6, %c0_53] : memref<32x32xf32, #tpu.memory_space<vmem>>, vector<1x32xf32>
    tpu.vector_store %arg25[%c6, %c0_53], %76 {strides = array<i32>} : memref<32x32xf32, #tpu.memory_space<vmem>>, vector<1x32xf32>,
    %78 = vector.extract_strided_slice %75 {offsets = [1, 0], sizes = [1, 32], strides = [1, 1]} : vector<2x32xf32> to vector<1x32xf32>
    %c6_54 = arith.constant 6 : index
    %c0_55 = arith.constant 0 : index
    %79 = vector.load %arg26[%c6_54, %c0_55] : memref<32x32xf32, #tpu.memory_space<vmem>>, vector<1x32xf32>
    tpu.vector_store %arg26[%c6_54, %c0_55], %78 {strides = array<i32>} : memref<32x32xf32, #tpu.memory_space<vmem>>, vector<1x32xf32>,
    %c7_i32 = arith.constant 7 : i32
    %80 = arith.addi %9, %c7_i32 : i32
    %81 = arith.index_cast %80 : i32 to index
    %82 = memref.load %arg7[%81] : memref<32xi32, #tpu.memory_space<smem>>
    %83 = arith.index_cast %82 : i32 to index
    %c0_56 = arith.constant 0 : index
    %c0_57 = arith.constant 0 : index
    %84 = vector.load %arg24[%83, %c0_56, %c0_57] : memref<9x2x32xf32, #tpu.memory_space<vmem>>, vector<1x2x32xf32>
    %85 = vector.shape_cast %84 : vector<1x2x32xf32> to vector<2x32xf32>
    %86 = vector.extract_strided_slice %85 {offsets = [0, 0], sizes = [1, 32], strides = [1, 1]} : vector<2x32xf32> to vector<1x32xf32>
    %c7 = arith.constant 7 : index
    %c0_58 = arith.constant 0 : index
    %87 = vector.load %arg25[%c7, %c0_58] : memref<32x32xf32, #tpu.memory_space<vmem>>, vector<1x32xf32>
    tpu.vector_store %arg25[%c7, %c0_58], %86 {strides = array<i32>} : memref<32x32xf32, #tpu.memory_space<vmem>>, vector<1x32xf32>,
    %88 = vector.extract_strided_slice %85 {offsets = [1, 0], sizes = [1, 32], strides = [1, 1]} : vector<2x32xf32> to vector<1x32xf32>
    %c7_59 = arith.constant 7 : index
    %c0_60 = arith.constant 0 : index
    %89 = vector.load %arg26[%c7_59, %c0_60] : memref<32x32xf32, #tpu.memory_space<vmem>>, vector<1x32xf32>
    tpu.vector_store %arg26[%c7_59, %c0_60], %88 {strides = array<i32>} : memref<32x32xf32, #tpu.memory_space<vmem>>, vector<1x32xf32>,
    %c8_i32 = arith.constant 8 : i32
    %90 = arith.addi %9, %c8_i32 : i32
    %91 = arith.index_cast %90 : i32 to index
    %92 = memref.load %arg7[%91] : memref<32xi32, #tpu.memory_space<smem>>
    %93 = arith.index_cast %92 : i32 to index
    %c0_61 = arith.constant 0 : index
    %c0_62 = arith.constant 0 : index
    %94 = vector.load %arg24[%93, %c0_61, %c0_62] : memref<9x2x32xf32, #tpu.memory_space<vmem>>, vector<1x2x32xf32>
    %95 = vector.shape_cast %94 : vector<1x2x32xf32> to vector<2x32xf32>
    %96 = vector.extract_strided_slice %95 {offsets = [0, 0], sizes = [1, 32], strides = [1, 1]} : vector<2x32xf32> to vector<1x32xf32>
    %c8 = arith.constant 8 : index
    %c0_63 = arith.constant 0 : index
    %97 = vector.load %arg25[%c8, %c0_63] : memref<32x32xf32, #tpu.memory_space<vmem>>, vector<1x32xf32>
    tpu.vector_store %arg25[%c8, %c0_63], %96 {strides = array<i32>} : memref<32x32xf32, #tpu.memory_space<vmem>>, vector<1x32xf32>,
    %98 = vector.extract_strided_slice %95 {offsets = [1, 0], sizes = [1, 32], strides = [1, 1]} : vector<2x32xf32> to vector<1x32xf32>
    %c8_64 = arith.constant 8 : index
    %c0_65 = arith.constant 0 : index
    %99 = vector.load %arg26[%c8_64, %c0_65] : memref<32x32xf32, #tpu.memory_space<vmem>>, vector<1x32xf32>
    tpu.vector_store %arg26[%c8_64, %c0_65], %98 {strides = array<i32>} : memref<32x32xf32, #tpu.memory_space<vmem>>, vector<1x32xf32>,
    %c9_i32 = arith.constant 9 : i32
    %100 = arith.addi %9, %c9_i32 : i32
    %101 = arith.index_cast %100 : i32 to index
    %102 = memref.load %arg7[%101] : memref<32xi32, #tpu.memory_space<smem>>
    %103 = arith.index_cast %102 : i32 to index
    %c0_66 = arith.constant 0 : index
    %c0_67 = arith.constant 0 : index
    %104 = vector.load %arg24[%103, %c0_66, %c0_67] : memref<9x2x32xf32, #tpu.memory_space<vmem>>, vector<1x2x32xf32>
    %105 = vector.shape_cast %104 : vector<1x2x32xf32> to vector<2x32xf32>
    %106 = vector.extract_strided_slice %105 {offsets = [0, 0], sizes = [1, 32], strides = [1, 1]} : vector<2x32xf32> to vector<1x32xf32>
    %c9 = arith.constant 9 : index
    %c0_68 = arith.constant 0 : index
    %107 = vector.load %arg25[%c9, %c0_68] : memref<32x32xf32, #tpu.memory_space<vmem>>, vector<1x32xf32>
    tpu.vector_store %arg25[%c9, %c0_68], %106 {strides = array<i32>} : memref<32x32xf32, #tpu.memory_space<vmem>>, vector<1x32xf32>,
    %108 = vector.extract_strided_slice %105 {offsets = [1, 0], sizes = [1, 32], strides = [1, 1]} : vector<2x32xf32> to vector<1x32xf32>
    %c9_69 = arith.constant 9 : index
    %c0_70 = arith.constant 0 : index
    %109 = vector.load %arg26[%c9_69, %c0_70] : memref<32x32xf32, #tpu.memory_space<vmem>>, vector<1x32xf32>
    tpu.vector_store %arg26[%c9_69, %c0_70], %108 {strides = array<i32>} : memref<32x32xf32, #tpu.memory_space<vmem>>, vector<1x32xf32>,
    %c10_i32 = arith.constant 10 : i32
    %110 = arith.addi %9, %c10_i32 : i32
    %111 = arith.index_cast %110 : i32 to index
    %112 = memref.load %arg7[%111] : memref<32xi32, #tpu.memory_space<smem>>
    %113 = arith.index_cast %112 : i32 to index
    %c0_71 = arith.constant 0 : index
    %c0_72 = arith.constant 0 : index
    %114 = vector.load %arg24[%113, %c0_71, %c0_72] : memref<9x2x32xf32, #tpu.memory_space<vmem>>, vector<1x2x32xf32>
    %115 = vector.shape_cast %114 : vector<1x2x32xf32> to vector<2x32xf32>
    %116 = vector.extract_strided_slice %115 {offsets = [0, 0], sizes = [1, 32], strides = [1, 1]} : vector<2x32xf32> to vector<1x32xf32>
    %c10 = arith.constant 10 : index
    %c0_73 = arith.constant 0 : index
    %117 = vector.load %arg25[%c10, %c0_73] : memref<32x32xf32, #tpu.memory_space<vmem>>, vector<1x32xf32>
    tpu.vector_store %arg25[%c10, %c0_73], %116 {strides = array<i32>} : memref<32x32xf32, #tpu.memory_space<vmem>>, vector<1x32xf32>,
    %118 = vector.extract_strided_slice %115 {offsets = [1, 0], sizes = [1, 32], strides = [1, 1]} : vector<2x32xf32> to vector<1x32xf32>
    %c10_74 = arith.constant 10 : index
    %c0_75 = arith.constant 0 : index
    %119 = vector.load %arg26[%c10_74, %c0_75] : memref<32x32xf32, #tpu.memory_space<vmem>>, vector<1x32xf32>
    tpu.vector_store %arg26[%c10_74, %c0_75], %118 {strides = array<i32>} : memref<32x32xf32, #tpu.memory_space<vmem>>, vector<1x32xf32>,
    %c11_i32 = arith.constant 11 : i32
    %120 = arith.addi %9, %c11_i32 : i32
    %121 = arith.index_cast %120 : i32 to index
    %122 = memref.load %arg7[%121] : memref<32xi32, #tpu.memory_space<smem>>
    %123 = arith.index_cast %122 : i32 to index
    %c0_76 = arith.constant 0 : index
    %c0_77 = arith.constant 0 : index
    %124 = vector.load %arg24[%123, %c0_76, %c0_77] : memref<9x2x32xf32, #tpu.memory_space<vmem>>, vector<1x2x32xf32>
    %125 = vector.shape_cast %124 : vector<1x2x32xf32> to vector<2x32xf32>
    %126 = vector.extract_strided_slice %125 {offsets = [0, 0], sizes = [1, 32], strides = [1, 1]} : vector<2x32xf32> to vector<1x32xf32>
    %c11 = arith.constant 11 : index
    %c0_78 = arith.constant 0 : index
    %127 = vector.load %arg25[%c11, %c0_78] : memref<32x32xf32, #tpu.memory_space<vmem>>, vector<1x32xf32>
    tpu.vector_store %arg25[%c11, %c0_78], %126 {strides = array<i32>} : memref<32x32xf32, #tpu.memory_space<vmem>>, vector<1x32xf32>,
    %128 = vector.extract_strided_slice %125 {offsets = [1, 0], sizes = [1, 32], strides = [1, 1]} : vector<2x32xf32> to vector<1x32xf32>
    %c11_79 = arith.constant 11 : index
    %c0_80 = arith.constant 0 : index
    %129 = vector.load %arg26[%c11_79, %c0_80] : memref<32x32xf32, #tpu.memory_space<vmem>>, vector<1x32xf32>
    tpu.vector_store %arg26[%c11_79, %c0_80], %128 {strides = array<i32>} : memref<32x32xf32, #tpu.memory_space<vmem>>, vector<1x32xf32>,
    %c12_i32 = arith.constant 12 : i32
    %130 = arith.addi %9, %c12_i32 : i32
    %131 = arith.index_cast %130 : i32 to index
    %132 = memref.load %arg7[%131] : memref<32xi32, #tpu.memory_space<smem>>
    %133 = arith.index_cast %132 : i32 to index
    %c0_81 = arith.constant 0 : index
    %c0_82 = arith.constant 0 : index
    %134 = vector.load %arg24[%133, %c0_81, %c0_82] : memref<9x2x32xf32, #tpu.memory_space<vmem>>, vector<1x2x32xf32>
    %135 = vector.shape_cast %134 : vector<1x2x32xf32> to vector<2x32xf32>
    %136 = vector.extract_strided_slice %135 {offsets = [0, 0], sizes = [1, 32], strides = [1, 1]} : vector<2x32xf32> to vector<1x32xf32>
    %c12 = arith.constant 12 : index
    %c0_83 = arith.constant 0 : index
    %137 = vector.load %arg25[%c12, %c0_83] : memref<32x32xf32, #tpu.memory_space<vmem>>, vector<1x32xf32>
    tpu.vector_store %arg25[%c12, %c0_83], %136 {strides = array<i32>} : memref<32x32xf32, #tpu.memory_space<vmem>>, vector<1x32xf32>,
    %138 = vector.extract_strided_slice %135 {offsets = [1, 0], sizes = [1, 32], strides = [1, 1]} : vector<2x32xf32> to vector<1x32xf32>
    %c12_84 = arith.constant 12 : index
    %c0_85 = arith.constant 0 : index
    %139 = vector.load %arg26[%c12_84, %c0_85] : memref<32x32xf32, #tpu.memory_space<vmem>>, vector<1x32xf32>
    tpu.vector_store %arg26[%c12_84, %c0_85], %138 {strides = array<i32>} : memref<32x32xf32, #tpu.memory_space<vmem>>, vector<1x32xf32>,
    %c13_i32 = arith.constant 13 : i32
    %140 = arith.addi %9, %c13_i32 : i32
    %141 = arith.index_cast %140 : i32 to index
    %142 = memref.load %arg7[%141] : memref<32xi32, #tpu.memory_space<smem>>
    %143 = arith.index_cast %142 : i32 to index
    %c0_86 = arith.constant 0 : index
    %c0_87 = arith.constant 0 : index
    %144 = vector.load %arg24[%143, %c0_86, %c0_87] : memref<9x2x32xf32, #tpu.memory_space<vmem>>, vector<1x2x32xf32>
    %145 = vector.shape_cast %144 : vector<1x2x32xf32> to vector<2x32xf32>
    %146 = vector.extract_strided_slice %145 {offsets = [0, 0], sizes = [1, 32], strides = [1, 1]} : vector<2x32xf32> to vector<1x32xf32>
    %c13 = arith.constant 13 : index
    %c0_88 = arith.constant 0 : index
    %147 = vector.load %arg25[%c13, %c0_88] : memref<32x32xf32, #tpu.memory_space<vmem>>, vector<1x32xf32>
    tpu.vector_store %arg25[%c13, %c0_88], %146 {strides = array<i32>} : memref<32x32xf32, #tpu.memory_space<vmem>>, vector<1x32xf32>,
    %148 = vector.extract_strided_slice %145 {offsets = [1, 0], sizes = [1, 32], strides = [1, 1]} : vector<2x32xf32> to vector<1x32xf32>
    %c13_89 = arith.constant 13 : index
    %c0_90 = arith.constant 0 : index
    %149 = vector.load %arg26[%c13_89, %c0_90] : memref<32x32xf32, #tpu.memory_space<vmem>>, vector<1x32xf32>
    tpu.vector_store %arg26[%c13_89, %c0_90], %148 {strides = array<i32>} : memref<32x32xf32, #tpu.memory_space<vmem>>, vector<1x32xf32>,
    %c14_i32 = arith.constant 14 : i32
    %150 = arith.addi %9, %c14_i32 : i32
    %151 = arith.index_cast %150 : i32 to index
    %152 = memref.load %arg7[%151] : memref<32xi32, #tpu.memory_space<smem>>
    %153 = arith.index_cast %152 : i32 to index
    %c0_91 = arith.constant 0 : index
    %c0_92 = arith.constant 0 : index
    %154 = vector.load %arg24[%153, %c0_91, %c0_92] : memref<9x2x32xf32, #tpu.memory_space<vmem>>, vector<1x2x32xf32>
    %155 = vector.shape_cast %154 : vector<1x2x32xf32> to vector<2x32xf32>
    %156 = vector.extract_strided_slice %155 {offsets = [0, 0], sizes = [1, 32], strides = [1, 1]} : vector<2x32xf32> to vector<1x32xf32>
    %c14 = arith.constant 14 : index
    %c0_93 = arith.constant 0 : index
    %157 = vector.load %arg25[%c14, %c0_93] : memref<32x32xf32, #tpu.memory_space<vmem>>, vector<1x32xf32>
    tpu.vector_store %arg25[%c14, %c0_93], %156 {strides = array<i32>} : memref<32x32xf32, #tpu.memory_space<vmem>>, vector<1x32xf32>,
    %158 = vector.extract_strided_slice %155 {offsets = [1, 0], sizes = [1, 32], strides = [1, 1]} : vector<2x32xf32> to vector<1x32xf32>
    %c14_94 = arith.constant 14 : index
    %c0_95 = arith.constant 0 : index
    %159 = vector.load %arg26[%c14_94, %c0_95] : memref<32x32xf32, #tpu.memory_space<vmem>>, vector<1x32xf32>
    tpu.vector_store %arg26[%c14_94, %c0_95], %158 {strides = array<i32>} : memref<32x32xf32, #tpu.memory_space<vmem>>, vector<1x32xf32>,
    %c15_i32 = arith.constant 15 : i32
    %160 = arith.addi %9, %c15_i32 : i32
    %161 = arith.index_cast %160 : i32 to index
    %162 = memref.load %arg7[%161] : memref<32xi32, #tpu.memory_space<smem>>
    %163 = arith.index_cast %162 : i32 to index
    %c0_96 = arith.constant 0 : index
    %c0_97 = arith.constant 0 : index
    %164 = vector.load %arg24[%163, %c0_96, %c0_97] : memref<9x2x32xf32, #tpu.memory_space<vmem>>, vector<1x2x32xf32>
    %165 = vector.shape_cast %164 : vector<1x2x32xf32> to vector<2x32xf32>
    %166 = vector.extract_strided_slice %165 {offsets = [0, 0], sizes = [1, 32], strides = [1, 1]} : vector<2x32xf32> to vector<1x32xf32>
    %c15 = arith.constant 15 : index
    %c0_98 = arith.constant 0 : index
    %167 = vector.load %arg25[%c15, %c0_98] : memref<32x32xf32, #tpu.memory_space<vmem>>, vector<1x32xf32>
    tpu.vector_store %arg25[%c15, %c0_98], %166 {strides = array<i32>} : memref<32x32xf32, #tpu.memory_space<vmem>>, vector<1x32xf32>,
    %168 = vector.extract_strided_slice %165 {offsets = [1, 0], sizes = [1, 32], strides = [1, 1]} : vector<2x32xf32> to vector<1x32xf32>
    %c15_99 = arith.constant 15 : index
    %c0_100 = arith.constant 0 : index
    %169 = vector.load %arg26[%c15_99, %c0_100] : memref<32x32xf32, #tpu.memory_space<vmem>>, vector<1x32xf32>
    tpu.vector_store %arg26[%c15_99, %c0_100], %168 {strides = array<i32>} : memref<32x32xf32, #tpu.memory_space<vmem>>, vector<1x32xf32>,
    %c16_i32 = arith.constant 16 : i32
    %170 = arith.addi %9, %c16_i32 : i32
    %171 = arith.index_cast %170 : i32 to index
    %172 = memref.load %arg7[%171] : memref<32xi32, #tpu.memory_space<smem>>
    %173 = arith.index_cast %172 : i32 to index
    %c0_101 = arith.constant 0 : index
    %c0_102 = arith.constant 0 : index
    %174 = vector.load %arg24[%173, %c0_101, %c0_102] : memref<9x2x32xf32, #tpu.memory_space<vmem>>, vector<1x2x32xf32>
    %175 = vector.shape_cast %174 : vector<1x2x32xf32> to vector<2x32xf32>
    %176 = vector.extract_strided_slice %175 {offsets = [0, 0], sizes = [1, 32], strides = [1, 1]} : vector<2x32xf32> to vector<1x32xf32>
    %c16 = arith.constant 16 : index
    %c0_103 = arith.constant 0 : index
    %177 = vector.load %arg25[%c16, %c0_103] : memref<32x32xf32, #tpu.memory_space<vmem>>, vector<1x32xf32>
    tpu.vector_store %arg25[%c16, %c0_103], %176 {strides = array<i32>} : memref<32x32xf32, #tpu.memory_space<vmem>>, vector<1x32xf32>,
    %178 = vector.extract_strided_slice %175 {offsets = [1, 0], sizes = [1, 32], strides = [1, 1]} : vector<2x32xf32> to vector<1x32xf32>
    %c16_104 = arith.constant 16 : index
    %c0_105 = arith.constant 0 : index
    %179 = vector.load %arg26[%c16_104, %c0_105] : memref<32x32xf32, #tpu.memory_space<vmem>>, vector<1x32xf32>
    tpu.vector_store %arg26[%c16_104, %c0_105], %178 {strides = array<i32>} : memref<32x32xf32, #tpu.memory_space<vmem>>, vector<1x32xf32>,
    %c17_i32 = arith.constant 17 : i32
    %180 = arith.addi %9, %c17_i32 : i32
    %181 = arith.index_cast %180 : i32 to index
    %182 = memref.load %arg7[%181] : memref<32xi32, #tpu.memory_space<smem>>
    %183 = arith.index_cast %182 : i32 to index
    %c0_106 = arith.constant 0 : index
    %c0_107 = arith.constant 0 : index
    %184 = vector.load %arg24[%183, %c0_106, %c0_107] : memref<9x2x32xf32, #tpu.memory_space<vmem>>, vector<1x2x32xf32>
    %185 = vector.shape_cast %184 : vector<1x2x32xf32> to vector<2x32xf32>
    %186 = vector.extract_strided_slice %185 {offsets = [0, 0], sizes = [1, 32], strides = [1, 1]} : vector<2x32xf32> to vector<1x32xf32>
    %c17 = arith.constant 17 : index
    %c0_108 = arith.constant 0 : index
    %187 = vector.load %arg25[%c17, %c0_108] : memref<32x32xf32, #tpu.memory_space<vmem>>, vector<1x32xf32>
    tpu.vector_store %arg25[%c17, %c0_108], %186 {strides = array<i32>} : memref<32x32xf32, #tpu.memory_space<vmem>>, vector<1x32xf32>,
    %188 = vector.extract_strided_slice %185 {offsets = [1, 0], sizes = [1, 32], strides = [1, 1]} : vector<2x32xf32> to vector<1x32xf32>
    %c17_109 = arith.constant 17 : index
    %c0_110 = arith.constant 0 : index
    %189 = vector.load %arg26[%c17_109, %c0_110] : memref<32x32xf32, #tpu.memory_space<vmem>>, vector<1x32xf32>
    tpu.vector_store %arg26[%c17_109, %c0_110], %188 {strides = array<i32>} : memref<32x32xf32, #tpu.memory_space<vmem>>, vector<1x32xf32>,
    %c18_i32 = arith.constant 18 : i32
    %190 = arith.addi %9, %c18_i32 : i32
    %191 = arith.index_cast %190 : i32 to index
    %192 = memref.load %arg7[%191] : memref<32xi32, #tpu.memory_space<smem>>
    %193 = arith.index_cast %192 : i32 to index
    %c0_111 = arith.constant 0 : index
    %c0_112 = arith.constant 0 : index
    %194 = vector.load %arg24[%193, %c0_111, %c0_112] : memref<9x2x32xf32, #tpu.memory_space<vmem>>, vector<1x2x32xf32>
    %195 = vector.shape_cast %194 : vector<1x2x32xf32> to vector<2x32xf32>
    %196 = vector.extract_strided_slice %195 {offsets = [0, 0], sizes = [1, 32], strides = [1, 1]} : vector<2x32xf32> to vector<1x32xf32>
    %c18 = arith.constant 18 : index
    %c0_113 = arith.constant 0 : index
    %197 = vector.load %arg25[%c18, %c0_113] : memref<32x32xf32, #tpu.memory_space<vmem>>, vector<1x32xf32>
    tpu.vector_store %arg25[%c18, %c0_113], %196 {strides = array<i32>} : memref<32x32xf32, #tpu.memory_space<vmem>>, vector<1x32xf32>,
    %198 = vector.extract_strided_slice %195 {offsets = [1, 0], sizes = [1, 32], strides = [1, 1]} : vector<2x32xf32> to vector<1x32xf32>
    %c18_114 = arith.constant 18 : index
    %c0_115 = arith.constant 0 : index
    %199 = vector.load %arg26[%c18_114, %c0_115] : memref<32x32xf32, #tpu.memory_space<vmem>>, vector<1x32xf32>
    tpu.vector_store %arg26[%c18_114, %c0_115], %198 {strides = array<i32>} : memref<32x32xf32, #tpu.memory_space<vmem>>, vector<1x32xf32>,
    %c19_i32 = arith.constant 19 : i32
    %200 = arith.addi %9, %c19_i32 : i32
    %201 = arith.index_cast %200 : i32 to index
    %202 = memref.load %arg7[%201] : memref<32xi32, #tpu.memory_space<smem>>
    %203 = arith.index_cast %202 : i32 to index
    %c0_116 = arith.constant 0 : index
    %c0_117 = arith.constant 0 : index
    %204 = vector.load %arg24[%203, %c0_116, %c0_117] : memref<9x2x32xf32, #tpu.memory_space<vmem>>, vector<1x2x32xf32>
    %205 = vector.shape_cast %204 : vector<1x2x32xf32> to vector<2x32xf32>
    %206 = vector.extract_strided_slice %205 {offsets = [0, 0], sizes = [1, 32], strides = [1, 1]} : vector<2x32xf32> to vector<1x32xf32>
    %c19 = arith.constant 19 : index
    %c0_118 = arith.constant 0 : index
    %207 = vector.load %arg25[%c19, %c0_118] : memref<32x32xf32, #tpu.memory_space<vmem>>, vector<1x32xf32>
    tpu.vector_store %arg25[%c19, %c0_118], %206 {strides = array<i32>} : memref<32x32xf32, #tpu.memory_space<vmem>>, vector<1x32xf32>,
    %208 = vector.extract_strided_slice %205 {offsets = [1, 0], sizes = [1, 32], strides = [1, 1]} : vector<2x32xf32> to vector<1x32xf32>
    %c19_119 = arith.constant 19 : index
    %c0_120 = arith.constant 0 : index
    %209 = vector.load %arg26[%c19_119, %c0_120] : memref<32x32xf32, #tpu.memory_space<vmem>>, vector<1x32xf32>
    tpu.vector_store %arg26[%c19_119, %c0_120], %208 {strides = array<i32>} : memref<32x32xf32, #tpu.memory_space<vmem>>, vector<1x32xf32>,
    %c20_i32 = arith.constant 20 : i32
    %210 = arith.addi %9, %c20_i32 : i32
    %211 = arith.index_cast %210 : i32 to index
    %212 = memref.load %arg7[%211] : memref<32xi32, #tpu.memory_space<smem>>
    %213 = arith.index_cast %212 : i32 to index
    %c0_121 = arith.constant 0 : index
    %c0_122 = arith.constant 0 : index
    %214 = vector.load %arg24[%213, %c0_121, %c0_122] : memref<9x2x32xf32, #tpu.memory_space<vmem>>, vector<1x2x32xf32>
    %215 = vector.shape_cast %214 : vector<1x2x32xf32> to vector<2x32xf32>
    %216 = vector.extract_strided_slice %215 {offsets = [0, 0], sizes = [1, 32], strides = [1, 1]} : vector<2x32xf32> to vector<1x32xf32>
    %c20 = arith.constant 20 : index
    %c0_123 = arith.constant 0 : index
    %217 = vector.load %arg25[%c20, %c0_123] : memref<32x32xf32, #tpu.memory_space<vmem>>, vector<1x32xf32>
    tpu.vector_store %arg25[%c20, %c0_123], %216 {strides = array<i32>} : memref<32x32xf32, #tpu.memory_space<vmem>>, vector<1x32xf32>,
    %218 = vector.extract_strided_slice %215 {offsets = [1, 0], sizes = [1, 32], strides = [1, 1]} : vector<2x32xf32> to vector<1x32xf32>
    %c20_124 = arith.constant 20 : index
    %c0_125 = arith.constant 0 : index
    %219 = vector.load %arg26[%c20_124, %c0_125] : memref<32x32xf32, #tpu.memory_space<vmem>>, vector<1x32xf32>
    tpu.vector_store %arg26[%c20_124, %c0_125], %218 {strides = array<i32>} : memref<32x32xf32, #tpu.memory_space<vmem>>, vector<1x32xf32>,
    %c21_i32 = arith.constant 21 : i32
    %220 = arith.addi %9, %c21_i32 : i32
    %221 = arith.index_cast %220 : i32 to index
    %222 = memref.load %arg7[%221] : memref<32xi32, #tpu.memory_space<smem>>
    %223 = arith.index_cast %222 : i32 to index
    %c0_126 = arith.constant 0 : index
    %c0_127 = arith.constant 0 : index
    %224 = vector.load %arg24[%223, %c0_126, %c0_127] : memref<9x2x32xf32, #tpu.memory_space<vmem>>, vector<1x2x32xf32>
    %225 = vector.shape_cast %224 : vector<1x2x32xf32> to vector<2x32xf32>
    %226 = vector.extract_strided_slice %225 {offsets = [0, 0], sizes = [1, 32], strides = [1, 1]} : vector<2x32xf32> to vector<1x32xf32>
    %c21 = arith.constant 21 : index
    %c0_128 = arith.constant 0 : index
    %227 = vector.load %arg25[%c21, %c0_128] : memref<32x32xf32, #tpu.memory_space<vmem>>, vector<1x32xf32>
    tpu.vector_store %arg25[%c21, %c0_128], %226 {strides = array<i32>} : memref<32x32xf32, #tpu.memory_space<vmem>>, vector<1x32xf32>,
    %228 = vector.extract_strided_slice %225 {offsets = [1, 0], sizes = [1, 32], strides = [1, 1]} : vector<2x32xf32> to vector<1x32xf32>
    %c21_129 = arith.constant 21 : index
    %c0_130 = arith.constant 0 : index
    %229 = vector.load %arg26[%c21_129, %c0_130] : memref<32x32xf32, #tpu.memory_space<vmem>>, vector<1x32xf32>
    tpu.vector_store %arg26[%c21_129, %c0_130], %228 {strides = array<i32>} : memref<32x32xf32, #tpu.memory_space<vmem>>, vector<1x32xf32>,
    %c22_i32 = arith.constant 22 : i32
    %230 = arith.addi %9, %c22_i32 : i32
    %231 = arith.index_cast %230 : i32 to index
    %232 = memref.load %arg7[%231] : memref<32xi32, #tpu.memory_space<smem>>
    %233 = arith.index_cast %232 : i32 to index
    %c0_131 = arith.constant 0 : index
    %c0_132 = arith.constant 0 : index
    %234 = vector.load %arg24[%233, %c0_131, %c0_132] : memref<9x2x32xf32, #tpu.memory_space<vmem>>, vector<1x2x32xf32>
    %235 = vector.shape_cast %234 : vector<1x2x32xf32> to vector<2x32xf32>
    %236 = vector.extract_strided_slice %235 {offsets = [0, 0], sizes = [1, 32], strides = [1, 1]} : vector<2x32xf32> to vector<1x32xf32>
    %c22 = arith.constant 22 : index
    %c0_133 = arith.constant 0 : index
    %237 = vector.load %arg25[%c22, %c0_133] : memref<32x32xf32, #tpu.memory_space<vmem>>, vector<1x32xf32>
    tpu.vector_store %arg25[%c22, %c0_133], %236 {strides = array<i32>} : memref<32x32xf32, #tpu.memory_space<vmem>>, vector<1x32xf32>,
    %238 = vector.extract_strided_slice %235 {offsets = [1, 0], sizes = [1, 32], strides = [1, 1]} : vector<2x32xf32> to vector<1x32xf32>
    %c22_134 = arith.constant 22 : index
    %c0_135 = arith.constant 0 : index
    %239 = vector.load %arg26[%c22_134, %c0_135] : memref<32x32xf32, #tpu.memory_space<vmem>>, vector<1x32xf32>
    tpu.vector_store %arg26[%c22_134, %c0_135], %238 {strides = array<i32>} : memref<32x32xf32, #tpu.memory_space<vmem>>, vector<1x32xf32>,
    %c23_i32 = arith.constant 23 : i32
    %240 = arith.addi %9, %c23_i32 : i32
    %241 = arith.index_cast %240 : i32 to index
    %242 = memref.load %arg7[%241] : memref<32xi32, #tpu.memory_space<smem>>
    %243 = arith.index_cast %242 : i32 to index
    %c0_136 = arith.constant 0 : index
    %c0_137 = arith.constant 0 : index
    %244 = vector.load %arg24[%243, %c0_136, %c0_137] : memref<9x2x32xf32, #tpu.memory_space<vmem>>, vector<1x2x32xf32>
    %245 = vector.shape_cast %244 : vector<1x2x32xf32> to vector<2x32xf32>
    %246 = vector.extract_strided_slice %245 {offsets = [0, 0], sizes = [1, 32], strides = [1, 1]} : vector<2x32xf32> to vector<1x32xf32>
    %c23 = arith.constant 23 : index
    %c0_138 = arith.constant 0 : index
    %247 = vector.load %arg25[%c23, %c0_138] : memref<32x32xf32, #tpu.memory_space<vmem>>, vector<1x32xf32>
    tpu.vector_store %arg25[%c23, %c0_138], %246 {strides = array<i32>} : memref<32x32xf32, #tpu.memory_space<vmem>>, vector<1x32xf32>,
    %248 = vector.extract_strided_slice %245 {offsets = [1, 0], sizes = [1, 32], strides = [1, 1]} : vector<2x32xf32> to vector<1x32xf32>
    %c23_139 = arith.constant 23 : index
    %c0_140 = arith.constant 0 : index
    %249 = vector.load %arg26[%c23_139, %c0_140] : memref<32x32xf32, #tpu.memory_space<vmem>>, vector<1x32xf32>
    tpu.vector_store %arg26[%c23_139, %c0_140], %248 {strides = array<i32>} : memref<32x32xf32, #tpu.memory_space<vmem>>, vector<1x32xf32>,
    %c24_i32 = arith.constant 24 : i32
    %250 = arith.addi %9, %c24_i32 : i32
    %251 = arith.index_cast %250 : i32 to index
    %252 = memref.load %arg7[%251] : memref<32xi32, #tpu.memory_space<smem>>
    %253 = arith.index_cast %252 : i32 to index
    %c0_141 = arith.constant 0 : index
    %c0_142 = arith.constant 0 : index
    %254 = vector.load %arg24[%253, %c0_141, %c0_142] : memref<9x2x32xf32, #tpu.memory_space<vmem>>, vector<1x2x32xf32>
    %255 = vector.shape_cast %254 : vector<1x2x32xf32> to vector<2x32xf32>
    %256 = vector.extract_strided_slice %255 {offsets = [0, 0], sizes = [1, 32], strides = [1, 1]} : vector<2x32xf32> to vector<1x32xf32>
    %c24 = arith.constant 24 : index
    %c0_143 = arith.constant 0 : index
    %257 = vector.load %arg25[%c24, %c0_143] : memref<32x32xf32, #tpu.memory_space<vmem>>, vector<1x32xf32>
    tpu.vector_store %arg25[%c24, %c0_143], %256 {strides = array<i32>} : memref<32x32xf32, #tpu.memory_space<vmem>>, vector<1x32xf32>,
    %258 = vector.extract_strided_slice %255 {offsets = [1, 0], sizes = [1, 32], strides = [1, 1]} : vector<2x32xf32> to vector<1x32xf32>
    %c24_144 = arith.constant 24 : index
    %c0_145 = arith.constant 0 : index
    %259 = vector.load %arg26[%c24_144, %c0_145] : memref<32x32xf32, #tpu.memory_space<vmem>>, vector<1x32xf32>
    tpu.vector_store %arg26[%c24_144, %c0_145], %258 {strides = array<i32>} : memref<32x32xf32, #tpu.memory_space<vmem>>, vector<1x32xf32>,
    %c25_i32 = arith.constant 25 : i32
    %260 = arith.addi %9, %c25_i32 : i32
    %261 = arith.index_cast %260 : i32 to index
    %262 = memref.load %arg7[%261] : memref<32xi32, #tpu.memory_space<smem>>
    %263 = arith.index_cast %262 : i32 to index
    %c0_146 = arith.constant 0 : index
    %c0_147 = arith.constant 0 : index
    %264 = vector.load %arg24[%263, %c0_146, %c0_147] : memref<9x2x32xf32, #tpu.memory_space<vmem>>, vector<1x2x32xf32>
    %265 = vector.shape_cast %264 : vector<1x2x32xf32> to vector<2x32xf32>
    %266 = vector.extract_strided_slice %265 {offsets = [0, 0], sizes = [1, 32], strides = [1, 1]} : vector<2x32xf32> to vector<1x32xf32>
    %c25 = arith.constant 25 : index
    %c0_148 = arith.constant 0 : index
    %267 = vector.load %arg25[%c25, %c0_148] : memref<32x32xf32, #tpu.memory_space<vmem>>, vector<1x32xf32>
    tpu.vector_store %arg25[%c25, %c0_148], %266 {strides = array<i32>} : memref<32x32xf32, #tpu.memory_space<vmem>>, vector<1x32xf32>,
    %268 = vector.extract_strided_slice %265 {offsets = [1, 0], sizes = [1, 32], strides = [1, 1]} : vector<2x32xf32> to vector<1x32xf32>
    %c25_149 = arith.constant 25 : index
    %c0_150 = arith.constant 0 : index
    %269 = vector.load %arg26[%c25_149, %c0_150] : memref<32x32xf32, #tpu.memory_space<vmem>>, vector<1x32xf32>
    tpu.vector_store %arg26[%c25_149, %c0_150], %268 {strides = array<i32>} : memref<32x32xf32, #tpu.memory_space<vmem>>, vector<1x32xf32>,
    %c26_i32 = arith.constant 26 : i32
    %270 = arith.addi %9, %c26_i32 : i32
    %271 = arith.index_cast %270 : i32 to index
    %272 = memref.load %arg7[%271] : memref<32xi32, #tpu.memory_space<smem>>
    %273 = arith.index_cast %272 : i32 to index
    %c0_151 = arith.constant 0 : index
    %c0_152 = arith.constant 0 : index
    %274 = vector.load %arg24[%273, %c0_151, %c0_152] : memref<9x2x32xf32, #tpu.memory_space<vmem>>, vector<1x2x32xf32>
    %275 = vector.shape_cast %274 : vector<1x2x32xf32> to vector<2x32xf32>
    %276 = vector.extract_strided_slice %275 {offsets = [0, 0], sizes = [1, 32], strides = [1, 1]} : vector<2x32xf32> to vector<1x32xf32>
    %c26 = arith.constant 26 : index
    %c0_153 = arith.constant 0 : index
    %277 = vector.load %arg25[%c26, %c0_153] : memref<32x32xf32, #tpu.memory_space<vmem>>, vector<1x32xf32>
    tpu.vector_store %arg25[%c26, %c0_153], %276 {strides = array<i32>} : memref<32x32xf32, #tpu.memory_space<vmem>>, vector<1x32xf32>,
    %278 = vector.extract_strided_slice %275 {offsets = [1, 0], sizes = [1, 32], strides = [1, 1]} : vector<2x32xf32> to vector<1x32xf32>
    %c26_154 = arith.constant 26 : index
    %c0_155 = arith.constant 0 : index
    %279 = vector.load %arg26[%c26_154, %c0_155] : memref<32x32xf32, #tpu.memory_space<vmem>>, vector<1x32xf32>
    tpu.vector_store %arg26[%c26_154, %c0_155], %278 {strides = array<i32>} : memref<32x32xf32, #tpu.memory_space<vmem>>, vector<1x32xf32>,
    %c27_i32 = arith.constant 27 : i32
    %280 = arith.addi %9, %c27_i32 : i32
    %281 = arith.index_cast %280 : i32 to index
    %282 = memref.load %arg7[%281] : memref<32xi32, #tpu.memory_space<smem>>
    %283 = arith.index_cast %282 : i32 to index
    %c0_156 = arith.constant 0 : index
    %c0_157 = arith.constant 0 : index
    %284 = vector.load %arg24[%283, %c0_156, %c0_157] : memref<9x2x32xf32, #tpu.memory_space<vmem>>, vector<1x2x32xf32>
    %285 = vector.shape_cast %284 : vector<1x2x32xf32> to vector<2x32xf32>
    %286 = vector.extract_strided_slice %285 {offsets = [0, 0], sizes = [1, 32], strides = [1, 1]} : vector<2x32xf32> to vector<1x32xf32>
    %c27 = arith.constant 27 : index
    %c0_158 = arith.constant 0 : index
    %287 = vector.load %arg25[%c27, %c0_158] : memref<32x32xf32, #tpu.memory_space<vmem>>, vector<1x32xf32>
    tpu.vector_store %arg25[%c27, %c0_158], %286 {strides = array<i32>} : memref<32x32xf32, #tpu.memory_space<vmem>>, vector<1x32xf32>,
    %288 = vector.extract_strided_slice %285 {offsets = [1, 0], sizes = [1, 32], strides = [1, 1]} : vector<2x32xf32> to vector<1x32xf32>
    %c27_159 = arith.constant 27 : index
    %c0_160 = arith.constant 0 : index
    %289 = vector.load %arg26[%c27_159, %c0_160] : memref<32x32xf32, #tpu.memory_space<vmem>>, vector<1x32xf32>
    tpu.vector_store %arg26[%c27_159, %c0_160], %288 {strides = array<i32>} : memref<32x32xf32, #tpu.memory_space<vmem>>, vector<1x32xf32>,
    %c28_i32 = arith.constant 28 : i32
    %290 = arith.addi %9, %c28_i32 : i32
    %291 = arith.index_cast %290 : i32 to index
    %292 = memref.load %arg7[%291] : memref<32xi32, #tpu.memory_space<smem>>
    %293 = arith.index_cast %292 : i32 to index
    %c0_161 = arith.constant 0 : index
    %c0_162 = arith.constant 0 : index
    %294 = vector.load %arg24[%293, %c0_161, %c0_162] : memref<9x2x32xf32, #tpu.memory_space<vmem>>, vector<1x2x32xf32>
    %295 = vector.shape_cast %294 : vector<1x2x32xf32> to vector<2x32xf32>
    %296 = vector.extract_strided_slice %295 {offsets = [0, 0], sizes = [1, 32], strides = [1, 1]} : vector<2x32xf32> to vector<1x32xf32>
    %c28 = arith.constant 28 : index
    %c0_163 = arith.constant 0 : index
    %297 = vector.load %arg25[%c28, %c0_163] : memref<32x32xf32, #tpu.memory_space<vmem>>, vector<1x32xf32>
    tpu.vector_store %arg25[%c28, %c0_163], %296 {strides = array<i32>} : memref<32x32xf32, #tpu.memory_space<vmem>>, vector<1x32xf32>,
    %298 = vector.extract_strided_slice %295 {offsets = [1, 0], sizes = [1, 32], strides = [1, 1]} : vector<2x32xf32> to vector<1x32xf32>
    %c28_164 = arith.constant 28 : index
    %c0_165 = arith.constant 0 : index
    %299 = vector.load %arg26[%c28_164, %c0_165] : memref<32x32xf32, #tpu.memory_space<vmem>>, vector<1x32xf32>
    tpu.vector_store %arg26[%c28_164, %c0_165], %298 {strides = array<i32>} : memref<32x32xf32, #tpu.memory_space<vmem>>, vector<1x32xf32>,
    %c29_i32 = arith.constant 29 : i32
    %300 = arith.addi %9, %c29_i32 : i32
    %301 = arith.index_cast %300 : i32 to index
    %302 = memref.load %arg7[%301] : memref<32xi32, #tpu.memory_space<smem>>
    %303 = arith.index_cast %302 : i32 to index
    %c0_166 = arith.constant 0 : index
    %c0_167 = arith.constant 0 : index
    %304 = vector.load %arg24[%303, %c0_166, %c0_167] : memref<9x2x32xf32, #tpu.memory_space<vmem>>, vector<1x2x32xf32>
    %305 = vector.shape_cast %304 : vector<1x2x32xf32> to vector<2x32xf32>
    %306 = vector.extract_strided_slice %305 {offsets = [0, 0], sizes = [1, 32], strides = [1, 1]} : vector<2x32xf32> to vector<1x32xf32>
    %c29 = arith.constant 29 : index
    %c0_168 = arith.constant 0 : index
    %307 = vector.load %arg25[%c29, %c0_168] : memref<32x32xf32, #tpu.memory_space<vmem>>, vector<1x32xf32>
    tpu.vector_store %arg25[%c29, %c0_168], %306 {strides = array<i32>} : memref<32x32xf32, #tpu.memory_space<vmem>>, vector<1x32xf32>,
    %308 = vector.extract_strided_slice %305 {offsets = [1, 0], sizes = [1, 32], strides = [1, 1]} : vector<2x32xf32> to vector<1x32xf32>
    %c29_169 = arith.constant 29 : index
    %c0_170 = arith.constant 0 : index
    %309 = vector.load %arg26[%c29_169, %c0_170] : memref<32x32xf32, #tpu.memory_space<vmem>>, vector<1x32xf32>
    tpu.vector_store %arg26[%c29_169, %c0_170], %308 {strides = array<i32>} : memref<32x32xf32, #tpu.memory_space<vmem>>, vector<1x32xf32>,
    %c30_i32 = arith.constant 30 : i32
    %310 = arith.addi %9, %c30_i32 : i32
    %311 = arith.index_cast %310 : i32 to index
    %312 = memref.load %arg7[%311] : memref<32xi32, #tpu.memory_space<smem>>
    %313 = arith.index_cast %312 : i32 to index
    %c0_171 = arith.constant 0 : index
    %c0_172 = arith.constant 0 : index
    %314 = vector.load %arg24[%313, %c0_171, %c0_172] : memref<9x2x32xf32, #tpu.memory_space<vmem>>, vector<1x2x32xf32>
    %315 = vector.shape_cast %314 : vector<1x2x32xf32> to vector<2x32xf32>
    %316 = vector.extract_strided_slice %315 {offsets = [0, 0], sizes = [1, 32], strides = [1, 1]} : vector<2x32xf32> to vector<1x32xf32>
    %c30 = arith.constant 30 : index
    %c0_173 = arith.constant 0 : index
    %317 = vector.load %arg25[%c30, %c0_173] : memref<32x32xf32, #tpu.memory_space<vmem>>, vector<1x32xf32>
    tpu.vector_store %arg25[%c30, %c0_173], %316 {strides = array<i32>} : memref<32x32xf32, #tpu.memory_space<vmem>>, vector<1x32xf32>,
    %318 = vector.extract_strided_slice %315 {offsets = [1, 0], sizes = [1, 32], strides = [1, 1]} : vector<2x32xf32> to vector<1x32xf32>
    %c30_174 = arith.constant 30 : index
    %c0_175 = arith.constant 0 : index
    %319 = vector.load %arg26[%c30_174, %c0_175] : memref<32x32xf32, #tpu.memory_space<vmem>>, vector<1x32xf32>
    tpu.vector_store %arg26[%c30_174, %c0_175], %318 {strides = array<i32>} : memref<32x32xf32, #tpu.memory_space<vmem>>, vector<1x32xf32>,
    %c31_i32 = arith.constant 31 : i32
    %320 = arith.addi %9, %c31_i32 : i32
    %321 = arith.index_cast %320 : i32 to index
    %322 = memref.load %arg7[%321] : memref<32xi32, #tpu.memory_space<smem>>
    %323 = arith.index_cast %322 : i32 to index
    %c0_176 = arith.constant 0 : index
    %c0_177 = arith.constant 0 : index
    %324 = vector.load %arg24[%323, %c0_176, %c0_177] : memref<9x2x32xf32, #tpu.memory_space<vmem>>, vector<1x2x32xf32>
    %325 = vector.shape_cast %324 : vector<1x2x32xf32> to vector<2x32xf32>
    %326 = vector.extract_strided_slice %325 {offsets = [0, 0], sizes = [1, 32], strides = [1, 1]} : vector<2x32xf32> to vector<1x32xf32>
    %c31 = arith.constant 31 : index
    %c0_178 = arith.constant 0 : index
    %327 = vector.load %arg25[%c31, %c0_178] : memref<32x32xf32, #tpu.memory_space<vmem>>, vector<1x32xf32>
    tpu.vector_store %arg25[%c31, %c0_178], %326 {strides = array<i32>} : memref<32x32xf32, #tpu.memory_space<vmem>>, vector<1x32xf32>,
    %328 = vector.extract_strided_slice %325 {offsets = [1, 0], sizes = [1, 32], strides = [1, 1]} : vector<2x32xf32> to vector<1x32xf32>
    %c31_179 = arith.constant 31 : index
    %c0_180 = arith.constant 0 : index
    %329 = vector.load %arg26[%c31_179, %c0_180] : memref<32x32xf32, #tpu.memory_space<vmem>>, vector<1x32xf32>
    tpu.vector_store %arg26[%c31_179, %c0_180], %328 {strides = array<i32>} : memref<32x32xf32, #tpu.memory_space<vmem>>, vector<1x32xf32>,
    %330 = arith.index_cast %c0_i32_16 : i32 to index
    %c0_181 = arith.constant 0 : index
    %c0_182 = arith.constant 0 : index
    %331 = vector.load %arg9[%330, %c0_181, %c0_182] : memref<1x32x2xf32, #tpu.memory_space<vmem>>, vector<1x32x2xf32>
    %332 = vector.shape_cast %331 : vector<1x32x2xf32> to vector<32x2xf32>
    %333 = vector.extract_strided_slice %332 {offsets = [0, 0], sizes = [32, 1], strides = [1, 1]} : vector<32x2xf32> to vector<32x1xf32>
    %334 = vector.extract_strided_slice %332 {offsets = [0, 1], sizes = [32, 1], strides = [1, 1]} : vector<32x2xf32> to vector<32x1xf32>
    %335 = arith.addf %333, %334 : vector<32x1xf32>
    %cst_183 = arith.constant 0.000000e+00 : f32
    %336 = vector.broadcast %cst_183 : f32 to vector<32x1xf32>
    %337 = arith.cmpf ogt, %335, %336 : vector<32x1xf32>
    %cst_184 = arith.constant 1.000000e+00 : f32
    %338 = vector.broadcast %cst_184 : f32 to vector<32x1xf32>
    %339 = arith.select %337, %335, %338 : vector<32x1xi1>, vector<32x1xf32>
    %340 = arith.divf %333, %339 : vector<32x1xf32>
    %c0_185 = arith.constant 0 : index
    %c0_186 = arith.constant 0 : index
    %341 = vector.load %arg25[%c0_185, %c0_186] : memref<32x32xf32, #tpu.memory_space<vmem>>, vector<32x32xf32>
    %342 = arith.truncf %341 : vector<32x32xf32> to vector<32x32xbf16>
    %c0_187 = arith.constant 0 : index
    %c0_188 = arith.constant 0 : index
    %c0_189 = arith.constant 0 : index
    %343 = vector.load %arg17[%c0_187, %c0_188, %c0_189] : memref<2x32x32xbf16, #tpu.memory_space<vmem>>, vector<1x32x32xbf16>
    %344 = vector.shape_cast %343 : vector<1x32x32xbf16> to vector<32x32xbf16>
    %cst_190 = arith.constant dense<0.000000e+00> : vector<32x32xf32>
    %345 = tpu.matmul %342, %344, %cst_190 {dimension_numbers = #tpu.dot_dimension_numbers<[1], [0], [0], [1], [0, 0, 1, 1], [], []>} : vector<32x32xbf16>, vector<32x32xbf16>, vector<32x32xf32> -> vector<32x32xf32>
    %c0_191 = arith.constant 0 : index
    %c0_192 = arith.constant 0 : index
    %346 = vector.load %arg18[%c0_191, %c0_192] : memref<2x32xf32, #tpu.memory_space<vmem>>, vector<1x32xf32>
    %347 = vector.broadcast %346 : vector<1x32xf32> to vector<32x32xf32>
    %348 = arith.addf %345, %347 : vector<32x32xf32>
    %cst_193 = arith.constant 0.000000e+00 : f32
    %349 = vector.broadcast %cst_193 : f32 to vector<32x32xf32>
    %350 = arith.maximumf %348, %349 : vector<32x32xf32>
    %c0_194 = arith.constant 0 : index
    %c0_195 = arith.constant 0 : index
    %351 = vector.load %arg19[%c0_194, %c0_195] : memref<2x32xf32, #tpu.memory_space<vmem>>, vector<1x32xf32>
    %352 = vector.broadcast %351 : vector<1x32xf32> to vector<32x32xf32>
    %353 = arith.mulf %350, %352 : vector<32x32xf32>
    %cst_196 = arith.constant dense<0.000000e+00> : vector<32xf32>
    %354 = vector.multi_reduction <add>, %353, %cst_196 [1] : vector<32x32xf32> to vector<32xf32>
    %355 = vector.shape_cast %354 : vector<32xf32> to vector<32x1xf32>
    %c0_197 = arith.constant 0 : index
    %c0_198 = arith.constant 0 : index
    %356 = vector.load %arg20[%c0_197, %c0_198] : memref<2x1xf32, #tpu.memory_space<vmem>>, vector<1x1xf32>
    %357 = vector.broadcast %356 : vector<1x1xf32> to vector<32x1xf32>
    %358 = arith.addf %355, %357 : vector<32x1xf32>
    %cst_199 = arith.constant 0.000000e+00 : f32
    %359 = vector.broadcast %cst_199 : f32 to vector<32x1xf32>
    %360 = arith.subf %359, %358 : vector<32x1xf32>
    %cst_200 = arith.constant 0.000000e+00 : f32
    %361 = vector.broadcast %cst_200 : f32 to vector<32x1xf32>
    %362 = arith.maximumf %360, %361 : vector<32x1xf32>
    %363 = math.absf %360 : vector<32x1xf32>
    %cst_201 = arith.constant 0.000000e+00 : f32
    %364 = vector.broadcast %cst_201 : f32 to vector<32x1xf32>
    %365 = arith.subf %364, %363 : vector<32x1xf32>
    %366 = math.exp %365 : vector<32x1xf32>
    %cst_202 = arith.constant 1.000000e+00 : f32
    %367 = vector.broadcast %cst_202 : f32 to vector<32x1xf32>
    %368 = arith.addf %367, %366 : vector<32x1xf32>
    %369 = math.log %368 : vector<32x1xf32>
    %370 = arith.addf %362, %369 : vector<32x1xf32>
    %cst_203 = arith.constant 0.000000e+00 : f32
    %371 = vector.broadcast %cst_203 : f32 to vector<32x1xf32>
    %372 = arith.subf %371, %370 : vector<32x1xf32>
    %cst_204 = arith.constant 0.000000e+00 : f32
    %373 = vector.broadcast %cst_204 : f32 to vector<32x1xf32>
    %374 = arith.maximumf %358, %373 : vector<32x1xf32>
    %375 = math.absf %358 : vector<32x1xf32>
    %cst_205 = arith.constant 0.000000e+00 : f32
    %376 = vector.broadcast %cst_205 : f32 to vector<32x1xf32>
    %377 = arith.subf %376, %375 : vector<32x1xf32>
    %378 = math.exp %377 : vector<32x1xf32>
    %cst_206 = arith.constant 1.000000e+00 : f32
    %379 = vector.broadcast %cst_206 : f32 to vector<32x1xf32>
    %380 = arith.addf %379, %378 : vector<32x1xf32>
    %381 = math.log %380 : vector<32x1xf32>
    %382 = arith.addf %374, %381 : vector<32x1xf32>
    %cst_207 = arith.constant 0.000000e+00 : f32
    %383 = vector.broadcast %cst_207 : f32 to vector<32x1xf32>
    %384 = arith.subf %383, %382 : vector<32x1xf32>
    %385 = vector.broadcast %8 : f32 to vector<32x1xf32>
    %386 = arith.mulf %385, %340 : vector<32x1xf32>
    %387 = arith.mulf %386, %372 : vector<32x1xf32>
    %cst_208 = arith.constant 1.000000e+00 : f32
    %388 = vector.broadcast %cst_208 : f32 to vector<32x1xf32>
    %389 = arith.subf %388, %340 : vector<32x1xf32>
    %390 = arith.mulf %389, %384 : vector<32x1xf32>
    %391 = arith.addf %387, %390 : vector<32x1xf32>
    %cst_209 = arith.constant 0.000000e+00 : f32
    %392 = vector.broadcast %cst_209 : f32 to vector<32x1xf32>
    %393 = arith.subf %392, %391 : vector<32x1xf32>
    %c0_210 = arith.constant 0 : index
    %c0_211 = arith.constant 0 : index
    %c0_212 = arith.constant 0 : index
    %394 = vector.load %arg21[%c0_210, %c0_211, %c0_212] : memref<2x32x1xf32, #tpu.memory_space<vmem>>, vector<1x32x1xf32>
    %395 = vector.shape_cast %394 : vector<1x32x1xf32> to vector<32x1xf32>
    %396 = arith.mulf %335, %393 : vector<32x1xf32>
    %397 = arith.addf %395, %396 : vector<32x1xf32>
    %c0_213 = arith.constant 0 : index
    %c0_214 = arith.constant 0 : index
    %c0_215 = arith.constant 0 : index
    %398 = vector.load %arg21[%c0_213, %c0_214, %c0_215] : memref<2x32x1xf32, #tpu.memory_space<vmem>>, vector<1x32x1xf32>
    %399 = vector.shape_cast %398 : vector<1x32x1xf32> to vector<32x1xf32>
    %400 = vector.shape_cast %397 : vector<32x1xf32> to vector<1x32x1xf32>
    tpu.vector_store %arg21[%c0_213, %c0_214, %c0_215], %400 {strides = array<i32>} : memref<2x32x1xf32, #tpu.memory_space<vmem>>, vector<1x32x1xf32>,
    %c0_216 = arith.constant 0 : index
    %c0_217 = arith.constant 0 : index
    %c0_218 = arith.constant 0 : index
    %401 = vector.load %arg22[%c0_216, %c0_217, %c0_218] : memref<2x32x1xf32, #tpu.memory_space<vmem>>, vector<1x32x1xf32>
    %402 = vector.shape_cast %401 : vector<1x32x1xf32> to vector<32x1xf32>
    %cst_219 = arith.constant 0.000000e+00 : f32
    %403 = vector.broadcast %cst_219 : f32 to vector<32x1xf32>
    %404 = arith.cmpf oge, %358, %403 : vector<32x1xf32>
    %cst_220 = arith.constant 0.000000e+00 : f32
    %405 = vector.broadcast %cst_220 : f32 to vector<32x1xf32>
    %406 = arith.select %404, %333, %405 : vector<32x1xi1>, vector<32x1xf32>
    %407 = arith.addf %402, %406 : vector<32x1xf32>
    %c0_221 = arith.constant 0 : index
    %c0_222 = arith.constant 0 : index
    %c0_223 = arith.constant 0 : index
    %408 = vector.load %arg22[%c0_221, %c0_222, %c0_223] : memref<2x32x1xf32, #tpu.memory_space<vmem>>, vector<1x32x1xf32>
    %409 = vector.shape_cast %408 : vector<1x32x1xf32> to vector<32x1xf32>
    %410 = vector.shape_cast %407 : vector<32x1xf32> to vector<1x32x1xf32>
    tpu.vector_store %arg22[%c0_221, %c0_222, %c0_223], %410 {strides = array<i32>} : memref<2x32x1xf32, #tpu.memory_space<vmem>>, vector<1x32x1xf32>,
    %c0_224 = arith.constant 0 : index
    %c0_225 = arith.constant 0 : index
    %c0_226 = arith.constant 0 : index
    %411 = vector.load %arg23[%c0_224, %c0_225, %c0_226] : memref<2x32x1xf32, #tpu.memory_space<vmem>>, vector<1x32x1xf32>
    %412 = vector.shape_cast %411 : vector<1x32x1xf32> to vector<32x1xf32>
    %cst_227 = arith.constant 0.000000e+00 : f32
    %413 = vector.broadcast %cst_227 : f32 to vector<32x1xf32>
    %414 = arith.cmpf olt, %358, %413 : vector<32x1xf32>
    %cst_228 = arith.constant 0.000000e+00 : f32
    %415 = vector.broadcast %cst_228 : f32 to vector<32x1xf32>
    %416 = arith.select %414, %334, %415 : vector<32x1xi1>, vector<32x1xf32>
    %417 = arith.addf %412, %416 : vector<32x1xf32>
    %c0_229 = arith.constant 0 : index
    %c0_230 = arith.constant 0 : index
    %c0_231 = arith.constant 0 : index
    %418 = vector.load %arg23[%c0_229, %c0_230, %c0_231] : memref<2x32x1xf32, #tpu.memory_space<vmem>>, vector<1x32x1xf32>
    %419 = vector.shape_cast %418 : vector<1x32x1xf32> to vector<32x1xf32>
    %420 = vector.shape_cast %417 : vector<32x1xf32> to vector<1x32x1xf32>
    tpu.vector_store %arg23[%c0_229, %c0_230, %c0_231], %420 {strides = array<i32>} : memref<2x32x1xf32, #tpu.memory_space<vmem>>, vector<1x32x1xf32>,
    %c0_232 = arith.constant 0 : index
    %c0_233 = arith.constant 0 : index
    %421 = vector.load %arg26[%c0_232, %c0_233] : memref<32x32xf32, #tpu.memory_space<vmem>>, vector<32x32xf32>
    %422 = arith.truncf %421 : vector<32x32xf32> to vector<32x32xbf16>
    %c1_234 = arith.constant 1 : index
    %c0_235 = arith.constant 0 : index
    %c0_236 = arith.constant 0 : index
    %423 = vector.load %arg17[%c1_234, %c0_235, %c0_236] : memref<2x32x32xbf16, #tpu.memory_space<vmem>>, vector<1x32x32xbf16>
    %424 = vector.shape_cast %423 : vector<1x32x32xbf16> to vector<32x32xbf16>
    %cst_237 = arith.constant dense<0.000000e+00> : vector<32x32xf32>
    %425 = tpu.matmul %422, %424, %cst_237 {dimension_numbers = #tpu.dot_dimension_numbers<[1], [0], [0], [1], [0, 0, 1, 1], [], []>} : vector<32x32xbf16>, vector<32x32xbf16>, vector<32x32xf32> -> vector<32x32xf32>
    %c1_238 = arith.constant 1 : index
    %c0_239 = arith.constant 0 : index
    %426 = vector.load %arg18[%c1_238, %c0_239] : memref<2x32xf32, #tpu.memory_space<vmem>>, vector<1x32xf32>
    %427 = vector.broadcast %426 : vector<1x32xf32> to vector<32x32xf32>
    %428 = arith.addf %425, %427 : vector<32x32xf32>
    %cst_240 = arith.constant 0.000000e+00 : f32
    %429 = vector.broadcast %cst_240 : f32 to vector<32x32xf32>
    %430 = arith.maximumf %428, %429 : vector<32x32xf32>
    %c1_241 = arith.constant 1 : index
    %c0_242 = arith.constant 0 : index
    %431 = vector.load %arg19[%c1_241, %c0_242] : memref<2x32xf32, #tpu.memory_space<vmem>>, vector<1x32xf32>
    %432 = vector.broadcast %431 : vector<1x32xf32> to vector<32x32xf32>
    %433 = arith.mulf %430, %432 : vector<32x32xf32>
    %cst_243 = arith.constant dense<0.000000e+00> : vector<32xf32>
    %434 = vector.multi_reduction <add>, %433, %cst_243 [1] : vector<32x32xf32> to vector<32xf32>
    %435 = vector.shape_cast %434 : vector<32xf32> to vector<32x1xf32>
    %c1_244 = arith.constant 1 : index
    %c0_245 = arith.constant 0 : index
    %436 = vector.load %arg20[%c1_244, %c0_245] : memref<2x1xf32, #tpu.memory_space<vmem>>, vector<1x1xf32>
    %437 = vector.broadcast %436 : vector<1x1xf32> to vector<32x1xf32>
    %438 = arith.addf %435, %437 : vector<32x1xf32>
    %cst_246 = arith.constant 0.000000e+00 : f32
    %439 = vector.broadcast %cst_246 : f32 to vector<32x1xf32>
    %440 = arith.subf %439, %438 : vector<32x1xf32>
    %cst_247 = arith.constant 0.000000e+00 : f32
    %441 = vector.broadcast %cst_247 : f32 to vector<32x1xf32>
    %442 = arith.maximumf %440, %441 : vector<32x1xf32>
    %443 = math.absf %440 : vector<32x1xf32>
    %cst_248 = arith.constant 0.000000e+00 : f32
    %444 = vector.broadcast %cst_248 : f32 to vector<32x1xf32>
    %445 = arith.subf %444, %443 : vector<32x1xf32>
    %446 = math.exp %445 : vector<32x1xf32>
    %cst_249 = arith.constant 1.000000e+00 : f32
    %447 = vector.broadcast %cst_249 : f32 to vector<32x1xf32>
    %448 = arith.addf %447, %446 : vector<32x1xf32>
    %449 = math.log %448 : vector<32x1xf32>
    %450 = arith.addf %442, %449 : vector<32x1xf32>
    %cst_250 = arith.constant 0.000000e+00 : f32
    %451 = vector.broadcast %cst_250 : f32 to vector<32x1xf32>
    %452 = arith.subf %451, %450 : vector<32x1xf32>
    %cst_251 = arith.constant 0.000000e+00 : f32
    %453 = vector.broadcast %cst_251 : f32 to vector<32x1xf32>
    %454 = arith.maximumf %438, %453 : vector<32x1xf32>
    %455 = math.absf %438 : vector<32x1xf32>
    %cst_252 = arith.constant 0.000000e+00 : f32
    %456 = vector.broadcast %cst_252 : f32 to vector<32x1xf32>
    %457 = arith.subf %456, %455 : vector<32x1xf32>
    %458 = math.exp %457 : vector<32x1xf32>
    %cst_253 = arith.constant 1.000000e+00 : f32
    %459 = vector.broadcast %cst_253 : f32 to vector<32x1xf32>
    %460 = arith.addf %459, %458 : vector<32x1xf32>
    %461 = math.log %460 : vector<32x1xf32>
    %462 = arith.addf %454, %461 : vector<32x1xf32>
    %cst_254 = arith.constant 0.000000e+00 : f32
    %463 = vector.broadcast %cst_254 : f32 to vector<32x1xf32>
    %464 = arith.subf %463, %462 : vector<32x1xf32>
    %465 = vector.broadcast %8 : f32 to vector<32x1xf32>
    %466 = arith.mulf %465, %340 : vector<32x1xf32>
    %467 = arith.mulf %466, %452 : vector<32x1xf32>
    %cst_255 = arith.constant 1.000000e+00 : f32
    %468 = vector.broadcast %cst_255 : f32 to vector<32x1xf32>
    %469 = arith.subf %468, %340 : vector<32x1xf32>
    %470 = arith.mulf %469, %464 : vector<32x1xf32>
    %471 = arith.addf %467, %470 : vector<32x1xf32>
    %cst_256 = arith.constant 0.000000e+00 : f32
    %472 = vector.broadcast %cst_256 : f32 to vector<32x1xf32>
    %473 = arith.subf %472, %471 : vector<32x1xf32>
    %c1_257 = arith.constant 1 : index
    %c0_258 = arith.constant 0 : index
    %c0_259 = arith.constant 0 : index
    %474 = vector.load %arg21[%c1_257, %c0_258, %c0_259] : memref<2x32x1xf32, #tpu.memory_space<vmem>>, vector<1x32x1xf32>
    %475 = vector.shape_cast %474 : vector<1x32x1xf32> to vector<32x1xf32>
    %476 = arith.mulf %335, %473 : vector<32x1xf32>
    %477 = arith.addf %475, %476 : vector<32x1xf32>
    %c1_260 = arith.constant 1 : index
    %c0_261 = arith.constant 0 : index
    %c0_262 = arith.constant 0 : index
    %478 = vector.load %arg21[%c1_260, %c0_261, %c0_262] : memref<2x32x1xf32, #tpu.memory_space<vmem>>, vector<1x32x1xf32>
    %479 = vector.shape_cast %478 : vector<1x32x1xf32> to vector<32x1xf32>
    %480 = vector.shape_cast %477 : vector<32x1xf32> to vector<1x32x1xf32>
    tpu.vector_store %arg21[%c1_260, %c0_261, %c0_262], %480 {strides = array<i32>} : memref<2x32x1xf32, #tpu.memory_space<vmem>>, vector<1x32x1xf32>,
    %c1_263 = arith.constant 1 : index
    %c0_264 = arith.constant 0 : index
    %c0_265 = arith.constant 0 : index
    %481 = vector.load %arg22[%c1_263, %c0_264, %c0_265] : memref<2x32x1xf32, #tpu.memory_space<vmem>>, vector<1x32x1xf32>
    %482 = vector.shape_cast %481 : vector<1x32x1xf32> to vector<32x1xf32>
    %cst_266 = arith.constant 0.000000e+00 : f32
    %483 = vector.broadcast %cst_266 : f32 to vector<32x1xf32>
    %484 = arith.cmpf oge, %438, %483 : vector<32x1xf32>
    %cst_267 = arith.constant 0.000000e+00 : f32
    %485 = vector.broadcast %cst_267 : f32 to vector<32x1xf32>
    %486 = arith.select %484, %333, %485 : vector<32x1xi1>, vector<32x1xf32>
    %487 = arith.addf %482, %486 : vector<32x1xf32>
    %c1_268 = arith.constant 1 : index
    %c0_269 = arith.constant 0 : index
    %c0_270 = arith.constant 0 : index
    %488 = vector.load %arg22[%c1_268, %c0_269, %c0_270] : memref<2x32x1xf32, #tpu.memory_space<vmem>>, vector<1x32x1xf32>
    %489 = vector.shape_cast %488 : vector<1x32x1xf32> to vector<32x1xf32>
    %490 = vector.shape_cast %487 : vector<32x1xf32> to vector<1x32x1xf32>
    tpu.vector_store %arg22[%c1_268, %c0_269, %c0_270], %490 {strides = array<i32>} : memref<2x32x1xf32, #tpu.memory_space<vmem>>, vector<1x32x1xf32>,
    %c1_271 = arith.constant 1 : index
    %c0_272 = arith.constant 0 : index
    %c0_273 = arith.constant 0 : index
    %491 = vector.load %arg23[%c1_271, %c0_272, %c0_273] : memref<2x32x1xf32, #tpu.memory_space<vmem>>, vector<1x32x1xf32>
    %492 = vector.shape_cast %491 : vector<1x32x1xf32> to vector<32x1xf32>
    %cst_274 = arith.constant 0.000000e+00 : f32
    %493 = vector.broadcast %cst_274 : f32 to vector<32x1xf32>
    %494 = arith.cmpf olt, %438, %493 : vector<32x1xf32>
    %cst_275 = arith.constant 0.000000e+00 : f32
    %495 = vector.broadcast %cst_275 : f32 to vector<32x1xf32>
    %496 = arith.select %494, %334, %495 : vector<32x1xi1>, vector<32x1xf32>
    %497 = arith.addf %492, %496 : vector<32x1xf32>
    %c1_276 = arith.constant 1 : index
    %c0_277 = arith.constant 0 : index
    %c0_278 = arith.constant 0 : index
    %498 = vector.load %arg23[%c1_276, %c0_277, %c0_278] : memref<2x32x1xf32, #tpu.memory_space<vmem>>, vector<1x32x1xf32>
    %499 = vector.shape_cast %498 : vector<1x32x1xf32> to vector<32x1xf32>
    %500 = vector.shape_cast %497 : vector<32x1xf32> to vector<1x32x1xf32>
    tpu.vector_store %arg23[%c1_276, %c0_277, %c0_278], %500 {strides = array<i32>} : memref<2x32x1xf32, #tpu.memory_space<vmem>>, vector<1x32x1xf32>,
    %c1_i32_279 = arith.constant 1 : i32
    return
  }
}

</mosaic_0001>

<bundles_post_ra>
// kernel: tpu_custom_call.1
= control target key start
LH: loop header
LB: loop body
LE: loop exit
PB: predicated region body
PF: predicated region fallthrough
CT: control target
= control target key end

     0   :  { %s5366_s0 = inlined_call_operand.hbm [shape: s32[4], index: 0, kind: input, shape index: {}]   ;;  %s5367_s1 = inlined_call_operand.hbm [shape: s32[4], index: 1, kind: input, shape index: {}]   ;;  %s5368_s2 = inlined_call_operand.hbm [shape: s32[4], index: 2, kind: input, shape index: {}]   ;;  %s5369_s3 = inlined_call_operand.hbm [shape: s32[4], index: 3, kind: input, shape index: {}]   ;;  %s5370_s4 = inlined_call_operand.hbm [shape: s32[128], index: 4, kind: input, shape index: {}]   ;;  %s5371_s5 = inlined_call_operand.hbm [shape: s32[128], index: 5, kind: input, shape index: {}]   ;;  %s5372_s6 = inlined_call_operand.hbm [shape: s32[128], index: 6, kind: input, shape index: {}]   ;;  %s5373_s7 = inlined_call_operand.hbm [shape: s32[32], index: 7, kind: input, shape index: {}]   ;;  %s5374_s8 = inlined_call_operand.<no memory space> [shape: f32[1], index: 8, kind: input, shape index: {}]   ;;  %s5375_s9 = inlined_call_operand.vmem [shape: f32[1,32,2], index: 9, kind: input, shape index: {}]   ;;  %s5376_s10 = inlined_call_operand.hbm [shape: f32[3,2,32], index: 10, kind: input, shape index: {}]   ;;  %s5377_s11 = inlined_call_operand.hbm [shape: f32[2,2,32], index: 11, kind: input, shape index: {}]   ;;  %s5378_s12 = inlined_call_operand.vmem [shape: bf16[4,32,32], index: 12, kind: input, shape index: {}]   ;;  %s5379_s13 = inlined_call_operand.hbm [shape: bf16[4,32,32], index: 13, kind: input, shape index: {}]   ;;  %s5380_s14 = inlined_call_operand.hbm [shape: f32[4,1,32], index: 14, kind: input, shape index: {}]   ;;  %s5381_s15 = inlined_call_operand.hbm [shape: bf16[4,32,32], index: 15, kind: input, shape index: {}]   ;;  %s5382_s16 = inlined_call_operand.hbm [shape: f32[4,1,32], index: 16, kind: input, shape index: {}]   ;;  %s5383_s17 = inlined_call_operand.vmem [shape: bf16[2,32,32], index: 17, kind: input, shape index: {}]   ;;  %s5384_s18 = inlined_call_operand.vmem [shape: f32[2,32], index: 18, kind: input, shape index: {}]   ;;  %s5385_s19 = inlined_call_operand.vmem [shape: f32[2,32], index: 19, kind: input, shape index: {}]   ;;  %s5386_s20 = inlined_call_operand.vmem [shape: f32[2,1], index: 20, kind: input, shape index: {}]   ;;  %s5387_s21 = inlined_call_operand.vmem [shape: f32[2,32,1], index: 21, kind: output, shape index: {0}]   ;;  %s5388_s22 = inlined_call_operand.vmem [shape: f32[2,32,1], index: 22, kind: output, shape index: {1}]   ;;  %s5389_s23 = inlined_call_operand.vmem [shape: f32[2,32,1], index: 23, kind: output, shape index: {2}]  }
   0x1   :  { %5464 = sst [smem:[#allocation74_spill]] %s5366_s0 }
   0x2   :  { %5465 = sst [smem:[#allocation75_spill]] %s5367_s1 }
   0x3   :  { %5466 = sst [smem:[#allocation76_spill]] %s5368_s2 }
   0x4   :  { %5467 = sst [smem:[#allocation77_spill]] %s5369_s3 }
   0x5   :  { %5468 = sst [smem:[#allocation78_spill]] %s5370_s4 }
   0x6   :  { %5469 = sst [smem:[#allocation79_spill]] %s5371_s5 }
   0x7   :  { %5470 = sst [smem:[#allocation80_spill]] %s5372_s6 }
   0x8   :  { %5471 = sst [smem:[#allocation81_spill]] %s5373_s7 }
   0x9   :  { %5472 = sst [smem:[#allocation82_spill]] %s5375_s9 }
   0xa   :  { %5473 = sst [smem:[#allocation83_spill]] %s5378_s12 }
   0xb   :  { %5474 = sst [smem:[#allocation84_spill]] %s5383_s17 }
   0xc   :  { %5475 = sst [smem:[#allocation85_spill]] %s5384_s18 }
   0xd   :  { %5476 = sst [smem:[#allocation86_spill]] %s5385_s19 }
   0xe   :  { %5477 = sst [smem:[#allocation87_spill]] %s5386_s20 }
   0xf   :  { %5478 = sst [smem:[#allocation88_spill]] %s5387_s21 }
  0x10   :  { %5479 = sst [smem:[#allocation89_spill]] %s5388_s22 }
  0x11   :  { %5480 = sst [smem:[#allocation90_spill]] %s5389_s23 }
  0x12   :  { %29 = sst [smem:[#allocation7]] %s5374_s8 }
  0x13   :  { %30 = vsyncpa [#allocation10], 0 }
  0x14   :  { %31 = vsyncpa [#allocation12], 0 }
  0x15   :  { %32 = vsyncpa [#allocation15], 0 }
  0x16   :  { %33 = vsyncpa [#allocation18], 0 }
  0x17   :  { %34 = vsyncpa [#allocation21], 0 }
  0x18   :  { %35 = vsyncpa [#allocation9], 0 }
  0x19   :  { %36 = vsyncpa [#allocation24], 0 }
  0x1a   :  { %37 = vsyncpa [#allocation27], 0 }
  0x1b   :  { %38 = vsyncpa [#allocation30], 0  ;;  %s5481_s5 = sld [smem:[#allocation75_spill]] }
  0x21   :  { %s3115_s1 = scalar_lea.hbm %s5481_s5, 16 }
  0x22   :  { %p3116_p0 = scmp.ne.s32.totalorder %s5481_s5, %s3115_s1  ;;  %p3119_p1 = scmp.lt.u32.totalorder %s3115_s1, %s5481_s5 }
  0x24   :  { %p3121_p2 = pnand %p3119_p1, %p3116_p0 }
  0x26   :  { %3124 = shalt.err (!%p3121_p2)
}
  0x27   :  { %s3361_s8 = smov [#allocation11]   ;;  %s5482_s0 = sld [smem:[#allocation77_spill]] }
  0x28   :  { %54 = dma.hbm_to_smem %s5481_s5, 16, %s3361_s8, [#allocation12]  }
  0x2d   :  { %s3125_s4 = scalar_lea.hbm %s5482_s0, 16 }
  0x2e   :  { %p3126_p3 = scmp.ne.s32.totalorder %s5482_s0, %s3125_s4  ;;  %p3129_p4 = scmp.lt.u32.totalorder %s3125_s4, %s5482_s0 }
  0x30   :  { %p3131_p5 = pnand %p3129_p4, %p3126_p3 }
  0x32   :  { %3134 = shalt.err (!%p3131_p5)
}
  0x33   :  { %s3362_s1 = smov [#allocation14]   ;;  %s5483_s8 = sld [smem:[#allocation79_spill]] }
  0x34   :  { %70 = dma.hbm_to_smem %s5482_s0, 16, %s3362_s1, [#allocation15]  }
  0x39   :  { %s3135_s7 = scalar_lea.hbm %s5483_s8, 16 }
  0x3a   :  { %p3136_p6 = scmp.ne.s32.totalorder %s5483_s8, %s3135_s7  ;;  %p3139_p7 = scmp.lt.u32.totalorder %s3135_s7, %s5483_s8 }
  0x3c   :  { %p3141_p8 = pnand %p3139_p7, %p3136_p6 }
  0x3e   :  { %3144 = shalt.err (!%p3141_p8)
}
  0x3f   :  { %s3363_s4 = smov [#allocation17]   ;;  %s3364_s0 = smov [#allocation23]  }
  0x40   :  { %86 = dma.hbm_to_smem %s5483_s8, 16, %s3363_s4, [#allocation18]  }
  0x41   :  { %s124_s26 = sshll.u32 %s3364_s0, 4  ;;  %s3365_s1 = smov [#allocation26]   ;;  %s125_s26 = int_to_ptr.vmem [resolvable:$true] %s124_s26 }
  0x42   :  { %s150_s2 = sshll.u32 %s3365_s1, 4  ;;  %s3145_s27 = scalar_lea.hbm %s5377_s11, 64  ;;  %s151_s2 = int_to_ptr.vmem [resolvable:$true] %s150_s2 }
  0x43   :  { %p3146_p9 = scmp.ne.s32.totalorder %s5377_s11, %s3145_s27  ;;  %p3149_p10 = scmp.lt.u32.totalorder %s3145_s27, %s5377_s11 }
  0x45   :  { %p3151_p11 = pnand %p3149_p10, %p3146_p9 }
  0x47   :  { %3154 = shalt.err (!%p3151_p11)
}
  0x48   :  { %s3155_s8 = scalar_lea.vmem %s125_s26, 64  ;;  %p3160_p13 = scmp.lt.s32.totalorder %s125_s26, %s125_s26 }
  0x49   :  { %p3156_p12 = scmp.ne.s32.totalorder %s125_s26, %s3155_s8  ;;  %p3161_p0 = scmp.lt.s32.totalorder %s3155_s8, %s3155_s8 }
  0x4b   :  { %p3162_p1 = por %p3161_p0, %p3160_p13 }
  0x4d   :  { %p3163_p2 = pnand %p3162_p1, %p3156_p12 }
  0x4f   :  { %3166 = shalt.err (!%p3163_p2)
}
  0x50   :  { %s5398_s30 = smov 32   ;;  %s3367_s4 = smov 2  }
  0x51   :  { %130 = dma.hbm_to_vmem [thread:$0]  %s5377_s11, 64, %s125_s26, [#allocation24], %s5398_s30, %s5398_s30, %s3367_s4  }
  0x52   :  { %s3167_s6 = scalar_lea.hbm %s5380_s14, 64 }
  0x53   :  { %p3168_p3 = scmp.ne.s32.totalorder %s5380_s14, %s3167_s6  ;;  %p3171_p4 = scmp.lt.u32.totalorder %s3167_s6, %s5380_s14 }
  0x55   :  { %p3173_p5 = pnand %p3171_p4, %p3168_p3 }
  0x57   :  { %3176 = shalt.err (!%p3173_p5)
}
  0x58   :  { %s3177_s7 = scalar_lea.vmem %s151_s2, 64  ;;  %p3182_p7 = scmp.lt.s32.totalorder %s151_s2, %s151_s2 }
  0x59   :  { %p3178_p6 = scmp.ne.s32.totalorder %s151_s2, %s3177_s7  ;;  %p3183_p8 = scmp.lt.s32.totalorder %s3177_s7, %s3177_s7 }
  0x5b   :  { %p3184_p9 = por %p3183_p8, %p3182_p7 }
  0x5d   :  { %p3185_p10 = pnand %p3184_p9, %p3178_p6 }
  0x5f   :  { %3188 = shalt.err (!%p3185_p10)
}
  0x60   :  { %s3368_s11 = smov 16   ;;  %s3369_s26 = smov 1  }
  0x61   :  { %156 = dma.hbm_to_vmem [thread:$0]  %s5380_s14, 64, %s151_s2, [#allocation27], %s3368_s11, %s3368_s11, %s3369_s26  }
  0x62   :  { %s5484_s0 = sld [smem:[#allocation74_spill]] }
  0x68   :  { %s3189_s1 = scalar_lea.hbm %s5484_s0, 16 }
  0x69   :  { %p3190_p11 = scmp.ne.s32.totalorder %s5484_s0, %s3189_s1  ;;  %p3193_p12 = scmp.lt.u32.totalorder %s3189_s1, %s5484_s0 }
  0x6b   :  { %p3195_p13 = pnand %p3193_p12, %p3190_p11 }
  0x6d   :  { %3198 = shalt.err (!%p3195_p13)
}
  0x6e   :  { %s3370_s29 = smov [#allocation8]   ;;  %s5485_s3 = sld [smem:[#allocation76_spill]] }
  0x6f   :  { %46 = dma.hbm_to_smem %s5484_s0, 16, %s3370_s29, [#allocation10]  }
  0x74   :  { %s3199_s8 = scalar_lea.hbm %s5485_s3, 16 }
  0x75   :  { %p3200_p0 = scmp.ne.s32.totalorder %s5485_s3, %s3199_s8  ;;  %p3203_p1 = scmp.lt.u32.totalorder %s3199_s8, %s5485_s3 }
  0x77   :  { %p3205_p2 = pnand %p3203_p1, %p3200_p0 }
  0x79   :  { %3208 = shalt.err (!%p3205_p2)
}
  0x7a   :  { %s3371_s1 = smov [#allocation13]   ;;  %s5486_s29 = sld [smem:[#allocation78_spill]] }
  0x7b   :  { %62 = dma.hbm_to_smem %s5485_s3, 16, %s3371_s1, [#allocation12]  }
  0x80   :  { %s3209_s7 = scalar_lea.hbm %s5486_s29, 16 }
  0x81   :  { %p3210_p3 = scmp.ne.s32.totalorder %s5486_s29, %s3209_s7  ;;  %p3213_p4 = scmp.lt.u32.totalorder %s3209_s7, %s5486_s29 }
  0x83   :  { %p3215_p5 = pnand %p3213_p4, %p3210_p3 }
  0x85   :  { %3218 = shalt.err (!%p3215_p5)
}
  0x86   :  { %s3372_s8 = smov [#allocation16]   ;;  %s5487_s27 = sld [smem:[#allocation80_spill]] }
  0x87   :  { %78 = dma.hbm_to_smem %s5486_s29, 16, %s3372_s8, [#allocation15]  }
  0x8c   :  { %s3219_s28 = scalar_lea.hbm %s5487_s27, 16 }
  0x8d   :  { %p3220_p6 = scmp.ne.s32.totalorder %s5487_s27, %s3219_s28  ;;  %p3223_p7 = scmp.lt.u32.totalorder %s3219_s28, %s5487_s27 }
  0x8f   :  { %p3225_p8 = pnand %p3223_p7, %p3220_p6 }
  0x91   :  { %3228 = shalt.err (!%p3225_p8)
}
  0x92   :  { %s3373_s7 = smov [#allocation19]   ;;  %s5488_s6 = sld [smem:[#allocation81_spill]] }
  0x93   :  { %94 = dma.hbm_to_smem %s5487_s27, 16, %s3373_s7, [#allocation18]  }
  0x98   :  { %s3229_s5 = scalar_lea.hbm %s5488_s6, 16 }
  0x99   :  { %p3230_p9 = scmp.ne.s32.totalorder %s5488_s6, %s3229_s5  ;;  %p3233_p10 = scmp.lt.u32.totalorder %s3229_s5, %s5488_s6 }
  0x9b   :  { %p3235_p11 = pnand %p3233_p10, %p3230_p9 }
  0x9d   :  { %3238 = shalt.err (!%p3235_p11)
}
  0x9e   :  { %s3374_s28 = smov [#allocation20]   ;;  %s3375_s27 = smov [#allocation22]  }
  0x9f   :  { %102 = dma.hbm_to_smem %s5488_s6, 16, %s3374_s28, [#allocation21]  }
  0xa0   :  { %s112_s7 = sshll.u32 %s3375_s27, 4  ;;  %s3376_s24 = smov [#allocation25]   ;;  %s113_s7 = int_to_ptr.vmem [resolvable:$true] %s112_s7 }
  0xa1   :  { %s138_s25 = sshll.u32 %s3376_s24, 4  ;;  %s3239_s3 = scalar_lea.hbm %s5376_s10, 96  ;;  %s3632_s25 = int_to_ptr.vmem [resolvable:$true] %s138_s25 }
  0xa2   :  { %p3240_p12 = scmp.ne.s32.totalorder %s5376_s10, %s3239_s3  ;;  %p3243_p13 = scmp.lt.u32.totalorder %s3239_s3, %s5376_s10 }
  0xa4   :  { %p3245_p0 = pnand %p3243_p13, %p3240_p12 }
  0xa6   :  { %3248 = shalt.err (!%p3245_p0)
}
  0xa7   :  { %s3249_s6 = scalar_lea.vmem %s113_s7, 96  ;;  %p3254_p2 = scmp.lt.s32.totalorder %s113_s7, %s113_s7 }
  0xa8   :  { %p3250_p1 = scmp.ne.s32.totalorder %s113_s7, %s3249_s6  ;;  %p3255_p3 = scmp.lt.s32.totalorder %s3249_s6, %s3249_s6 }
  0xaa   :  { %p3256_p4 = por %p3255_p3, %p3254_p2 }
  0xac   :  { %p3257_p5 = pnand %p3256_p4, %p3250_p1 }
  0xae   :  { %3260 = shalt.err (!%p3257_p5)
}
  0xaf   :  { %s5489_s28 = smov 32   ;;  %s3261_s29 = scalar_lea.hbm %s5379_s13, 1024 }
  0xb0   :  { %118 = dma.hbm_to_vmem [thread:$0]  %s5376_s10, 96, %s113_s7, [#allocation9], %s5489_s28, %s5489_s28, %s3367_s4  }
  0xb1   :  { %p3262_p6 = scmp.ne.s32.totalorder %s5379_s13, %s3261_s29  ;;  %p3265_p7 = scmp.lt.u32.totalorder %s3261_s29, %s5379_s13 }
  0xb3   :  { %p3267_p8 = pnand %p3265_p7, %p3262_p6 }
  0xb5   :  { %3270 = shalt.err (!%p3267_p8)
}
  0xb6   :  { %s3271_s30 = scalar_lea.vmem %s3632_s25, 1024  ;;  %p3276_p10 = scmp.lt.s32.totalorder %s3632_s25, %s3632_s25 }
  0xb7   :  { %p3272_p9 = scmp.ne.s32.totalorder %s3632_s25, %s3271_s30  ;;  %p3277_p11 = scmp.lt.s32.totalorder %s3271_s30, %s3271_s30 }
  0xb9   :  { %p3278_p12 = por %p3277_p11, %p3276_p10 }
  0xbb   :  { %p3279_p13 = pnand %p3278_p12, %p3272_p9 }
  0xbd   :  { %3282 = shalt.err (!%p3279_p13)
}
  0xbe   :  { %s3377_s10 = smov 64   ;;  %s3378_s4 = smov 4  }
  0xbf   :  { %144 = dma.hbm_to_vmem [thread:$0]  %s5379_s13, 1024, %s3632_s25, [#allocation24], %s3377_s10, %s3377_s10, %s3378_s4  }
  0xc0   :  { %s3379_s6 = smov [#allocation28]   ;;  %s3380_s14 = smov [#allocation29]  }
  0xc1   :  { %s162_s28 = sshll.u32 %s3379_s6, 4  ;;  %s174_s2 = sshll.u32 %s3380_s14, 4  ;;  %s163_s28 = int_to_ptr.vmem [resolvable:$true] %s162_s28  ;;  %s3666_s2 = int_to_ptr.vmem [resolvable:$true] %s174_s2 }
  0xc2   :  { %s3283_s29 = scalar_lea.hbm %s5381_s15, 1024 }
  0xc3   :  { %p3284_p0 = scmp.ne.s32.totalorder %s5381_s15, %s3283_s29  ;;  %p3287_p1 = scmp.lt.u32.totalorder %s3283_s29, %s5381_s15 }
  0xc5   :  { %p3289_p2 = pnand %p3287_p1, %p3284_p0 }
  0xc7   :  { %3292 = shalt.err (!%p3289_p2)
}
  0xc8   :  { %s3293_s13 = scalar_lea.vmem %s163_s28, 1024  ;;  %p3298_p4 = scmp.lt.s32.totalorder %s163_s28, %s163_s28 }
  0xc9   :  { %p3294_p3 = scmp.ne.s32.totalorder %s163_s28, %s3293_s13  ;;  %p3299_p5 = scmp.lt.s32.totalorder %s3293_s13, %s3293_s13 }
  0xcb   :  { %p3300_p6 = por %p3299_p5, %p3298_p4 }
  0xcd   :  { %p3301_p7 = pnand %p3300_p6, %p3294_p3 }
  0xcf   :  { %3304 = shalt.err (!%p3301_p7)
}
  0xd0   :  { %168 = dma.hbm_to_vmem [thread:$0]  %s5381_s15, 1024, %s163_s28, [#allocation27], %s3377_s10, %s3377_s10, %s3378_s4  }
  0xd1   :  { %s3305_s6 = scalar_lea.hbm %s5382_s16, 64 }
  0xd2   :  { %p3306_p8 = scmp.ne.s32.totalorder %s5382_s16, %s3305_s6  ;;  %p3309_p9 = scmp.lt.u32.totalorder %s3305_s6, %s5382_s16 }
  0xd4   :  { %p3311_p10 = pnand %p3309_p9, %p3306_p8 }
  0xd6   :  { %3314 = shalt.err (!%p3311_p10)
}
  0xd7   :  { %s3315_s8 = scalar_lea.vmem %s3666_s2, 64  ;;  %p3320_p12 = scmp.lt.s32.totalorder %s3666_s2, %s3666_s2 }
  0xd8   :  { %p3316_p11 = scmp.ne.s32.totalorder %s3666_s2, %s3315_s8  ;;  %p3321_p13 = scmp.lt.s32.totalorder %s3315_s8, %s3315_s8 }
  0xda   :  { %p3322_p0 = por %p3321_p13, %p3320_p12 }
  0xdc   :  { %p3323_p1 = pnand %p3322_p0, %p3316_p11 }
  0xde   :  { %3326 = shalt.err (!%p3323_p1)
}
  0xdf   :  { %180 = dma.hbm_to_vmem [thread:$0]  %s5382_s16, 64, %s3666_s2, [#allocation30], %s3368_s11, %s3368_s11, %s3369_s26  }
  0xe0   :  { %3335 = dma.done.wait [#allocation10], 16  }
  0xe1   :  { %3336 = vsyncadd [#allocation10], 4294967280 }
  0xe2   :  { %3337 = dma.done.wait [#allocation12], 32  }
  0xe3   :  { %3338 = vsyncadd [#allocation12], 4294967264 }
  0xe4   :  { %3339 = dma.done.wait [#allocation15], 32  }
  0xe5   :  { %3340 = vsyncadd [#allocation15], 4294967264 }
  0xe6   :  { %3341 = dma.done.wait [#allocation18], 32  }
  0xe7   :  { %3342 = vsyncadd [#allocation18], 4294967264 }
  0xe8   :  { %3343 = dma.done.wait [#allocation21], 16  }
  0xe9   :  { %3344 = vsyncadd [#allocation21], 4294967280 }
  0xea   :  { %3345 = dma.done.wait [#allocation9], 96  }
  0xeb   :  { %3346 = vsyncadd [#allocation9], 4294967200 }
  0xec   :  { %3347 = dma.done.wait [#allocation24], 1088  }
  0xed   :  { %3348 = vsyncadd [#allocation24], 4294966208 }
  0xee   :  { %3349 = dma.done.wait [#allocation27], 1088  }
  0xef   :  { %3350 = vsyncadd [#allocation27], 4294966208 }
  0xf0   :  { %3351 = dma.done.wait [#allocation30], 64  }
  0xf1   :  { %3352 = vsyncadd [#allocation30], 4294967232 }
  0xf2   :  { %231 = sfence }
  0xf3   :  { %vm233_vm0 = vcmask 7168   ;;  %v3381_v0 = vmov 0.0   ;;  %s3353_s28 = smov 0  }
  0xf4   :  { %234 = vst.msk [vmem:[%s5387_s21] sm:$0xff] %vm233_vm0, %v3381_v0  ;;  %235 = vst.msk [vmem:[%s5387_s21 + $0x8] sm:$0xff] %vm233_vm0, %v3381_v0 }
  0xf5   :  { %236 = vst.msk [vmem:[%s5387_s21 + $0x10] sm:$0xff] %vm233_vm0, %v3381_v0  ;;  %237 = vst.msk [vmem:[%s5387_s21 + $0x18] sm:$0xff] %vm233_vm0, %v3381_v0 }
  0xf6   :  { %238 = vst.msk [vmem:[%s5387_s21 + $0x20] sm:$0xff] %vm233_vm0, %v3381_v0  ;;  %239 = vst.msk [vmem:[%s5387_s21 + $0x28] sm:$0xff] %vm233_vm0, %v3381_v0 }
  0xf7   :  { %240 = vst.msk [vmem:[%s5387_s21 + $0x30] sm:$0xff] %vm233_vm0, %v3381_v0  ;;  %241 = vst.msk [vmem:[%s5387_s21 + $0x38] sm:$0xff] %vm233_vm0, %v3381_v0 }
  0xf8   :  { %242 = vst.msk [vmem:[%s5388_s22] sm:$0xff] %vm233_vm0, %v3381_v0  ;;  %243 = vst.msk [vmem:[%s5388_s22 + $0x8] sm:$0xff] %vm233_vm0, %v3381_v0 }
  0xf9   :  { %244 = vst.msk [vmem:[%s5388_s22 + $0x10] sm:$0xff] %vm233_vm0, %v3381_v0  ;;  %245 = vst.msk [vmem:[%s5388_s22 + $0x18] sm:$0xff] %vm233_vm0, %v3381_v0 }
  0xfa   :  { %246 = vst.msk [vmem:[%s5388_s22 + $0x20] sm:$0xff] %vm233_vm0, %v3381_v0  ;;  %247 = vst.msk [vmem:[%s5388_s22 + $0x28] sm:$0xff] %vm233_vm0, %v3381_v0 }
  0xfb   :  { %248 = vst.msk [vmem:[%s5388_s22 + $0x30] sm:$0xff] %vm233_vm0, %v3381_v0  ;;  %249 = vst.msk [vmem:[%s5388_s22 + $0x38] sm:$0xff] %vm233_vm0, %v3381_v0 }
  0xfc   :  { %250 = vst.msk [vmem:[%s5389_s23] sm:$0xff] %vm233_vm0, %v3381_v0  ;;  %251 = vst.msk [vmem:[%s5389_s23 + $0x8] sm:$0xff] %vm233_vm0, %v3381_v0 }
  0xfd   :  { %252 = vst.msk [vmem:[%s5389_s23 + $0x10] sm:$0xff] %vm233_vm0, %v3381_v0  ;;  %253 = vst.msk [vmem:[%s5389_s23 + $0x18] sm:$0xff] %vm233_vm0, %v3381_v0 }
  0xfe   :  { %254 = vst.msk [vmem:[%s5389_s23 + $0x20] sm:$0xff] %vm233_vm0, %v3381_v0  ;;  %255 = vst.msk [vmem:[%s5389_s23 + $0x28] sm:$0xff] %vm233_vm0, %v3381_v0 }
  0xff   :  { %256 = vst.msk [vmem:[%s5389_s23 + $0x30] sm:$0xff] %vm233_vm0, %v3381_v0  ;;  %257 = vst.msk [vmem:[%s5389_s23 + $0x38] sm:$0xff] %vm233_vm0, %v3381_v0 }
 0x100 LB: > { %s264_s2 = sld [smem:[#allocation11 + %s3355_s28]]  ;;  %vm276_vm1 = vcmask 254976   ;;  %s3355_s28 = sphi %s3353_s28, %s263_s28  }
 0x101   : > { %s268_s3 = sld [smem:[#allocation13 + %s3355_s28]] }
 0x102   : > { %s273_s1 = sld [smem:[#allocation8 + %s3355_s28]]  ;;  %s263_s28 = sadd.s32 1, %s3355_s28  }
 0x103   : > { %p260_p2 = scmp.ge.s32.totalorder %s263_s28, 4  }
 0x104   :  { %s3797_s6 = smov (%p260_p2), 0  }
 0x106   : > { %s2618_s5 = sshll.u32 %s264_s2, 1  ;;  %262 = sbr.rel (!%p260_p2) target bundleno = 256 (0x100), region = 335 }
 0x107   : > { %s2619_s13 = sshll.u32 %s268_s3, 1  ;;  %s266_s25 = scalar_lea.vmem [#allocation22], %s2618_s5 }
 0x108   : > { %v267_v1 = vld [vmem:[%s266_s25] sm:$0x3]  ;;  %s270_s30 = scalar_lea.vmem [#allocation23], %s2619_s13  ;;  %s2620_s7 = sshll.u32 %s273_s1, 1 }
 0x109   : > { %v271_v2 = vld [vmem:[%s270_s30] sm:$0x3]  ;;  %s275_s0 = scalar_lea.vmem [#allocation2], %s2620_s7 }
 0x10a   : > { %v272_v3 = vadd.f32 %v271_v2, %v267_v1 }
 0x10c   : > { %277 = vst.msk [vmem:[%s275_s0] sm:$0x3] %vm276_vm1, %v272_v3 }
 0x10d LB: > { %5490 = sst [smem:[#allocation40_spill]] %s3359_s6  ;;  %s3806_s27 = sshll.u32 %s3359_s6, 5  ;;  %vm294_vm2 = vcmask 253952   ;;  %vm741_vm3 = vcmask 261120   ;;  %vm297_vm4 = vcmask 254977   ;;  %vm1225_vm5 = vcmask 1040384   ;;  %s3359_s6 = sphi %s3797_s6, %s283_s6  }
 0x10e   : > { %s3803_s14 = sld [smem:[#allocation14 + %s3359_s6]]  ;;  %s3810_s29 = sadd.s32 1, %s3806_s27 }
 0x10f   : > { %5492 = sst [smem:[#allocation42_spill]] %s3806_s27  ;;  %s3814_s15 = sadd.s32 2, %s3806_s27 }
 0x110   : > { %s290_s24 = sld [smem:[#allocation19 + %s3806_s27]]  ;;  %s3817_s10 = sadd.s32 3, %s3806_s27 }
 0x111   : > { %s305_s8 = sld [smem:[#allocation19 + %s3810_s29]]  ;;  %s3825_s4 = sadd.s32 4, %s3806_s27 }
 0x112   : > { %s318_s16 = sld [smem:[#allocation19 + %s3814_s15]]  ;;  %s3866_s1 = sadd.s32 7, %s3806_s27 }
 0x113   : > { %s331_s11 = sld [smem:[#allocation19 + %s3817_s10]]  ;;  %s3922_s18 = sadd.s32 14, %s3806_s27 }
 0x114   : > { %5491 = sst [smem:[#allocation41_spill]] %s3803_s14  ;;  %s3822_s26 = sshll.u32 %s3803_s14, 5 }
 0x115   : > { %5493 = sst [smem:[#allocation43_spill]] %s3822_s26  ;;  %s3828_s2 = scalar_lea.vmem [#allocation25], %s3822_s26 }
 0x116   : > { %s2623_s28 = sshll.u32 %s290_s24, 1  ;;  %5494 = sst [smem:[#allocation44_spill]] %s3828_s2  ;;  %v3027_v4 = vld [vmem:[%s3828_s2] sm:$0xff]   ;;  %v3028_v5 = vld [vmem:[%s3828_s2 + $0x8] sm:$0xff]  }
 0x117   : > { %s2625_s3 = sshll.u32 %s305_s8, 1  ;;  %s5495_s12 = sld [smem:[#allocation83_spill]]  ;;  %2917 = vmatprep.subr.bf16.mxu0 %v3027_v4 }
 0x118   : > { %s292_s25 = scalar_lea.vmem [#allocation2], %s2623_s28  ;;  %s2627_s30 = sshll.u32 %s318_s16, 1  ;;  %2918 = vmatpush3.bf16.msra.mxu0 %v3027_v4 }
 0x119   : > { %v3838_v6 = vld [vmem:[%s292_s25] sm:$0x3]  ;;  %s307_s7 = scalar_lea.vmem [#allocation2], %s2625_s3  ;;  %s2629_s0 = sshll.u32 %s331_s11, 1  ;;  %2919 = vmatprep.subr.bf16.mxu0 %v3028_v5 }
 0x11a   : > { %296 = vst.msk [vmem:[#allocation5] sm:$0x1] %vm294_vm2, %v3838_v6  ;;  %v3842_v7 = vld [vmem:[%s307_s7] sm:$0x3]  ;;  %s320_s24 = scalar_lea.vmem [#allocation2], %s2627_s30  ;;  %s333_s8 = scalar_lea.vmem [#allocation2], %s2629_s0 }
 0x11b   : > { %310 = vst.msk [vmem:[#allocation5 + $0x1] sm:$0x1] %vm294_vm2, %v3842_v7  ;;  %v3846_v8 = vld [vmem:[%s320_s24] sm:$0x3]  ;;  %s344_s16 = sld [smem:[#allocation19 + %s3825_s4]]  ;;  %s3857_s28 = sadd.s32 5, %s3806_s27 }
 0x11c   : > { %323 = vst.msk [vmem:[#allocation5 + $0x2] sm:$0x1] %vm294_vm2, %v3846_v8  ;;  %v3853_v10 = vld [vmem:[%s333_s8] sm:$0x3]  ;;  %5496 = sst [smem:[#allocation45_spill]] %s3857_s28  ;;  %2920 = vmatpush3.bf16.msra.mxu0 %v3028_v5  ;;  %s3863_s3 = sadd.s32 6, %s3806_s27 }
 0x11d   : > { %s3836_s13 = scalar_lea.vmem %s5495_s12, %s3822_s26  ;;  %336 = vst.msk [vmem:[#allocation5 + $0x3] sm:$0x1] %vm294_vm2, %v3853_v10  ;;  %s357_s11 = sld [smem:[#allocation19 + %s3857_s28]] }
 0x11e   : > { %v3849_v9 = vld [vmem:[%s3836_s13] sm:$0xff]   ;;  %5497 = sst [smem:[#allocation46_spill]] %s3863_s3  ;;  %s3872_s30 = sadd.s32 8, %s3806_s27  ;;  %v3030_v45 = vld [vmem:[%s3836_s13 + $0x8] sm:$0xff]   ;;  %299 = vst.msk [vmem:[#allocation6 - $0x1] sm:$0x2] %vm297_vm4, %v3838_v6 }
 0x11f   : > { %s370_s5 = sld [smem:[#allocation19 + %s3863_s3]]  ;;  %2925 = vmatprep.subr.bf16.mxu0 %v3849_v9  ;;  %s3875_s0 = sadd.s32 9, %s3806_s27  ;;  %312 = vst.msk [vmem:[#allocation6] sm:$0x2] %vm297_vm4, %v3842_v7  ;;  %325 = vst.msk [vmem:[#allocation6 + $0x1] sm:$0x2] %vm297_vm4, %v3846_v8 }
 0x120   : > { %s383_s25 = sld [smem:[#allocation19 + %s3866_s1]]  ;;  %s3971_s6 = sadd.s32 19, %s3806_s27  ;;  %338 = vst.msk [vmem:[#allocation6 + $0x2] sm:$0x2] %vm297_vm4, %v3853_v10 }
 0x121   : > { %s2631_s7 = sshll.u32 %s344_s16, 1  ;;  %s396_s12 = sld [smem:[#allocation19 + %s3872_s30]] }
 0x122   : > { %s346_s8 = scalar_lea.vmem [#allocation2], %s2631_s7  ;;  %5502 = sst [smem:[#allocation51_spill]] %s3922_s18 }
 0x123   : > { %s2633_s24 = sshll.u32 %s357_s11, 1  ;;  %v3877_v11 = vld [vmem:[%s346_s8] sm:$0x3]  ;;  %s409_s11 = sld [smem:[#allocation19 + %s3875_s0]] }
 0x124   : > { %349 = vst.msk [vmem:[#allocation5 + $0x4] sm:$0x1] %vm294_vm2, %v3877_v11  ;;  %s359_s21 = scalar_lea.vmem [#allocation2], %s2633_s24  ;;  %s3894_s24 = sadd.s32 10, %s3806_s27 }
 0x125   : > { %v3882_v12 = vld [vmem:[%s359_s21] sm:$0x3]  ;;  %s2635_s23 = sshll.u32 %s370_s5, 1  ;;  %5498 = sst [smem:[#allocation47_spill]] %s3894_s24  ;;  %351 = vst.msk [vmem:[#allocation6 + $0x3] sm:$0x2] %vm297_vm4, %v3877_v11 }
 0x126   : > { %362 = vst.msk [vmem:[#allocation5 + $0x5] sm:$0x1] %vm294_vm2, %v3882_v12  ;;  %s2637_s16 = sshll.u32 %s383_s25, 1  ;;  %s372_s22 = scalar_lea.vmem [#allocation2], %s2635_s23 }
 0x127   : > { %v3886_v13 = vld [vmem:[%s372_s22] sm:$0x3]  ;;  %s385_s7 = scalar_lea.vmem [#allocation2], %s2637_s16  ;;  %s3897_s21 = sadd.s32 11, %s3806_s27  ;;  %364 = vst.msk [vmem:[#allocation6 + $0x4] sm:$0x2] %vm297_vm4, %v3882_v12 }
 0x128   : > { %375 = vst.msk [vmem:[#allocation5 + $0x6] sm:$0x1] %vm294_vm2, %v3886_v13  ;;  %v3891_v14 = vld [vmem:[%s385_s7] sm:$0x3]  ;;  %5499 = sst [smem:[#allocation48_spill]] %s3897_s21  ;;  %s2639_s22 = sshll.u32 %s396_s12, 1 }
 0x129   : > { %388 = vst.msk [vmem:[#allocation5 + $0x7] sm:$0x1] %vm294_vm2, %v3891_v14  ;;  %s422_s23 = sld [smem:[#allocation19 + %s3894_s24]]  ;;  %s398_s25 = scalar_lea.vmem [#allocation2], %s2639_s22 }
 0x12a   : > { %s435_s5 = sld [smem:[#allocation19 + %s3897_s21]]  ;;  %v3903_v15 = vld [vmem:[%s398_s25] sm:$0x3]  ;;  %s3906_s8 = sadd.s32 12, %s3806_s27  ;;  %377 = vst.msk [vmem:[#allocation6 + $0x5] sm:$0x2] %vm297_vm4, %v3886_v13 }
 0x12b   : > { %5500 = sst [smem:[#allocation49_spill]] %s3906_s8  ;;  %401 = vst.msk [vmem:[#allocation5 + $0x8] sm:$0x1] %vm294_vm2, %v3903_v15  ;;  %s2641_s16 = sshll.u32 %s409_s11, 1 }
 0x12c   : > { %s3911_s7 = sadd.s32 13, %s3806_s27  ;;  %s448_s20 = sld [smem:[#allocation19 + %s3906_s8]]  ;;  %390 = vst.msk [vmem:[#allocation6 + $0x6] sm:$0x2] %vm297_vm4, %v3891_v14  ;;  %403 = vst.msk [vmem:[#allocation6 + $0x7] sm:$0x2] %vm297_vm4, %v3903_v15 }
 0x12d   : > { %5501 = sst [smem:[#allocation50_spill]] %s3911_s7  ;;  %s411_s9 = scalar_lea.vmem [#allocation2], %s2641_s16 }
 0x12e   : > { %v3914_v16 = vld [vmem:[%s411_s9] sm:$0x3]  ;;  %s461_s22 = sld [smem:[#allocation19 + %s3911_s7]]  ;;  %s3930_s16 = sadd.s32 15, %s3806_s27 }
 0x12f   : > { %s2643_s12 = sshll.u32 %s422_s23, 1  ;;  %414 = vst.msk [vmem:[#allocation5 + $0x9] sm:$0x1] %vm294_vm2, %v3914_v16  ;;  %s474_s9 = sld [smem:[#allocation19 + %s3922_s18]] }
 0x130   : > { %s424_s25 = scalar_lea.vmem [#allocation2], %s2643_s12  ;;  %s2645_s19 = sshll.u32 %s435_s5, 1  ;;  %v710_v23 = vld [vmem:[#allocation5] sm:$0xff]  ;;  %416 = vst.msk [vmem:[#allocation6 + $0x8] sm:$0x2] %vm297_vm4, %v3914_v16 }
 0x131   : > { %v3919_v17 = vld [vmem:[%s424_s25] sm:$0x3]  ;;  %s437_s11 = scalar_lea.vmem [#allocation2], %s2645_s19  ;;  %5503 = sst [smem:[#allocation52_spill]] %s3930_s16 }
 0x132   : > { %427 = vst.msk [vmem:[#allocation5 + $0xa] sm:$0x1] %vm294_vm2, %v3919_v17  ;;  %v3926_v18 = vld [vmem:[%s437_s11] sm:$0x3]  ;;  %s2647_s23 = sshll.u32 %s448_s20, 1  ;;  %s487_s12 = sld [smem:[#allocation19 + %s3930_s16]] }
 0x133   : > { %440 = vst.msk [vmem:[#allocation5 + $0xb] sm:$0x1] %vm294_vm2, %v3926_v18  ;;  %s450_s25 = scalar_lea.vmem [#allocation2], %s2647_s23  ;;  %5507 = sst [smem:[#allocation56_spill]] %s3971_s6 }
 0x134   : > { %v3935_v19 = vld [vmem:[%s450_s25] sm:$0x3]  ;;  %s2649_s5 = sshll.u32 %s461_s22, 1  ;;  %s3985_s2 = sadd.s32 22, %s3806_s27  ;;  %429 = vst.msk [vmem:[#allocation6 + $0x9] sm:$0x2] %vm297_vm4, %v3919_v17 }
 0x135   : > { %453 = vst.msk [vmem:[#allocation5 + $0xc] sm:$0x1] %vm294_vm2, %v3935_v19  ;;  %s463_s19 = scalar_lea.vmem [#allocation2], %s2649_s5  ;;  %s2651_s11 = sshll.u32 %s474_s9, 1 }
 0x136   : > { %v3939_v20 = vld [vmem:[%s463_s19] sm:$0x3]  ;;  %s476_s17 = scalar_lea.vmem [#allocation2], %s2651_s11  ;;  %s3952_s9 = sadd.s32 16, %s3806_s27  ;;  %442 = vst.msk [vmem:[#allocation6 + $0xa] sm:$0x2] %vm297_vm4, %v3926_v18 }
 0x137   : > { %466 = vst.msk [vmem:[#allocation5 + $0xd] sm:$0x1] %vm294_vm2, %v3939_v20  ;;  %v3943_v21 = vld [vmem:[%s476_s17] sm:$0x3]  ;;  %5504 = sst [smem:[#allocation53_spill]] %s3952_s9  ;;  %s3956_s17 = sadd.s32 17, %s3806_s27 }
 0x138   : > { %s2653_s20 = sshll.u32 %s487_s12, 1  ;;  %479 = vst.msk [vmem:[#allocation5 + $0xe] sm:$0x1] %vm294_vm2, %v3943_v21  ;;  %5505 = sst [smem:[#allocation54_spill]] %s3956_s17 }
 0x139   : > { %s489_s22 = scalar_lea.vmem [#allocation2], %s2653_s20  ;;  %s500_s23 = sld [smem:[#allocation19 + %s3952_s9]]  ;;  %455 = vst.msk [vmem:[#allocation6 + $0xb] sm:$0x2] %vm297_vm4, %v3935_v19  ;;  %468 = vst.msk [vmem:[#allocation6 + $0xc] sm:$0x2] %vm297_vm4, %v3939_v20 }
 0x13a   : > { %v3947_v22 = vld [vmem:[%s489_s22] sm:$0x3]  ;;  %s513_s12 = sld [smem:[#allocation19 + %s3956_s17]]  ;;  %s3963_s11 = sadd.s32 18, %s3806_s27  ;;  %481 = vst.msk [vmem:[#allocation6 + $0xd] sm:$0x2] %vm297_vm4, %v3943_v21 }
 0x13b   : > { %492 = vst.msk [vmem:[#allocation5 + $0xf] sm:$0x1] %vm294_vm2, %v3947_v22  ;;  %5506 = sst [smem:[#allocation55_spill]] %s3963_s11 }
 0x13c   : > { %s526_s22 = sld [smem:[#allocation19 + %s3963_s11]]  ;;  %s3993_s11 = sadd.s32 24, %s3806_s27  ;;  %494 = vst.msk [vmem:[#allocation6 + $0xe] sm:$0x2] %vm297_vm4, %v3947_v22 }
 0x13d   : > { %5510 = sst [smem:[#allocation59_spill]] %s3985_s2 }
 0x13e   : > { %5512 = sst [smem:[#allocation61_spill]] %s3993_s11 }
 0x13f   : > { %s2655_s25 = sshll.u32 %s500_s23, 1  ;;  %s539_s23 = sld [smem:[#allocation19 + %s3971_s6]] }
 0x140   : > { %s2657_s5 = sshll.u32 %s513_s12, 1  ;;  %s502_s19 = scalar_lea.vmem [#allocation2], %s2655_s25 }
 0x141   : > { %v3960_v26 = vld [vmem:[%s502_s19] sm:$0x3]  ;;  %s515_s20 = scalar_lea.vmem [#allocation2], %s2657_s5  ;;  %s3977_s12 = sadd.s32 20, %s3806_s27 }
 0x142   : > { %v711_v24 = vld [vmem:[#allocation5 + $0x8] sm:$0xff]  ;;  %505 = vst.msk [vmem:[#allocation5 + $0x10] sm:$0x1] %vm294_vm2, %v3960_v26  ;;  %5508 = sst [smem:[#allocation57_spill]] %s3977_s12  ;;  %s3981_s19 = sadd.s32 21, %s3806_s27 }
 0x143   : > { %v714_v25 = vpack.c.bf16 %v711_v24, %v710_v23  ;;  %v3967_v27 = vld [vmem:[%s515_s20] sm:$0x3]  ;;  %s552_s25 = sld [smem:[#allocation19 + %s3977_s12]]  ;;  %s3989_s20 = sadd.s32 23, %s3806_s27  ;;  %507 = vst.msk [vmem:[#allocation6 + $0xf] sm:$0x2] %vm297_vm4, %v3960_v26 }
 0x144   : > { %518 = vst.msk [vmem:[#allocation5 + $0x11] sm:$0x1] %vm294_vm2, %v3967_v27  ;;  %5509 = sst [smem:[#allocation58_spill]] %s3981_s19  ;;  %s2659_s6 = sshll.u32 %s526_s22, 1 }
 0x145   : > { %2921 = vmatprep.mubr.msk.bf16.mxu0 %vm741_vm3, %v714_v25  ;;  %s565_s14 = sld [smem:[#allocation19 + %s3981_s19]]  ;;  %s2661_s9 = sshll.u32 %s539_s23, 1  ;;  %520 = vst.msk [vmem:[#allocation6 + $0x10] sm:$0x2] %vm297_vm4, %v3967_v27  ;;  %v970_v27 = vld [vmem:[#allocation6] sm:$0xff] }
 0x146   : > { %s578_s5 = sld [smem:[#allocation19 + %s3985_s2]]  ;;  %s528_s16 = scalar_lea.vmem [#allocation2], %s2659_s6 }
 0x147   : > { %5511 = sst [smem:[#allocation60_spill]] %s3989_s20  ;;  %v3996_v28 = vld [vmem:[%s528_s16] sm:$0x3]  ;;  %s541_s19 = scalar_lea.vmem [#allocation2], %s2661_s9 }
 0x148   : > { %s591_s26 = sld [smem:[#allocation19 + %s3989_s20]]  ;;  %531 = vst.msk [vmem:[#allocation5 + $0x12] sm:$0x1] %vm294_vm2, %v3996_v28  ;;  %v4000_v29 = vld [vmem:[%s541_s19] sm:$0x3]  ;;  %s4033_s19 = sadd.s32 27, %s3806_s27 }
 0x149   : > { %s604_s17 = sld [smem:[#allocation19 + %s3993_s11]]  ;;  %s2663_s12 = sshll.u32 %s552_s25, 1  ;;  %544 = vst.msk [vmem:[#allocation5 + $0x13] sm:$0x1] %vm294_vm2, %v4000_v29 }
 0x14a   : > { %s554_s20 = scalar_lea.vmem [#allocation2], %s2663_s12  ;;  %5515 = sst [smem:[#allocation64_spill]] %s4033_s19  ;;  %533 = vst.msk [vmem:[#allocation6 + $0x11] sm:$0x2] %vm297_vm4, %v3996_v28  ;;  %546 = vst.msk [vmem:[#allocation6 + $0x12] sm:$0x2] %vm297_vm4, %v4000_v29 }
 0x14b   : > { %s2665_s2 = sshll.u32 %s565_s14, 1  ;;  %v4004_v30 = vld [vmem:[%s554_s20] sm:$0x3]  ;;  %s4037_s20 = sadd.s32 28, %s3806_s27 }
 0x14c   : > { %s2667_s22 = sshll.u32 %s578_s5, 1  ;;  %557 = vst.msk [vmem:[#allocation5 + $0x14] sm:$0x1] %vm294_vm2, %v4004_v30  ;;  %s567_s6 = scalar_lea.vmem [#allocation2], %s2665_s2  ;;  %v971_v28 = vld [vmem:[#allocation6 + $0x8] sm:$0xff] }
 0x14d   : > { %v4008_v31 = vld [vmem:[%s567_s6] sm:$0x3]  ;;  %s580_s14 = scalar_lea.vmem [#allocation2], %s2667_s22  ;;  %s4019_s2 = sadd.s32 25, %s3806_s27  ;;  %559 = vst.msk [vmem:[#allocation6 + $0x13] sm:$0x2] %vm297_vm4, %v4004_v30 }
 0x14e   : > { %s2669_s16 = sshll.u32 %s591_s26, 1  ;;  %570 = vst.msk [vmem:[#allocation5 + $0x15] sm:$0x1] %vm294_vm2, %v4008_v31  ;;  %v4012_v32 = vld [vmem:[%s580_s14] sm:$0x3]  ;;  %5513 = sst [smem:[#allocation62_spill]] %s4019_s2 }
 0x14f   : > { %s2671_s9 = sshll.u32 %s604_s17, 1  ;;  %583 = vst.msk [vmem:[#allocation5 + $0x16] sm:$0x1] %vm294_vm2, %v4012_v32  ;;  %s593_s23 = scalar_lea.vmem [#allocation2], %s2669_s16 }
 0x150   : > { %v4016_v33 = vld [vmem:[%s593_s23] sm:$0x3]  ;;  %s606_s26 = scalar_lea.vmem [#allocation2], %s2671_s9  ;;  %s617_s12 = sld [smem:[#allocation19 + %s4019_s2]]  ;;  %572 = vst.msk [vmem:[#allocation6 + $0x14] sm:$0x2] %vm297_vm4, %v4008_v31 }
 0x151   : > { %596 = vst.msk [vmem:[#allocation5 + $0x17] sm:$0x1] %vm294_vm2, %v4016_v33  ;;  %v4023_v34 = vld [vmem:[%s606_s26] sm:$0x3]  ;;  %s4027_s17 = sadd.s32 26, %s3806_s27  ;;  %s643_s5 = sld [smem:[#allocation19 + %s4033_s19]] }
 0x152   : > { %5514 = sst [smem:[#allocation63_spill]] %s4027_s17  ;;  %609 = vst.msk [vmem:[#allocation5 + $0x18] sm:$0x1] %vm294_vm2, %v4023_v34  ;;  %s4041_s6 = sadd.s32 29, %s3806_s27 }
 0x153   : > { %s630_s25 = sld [smem:[#allocation19 + %s4027_s17]]  ;;  %s4045_s14 = sadd.s32 30, %s3806_s27  ;;  %585 = vst.msk [vmem:[#allocation6 + $0x15] sm:$0x2] %vm297_vm4, %v4012_v32  ;;  %598 = vst.msk [vmem:[#allocation6 + $0x16] sm:$0x2] %vm297_vm4, %v4016_v33  ;;  %v974_v33 = vpack.c.bf16 %v971_v28, %v970_v27 }
 0x154   : > { %5516 = sst [smem:[#allocation65_spill]] %s4037_s20  ;;  %s4049_s23 = sadd.s32 31, %s3806_s27  ;;  %611 = vst.msk [vmem:[#allocation6 + $0x17] sm:$0x2] %vm297_vm4, %v4023_v34 }
 0x155   : > { %s656_s22 = sld [smem:[#allocation19 + %s4037_s20]] }
 0x156   : > { %5517 = sst [smem:[#allocation66_spill]] %s4041_s6  ;;  %s2673_s26 = sshll.u32 %s617_s12, 1 }
 0x157   : > { %s669_s16 = sld [smem:[#allocation19 + %s4041_s6]]  ;;  %s619_s11 = scalar_lea.vmem [#allocation2], %s2673_s26 }
 0x158   : > { %5518 = sst [smem:[#allocation67_spill]] %s4045_s14  ;;  %v4052_v35 = vld [vmem:[%s619_s11] sm:$0x3]  ;;  %s2677_s19 = sshll.u32 %s643_s5, 1  ;;  %v712_v42 = vld [vmem:[#allocation5 + $0x10] sm:$0xff] }
 0x159   : > { %s682_s9 = sld [smem:[#allocation19 + %s4045_s14]]  ;;  %s2675_s2 = sshll.u32 %s630_s25, 1  ;;  %622 = vst.msk [vmem:[#allocation5 + $0x19] sm:$0x1] %vm294_vm2, %v4052_v35 }
 0x15a   : > { %5519 = sst [smem:[#allocation68_spill]] %s4049_s23  ;;  %s632_s20 = scalar_lea.vmem [#allocation2], %s2675_s2  ;;  %624 = vst.msk [vmem:[#allocation6 + $0x18] sm:$0x2] %vm297_vm4, %v4052_v35  ;;  %v972_v35 = vld [vmem:[#allocation6 + $0x10] sm:$0xff] }
 0x15b   : > { %s695_s17 = sld [smem:[#allocation19 + %s4049_s23]]  ;;  %v4056_v36 = vld [vmem:[%s632_s20] sm:$0x3]  ;;  %s2679_s6 = sshll.u32 %s656_s22, 1 }
 0x15c   : > { %635 = vst.msk [vmem:[#allocation5 + $0x1a] sm:$0x1] %vm294_vm2, %v4056_v36  ;;  %s645_s14 = scalar_lea.vmem [#allocation2], %s2677_s19  ;;  %s658_s11 = scalar_lea.vmem [#allocation2], %s2679_s6 }
 0x15d   : > { %v4060_v37 = vld [vmem:[%s645_s14] sm:$0x3]  ;;  %s2681_s12 = sshll.u32 %s669_s16, 1  ;;  %s314_s22 = sld [smem:[#allocation17 + %s3814_s15]]  ;;  %637 = vst.msk [vmem:[#allocation6 + $0x19] sm:$0x2] %vm297_vm4, %v4056_v36 }
 0x15e   : > { %648 = vst.msk [vmem:[#allocation5 + $0x1b] sm:$0x1] %vm294_vm2, %v4060_v37  ;;  %v4064_v38 = vld [vmem:[%s658_s11] sm:$0x3]  ;;  %s671_s2 = scalar_lea.vmem [#allocation2], %s2681_s12  ;;  %s327_s6 = sld [smem:[#allocation17 + %s3817_s10]] }
 0x15f   : > { %5520 = vst [vmem:[#allocation69_spill] sm:$0xff] %v4064_v38  ;;  %s2683_s25 = sshll.u32 %s682_s9, 1  ;;  %661 = vst.msk [vmem:[#allocation5 + $0x1c] sm:$0x1] %vm294_vm2, %v4064_v38  ;;  %v4068_v39 = vld [vmem:[%s671_s2] sm:$0x3] }
 0x160   : > { %5521 = vst [vmem:[#allocation70_spill] sm:$0xff] %v4068_v39  ;;  %674 = vst.msk [vmem:[#allocation5 + $0x1d] sm:$0x1] %vm294_vm2, %v4068_v39  ;;  %s684_s5 = scalar_lea.vmem [#allocation2], %s2683_s25  ;;  %s4087_s16 = sld [smem:[#allocation17 + %s3825_s4]] }
 0x161   : > { %s2685_s19 = sshll.u32 %s695_s17, 1  ;;  %v4072_v40 = vld [vmem:[%s684_s5] sm:$0x3]  ;;  %s301_s17 = sld [smem:[#allocation17 + %s3810_s29]]  ;;  %650 = vst.msk [vmem:[#allocation6 + $0x1a] sm:$0x2] %vm297_vm4, %v4060_v37 }
 0x162   : > { %5522 = vst [vmem:[#allocation71_spill] sm:$0xff] %v4072_v40  ;;  %687 = vst.msk [vmem:[#allocation5 + $0x1e] sm:$0x1] %vm294_vm2, %v4072_v40  ;;  %s697_s20 = scalar_lea.vmem [#allocation2], %s2685_s19  ;;  %s4090_s14 = sld [smem:[#allocation17 + %s3857_s28]]  ;;  %v3035_v37 = vld [vmem:[%s3836_s13 + $0x10] sm:$0xff]  }
 0x163   : > { %v4076_v41 = vld [vmem:[%s697_s20] sm:$0x3]  ;;  %s4093_s9 = sld [smem:[#allocation17 + %s3863_s3]]  ;;  %s2626_s25 = sshll.u32 %s314_s22, 1 }
 0x164   : > { %5523 = vst [vmem:[#allocation72_spill] sm:$0xff] %v4076_v41  ;;  %700 = vst.msk [vmem:[#allocation5 + $0x1f] sm:$0x1] %vm294_vm2, %v4076_v41  ;;  %s4096_s26 = sld [smem:[#allocation17 + %s3866_s1]]  ;;  %s316_s20 = scalar_lea.vmem [#allocation2], %s2626_s25 }
 0x165   : > { %s286_s12 = sld [smem:[#allocation17 + %s3806_s27]]  ;;  %v4104_v47 = vld [vmem:[%s316_s20] sm:$0x3]  ;;  %s2628_s3 = sshll.u32 %s327_s6, 1 }
 0x166   : > { %s4100_s2 = sld [smem:[#allocation17 + %s3872_s30]]  ;;  %322 = vst.msk [vmem:[#allocation3 + $0x2] sm:$0x1] %vm294_vm2, %v4104_v47  ;;  %s2630_s6 = sshll.u32 %s4087_s16, 1  ;;  %v5544_v6 = vld [vmem:[#allocation69_spill] sm:$0xff] }
 0x167   : > { %s2624_s11 = sshll.u32 %s301_s17, 1  ;;  %s5524_s5 = sld [smem:[#allocation52_spill]]  ;;  %324 = vst.msk [vmem:[#allocation4 + $0x1] sm:$0x2] %vm297_vm4, %v4104_v47  ;;  %663 = vst.msk [vmem:[#allocation6 + $0x1b] sm:$0x2] %vm297_vm4, %v5544_v6 }
 0x168   : > { %s303_s19 = scalar_lea.vmem [#allocation2], %s2624_s11  ;;  %s4107_s28 = sld [smem:[#allocation17 + %s3875_s0]]  ;;  %v5546_v8 = vld [vmem:[#allocation70_spill] sm:$0xff] }
 0x169   : > { %v4102_v46 = vld [vmem:[%s303_s19] sm:$0x3]  ;;  %s4114_s17 = sld [smem:[#allocation17 + %s3894_s24]]  ;;  %s329_s11 = scalar_lea.vmem [#allocation2], %s2628_s3  ;;  %676 = vst.msk [vmem:[#allocation6 + $0x1c] sm:$0x2] %vm297_vm4, %v5546_v8 }
 0x16a   : > { %309 = vst.msk [vmem:[#allocation3 + $0x1] sm:$0x1] %vm294_vm2, %v4102_v46  ;;  %s4117_s22 = sld [smem:[#allocation17 + %s3897_s21]]  ;;  %v4119_v48 = vld [vmem:[%s329_s11] sm:$0x3]  ;;  %s342_s3 = scalar_lea.vmem [#allocation2], %s2630_s6 }
 0x16b   : > { %v713_v43 = vld [vmem:[#allocation5 + $0x18] sm:$0xff]  ;;  %s4122_s25 = sld [smem:[#allocation17 + %s3906_s8]]  ;;  %335 = vst.msk [vmem:[#allocation3 + $0x3] sm:$0x1] %vm294_vm2, %v4119_v48  ;;  %s2622_s27 = sshll.u32 %s286_s12, 1  ;;  %v5547_v10 = vld [vmem:[#allocation71_spill] sm:$0xff] }
 0x16c   : > { %v715_v44 = vpack.c.bf16 %v713_v43, %v712_v42  ;;  %s4128_s19 = sld [smem:[#allocation17 + %s3911_s7]]  ;;  %s288_s21 = scalar_lea.vmem [#allocation2], %s2622_s27  ;;  %v4138_v50 = vld [vmem:[%s342_s3] sm:$0x3]  ;;  %311 = vst.msk [vmem:[#allocation4] sm:$0x2] %vm297_vm4, %v4102_v46 }
 0x16d   : > { %s4131_s20 = sld [smem:[#allocation17 + %s3922_s18]]  ;;  %v4136_v49 = vld [vmem:[%s288_s21] sm:$0x3]  ;;  %s2632_s11 = sshll.u32 %s4090_s14, 1  ;;  %348 = vst.msk [vmem:[#allocation3 + $0x4] sm:$0x1] %vm294_vm2, %v4138_v50 }
 0x16e   : > { %2922 = vmatmul.mubr.msk.bf16.vlgmr.msra.gmra.mrb[0].mxu0 %vm741_vm3, %v715_v44  ;;  %s4134_s24 = sld [smem:[#allocation17 + %s5524_s5]]  ;;  %s2634_s8 = sshll.u32 %s4093_s9, 1  ;;  %295 = vst.msk [vmem:[#allocation3] sm:$0x1] %vm294_vm2, %v4136_v49  ;;  %v5548_v11 = vld [vmem:[#allocation72_spill] sm:$0xff] }
 0x16f   : > { %2926 = vmatpush3.bf16.msra.mxu0 %v3849_v9  ;;  %s355_s16 = scalar_lea.vmem [#allocation2], %s2632_s11  ;;  %s368_s12 = scalar_lea.vmem [#allocation2], %s2634_s8  ;;  %298 = vst.msk [vmem:[#allocation4 - $0x1] sm:$0x2] %vm297_vm4, %v4136_v49  ;;  %337 = vst.msk [vmem:[#allocation4 + $0x2] sm:$0x2] %vm297_vm4, %v4119_v48 }
 0x170   : > { %2927 = vmatprep.subr.bf16.mxu0 %v3030_v45  ;;  %v4146_v51 = vld [vmem:[%s355_s16] sm:$0x3]  ;;  %s2636_s27 = sshll.u32 %s4096_s26, 1  ;;  %s2638_s21 = sshll.u32 %s4100_s2, 1  ;;  %350 = vst.msk [vmem:[#allocation4 + $0x3] sm:$0x2] %vm297_vm4, %v4138_v50 }
 0x171   : > { %v4148_v52 = vld [vmem:[%s368_s12] sm:$0x3]  ;;  %361 = vst.msk [vmem:[#allocation3 + $0x5] sm:$0x1] %vm294_vm2, %v4146_v51  ;;  %s381_s14 = scalar_lea.vmem [#allocation2], %s2636_s27  ;;  %s394_s9 = scalar_lea.vmem [#allocation2], %s2638_s21 }
 0x172   : > { %374 = vst.msk [vmem:[#allocation3 + $0x6] sm:$0x1] %vm294_vm2, %v4148_v52  ;;  %v4156_v53 = vld [vmem:[%s381_s14] sm:$0x3]  ;;  %s2640_s6 = sshll.u32 %s4107_s28, 1  ;;  %s2642_s8 = sshll.u32 %s4114_s17, 1 }
 0x173   : > { %2928 = vmatpush3.bf16.msra.mxu0 %v3030_v45  ;;  %v4158_v54 = vld [vmem:[%s394_s9] sm:$0x3]  ;;  %387 = vst.msk [vmem:[#allocation3 + $0x7] sm:$0x1] %vm294_vm2, %v4156_v53  ;;  %s407_s26 = scalar_lea.vmem [#allocation2], %s2640_s6  ;;  %s420_s2 = scalar_lea.vmem [#allocation2], %s2642_s8 }
 0x174   : > { %400 = vst.msk [vmem:[#allocation3 + $0x8] sm:$0x1] %vm294_vm2, %v4158_v54  ;;  %v4166_v55 = vld [vmem:[%s407_s26] sm:$0x3]  ;;  %s2644_s3 = sshll.u32 %s4117_s22, 1  ;;  %s2646_s11 = sshll.u32 %s4122_s25, 1 }
 0x175   : > { %v4168_v56 = vld [vmem:[%s420_s2] sm:$0x3]  ;;  %s5525_s28 = sld [smem:[#allocation53_spill]]  ;;  %413 = vst.msk [vmem:[#allocation3 + $0x9] sm:$0x1] %vm294_vm2, %v4166_v55  ;;  %s433_s17 = scalar_lea.vmem [#allocation2], %s2644_s3 }
 0x176   : > { %426 = vst.msk [vmem:[#allocation3 + $0xa] sm:$0x1] %vm294_vm2, %v4168_v56  ;;  %s5526_s16 = sld [smem:[#allocation54_spill]]  ;;  %v4176_v57 = vld [vmem:[%s433_s17] sm:$0x3]  ;;  %s446_s12 = scalar_lea.vmem [#allocation2], %s2646_s11 }
 0x177   : > { %v4178_v58 = vld [vmem:[%s446_s12] sm:$0x3]  ;;  %s5527_s27 = sld [smem:[#allocation55_spill]]  ;;  %s2648_s21 = sshll.u32 %s4128_s19, 1  ;;  %439 = vst.msk [vmem:[#allocation3 + $0xb] sm:$0x1] %vm294_vm2, %v4176_v57 }
 0x178   : > { %s5528_s14 = sld [smem:[#allocation56_spill]]  ;;  %s2650_s22 = sshll.u32 %s4131_s20, 1  ;;  %452 = vst.msk [vmem:[#allocation3 + $0xc] sm:$0x1] %vm294_vm2, %v4178_v58  ;;  %v3036_v46 = vld [vmem:[%s3836_s13 + $0x18] sm:$0xff]  }
 0x179   : > { %s5529_s25 = sld [smem:[#allocation57_spill]]  ;;  %s5530_s9 = sld [smem:[#allocation58_spill]]  ;;  %363 = vst.msk [vmem:[#allocation4 + $0x4] sm:$0x2] %vm297_vm4, %v4146_v51  ;;  %376 = vst.msk [vmem:[#allocation4 + $0x5] sm:$0x2] %vm297_vm4, %v4148_v52 }
 0x17a   : > { %s459_s6 = scalar_lea.vmem [#allocation2], %s2648_s21  ;;  %s5531_s8 = sld [smem:[#allocation59_spill]]  ;;  %v704_v62 = vld [vmem:[#allocation3] sm:$0xff]  ;;  %389 = vst.msk [vmem:[#allocation4 + $0x6] sm:$0x2] %vm297_vm4, %v4156_v53 }
 0x17b   : > { %v4186_v59 = vld [vmem:[%s459_s6] sm:$0x3]  ;;  %s5532_s26 = sld [smem:[#allocation60_spill]]  ;;  %s472_s2 = scalar_lea.vmem [#allocation2], %s2650_s22  ;;  %402 = vst.msk [vmem:[#allocation4 + $0x7] sm:$0x2] %vm297_vm4, %v4158_v54 }
 0x17c   : > { %s5533_s3 = sld [smem:[#allocation61_spill]]  ;;  %v4188_v60 = vld [vmem:[%s472_s2] sm:$0x3]  ;;  %s5534_s19 = sld [smem:[#allocation62_spill]]  ;;  %465 = vst.msk [vmem:[#allocation3 + $0xd] sm:$0x1] %vm294_vm2, %v4186_v59 }
 0x17d   : > { %s2652_s11 = sshll.u32 %s4134_s24, 1  ;;  %s496_s20 = sld [smem:[#allocation17 + %s5525_s28]]  ;;  %478 = vst.msk [vmem:[#allocation3 + $0xe] sm:$0x1] %vm294_vm2, %v4188_v60 }
 0x17e   : > { %s5535_s17 = sld [smem:[#allocation63_spill]]  ;;  %s485_s21 = scalar_lea.vmem [#allocation2], %s2652_s11  ;;  %415 = vst.msk [vmem:[#allocation4 + $0x8] sm:$0x2] %vm297_vm4, %v4166_v55  ;;  %428 = vst.msk [vmem:[#allocation4 + $0x9] sm:$0x2] %vm297_vm4, %v4168_v56 }
 0x17f   : > { %s509_s12 = sld [smem:[#allocation17 + %s5526_s16]]  ;;  %v4197_v61 = vld [vmem:[%s485_s21] sm:$0x3]  ;;  %441 = vst.msk [vmem:[#allocation4 + $0xa] sm:$0x2] %vm297_vm4, %v4176_v57 }
 0x180   : > { %s522_s6 = sld [smem:[#allocation17 + %s5527_s27]]  ;;  %491 = vst.msk [vmem:[#allocation3 + $0xf] sm:$0x1] %vm294_vm2, %v4197_v61 }
 0x181   : > { %s535_s5 = sld [smem:[#allocation17 + %s5528_s14]]  ;;  %454 = vst.msk [vmem:[#allocation4 + $0xb] sm:$0x2] %vm297_vm4, %v4178_v58  ;;  %467 = vst.msk [vmem:[#allocation4 + $0xc] sm:$0x2] %vm297_vm4, %v4186_v59 }
 0x182   : > { %s548_s22 = sld [smem:[#allocation17 + %s5529_s25]]  ;;  %480 = vst.msk [vmem:[#allocation4 + $0xd] sm:$0x2] %vm297_vm4, %v4188_v60  ;;  %493 = vst.msk [vmem:[#allocation4 + $0xe] sm:$0x2] %vm297_vm4, %v4197_v61 }
 0x183   : > { %s4205_s2 = sld [smem:[#allocation17 + %s5530_s9]]  ;;  %s2654_s16 = sshll.u32 %s496_s20, 1  ;;  %689 = vst.msk [vmem:[#allocation6 + $0x1d] sm:$0x2] %vm297_vm4, %v5547_v10  ;;  %702 = vst.msk [vmem:[#allocation6 + $0x1e] sm:$0x2] %vm297_vm4, %v5548_v11 }
 0x184   : > { %s4208_s24 = sld [smem:[#allocation17 + %s5531_s8]]  ;;  %s498_s14 = scalar_lea.vmem [#allocation2], %s2654_s16 }
 0x185   : > { %s4211_s28 = sld [smem:[#allocation17 + %s5532_s26]]  ;;  %s2656_s21 = sshll.u32 %s509_s12, 1  ;;  %v4222_v63 = vld [vmem:[%s498_s14] sm:$0x3] }
 0x186   : > { %s4214_s18 = sld [smem:[#allocation17 + %s5533_s3]]  ;;  %s2658_s25 = sshll.u32 %s522_s6, 1  ;;  %504 = vst.msk [vmem:[#allocation3 + $0x10] sm:$0x1] %vm294_vm2, %v4222_v63 }
 0x187   : > { %s4217_s7 = sld [smem:[#allocation17 + %s5534_s19]]  ;;  %s511_s8 = scalar_lea.vmem [#allocation2], %s2656_s21  ;;  %v705_v1 = vld [vmem:[#allocation3 + $0x8] sm:$0xff]  ;;  %506 = vst.msk [vmem:[#allocation4 + $0xf] sm:$0x2] %vm297_vm4, %v4222_v63 }
 0x188   : > { %s4220_s11 = sld [smem:[#allocation17 + %s5535_s17]]  ;;  %v4226_v0 = vld [vmem:[%s511_s8] sm:$0x3]  ;;  %s2660_s3 = sshll.u32 %s535_s5, 1  ;;  %v708_v3 = vpack.c.bf16 %v705_v1, %v704_v62 }
 0x189   : > { %517 = vst.msk [vmem:[#allocation3 + $0x11] sm:$0x1] %vm294_vm2, %v4226_v0  ;;  %s524_s20 = scalar_lea.vmem [#allocation2], %s2658_s25  ;;  %s2662_s16 = sshll.u32 %s548_s22, 1 }
 0x18a   : > { %v4230_v2 = vld [vmem:[%s524_s20] sm:$0x3]  ;;  %s537_s14 = scalar_lea.vmem [#allocation2], %s2660_s3  ;;  %s2664_s8 = sshll.u32 %s4205_s2, 1  ;;  %2929 = vmatprep.mubr.msk.bf16.mxu0 %vm741_vm3, %v708_v3  ;;  %519 = vst.msk [vmem:[#allocation4 + $0x10] sm:$0x2] %vm297_vm4, %v4226_v0 }
 0x18b   : > { %530 = vst.msk [vmem:[#allocation3 + $0x12] sm:$0x1] %vm294_vm2, %v4230_v2  ;;  %v4234_v4 = vld [vmem:[%s537_s14] sm:$0x3]  ;;  %s550_s5 = scalar_lea.vmem [#allocation2], %s2662_s16  ;;  %s2666_s25 = sshll.u32 %s4208_s24, 1 }
 0x18c   : > { %543 = vst.msk [vmem:[#allocation3 + $0x13] sm:$0x1] %vm294_vm2, %v4234_v4  ;;  %v4239_v5 = vld [vmem:[%s550_s5] sm:$0x3]  ;;  %s563_s12 = scalar_lea.vmem [#allocation2], %s2664_s8  ;;  %s2668_s3 = sshll.u32 %s4211_s28, 1 }
 0x18d   : > { %556 = vst.msk [vmem:[#allocation3 + $0x14] sm:$0x1] %vm294_vm2, %v4239_v5  ;;  %v4245_v9 = vld [vmem:[%s563_s12] sm:$0x3]  ;;  %s5536_s6 = sld [smem:[#allocation64_spill]]  ;;  %s576_s22 = scalar_lea.vmem [#allocation2], %s2666_s25 }
 0x18e   : > { %569 = vst.msk [vmem:[#allocation3 + $0x15] sm:$0x1] %vm294_vm2, %v4245_v9  ;;  %v4250_v23 = vld [vmem:[%s576_s22] sm:$0x3]  ;;  %s2670_s2 = sshll.u32 %s4214_s18, 1  ;;  %s5537_s24 = sld [smem:[#allocation65_spill]] }
 0x18f   : > { %582 = vst.msk [vmem:[#allocation3 + $0x16] sm:$0x1] %vm294_vm2, %v4250_v23  ;;  %s5538_s21 = sld [smem:[#allocation66_spill]]  ;;  %s589_s20 = scalar_lea.vmem [#allocation2], %s2668_s3  ;;  %v973_v36 = vld [vmem:[#allocation6 + $0x18] sm:$0xff] }
 0x190   : > { %v4255_v24 = vld [vmem:[%s589_s20] sm:$0x3]  ;;  %s5539_s16 = sld [smem:[#allocation67_spill]]  ;;  %s2672_s14 = sshll.u32 %s4217_s7, 1  ;;  %532 = vst.msk [vmem:[#allocation4 + $0x11] sm:$0x2] %vm297_vm4, %v4230_v2 }
 0x191   : > { %595 = vst.msk [vmem:[#allocation3 + $0x17] sm:$0x1] %vm294_vm2, %v4255_v24  ;;  %s602_s28 = scalar_lea.vmem [#allocation2], %s2670_s2  ;;  %s2674_s8 = sshll.u32 %s4220_s11, 1 }
 0x192   : > { %v4260_v25 = vld [vmem:[%s602_s28] sm:$0x3]  ;;  %s615_s18 = scalar_lea.vmem [#allocation2], %s2672_s14  ;;  %s628_s25 = scalar_lea.vmem [#allocation2], %s2674_s8  ;;  %545 = vst.msk [vmem:[#allocation4 + $0x12] sm:$0x2] %vm297_vm4, %v4234_v4 }
 0x193   : > { %608 = vst.msk [vmem:[#allocation3 + $0x18] sm:$0x1] %vm294_vm2, %v4260_v25  ;;  %v4265_v42 = vld [vmem:[%s615_s18] sm:$0x3]  ;;  %s639_s5 = sld [smem:[#allocation17 + %s5536_s6]] }
 0x194   : > { %621 = vst.msk [vmem:[#allocation3 + $0x19] sm:$0x1] %vm294_vm2, %v4265_v42  ;;  %v4270_v43 = vld [vmem:[%s628_s25] sm:$0x3]  ;;  %s652_s7 = sld [smem:[#allocation17 + %s5537_s24]] }
 0x195   : > { %s665_s12 = sld [smem:[#allocation17 + %s5538_s21]]  ;;  %634 = vst.msk [vmem:[#allocation3 + $0x1a] sm:$0x1] %vm294_vm2, %v4270_v43 }
 0x196   : > { %s678_s3 = sld [smem:[#allocation17 + %s5539_s16]]  ;;  %558 = vst.msk [vmem:[#allocation4 + $0x13] sm:$0x2] %vm297_vm4, %v4239_v5  ;;  %571 = vst.msk [vmem:[#allocation4 + $0x14] sm:$0x2] %vm297_vm4, %v4245_v9 }
 0x197   : > { %s691_s11 = sld [smem:[#allocation17 + %s4049_s23]]  ;;  %584 = vst.msk [vmem:[#allocation4 + $0x15] sm:$0x2] %vm297_vm4, %v4250_v23  ;;  %597 = vst.msk [vmem:[#allocation4 + $0x16] sm:$0x2] %vm297_vm4, %v4255_v24 }
 0x198   : > { %s5540_s18 = sld [smem:[#allocation43_spill]]  ;;  %v706_v41 = vld [vmem:[#allocation3 + $0x10] sm:$0xff]  ;;  %610 = vst.msk [vmem:[#allocation4 + $0x17] sm:$0x2] %vm297_vm4, %v4260_v25  ;;  %623 = vst.msk [vmem:[#allocation4 + $0x18] sm:$0x2] %vm297_vm4, %v4265_v42 }
 0x199   : > { %s2676_s22 = sshll.u32 %s639_s5, 1  ;;  %636 = vst.msk [vmem:[#allocation4 + $0x19] sm:$0x2] %vm297_vm4, %v4270_v43  ;;  %s4488_s23 = sld [smem:[#allocation16 + %s3866_s1]] }
 0x19a   : > { %s2678_s2 = sshll.u32 %s652_s7, 1  ;;  %s641_s20 = scalar_lea.vmem [#allocation2], %s2676_s22 }
 0x19b   : > { %v4278_v44 = vld [vmem:[%s641_s20] sm:$0x3]  ;;  %s2680_s14 = sshll.u32 %s665_s12, 1  ;;  %s654_s28 = scalar_lea.vmem [#allocation2], %s2678_s2 }
 0x19c   : > { %647 = vst.msk [vmem:[#allocation3 + $0x1b] sm:$0x1] %vm294_vm2, %v4278_v44  ;;  %v4282_v45 = vld [vmem:[%s654_s28] sm:$0x3]  ;;  %s2682_s8 = sshll.u32 %s678_s3, 1  ;;  %s667_s25 = scalar_lea.vmem [#allocation2], %s2680_s14 }
 0x19d   : > { %660 = vst.msk [vmem:[#allocation3 + $0x1c] sm:$0x1] %vm294_vm2, %v4282_v45  ;;  %v4286_v62 = vld [vmem:[%s667_s25] sm:$0x3]  ;;  %s2684_s5 = sshll.u32 %s691_s11, 1  ;;  %s680_s7 = scalar_lea.vmem [#allocation2], %s2682_s8 }
 0x19e   : > { %5541 = vst [vmem:[#allocation73_spill] sm:$0xff] %v4286_v62  ;;  %673 = vst.msk [vmem:[#allocation3 + $0x1d] sm:$0x1] %vm294_vm2, %v4286_v62  ;;  %v4290_v1 = vld [vmem:[%s680_s7] sm:$0x3]  ;;  %s693_s12 = scalar_lea.vmem [#allocation2], %s2684_s5 }
 0x19f   : > { %686 = vst.msk [vmem:[#allocation3 + $0x1e] sm:$0x1] %vm294_vm2, %v4290_v1  ;;  %v4294_v3 = vld [vmem:[%s693_s12] sm:$0x3]  ;;  %s4300_s3 = scalar_lea.vmem [#allocation28], %s5540_s18  ;;  %s5542_s11 = sld [smem:[#allocation44_spill]] }
 0x1a0   : > { %699 = vst.msk [vmem:[#allocation3 + $0x1f] sm:$0x1] %vm294_vm2, %v4294_v3  ;;  %v3031_v62 = vld [vmem:[%s4300_s3] sm:$0xff]   ;;  %v3032_v38 = vld [vmem:[%s4300_s3 + $0x8] sm:$0xff]   ;;  %s5543_s22 = sld [smem:[#allocation41_spill]]  ;;  %v3037_v50 = vld [vmem:[%s4300_s3 + $0x10] sm:$0xff]  }
 0x1a1   : > { %2933 = vmatprep.subr.bf16.mxu1 %v3031_v62  ;;  %649 = vst.msk [vmem:[#allocation4 + $0x1a] sm:$0x2] %vm297_vm4, %v4278_v44  ;;  %662 = vst.msk [vmem:[#allocation4 + $0x1b] sm:$0x2] %vm297_vm4, %v4282_v45  ;;  %v966_v47 = vld [vmem:[#allocation4 + $0x10] sm:$0xff]  ;;  %2957 = vmatprep.subr.bf16.mxu0 %v3037_v50  ;;  %v3038_v51 = vld [vmem:[%s4300_s3 + $0x18] sm:$0xff]  }
 0x1a2   : > { %2934 = vmatpush3.bf16.msra.mxu1 %v3031_v62  ;;  %688 = vst.msk [vmem:[#allocation4 + $0x1d] sm:$0x2] %vm297_vm4, %v4290_v1  ;;  %701 = vst.msk [vmem:[#allocation4 + $0x1e] sm:$0x2] %vm297_vm4, %v4294_v3  ;;  %s5549_s14 = sld [smem:[#allocation45_spill]]  ;;  %s5550_s28 = sld [smem:[#allocation46_spill]] }
 0x1a3   : > { %2935 = vmatprep.subr.bf16.mxu1 %v3032_v38  ;;  %s5551_s8 = sld [smem:[#allocation42_spill]]  ;;  %s5552_s18 = sld [smem:[#allocation47_spill]] }
 0x1a4   : > { %s4467_s25 = sld [smem:[#allocation16 + %s3810_s29]] }
 0x1a5   : > { %v5545_v7 = vld [vmem:[#allocation73_spill] sm:$0xff]  ;;  %v3033_v12 = vld [vmem:[%s5542_s11 + $0x10] sm:$0xff]   ;;  %v3034_v34 = vld [vmem:[%s5542_s11 + $0x18] sm:$0xff]   ;;  %s4470_s5 = sld [smem:[#allocation16 + %s3814_s15]] }
 0x1a6   : > { %2936 = vmatpush3.bf16.msra.mxu1 %v3032_v38  ;;  %675 = vst.msk [vmem:[#allocation4 + $0x1c] sm:$0x2] %vm297_vm4, %v5545_v7  ;;  %s2686_s2 = sshll.u32 %s5543_s22, 1  ;;  %v964_v38 = vld [vmem:[#allocation4] sm:$0xff]  ;;  %s4473_s7 = sld [smem:[#allocation16 + %s3817_s10]] }
 0x1a7   : > { %v707_v40 = vld [vmem:[#allocation3 + $0x18] sm:$0xff]  ;;  %2941 = vmatprep.subr.bf16.mxu1 %v3033_v12  ;;  %s4436_s20 = scalar_lea.vmem [#allocation26], %s2686_s2  ;;  %s4452_s13 = scalar_lea.vmem [#allocation29], %s2686_s2 }
 0x1a8   : > { %v709_v39 = vpack.c.bf16 %v707_v40, %v706_v41  ;;  %v2698_v13 = vld [vmem:[%s4436_s20] ss:$0 sm:$0xff]  ;;  %v975_v40 = vpack.c.bf16 %v973_v36, %v972_v35  ;;  %v2727_v61 = vld [vmem:[%s4436_s20 + $0x1] ss:$0 sm:$0xff]  ;;  %s4476_s12 = sld [smem:[#allocation16 + %s3825_s4]] }
 0x1a9   : > { %v2700_v52 = vld [vmem:[%s4452_s13] ss:$0 sm:$0xff]  ;;  %s4479_s3 = sld [smem:[#allocation16 + %s5549_s14]] }
 0x1aa   : > { %2930 = vmatmul.mubr.msk.bf16.vlgmr.msra.gmra.mrb[0].mxu0 %vm741_vm3, %v709_v39  ;;  %v965_v39 = vld [vmem:[#allocation4 + $0x8] sm:$0xff]  ;;  %s4482_s11 = sld [smem:[#allocation16 + %s5550_s28]] }
 0x1ab   : > { %v968_v41 = vpack.c.bf16 %v965_v39, %v964_v38  ;;  %2958 = vmatpush3.bf16.msra.mxu0 %v3037_v50  ;;  %s5553_s20 = sld [smem:[#allocation48_spill]]  ;;  %s5554_s15 = sld [smem:[#allocation49_spill]] }
 0x1ac   : > { %2959 = vmatprep.subr.bf16.mxu0 %v3038_v51  ;;  %s4493_s21 = sld [smem:[#allocation16 + %s3872_s30]] }
 0x1ad   : > { %v967_v48 = vld [vmem:[#allocation4 + $0x18] sm:$0xff]  ;;  %s4496_s4 = sld [smem:[#allocation16 + %s3875_s0]] }
 0x1ae   : > { %v969_v49 = vpack.c.bf16 %v967_v48, %v966_v47  ;;  %s4499_s24 = sld [smem:[#allocation16 + %s5551_s8]] }
 0x1af   : > { %2960 = vmatpush3.bf16.msra.mxu0 %v3038_v51  ;;  %s4502_s14 = sld [smem:[#allocation16 + %s5552_s18]] }
 0x1b0   : > { %s5555_s28 = sld [smem:[#allocation50_spill]]  ;;  %s5556_s30 = sld [smem:[#allocation51_spill]] }
 0x1b1   : > { %s4513_s0 = sld [smem:[#allocation16 + %s5553_s20]] }
 0x1b2   : > { %s4516_s8 = sld [smem:[#allocation16 + %s5554_s15]] }
 0x1b3   : > { %s5558_s18 = sld [smem:[#allocation52_spill]]  ;;  %s5562_s29 = sld [smem:[#allocation56_spill]] }
 0x1b6   : > { %s4530_s20 = sld [smem:[#allocation16 + %s5555_s28]] }
 0x1b7   : > { %s4533_s15 = sld [smem:[#allocation16 + %s5556_s30]] }
 0x1b8   : > { %5557 = sst [smem:[#allocation55_spill]] %s4516_s8  ;;  %s5560_s28 = sld [smem:[#allocation53_spill]] }
 0x1b9   : > { %s4540_s1 = sld [smem:[#allocation16 + %s5558_s18]]  ;;  %s2741_s18 = sshll.u32 %s4499_s24, 1 }
 0x1ba   : > { %s5561_s30 = sld [smem:[#allocation54_spill]]  ;;  %s1229_s2 = scalar_lea.vmem [#allocation2], %s2741_s18 }
 0x1bc   : > { %5559 = sst [smem:[#allocation58_spill]] %s4530_s20  ;;  %s5564_s20 = sshll.u32 %s4467_s25, 1 }
 0x1bd   : > { %s2755_s24 = sshll.u32 %s4533_s15, 1  ;;  %s1238_s8 = scalar_lea.vmem [#allocation2], %s5564_s20 }
 0x1be   : > { %s4593_s10 = sld [smem:[#allocation16 + %s5560_s28]]  ;;  %s5565_s20 = sshll.u32 %s4470_s5, 1 }
 0x1bf   : > { %s2756_s16 = sshll.u32 %s4540_s1, 1  ;;  %s4615_s25 = sld [smem:[#allocation16 + %s5562_s29]] }
 0x1c0   : > { %s4596_s22 = sld [smem:[#allocation16 + %s5561_s30]]  ;;  %s5566_s5 = sshll.u32 %s4473_s7, 1 }
 0x1c1   : > { %s1256_s29 = scalar_lea.vmem [#allocation2], %s5566_s5  ;;  %s5567_s28 = sld [smem:[#allocation59_spill]] }
 0x1c2   : > { %s5568_s30 = sshll.u32 %s4476_s12, 1  ;;  %s5569_s7 = sshll.u32 %s4479_s3, 1 }
 0x1c3   : > { %s1265_s18 = scalar_lea.vmem [#allocation2], %s5568_s30  ;;  %s4665_s12 = sld [smem:[#allocation16 + %s5530_s9]] }
 0x1c4   : > { %s4694_s9 = sld [smem:[#allocation16 + %s5532_s26]]  ;;  %s5573_s30 = sshll.u32 %s4493_s21, 1 }
 0x1c5   : > { %s4714_s26 = sld [smem:[#allocation16 + %s5535_s17]] }
 0x1c6   : > { %s5575_s21 = sld [smem:[#allocation55_spill]] }
 0x1c7   : > { %s4668_s3 = sld [smem:[#allocation16 + %s5567_s28]] }
 0x27d   : > { %v2931_v14 = vpop.f32.mrb[0].mxu0 }
 0x27e   : > { %v874_v15 = vadd.f32 %v2931_v14, %v2698_v13  ;;  %v849_v16 = vpop.f32.mrb[1].mxu0 }
 0x27f   : > { %v872_v17 = vadd.f32 %v2698_v13, %v849_v16  ;;  %v2932_v18 = vpop.f32.mrb[2].mxu0 }
 0x280   : > { %v875_v19 = vadd.f32 %v2932_v18, %v2698_v13  ;;  %v852_v20 = vpop.f32.mrb[3].mxu0  ;;  %v878_v22 = vmax.f32 %v874_v15, 0.0 }
 0x281   : > { %v873_v21 = vadd.f32 %v2698_v13, %v852_v20  ;;  %v876_v29 = vmax.f32 %v872_v17, 0.0  ;;  %v4527_v20 = vld [vmem:[%s4452_s13 + $0x1] ss:$0 sm:$0xff]  ;;  %s5563_s13 = sld [smem:[#allocation57_spill]] }
 0x282   : > { %v879_v26 = vmax.f32 %v875_v19, 0.0 }
 0x283   : > { %v877_v30 = vmax.f32 %v873_v21, 0.0 }
 0x284   : > { %v881_v31 = vpack.c.bf16 %v879_v26, %v878_v22 }
 0x285   : > { %v880_v32 = vpack.c.bf16 %v877_v30, %v876_v29 }
 0x287   : > { %2937 = vmatprep.mubr.msk.bf16.mxu1 %vm741_vm3, %v880_v32 }
 0x288   : > { %2938 = vmatmul.mubr.msk.bf16.vlgmr.msra.gmra.mrb[0].mxu1 %vm741_vm3, %v881_v31 }
 0x289   : > { %2942 = vmatpush3.bf16.msra.mxu1 %v3033_v12  ;;  %2945 = vmatprep.mubr.msk.bf16.mxu1 %vm741_vm3, %v974_v33 }
 0x28a   : > { %2943 = vmatprep.subr.bf16.mxu1 %v3034_v34 }
 0x28d   : > { %2944 = vmatpush3.bf16.msra.mxu1 %v3034_v34 }
 0x28e   : > { %2949 = vmatprep.subr.bf16.mxu1 %v3035_v37 }
 0x290   : > { %2946 = vmatmul.mubr.msk.bf16.vlgmr.msra.gmra.mrb[4].mxu1 %vm741_vm3, %v975_v40 }
 0x291   : > { %2950 = vmatpush3.bf16.msra.mxu1 %v3035_v37  ;;  %2953 = vmatprep.mubr.msk.bf16.mxu1 %vm741_vm3, %v968_v41 }
 0x292   : > { %2951 = vmatprep.subr.bf16.mxu1 %v3036_v46 }
 0x295   : > { %2952 = vmatpush3.bf16.msra.mxu1 %v3036_v46 }
 0x29c   : > { %2954 = vmatmul.mubr.msk.bf16.vlgmr.msra.gmra.mrb[4].mxu1 %vm741_vm3, %v969_v49 }
 0x35b   : > { %v2939_v53 = vpop.f32.mrb[0].mxu1 }
 0x35c   : > { %v4455_v54 = vadd.f32 %v2939_v53, %v2700_v52  ;;  %v948_v55 = vpop.f32.mrb[1].mxu1 }
 0x35d   : > { %v4457_v56 = vadd.f32 %v2700_v52, %v948_v55  ;;  %v2940_v57 = vpop.f32.mrb[2].mxu1 }
 0x35e   : > { %v951_v58 = vpop.f32.mrb[3].mxu1  ;;  %v4459_v59 = vadd.f32 %v2940_v57, %v2700_v52  ;;  %v1373_v1 = vrot.slane %v4455_v54, 1  ;;  %v1380_v3 = vrot.slane %v4455_v54, 2  ;;  %v1389_v6 = vrot.slane %v4455_v54, 3 }
 0x35f   : > { %v4461_v60 = vadd.f32 %v2700_v52, %v951_v58  ;;  %v1398_v7 = vrot.slane %v4455_v54, 4  ;;  %v1407_v8 = vrot.slane %v4455_v54, 5  ;;  %v1416_v10 = vrot.slane %v4455_v54, 6 }
 0x360   : > { %v1425_v11 = vrot.slane %v4455_v54, 7  ;;  %v1233_v12 = vrot.slane %v4457_v56, 1  ;;  %v1240_v13 = vrot.slane %v4457_v56, 2  ;;  %v1249_v14 = vrot.slane %v4457_v56, 3 }
 0x361   : > { %v1258_v15 = vrot.slane %v4457_v56, 4  ;;  %v1267_v16 = vrot.slane %v4457_v56, 5  ;;  %v1276_v17 = vrot.slane %v4457_v56, 6  ;;  %v1285_v18 = vrot.slane %v4457_v56, 7 }
 0x362   : > { %v1443_v19 = vrot.slane %v4459_v59, 1  ;;  %v1450_v21 = vrot.slane %v4459_v59, 2  ;;  %v1459_v22 = vrot.slane %v4459_v59, 3  ;;  %v1468_v26 = vrot.slane %v4459_v59, 4 }
 0x363   : > { %v1477_v27 = vrot.slane %v4459_v59, 5  ;;  %v1486_v28 = vrot.slane %v4459_v59, 6  ;;  %v1495_v29 = vrot.slane %v4459_v59, 7  ;;  %v1303_v30 = vrot.slane %v4461_v60, 1 }
 0x364   : > { %v1310_v32 = vrot.slane %v4461_v60, 2  ;;  %v1319_v33 = vrot.slane %v4461_v60, 3  ;;  %v1328_v34 = vrot.slane %v4461_v60, 4  ;;  %v1337_v37 = vrot.slane %v4461_v60, 5 }
 0x365   : > { %v1346_v38 = vrot.slane %v4461_v60, 6  ;;  %v1355_v39 = vrot.slane %v4461_v60, 7 }
 0x36f   : > { %v2955_v63 = vpop.f32.mrb[4].mxu1 }
 0x370   : > { %v1133_v0 = vadd.f32 %v2955_v63, %v2727_v61  ;;  %v1108_v2 = vpop.f32.mrb[5].mxu1 }
 0x371   : > { %v1131_v4 = vadd.f32 %v2727_v61, %v1108_v2  ;;  %v2956_v5 = vpop.f32.mrb[6].mxu1 }
 0x372   : > { %v1134_v9 = vadd.f32 %v2956_v5, %v2727_v61  ;;  %v1111_v23 = vpop.f32.mrb[7].mxu1  ;;  %v1137_v25 = vmax.f32 %v1133_v0, 0.0 }
 0x373   : > { %v1132_v24 = vadd.f32 %v2727_v61, %v1111_v23  ;;  %v1135_v43 = vmax.f32 %v1131_v4, 0.0 }
 0x374   : > { %v1138_v42 = vmax.f32 %v1134_v9, 0.0 }
 0x375   : > { %v1136_v44 = vmax.f32 %v1132_v24, 0.0 }
 0x376   : > { %v1140_v45 = vpack.c.bf16 %v1138_v42, %v1137_v25 }
 0x377   : > { %v1139_v62 = vpack.c.bf16 %v1136_v44, %v1135_v43 }
 0x379   : > { %2961 = vmatprep.mubr.msk.bf16.mxu0 %vm741_vm3, %v1139_v62 }
 0x37a   : > { %2962 = vmatmul.mubr.msk.bf16.vlgmr.msra.gmra.mrb[4].mxu0 %vm741_vm3, %v1140_v45 }
 0x44d   : > { %v2963_v31 = vpop.f32.mrb[4].mxu0 }
 0x44e   : > { %v1216_v35 = vadd.f32 %v2963_v31, %v4527_v20  ;;  %v1207_v36 = vpop.f32.mrb[5].mxu0 }
 0x44f   : > { %v1208_v40 = vadd.f32 %v4527_v20, %v1207_v36  ;;  %v2964_v41 = vpop.f32.mrb[6].mxu0 }
 0x450   : > { %v1365_v46 = vrot.slane %v1216_v35, 7  ;;  %v4559_v47 = vsel %vm1225_vm5, %v1373_v1, %v1216_v35  ;;  %v1382_v48 = vrot.slane %v1216_v35, 1  ;;  %v1391_v49 = vrot.slane %v1216_v35, 2  ;;  %v1210_v50 = vpop.f32.mrb[7].mxu0 }
 0x451   : > { %v1400_v51 = vrot.slane %v1216_v35, 3  ;;  %v1409_v52 = vrot.slane %v1216_v35, 4  ;;  %v1418_v53 = vrot.slane %v1216_v35, 5  ;;  %v1427_v55 = vrot.slane %v1216_v35, 6 }
 0x452   : > { %v4563_v57 = vsel %vm1225_vm5, %v4455_v54, %v1365_v46  ;;  %v4566_v58 = vsel %vm1225_vm5, %v1380_v3, %v1382_v48  ;;  %v4569_v61 = vsel %vm1225_vm5, %v1389_v6, %v1391_v49  ;;  %v1223_v63 = vrot.slane %v1208_v40, 7 }
 0x453   : > { %v4573_v0 = vsel %vm1225_vm5, %v1398_v7, %v1400_v51  ;;  %v4576_v2 = vsel %vm1225_vm5, %v1407_v8, %v1409_v52  ;;  %v4579_v4 = vsel %vm1225_vm5, %v1416_v10, %v1418_v53  ;;  %v4582_v54 = vsel %vm1225_vm5, %v1425_v11, %v1427_v55 }
 0x454   : > { %v1226_v5 = vsel %vm1225_vm5, %v4457_v56, %v1223_v63  ;;  %v1235_v9 = vsel %vm1225_vm5, %v1233_v12, %v1208_v40  ;;  %v1242_v23 = vrot.slane %v1208_v40, 1  ;;  %v1251_v24 = vrot.slane %v1208_v40, 2 }
 0x455   : > { %1231 = vst.msk [vmem:[%s1229_s2] sm:$0x3] %vm276_vm1, %v1226_v5  ;;  %v1260_v25 = vrot.slane %v1208_v40, 3  ;;  %v1269_v42 = vrot.slane %v1208_v40, 4  ;;  %v1278_v43 = vrot.slane %v1208_v40, 5  ;;  %v1287_v44 = vrot.slane %v1208_v40, 6 }
 0x456   : > { %1239 = vst.msk [vmem:[%s1238_s8] sm:$0x3] %vm276_vm1, %v1235_v9  ;;  %v1244_v45 = vsel %vm1225_vm5, %v1240_v13, %v1242_v23  ;;  %v1253_v62 = vsel %vm1225_vm5, %v1249_v14, %v1251_v24  ;;  %v1219_v1 = vadd.f32 %v2964_v41, %v4527_v20  ;;  %v4609_v3 = vadd.f32 %v4527_v20, %v1210_v50  ;;  %s4612_s2 = sld [smem:[#allocation16 + %s5527_s27]]  ;;  %s1247_s8 = scalar_lea.vmem [#allocation2], %s5565_s20 }
 0x457   : > { %1248 = vst.msk [vmem:[%s1247_s8] sm:$0x3] %vm276_vm1, %v1244_v45  ;;  %v1262_v6 = vsel %vm1225_vm5, %v1258_v15, %v1260_v25  ;;  %v1271_v7 = vsel %vm1225_vm5, %v1267_v16, %v1269_v42  ;;  %v1280_v8 = vsel %vm1225_vm5, %v1276_v17, %v1278_v43  ;;  %v1289_v10 = vsel %vm1225_vm5, %v1285_v18, %v1287_v44  ;;  %s4633_s27 = sld [smem:[#allocation16 + %s5563_s13]]  ;;  %s1274_s20 = scalar_lea.vmem [#allocation2], %s5569_s7 }
 0x458   : > { %1257 = vst.msk [vmem:[%s1256_s29] sm:$0x3] %vm276_vm1, %v1253_v62  ;;  %v1435_v11 = vrot.slane %v1219_v1, 7  ;;  %v4641_v12 = vsel %vm1225_vm5, %v1443_v19, %v1219_v1  ;;  %v1452_v13 = vrot.slane %v1219_v1, 1  ;;  %v1461_v14 = vrot.slane %v1219_v1, 2  ;;  %s5570_s13 = sld [smem:[#allocation61_spill]] }
 0x459   : > { %1266 = vst.msk [vmem:[%s1265_s18] sm:$0x3] %vm276_vm1, %v1262_v6  ;;  %v1470_v56 = vrot.slane %v1219_v1, 3  ;;  %v1479_v15 = vrot.slane %v1219_v1, 4  ;;  %v1488_v16 = vrot.slane %v1219_v1, 5  ;;  %v1497_v17 = vrot.slane %v1219_v1, 6 }
 0x45a   : > { %1275 = vst.msk [vmem:[%s1274_s20] sm:$0x3] %vm276_vm1, %v1271_v7  ;;  %v4651_v18 = vsel %vm1225_vm5, %v4459_v59, %v1435_v11  ;;  %v4656_v19 = vsel %vm1225_vm5, %v1450_v21, %v1452_v13  ;;  %v4661_v20 = vsel %vm1225_vm5, %v1459_v22, %v1461_v14  ;;  %v1295_v31 = vrot.slane %v4609_v3, 7  ;;  %s5571_s8 = sshll.u32 %s4482_s11, 1  ;;  %s5572_s29 = sshll.u32 %s4488_s23, 1 }
 0x45b   : > { %s1283_s5 = scalar_lea.vmem [#allocation2], %s5571_s8  ;;  %v4676_v21 = vsel %vm1225_vm5, %v1468_v26, %v1470_v56  ;;  %v4681_v22 = vsel %vm1225_vm5, %v1477_v27, %v1479_v15  ;;  %v4686_v35 = vsel %vm1225_vm5, %v1486_v28, %v1488_v16  ;;  %v4691_v36 = vsel %vm1225_vm5, %v1495_v29, %v1497_v17  ;;  %s1292_s28 = scalar_lea.vmem [#allocation2], %s5572_s29 }
 0x45c   : > { %1284 = vst.msk [vmem:[%s1283_s5] sm:$0x3] %vm276_vm1, %v1280_v8  ;;  %v1297_v26 = vsel %vm1225_vm5, %v4461_v60, %v1295_v31  ;;  %v1305_v59 = vsel %vm1225_vm5, %v1303_v30, %v4609_v3  ;;  %v1312_v27 = vrot.slane %v4609_v3, 1  ;;  %v1321_v28 = vrot.slane %v4609_v3, 2  ;;  %s4711_s23 = sld [smem:[#allocation16 + %s5534_s19]]  ;;  %s1300_s18 = scalar_lea.vmem [#allocation2], %s5573_s30 }
 0x45d   : > { %1293 = vst.msk [vmem:[%s1292_s28] sm:$0x3] %vm276_vm1, %v1289_v10  ;;  %v1330_v29 = vrot.slane %v4609_v3, 3  ;;  %v1339_v40 = vrot.slane %v4609_v3, 4  ;;  %v1348_v30 = vrot.slane %v4609_v3, 5  ;;  %v1357_v41 = vrot.slane %v4609_v3, 6 }
 0x45e   : > { %s4697_s11 = sld [smem:[#allocation16 + %s5570_s13]]  ;;  %1301 = vst.msk [vmem:[%s1300_s18] sm:$0x3] %vm276_vm1, %v1297_v26  ;;  %s5574_s13 = sshll.u32 %s4496_s4, 1  ;;  %v1314_v46 = vsel %vm1225_vm5, %v1310_v32, %v1312_v27  ;;  %v1323_v48 = vsel %vm1225_vm5, %v1319_v33, %v1321_v28 }
 0x45f   : > { %s1308_s17 = scalar_lea.vmem [#allocation2], %s5574_s13  ;;  %s5576_s20 = sld [smem:[#allocation58_spill]]  ;;  %v1332_v49 = vsel %vm1225_vm5, %v1328_v34, %v1330_v29  ;;  %v1341_v32 = vsel %vm1225_vm5, %v1337_v37, %v1339_v40  ;;  %v1350_v33 = vsel %vm1225_vm5, %v1346_v38, %v1348_v30  ;;  %v1359_v50 = vsel %vm1225_vm5, %v1355_v39, %v1357_v41 }
 0x460   : > { %1309 = vst.msk [vmem:[%s1308_s17] sm:$0x3] %vm276_vm1, %v1305_v59  ;;  %s5577_s5 = sld [smem:[#allocation65_spill]]  ;;  %s5578_s28 = sshll.u32 %s4502_s14, 1 }
 0x461   : > { %s1317_s30 = scalar_lea.vmem [#allocation2], %s5578_s28  ;;  %s5579_s4 = sld [smem:[#allocation66_spill]] }
 0x462   : > { %1318 = vst.msk [vmem:[%s1317_s30] sm:$0x3] %vm276_vm1, %v1314_v46  ;;  %s5580_s18 = sld [smem:[#allocation67_spill]]  ;;  %s5581_s17 = sshll.u32 %s4513_s0, 1 }
 0x463   : > { %s4753_s13 = sld [smem:[#allocation16 + %s5536_s6]]  ;;  %s1326_s28 = scalar_lea.vmem [#allocation2], %s5581_s17 }
 0x464   : > { %1327 = vst.msk [vmem:[%s1326_s28] sm:$0x3] %vm276_vm1, %v1323_v48  ;;  %s5582_s30 = sshll.u32 %s5575_s21, 1  ;;  %s5583_s8 = sld [smem:[#allocation68_spill]] }
 0x465   : > { %s1335_s29 = scalar_lea.vmem [#allocation2], %s5582_s30  ;;  %s5584_s19 = sshll.u32 %s5576_s20, 1 }
 0x466   : > { %1336 = vst.msk [vmem:[%s1335_s29] sm:$0x3] %vm276_vm1, %v1332_v49  ;;  %s1344_s7 = scalar_lea.vmem [#allocation2], %s5584_s19  ;;  %s4765_s14 = sld [smem:[#allocation16 + %s5577_s5]] }
 0x467   : > { %1345 = vst.msk [vmem:[%s1344_s7] sm:$0x3] %vm276_vm1, %v1341_v32  ;;  %s1353_s6 = scalar_lea.vmem [#allocation2], %s2755_s24  ;;  %s2762_s0 = sshll.u32 %s4665_s12, 1 }
 0x468   : > { %1354 = vst.msk [vmem:[%s1353_s6] sm:$0x3] %vm276_vm1, %v1350_v33  ;;  %s4772_s21 = sld [smem:[#allocation16 + %s5579_s4]]  ;;  %s1362_s29 = scalar_lea.vmem [#allocation2], %s2756_s16 }
 0x469   : > { %1363 = vst.msk [vmem:[%s1362_s29] sm:$0x3] %vm276_vm1, %v1359_v50  ;;  %s2763_s7 = sshll.u32 %s4668_s3, 1  ;;  %s4779_s19 = sld [smem:[#allocation16 + %s5580_s18]] }
 0x46a   : > { %s5585_s20 = sshll.u32 %s4593_s10, 1  ;;  %s2764_s24 = sshll.u32 %s4694_s9, 1 }
 0x46b   : > { %s1370_s15 = scalar_lea.vmem [#allocation2], %s5585_s20  ;;  %s4787_s12 = sld [smem:[#allocation16 + %s5583_s8]] }
 0x46c   : > { %1371 = vst.msk [vmem:[%s1370_s15] sm:$0x3] %vm276_vm1, %v4563_v57  ;;  %s5586_s5 = sshll.u32 %s4596_s22, 1  ;;  %s2765_s16 = sshll.u32 %s4697_s11, 1 }
 0x46d   : > { %s1378_s1 = scalar_lea.vmem [#allocation2], %s5586_s5  ;;  %s5587_s3 = sshll.u32 %s4612_s2, 1 }
 0x46e   : > { %1379 = vst.msk [vmem:[%s1378_s1] sm:$0x3] %vm276_vm1, %v4559_v47  ;;  %s1387_s4 = scalar_lea.vmem [#allocation2], %s5587_s3  ;;  %s2766_s10 = sshll.u32 %s4711_s23, 1 }
 0x46f   : > { %1388 = vst.msk [vmem:[%s1387_s4] sm:$0x3] %vm276_vm1, %v4566_v58  ;;  %s5588_s18 = sshll.u32 %s4615_s25, 1  ;;  %s2767_s22 = sshll.u32 %s4714_s26, 1 }
 0x470   : > { %s1396_s17 = scalar_lea.vmem [#allocation2], %s5588_s18  ;;  %s5589_s9 = sshll.u32 %s4633_s27, 1 }
 0x471   : > { %1397 = vst.msk [vmem:[%s1396_s17] sm:$0x3] %vm276_vm1, %v4569_v61  ;;  %s1405_s8 = scalar_lea.vmem [#allocation2], %s5589_s9  ;;  %s2768_s11 = sshll.u32 %s4753_s13, 1 }
 0x472   : > { %1406 = vst.msk [vmem:[%s1405_s8] sm:$0x3] %vm276_vm1, %v4573_v0  ;;  %s1414_s2 = scalar_lea.vmem [#allocation2], %s2762_s0  ;;  %s2769_s28 = sshll.u32 %s4765_s14, 1 }
 0x473   : > { %1415 = vst.msk [vmem:[%s1414_s2] sm:$0x3] %vm276_vm1, %v4576_v2  ;;  %s1423_s30 = scalar_lea.vmem [#allocation2], %s2763_s7  ;;  %s2770_s25 = sshll.u32 %s4772_s21, 1 }
 0x474   : > { %1424 = vst.msk [vmem:[%s1423_s30] sm:$0x3] %vm276_vm1, %v4579_v4  ;;  %s1432_s23 = scalar_lea.vmem [#allocation2], %s2764_s24  ;;  %s2771_s27 = sshll.u32 %s4779_s19, 1 }
 0x475   : > { %1433 = vst.msk [vmem:[%s1432_s23] sm:$0x3] %vm276_vm1, %v4582_v54  ;;  %s1440_s26 = scalar_lea.vmem [#allocation2], %s2765_s16  ;;  %s2772_s13 = sshll.u32 %s4787_s12, 1 }
 0x476   : > { %1441 = vst.msk [vmem:[%s1440_s26] sm:$0x3] %vm276_vm1, %v4651_v18  ;;  %s1448_s6 = scalar_lea.vmem [#allocation2], %s2766_s10  ;;  %s1457_s14 = scalar_lea.vmem [#allocation2], %s2767_s22 }
 0x477   : > { %1449 = vst.msk [vmem:[%s1448_s6] sm:$0x3] %vm276_vm1, %v4641_v12  ;;  %s1466_s0 = scalar_lea.vmem [#allocation2], %s2768_s11  ;;  %s1475_s21 = scalar_lea.vmem [#allocation2], %s2769_s28 }
 0x478   : > { %1458 = vst.msk [vmem:[%s1457_s14] sm:$0x3] %vm276_vm1, %v4656_v19  ;;  %s1484_s29 = scalar_lea.vmem [#allocation2], %s2770_s25  ;;  %s1493_s7 = scalar_lea.vmem [#allocation2], %s2771_s27 }
 0x479   : > { %1467 = vst.msk [vmem:[%s1466_s0] sm:$0x3] %vm276_vm1, %v4661_v20  ;;  %s1502_s19 = scalar_lea.vmem [#allocation2], %s2772_s13  ;;  %s5590_s20 = sld [smem:[#allocation40_spill]] }
 0x47a   : > { %1476 = vst.msk [vmem:[%s1475_s21] sm:$0x3] %vm276_vm1, %v4676_v21 }
 0x47b   : > { %1485 = vst.msk [vmem:[%s1484_s29] sm:$0x3] %vm276_vm1, %v4681_v22 }
 0x47c   : > { %1494 = vst.msk [vmem:[%s1493_s7] sm:$0x3] %vm276_vm1, %v4686_v35 }
 0x47d   : > { %1503 = vst.msk [vmem:[%s1502_s19] sm:$0x3] %vm276_vm1, %v4691_v36 }
 0x47f   : > { %s283_s6 = sadd.s32 1, %s5590_s20  }
 0x480   : > { %p280_p3 = scmp.ge.s32.totalorder %s283_s6, 4  }
 0x481   :  { %s5591_s12 = sld [smem:[#allocation84_spill]] (%p280_p3)  ;;  %s1505_s4 = sld [smem:[#allocation20]] (%p280_p3) }
 0x482   :  { %282 = sbr.rel (!%p280_p3) target bundleno = 269 (0x10d), region = 346  ;;  %s2774_s10 = sld [smem:[#allocation20 + $0x1]] (%p280_p3) }
 0x483   :  { %s2776_s18 = sld [smem:[#allocation20 + $0x2]] (%p280_p3)  ;;  %s2778_s17 = sld [smem:[#allocation20 + $0x3]] (%p280_p3) }
 0x484   :  { %s4847_s22 = sld [smem:[#allocation20 + $0x4]] (%p280_p3)  ;;  %s4849_s9 = sld [smem:[#allocation20 + $0x5]] (%p280_p3) }
 0x485   :  { %s4854_s2 = sld [smem:[#allocation20 + $0x6]] (%p280_p3)  ;;  %s4856_s28 = sld [smem:[#allocation20 + $0x7]] (%p280_p3) }
 0x486   :  { %s4858_s30 = sld [smem:[#allocation20 + $0x8]] (%p280_p3)  ;;  %s4860_s25 = sld [smem:[#allocation20 + $0x9]] (%p280_p3) }
 0x487   :  { %v3039_v60 = vld [vmem:[%s5591_s12] sm:$0xff] (%p280_p3)   ;;  %v3040_v34 = vld [vmem:[%s5591_s12 + $0x10] sm:$0xff] (%p280_p3)   ;;  %v3041_v37 = vld [vmem:[%s5591_s12 + $0x8] sm:$0xff] (%p280_p3)   ;;  %s4862_s23 = sld [smem:[#allocation20 + $0xa]] (%p280_p3)  ;;  %s4864_s27 = sld [smem:[#allocation20 + $0xb]] (%p280_p3) }
 0x488   :  { %2965 = vmatprep.subr.bf16.mxu0 (%p280_p3), %v3039_v60  ;;  %2973 = vmatprep.subr.bf16.mxu1 (%p280_p3), %v3040_v34  ;;  %v3042_v38 = vld [vmem:[%s5591_s12 + $0x18] sm:$0xff] (%p280_p3)   ;;  %s2773_s26 = sshll.u32 (%p280_p3), %s1505_s4, 1  ;;  %s2775_s13 = sshll.u32 (%p280_p3), %s2774_s10, 1 }
 0x489   :  { %2966 = vmatpush3.bf16.msra.mxu0 %v3039_v60  ;;  %2974 = vmatpush3.bf16.msra.mxu1 %v3040_v34  ;;  %s1507_s6 = scalar_lea.vmem [#allocation2], %s2773_s26  ;;  %s1515_s14 = scalar_lea.vmem [#allocation2], %s2775_s13 }
 0x48a   :  { %2967 = vmatprep.subr.bf16.mxu0 %v3041_v37  ;;  %2975 = vmatprep.subr.bf16.mxu1 %v3042_v38  ;;  %v1508_v39 = vld [vmem:[%s1507_s6] sm:$0x3]  ;;  %s2777_s0 = sshll.u32 %s2776_s18, 1  ;;  %s2779_s21 = sshll.u32 %s2778_s17, 1 }
 0x48b   :  { %v1516_v47 = vld [vmem:[%s1515_s14] sm:$0x3]  ;;  %1510 = vst.msk [vmem:[#allocation3] sm:$0x1] %vm294_vm2, %v1508_v39  ;;  %s1521_s29 = scalar_lea.vmem [#allocation2], %s2777_s0  ;;  %s1527_s7 = scalar_lea.vmem [#allocation2], %s2779_s21 }
 0x48c   :  { %1517 = vst.msk [vmem:[#allocation3 + $0x1] sm:$0x1] %vm294_vm2, %v1516_v47  ;;  %v1522_v51 = vld [vmem:[%s1521_s29] sm:$0x3]  ;;  %s2781_s19 = sshll.u32 %s4847_s22, 1  ;;  %s2783_s20 = sshll.u32 %s4849_s9, 1 }
 0x48d   :  { %2968 = vmatpush3.bf16.msra.mxu0 %v3041_v37  ;;  %2976 = vmatpush3.bf16.msra.mxu1 %v3042_v38  ;;  %1512 = vst.msk [vmem:[#allocation4 - $0x1] sm:$0x2] %vm297_vm4, %v1508_v39  ;;  %1518 = vst.msk [vmem:[#allocation4] sm:$0x2] %vm297_vm4, %v1516_v47  ;;  %v1528_v52 = vld [vmem:[%s1527_s7] sm:$0x3] }
 0x48e   :  { %1523 = vst.msk [vmem:[#allocation3 + $0x2] sm:$0x1] %vm294_vm2, %v1522_v51  ;;  %1529 = vst.msk [vmem:[#allocation3 + $0x3] sm:$0x1] %vm294_vm2, %v1528_v52  ;;  %s1533_s15 = scalar_lea.vmem [#allocation2], %s2781_s19  ;;  %s1539_s24 = scalar_lea.vmem [#allocation2], %s2783_s20 }
 0x48f   :  { %1524 = vst.msk [vmem:[#allocation4 + $0x1] sm:$0x2] %vm297_vm4, %v1522_v51  ;;  %1530 = vst.msk [vmem:[#allocation4 + $0x2] sm:$0x2] %vm297_vm4, %v1528_v52  ;;  %v1534_v53 = vld [vmem:[%s1533_s15] sm:$0x3] }
 0x490   :  { %v1540_v55 = vld [vmem:[%s1539_s24] sm:$0x3]  ;;  %s2785_s12 = sshll.u32 %s4854_s2, 1  ;;  %s2787_s5 = sshll.u32 %s4856_s28, 1  ;;  %1535 = vst.msk [vmem:[#allocation3 + $0x4] sm:$0x1] %vm294_vm2, %v1534_v53 }
 0x491   :  { %1541 = vst.msk [vmem:[#allocation3 + $0x5] sm:$0x1] %vm294_vm2, %v1540_v55  ;;  %s1545_s1 = scalar_lea.vmem [#allocation2], %s2785_s12  ;;  %s1551_s16 = scalar_lea.vmem [#allocation2], %s2787_s5 }
 0x492   :  { %1536 = vst.msk [vmem:[#allocation4 + $0x3] sm:$0x2] %vm297_vm4, %v1534_v53  ;;  %1542 = vst.msk [vmem:[#allocation4 + $0x4] sm:$0x2] %vm297_vm4, %v1540_v55  ;;  %v1546_v57 = vld [vmem:[%s1545_s1] sm:$0x3] }
 0x493   :  { %v1552_v58 = vld [vmem:[%s1551_s16] sm:$0x3]  ;;  %s2789_s3 = sshll.u32 %s4858_s30, 1  ;;  %s2791_s4 = sshll.u32 %s4860_s25, 1  ;;  %1547 = vst.msk [vmem:[#allocation3 + $0x6] sm:$0x1] %vm294_vm2, %v1546_v57 }
 0x494   :  { %1553 = vst.msk [vmem:[#allocation3 + $0x7] sm:$0x1] %vm294_vm2, %v1552_v58  ;;  %s1557_s10 = scalar_lea.vmem [#allocation2], %s2789_s3  ;;  %s1563_s18 = scalar_lea.vmem [#allocation2], %s2791_s4 }
 0x495   :  { %1548 = vst.msk [vmem:[#allocation4 + $0x5] sm:$0x2] %vm297_vm4, %v1546_v57  ;;  %1554 = vst.msk [vmem:[#allocation4 + $0x6] sm:$0x2] %vm297_vm4, %v1552_v58  ;;  %v1558_v61 = vld [vmem:[%s1557_s10] sm:$0x3] }
 0x496   :  { %v1564_v63 = vld [vmem:[%s1563_s18] sm:$0x3]  ;;  %s2793_s17 = sshll.u32 %s4862_s23, 1  ;;  %s2795_s22 = sshll.u32 %s4864_s27, 1  ;;  %1559 = vst.msk [vmem:[#allocation3 + $0x8] sm:$0x1] %vm294_vm2, %v1558_v61 }
 0x497   :  { %1565 = vst.msk [vmem:[#allocation3 + $0x9] sm:$0x1] %vm294_vm2, %v1564_v63  ;;  %s1569_s9 = scalar_lea.vmem [#allocation2], %s2793_s17  ;;  %s1575_s8 = scalar_lea.vmem [#allocation2], %s2795_s22 }
 0x498   :  { %1560 = vst.msk [vmem:[#allocation4 + $0x7] sm:$0x2] %vm297_vm4, %v1558_v61  ;;  %1566 = vst.msk [vmem:[#allocation4 + $0x8] sm:$0x2] %vm297_vm4, %v1564_v63  ;;  %v1570_v0 = vld [vmem:[%s1569_s9] sm:$0x3] }
 0x499   :  { %v1576_v2 = vld [vmem:[%s1575_s8] sm:$0x3]  ;;  %s2796_s11 = sld [smem:[#allocation20 + $0xc]]  ;;  %1571 = vst.msk [vmem:[#allocation3 + $0xa] sm:$0x1] %vm294_vm2, %v1570_v0  ;;  %s2798_s2 = sld [smem:[#allocation20 + $0xd]] }
 0x49a   :  { %1577 = vst.msk [vmem:[#allocation3 + $0xb] sm:$0x1] %vm294_vm2, %v1576_v2  ;;  %s2800_s28 = sld [smem:[#allocation20 + $0xe]]  ;;  %s2802_s30 = sld [smem:[#allocation20 + $0xf]] }
 0x49b   :  { %1572 = vst.msk [vmem:[#allocation4 + $0x9] sm:$0x2] %vm297_vm4, %v1570_v0  ;;  %1578 = vst.msk [vmem:[#allocation4 + $0xa] sm:$0x2] %vm297_vm4, %v1576_v2  ;;  %s4898_s25 = sld [smem:[#allocation20 + $0x10]]  ;;  %s4900_s23 = sld [smem:[#allocation20 + $0x11]] }
 0x49c   :  { %s4902_s27 = sld [smem:[#allocation20 + $0x12]]  ;;  %s4904_s26 = sld [smem:[#allocation20 + $0x13]]  ;;  %v1739_v44 = vld [vmem:[#allocation3] sm:$0xff] }
 0x49d   :  { %s4906_s13 = sld [smem:[#allocation20 + $0x14]]  ;;  %s4908_s6 = sld [smem:[#allocation20 + $0x15]]  ;;  %v2021_v62 = vld [vmem:[#allocation4] sm:$0xff] }
 0x49e   :  { %s4910_s14 = sld [smem:[#allocation20 + $0x16]]  ;;  %s4912_s21 = sld [smem:[#allocation20 + $0x17]] }
 0x49f   :  { %s2797_s0 = sshll.u32 %s2796_s11, 1  ;;  %s2799_s29 = sshll.u32 %s2798_s2, 1 }
 0x4a0   :  { %s1581_s7 = scalar_lea.vmem [#allocation2], %s2797_s0  ;;  %s2801_s19 = sshll.u32 %s2800_s28, 1 }
 0x4a1   :  { %v1582_v4 = vld [vmem:[%s1581_s7] sm:$0x3]  ;;  %s1587_s20 = scalar_lea.vmem [#allocation2], %s2799_s29  ;;  %s2803_s15 = sshll.u32 %s2802_s30, 1 }
 0x4a2   :  { %1583 = vst.msk [vmem:[#allocation3 + $0xc] sm:$0x1] %vm294_vm2, %v1582_v4  ;;  %v1588_v54 = vld [vmem:[%s1587_s20] sm:$0x3]  ;;  %s1593_s24 = scalar_lea.vmem [#allocation2], %s2801_s19  ;;  %s2805_s12 = sshll.u32 %s4898_s25, 1 }
 0x4a3   :  { %1584 = vst.msk [vmem:[#allocation4 + $0xb] sm:$0x2] %vm297_vm4, %v1582_v4  ;;  %v1594_v5 = vld [vmem:[%s1593_s24] sm:$0x3]  ;;  %1590 = vst.msk [vmem:[#allocation4 + $0xc] sm:$0x2] %vm297_vm4, %v1588_v54 }
 0x4a4   :  { %1589 = vst.msk [vmem:[#allocation3 + $0xd] sm:$0x1] %vm294_vm2, %v1588_v54  ;;  %1595 = vst.msk [vmem:[#allocation3 + $0xe] sm:$0x1] %vm294_vm2, %v1594_v5  ;;  %s1599_s5 = scalar_lea.vmem [#allocation2], %s2803_s15  ;;  %s2807_s1 = sshll.u32 %s4900_s23, 1 }
 0x4a5   :  { %v1600_v9 = vld [vmem:[%s1599_s5] sm:$0x3]  ;;  %1596 = vst.msk [vmem:[#allocation4 + $0xd] sm:$0x2] %vm297_vm4, %v1594_v5  ;;  %s1605_s16 = scalar_lea.vmem [#allocation2], %s2805_s12  ;;  %s2809_s3 = sshll.u32 %s4902_s27, 1 }
 0x4a6   :  { %1601 = vst.msk [vmem:[#allocation3 + $0xf] sm:$0x1] %vm294_vm2, %v1600_v9  ;;  %v1606_v23 = vld [vmem:[%s1605_s16] sm:$0x3]  ;;  %s1611_s4 = scalar_lea.vmem [#allocation2], %s2807_s1  ;;  %s2811_s10 = sshll.u32 %s4904_s26, 1 }
 0x4a7   :  { %1602 = vst.msk [vmem:[#allocation4 + $0xe] sm:$0x2] %vm297_vm4, %v1600_v9  ;;  %v1612_v24 = vld [vmem:[%s1611_s4] sm:$0x3]  ;;  %1608 = vst.msk [vmem:[#allocation4 + $0xf] sm:$0x2] %vm297_vm4, %v1606_v23 }
 0x4a8   :  { %1607 = vst.msk [vmem:[#allocation3 + $0x10] sm:$0x1] %vm294_vm2, %v1606_v23  ;;  %1613 = vst.msk [vmem:[#allocation3 + $0x11] sm:$0x1] %vm294_vm2, %v1612_v24  ;;  %s1617_s18 = scalar_lea.vmem [#allocation2], %s2809_s3  ;;  %s2813_s17 = sshll.u32 %s4906_s13, 1 }
 0x4a9   :  { %v1618_v25 = vld [vmem:[%s1617_s18] sm:$0x3]  ;;  %1614 = vst.msk [vmem:[#allocation4 + $0x10] sm:$0x2] %vm297_vm4, %v1612_v24  ;;  %s1623_s22 = scalar_lea.vmem [#allocation2], %s2811_s10  ;;  %s2815_s9 = sshll.u32 %s4908_s6, 1 }
 0x4aa   :  { %1619 = vst.msk [vmem:[#allocation3 + $0x12] sm:$0x1] %vm294_vm2, %v1618_v25  ;;  %v1624_v42 = vld [vmem:[%s1623_s22] sm:$0x3]  ;;  %s1629_s8 = scalar_lea.vmem [#allocation2], %s2813_s17  ;;  %s2817_s11 = sshll.u32 %s4910_s14, 1 }
 0x4ab   :  { %1620 = vst.msk [vmem:[#allocation4 + $0x11] sm:$0x2] %vm297_vm4, %v1618_v25  ;;  %v1630_v43 = vld [vmem:[%s1629_s8] sm:$0x3]  ;;  %1626 = vst.msk [vmem:[#allocation4 + $0x12] sm:$0x2] %vm297_vm4, %v1624_v42 }
 0x4ac   :  { %1625 = vst.msk [vmem:[#allocation3 + $0x13] sm:$0x1] %vm294_vm2, %v1624_v42  ;;  %1631 = vst.msk [vmem:[#allocation3 + $0x14] sm:$0x1] %vm294_vm2, %v1630_v43  ;;  %s1635_s2 = scalar_lea.vmem [#allocation2], %s2815_s9  ;;  %s2819_s28 = sshll.u32 %s4912_s21, 1 }
 0x4ad   :  { %v1636_v45 = vld [vmem:[%s1635_s2] sm:$0x3]  ;;  %1632 = vst.msk [vmem:[#allocation4 + $0x13] sm:$0x2] %vm297_vm4, %v1630_v43  ;;  %s1641_s30 = scalar_lea.vmem [#allocation2], %s2817_s11  ;;  %s2820_s25 = sld [smem:[#allocation20 + $0x18]] }
 0x4ae   :  { %1637 = vst.msk [vmem:[#allocation3 + $0x15] sm:$0x1] %vm294_vm2, %v1636_v45  ;;  %v1642_v1 = vld [vmem:[%s1641_s30] sm:$0x3]  ;;  %s1647_s23 = scalar_lea.vmem [#allocation2], %s2819_s28  ;;  %s2822_s27 = sld [smem:[#allocation20 + $0x19]] }
 0x4af   :  { %1638 = vst.msk [vmem:[#allocation4 + $0x14] sm:$0x2] %vm297_vm4, %v1636_v45  ;;  %v1740_v3 = vld [vmem:[#allocation3 + $0x8] sm:$0xff]  ;;  %1644 = vst.msk [vmem:[#allocation4 + $0x15] sm:$0x2] %vm297_vm4, %v1642_v1  ;;  %s2824_s26 = sld [smem:[#allocation20 + $0x1a]] }
 0x4b0   :  { %1643 = vst.msk [vmem:[#allocation3 + $0x16] sm:$0x1] %vm294_vm2, %v1642_v1  ;;  %v1648_v6 = vld [vmem:[%s1647_s23] sm:$0x3]  ;;  %v1743_v8 = vpack.c.bf16 %v1740_v3, %v1739_v44  ;;  %s2826_s13 = sld [smem:[#allocation20 + $0x1b]]  ;;  %s2828_s6 = sld [smem:[#allocation20 + $0x1c]] }
 0x4b1   :  { %v2022_v7 = vld [vmem:[#allocation4 + $0x8] sm:$0xff]  ;;  %1649 = vst.msk [vmem:[#allocation3 + $0x17] sm:$0x1] %vm294_vm2, %v1648_v6  ;;  %s4946_s14 = sld [smem:[#allocation20 + $0x1d]]  ;;  %s4949_s0 = sld [smem:[#allocation20 + $0x1e]] }
 0x4b2   :  { %1650 = vst.msk [vmem:[#allocation4 + $0x16] sm:$0x2] %vm297_vm4, %v1648_v6  ;;  %v2025_v10 = vpack.c.bf16 %v2022_v7, %v2021_v62  ;;  %2969 = vmatprep.mubr.msk.bf16.mxu0 %vm741_vm3, %v1743_v8  ;;  %s4952_s21 = sld [smem:[#allocation20 + $0x1f]]  ;;  %s5592_s11 = sld [smem:[#allocation85_spill]] }
 0x4b3   :  { %s2821_s29 = sshll.u32 %s2820_s25, 1  ;;  %s5593_s23 = sld [smem:[#allocation86_spill]] }
 0x4b4   :  { %2977 = vmatprep.mubr.msk.bf16.mxu1 %vm741_vm3, %v2025_v10  ;;  %s2823_s7 = sshll.u32 %s2822_s27, 1  ;;  %s1653_s19 = scalar_lea.vmem [#allocation2], %s2821_s29 }
 0x4b5   :  { %v1654_v11 = vld [vmem:[%s1653_s19] sm:$0x3]  ;;  %s2825_s20 = sshll.u32 %s2824_s26, 1  ;;  %s1659_s15 = scalar_lea.vmem [#allocation2], %s2823_s7 }
 0x4b6   :  { %1655 = vst.msk [vmem:[#allocation3 + $0x18] sm:$0x1] %vm294_vm2, %v1654_v11  ;;  %v1660_v12 = vld [vmem:[%s1659_s15] sm:$0x3]  ;;  %s2827_s24 = sshll.u32 %s2826_s13, 1  ;;  %s1665_s12 = scalar_lea.vmem [#allocation2], %s2825_s20 }
 0x4b7   :  { %1656 = vst.msk [vmem:[#allocation4 + $0x17] sm:$0x2] %vm297_vm4, %v1654_v11  ;;  %v1666_v13 = vld [vmem:[%s1665_s12] sm:$0x3]  ;;  %s2829_s5 = sshll.u32 %s2828_s6, 1  ;;  %s1671_s1 = scalar_lea.vmem [#allocation2], %s2827_s24 }
 0x4b8   :  { %1661 = vst.msk [vmem:[#allocation3 + $0x19] sm:$0x1] %vm294_vm2, %v1660_v12  ;;  %1667 = vst.msk [vmem:[#allocation3 + $0x1a] sm:$0x1] %vm294_vm2, %v1666_v13  ;;  %v1672_v14 = vld [vmem:[%s1671_s1] sm:$0x3] }
 0x4b9   :  { %1662 = vst.msk [vmem:[#allocation4 + $0x18] sm:$0x2] %vm297_vm4, %v1660_v12  ;;  %s2831_s16 = sshll.u32 %s4946_s14, 1  ;;  %1668 = vst.msk [vmem:[#allocation4 + $0x19] sm:$0x2] %vm297_vm4, %v1666_v13  ;;  %s1677_s3 = scalar_lea.vmem [#allocation2], %s2829_s5 }
 0x4ba   :  { %1673 = vst.msk [vmem:[#allocation3 + $0x1b] sm:$0x1] %vm294_vm2, %v1672_v14  ;;  %v1678_v56 = vld [vmem:[%s1677_s3] sm:$0x3]  ;;  %s2833_s4 = sshll.u32 %s4949_s0, 1  ;;  %s1683_s10 = scalar_lea.vmem [#allocation2], %s2831_s16 }
 0x4bb   :  { %1674 = vst.msk [vmem:[#allocation4 + $0x1a] sm:$0x2] %vm297_vm4, %v1672_v14  ;;  %v1684_v15 = vld [vmem:[%s1683_s10] sm:$0x3]  ;;  %s2835_s18 = sshll.u32 %s4952_s21, 1  ;;  %s1689_s17 = scalar_lea.vmem [#allocation2], %s2833_s4 }
 0x4bc   :  { %1679 = vst.msk [vmem:[#allocation3 + $0x1c] sm:$0x1] %vm294_vm2, %v1678_v56  ;;  %1685 = vst.msk [vmem:[#allocation3 + $0x1d] sm:$0x1] %vm294_vm2, %v1684_v15  ;;  %v1690_v16 = vld [vmem:[%s1689_s17] sm:$0x3] }
 0x4bd   :  { %1680 = vst.msk [vmem:[#allocation4 + $0x1b] sm:$0x2] %vm297_vm4, %v1678_v56  ;;  %1686 = vst.msk [vmem:[#allocation4 + $0x1c] sm:$0x2] %vm297_vm4, %v1684_v15  ;;  %s1695_s22 = scalar_lea.vmem [#allocation2], %s2835_s18  ;;  %v1741_v18 = vld [vmem:[#allocation3 + $0x10] sm:$0xff] }
 0x4be   :  { %1691 = vst.msk [vmem:[#allocation3 + $0x1e] sm:$0x1] %vm294_vm2, %v1690_v16  ;;  %v1696_v17 = vld [vmem:[%s1695_s22] sm:$0x3]  ;;  %v2023_v19 = vld [vmem:[#allocation4 + $0x10] sm:$0xff]  ;;  %s5594_s14 = sld [smem:[#allocation82_spill]] }
 0x4bf   :  { %1692 = vst.msk [vmem:[#allocation4 + $0x1d] sm:$0x2] %vm297_vm4, %v1690_v16  ;;  %1698 = vst.msk [vmem:[#allocation4 + $0x1e] sm:$0x2] %vm297_vm4, %v1696_v17  ;;  %v2836_v35 = vld [vmem:[%s5592_s11] ss:$0 sm:$0xff] }
 0x4c0   :  { %1697 = vst.msk [vmem:[#allocation3 + $0x1f] sm:$0x1] %vm294_vm2, %v1696_v17  ;;  %v2847_v36 = vld [vmem:[%s5592_s11 + $0x1] ss:$0 sm:$0xff]  ;;  %v2841_v48 = vld [vmem:[%s5593_s23] ss:$0 sm:$0xff] }
 0x4c1   :  { %v2852_v34 = vld [vmem:[%s5593_s23 + $0x1] ss:$0 sm:$0xff]  ;;  %s3382_s0 = smov 127   ;;  %s5595_s5 = sld [smem:[#allocation87_spill]] }
 0x4c2   :  { %s5596_s3 = sld [smem:[#allocation89_spill]]  ;;  %s5597_s15 = sld [smem:[#allocation90_spill]] }
 0x4c3   :  { %s5171_s11 = sld [smem:[#allocation7]]  ;;  %s5598_s19 = sld [smem:[#allocation88_spill]] }
 0x4c4   :  { %v4997_v43 = vld [vmem:[%s5594_s14 + $0x8] sm:$0xff]  ;;  %v5003_v44 = vld [vmem:[%s5594_s14 + $0x10] sm:$0xff]  ;;  %v5009_v45 = vld [vmem:[%s5594_s14] sm:$0xff] }
 0x4c5   :  { %v5016_v7 = vld [vmem:[%s5594_s14 + $0x18] sm:$0xff] }
 0x4c6   :  { %v2024_v31 = vld [vmem:[#allocation4 + $0x18] sm:$0xff] }
 0x4c7   :  { %v1742_v20 = vld [vmem:[#allocation3 + $0x18] sm:$0xff]  ;;  %v2026_v22 = vpack.c.bf16 %v2024_v31, %v2023_v19  ;;  %v2842_v8 = vld [vmem:[%s5595_s5] ss:$0 sm:$0xff] }
 0x4c8   :  { %v1744_v21 = vpack.c.bf16 %v1742_v20, %v1741_v18  ;;  %v1983_v13 = vld [vmem:[%s5596_s3 + $0x10] sm:$0xff] }
 0x4c9   :  { %2978 = vmatmul.mubr.msk.bf16.vlgmr.msra.gmra.mrb[0].mxu1 %vm741_vm3, %v2026_v22  ;;  %v1981_v22 = vld [vmem:[%s5596_s3] sm:$0xff] }
 0x4ca   :  { %2970 = vmatmul.mubr.msk.bf16.vlgmr.msra.gmra.mrb[0].mxu0 %vm741_vm3, %v1744_v21 }
 0x59c   :  { %v2979_v59 = vpop.f32.mrb[0].mxu1 }
 0x59d   :  { %v2971_v26 = vpop.f32.mrb[0].mxu0  ;;  %v2089_v29 = vpop.f32.mrb[1].mxu1  ;;  %v2098_v63 = vadd.f32 %v2979_v59, %v2847_v36 }
 0x59e   :  { %v1816_v27 = vadd.f32 %v2971_v26, %v2836_v35  ;;  %v1807_v28 = vpop.f32.mrb[1].mxu0  ;;  %v2090_v41 = vadd.f32 %v2847_v36, %v2089_v29  ;;  %v2980_v46 = vpop.f32.mrb[2].mxu1 }
 0x59f   :  { %v1808_v40 = vadd.f32 %v2836_v35, %v1807_v28  ;;  %v2972_v30 = vpop.f32.mrb[2].mxu0  ;;  %v2101_v50 = vadd.f32 %v2980_v46, %v2847_v36  ;;  %v2092_v60 = vpop.f32.mrb[3].mxu1  ;;  %v2106_v5 = vmax.f32 %v2098_v63, 0.0 }
 0x5a0   :  { %v1824_v49 = vmax.f32 %v1816_v27, 0.0  ;;  %v1819_v32 = vadd.f32 %v2972_v30, %v2836_v35  ;;  %v1810_v33 = vpop.f32.mrb[3].mxu0  ;;  %v2104_v39 = vmax.f32 %v2090_v41, 0.0  ;;  %v2093_v62 = vadd.f32 %v2847_v36, %v2092_v60 }
 0x5a1   :  { %v1822_v37 = vmax.f32 %v1808_v40, 0.0  ;;  %v1811_v38 = vadd.f32 %v2836_v35, %v1810_v33  ;;  %v2107_v55 = vmax.f32 %v2101_v50, 0.0  ;;  %v2115_v25 = vmul.f32 %v2852_v34, %v2106_v5  ;;  %v5043_v35 = vld [vmem:[%s5595_s5 + $0x1] ss:$0 sm:$0xff] }
 0x5a2   :  { %v1825_v47 = vmax.f32 %v1819_v32, 0.0  ;;  %v1833_v51 = vmul.f32 %v2841_v48, %v1824_v49  ;;  %v2113_v53 = vmul.f32 %v2852_v34, %v2104_v39  ;;  %v2105_v1 = vmax.f32 %v2093_v62, 0.0  ;;  %v1984_v49 = vld [vmem:[%s5596_s3 + $0x18] sm:$0xff] }
 0x5a3   :  { %v1831_v52 = vmul.f32 %v2841_v48, %v1822_v37  ;;  %v1823_v61 = vmax.f32 %v1811_v38, 0.0  ;;  %v2116_v54 = vmul.f32 %v2852_v34, %v2107_v55  ;;  %v2123_v42 = vsel %vm741_vm3, %v2115_v25, 0.0 }
 0x5a4   :  { %v1841_v57 = vsel %vm741_vm3, %v1833_v51, 0.0  ;;  %v1834_v58 = vmul.f32 %v2841_v48, %v1825_v47  ;;  %v2117_v2 = vsel %vm741_vm3, %v2113_v53, 0.0  ;;  %v2114_v3 = vmul.f32 %v2852_v34, %v2105_v1  ;;  %v2862_v34 = vld [vmem:[%s5596_s3 + $0x20] sm:$0xff] }
 0x5a5   :  { %1842 = vadd.xlane.f32.xlu1 %v1841_v57  ;;  %v1835_v0 = vsel %vm741_vm3, %v1831_v52, 0.0  ;;  %v1832_v9 = vmul.f32 %v2841_v48, %v1823_v61  ;;  %v2126_v23 = vsel %vm741_vm3, %v2116_v54, 0.0 }
 0x5a6   :  { %1836 = vadd.xlane.f32.xlu0 %v1835_v0  ;;  %v1844_v4 = vsel %vm741_vm3, %v1834_v58, 0.0  ;;  %v2120_v6 = vsel %vm741_vm3, %v2114_v3, 0.0  ;;  %v2865_v0 = vld [vmem:[%s5596_s3 + $0x38] sm:$0xff] }
 0x5a7   :  { %v1838_v24 = vsel %vm741_vm3, %v1832_v9, 0.0 }
 0x5a9   :  { %1845 = vadd.xlane.f32.xlu1 %v1844_v4 }
 0x5aa   :  { %2118 = vadd.xlane.f32.xlu0 %v2117_v2 }
 0x5ad   :  { %2127 = vadd.xlane.f32.xlu1 %v2126_v23 }
 0x5ae   :  { %1839 = vadd.xlane.f32.xlu0 %v1838_v24 }
 0x5b2   :  { %2124 = vadd.xlane.f32.xlu0 %v2123_v42 }
 0x5be   :  { %1709 = vrot.lane.b32.xlu1 %v4997_v43, %s3382_s0 }
 0x5c2   :  { %1711 = vrot.lane.b32.xlu1 %v5003_v44, %s3382_s0 }
 0x5c8   :  { %1707 = vrot.lane.b32.xlu0 %v5009_v45, %s3382_s0 }
 0x5e6   :  { %2121 = vadd.xlane.f32.xlu1 %v2120_v6  ;;  %v1982_v6 = vld [vmem:[%s5596_s3 + $0x8] sm:$0xff] }
 0x5f7   :  { %1713 = vrot.lane.b32.xlu1 %v5016_v7, %s3382_s0 }
 0x632   :  { %v1843_v10 = vpop.xlane.xlu1 %1842 }
 0x633   :  { %v5022_v11 = vadd.f32 %v2842_v8, %v1843_v10  ;;  %v1837_v12 = vpop.xlane.xlu0 %1836 }
 0x634   :  { %v5027_v14 = vadd.f32 %v2842_v8, %v1837_v12 }
 0x635   :  { %v1858_v56 = vsub.f32 0.0, %v5022_v11  ;;  %v1906_v15 = vand.u32 2147483647, %v5022_v11  ;;  %vm1987_vm6 = vcmp.ge.f32.partialorder %v5022_v11, 0.0  ;;  %vm2007_vm1 = vcmp.lt.f32.partialorder %v5022_v11, 0.0 }
 0x636   :  { %v1991_v16 = vsel %vm1987_vm6, %v5003_v44, 0.0  ;;  %v1856_v17 = vsub.f32 0.0, %v5027_v14  ;;  %v1904_v18 = vand.u32 2147483647, %v5027_v14  ;;  %v1846_v19 = vpop.xlane.xlu1 %1845  ;;  %vm1985_vm7 = vcmp.ge.f32.partialorder %v5027_v14, 0.0 }
 0x637   :  { %v1866_v20 = vand.u32 2147483647, %v1858_v56  ;;  %v1910_v31 = vsub.f32 0.0, %v1906_v15  ;;  %v1995_v21 = vadd.f32 %v1991_v16, %v1983_v13  ;;  %v2119_v36 = vpop.xlane.xlu0 %2118  ;;  %v1989_v29 = vsel %vm1985_vm7, %v5009_v45, 0.0 }
 0x638   :  { %v1864_v26 = vand.u32 2147483647, %v1856_v17  ;;  %v1908_v59 = vsub.f32 0.0, %v1904_v18  ;;  %v5053_v40 = vadd.f32 %v2842_v8, %v1846_v19  ;;  %v1993_v41 = vadd.f32 %v1989_v29, %v1981_v22 }
 0x639   :  { %v1870_v27 = vsub.f32 0.0, %v1866_v20  ;;  %v1916_v28 = vmul.f32 1.442695, %v1910_v31  ;;  %1999 = vst.msk [vmem:[%s5596_s3 + $0x10] sm:$0xff] %vm233_vm0, %v1995_v21  ;;  %v5056_v46 = vadd.f32 %v5043_v35, %v2119_v36  ;;  %v2002_v20 = vld [vmem:[%s5597_s15 + $0x8] sm:$0xff]  ;;  %vm2005_vm3 = vcmp.lt.f32.partialorder %v5027_v14, 0.0 }
 0x63a   :  { %v1868_v30 = vsub.f32 0.0, %v1864_v26  ;;  %1997 = vst.msk [vmem:[%s5596_s3] sm:$0xff] %vm233_vm0, %v1993_v41  ;;  %vm1988_vm8 = vcmp.ge.f32.partialorder %v5053_v40, 0.0  ;;  %v1912_v32 = vmul.f32 1.442695, %v1908_v59  ;;  %v2128_v38 = vpop.xlane.xlu1 %2127  ;;  %v1859_v5 = vsub.f32 0.0, %v5053_v40 }
 0x63b   :  { %v1876_v48 = vmul.f32 1.442695, %v1870_v27  ;;  %3043 = vpow2.f32 %v1916_v28  ;;  %v1992_v33 = vsel %vm1988_vm8, %v5016_v7, 0.0  ;;  %v2138_v37 = vsub.f32 0.0, %v5056_v46  ;;  %v1840_v47 = vpop.xlane.xlu0 %1839 }
 0x63c   :  { %v1872_v50 = vmul.f32 1.442695, %v1868_v30  ;;  %v1996_v60 = vadd.f32 %v1992_v33, %v1984_v49  ;;  %v2186_v39 = vand.u32 2147483647, %v5056_v46  ;;  %vm2260_vm9 = vcmp.ge.f32.partialorder %v5056_v46, 0.0 }
 0x63d   :  { %3045 = vpow2.f32 %v1876_v48  ;;  %v2146_v51 = vand.u32 2147483647, %v2138_v37  ;;  %v2264_v52 = vsel %vm2260_vm9, %v5009_v45, 0.0  ;;  %v5081_v57 = vadd.f32 %v5043_v35, %v2128_v38 }
 0x63e   :  { %2000 = vst.msk [vmem:[%s5596_s3 + $0x18] sm:$0xff] %vm233_vm0, %v1996_v60  ;;  %3047 = vpow2.f32 %v1912_v32  ;;  %v2190_v53 = vsub.f32 0.0, %v2186_v39  ;;  %v2268_v55 = vadd.f32 %v2862_v34, %v2264_v52  ;;  %v5083_v61 = vadd.f32 %v2842_v8, %v1840_v47  ;;  %v5110_v10 = vpop.permute.xlu1 %1709  ;;  %v2864_v39 = vld [vmem:[%s5596_s3 + $0x30] sm:$0xff] }
 0x63f   :  { %3049 = vpow2.f32 %v1872_v50  ;;  %v2150_v58 = vsub.f32 0.0, %v2146_v51  ;;  %vm2263_vm10 = vcmp.ge.f32.partialorder %v5081_v57, 0.0  ;;  %v1907_v25 = vand.u32 2147483647, %v5053_v40  ;;  %v2125_v13 = vpop.xlane.xlu0 %2124 }
 0x640   :  { %v2194_v63 = vmul.f32 1.442695, %v2190_v53  ;;  %2866 = vst.msk [vmem:[%s5596_s3 + $0x20] sm:$0xff] %vm233_vm0, %v2268_v55  ;;  %v1857_v4 = vsub.f32 0.0, %v5083_v61  ;;  %v2267_v9 = vsel %vm2263_vm10, %v5016_v7, 0.0  ;;  %vm1986_vm11 = vcmp.ge.f32.partialorder %v5083_v61, 0.0 }
 0x641   :  { %v2154_v2 = vmul.f32 1.442695, %v2150_v58  ;;  %v2271_v23 = vadd.f32 %v2865_v0, %v2267_v9  ;;  %v5105_v3 = vand.u32 2147483647, %v1859_v5  ;;  %v1905_v12 = vand.u32 2147483647, %v5083_v61 }
 0x642   :  { %3051 = vpow2.f32 %v2194_v63  ;;  %v1865_v42 = vand.u32 2147483647, %v1857_v4  ;;  %v1911_v16 = vsub.f32 0.0, %v1907_v25  ;;  %v1990_v19 = vsel %vm1986_vm11, %v4997_v43, 0.0  ;;  %v1712_v33 = vpop.permute.xlu1 %1711 }
 0x643   :  { %3053 = vpow2.f32 %v2154_v2  ;;  %2869 = vst.msk [vmem:[%s5596_s3 + $0x38] sm:$0xff] %vm233_vm0, %v2271_v23  ;;  %v1909_v21 = vsub.f32 0.0, %v1905_v12  ;;  %v1994_v22 = vadd.f32 %v1990_v19, %v1982_v6  ;;  %vm2006_vm12 = vcmp.lt.f32.partialorder %v5083_v61, 0.0  ;;  %v2003_v23 = vld [vmem:[%s5597_s15 + $0x10] sm:$0xff] }
 0x644   :  { %v1869_v8 = vsub.f32 0.0, %v1865_v42  ;;  %v1871_v36 = vsub.f32 0.0, %v5105_v3  ;;  %v2010_v26 = vsel %vm2006_vm12, %v5110_v10, 0.0  ;;  %v5122_v59 = vadd.f32 %v5043_v35, %v2125_v13  ;;  %v2872_v6 = vld [vmem:[%s5597_s15 + $0x30] sm:$0xff] }
 0x645   :  { %v3044_v54 = vpop.eup %3043  ;;  %v1914_v28 = vmul.f32 1.442695, %v1909_v21  ;;  %1998 = vst.msk [vmem:[%s5596_s3 + $0x8] sm:$0xff] %vm233_vm0, %v1994_v22  ;;  %v2014_v29 = vadd.f32 %v2010_v26, %v2002_v20  ;;  %v5130_v48 = vadd.f32 %v5110_v10, %v4997_v43  ;;  %v1918_v60 = vmul.f32 1.442695, %v1911_v16  ;;  %v1708_v20 = vpop.permute.xlu0 %1707 }
 0x646   :  { %v1922_v62 = vadd.f32 1.0, %v3044_v54  ;;  %v1874_v18 = vmul.f32 1.442695, %v1869_v8  ;;  %v2140_v49 = vsub.f32 0.0, %v5122_v59  ;;  %v2188_v32 = vand.u32 2147483647, %v5122_v59 }
 0x647   :  { %v3046_v24 = vpop.eup %3045  ;;  %v2141_v38 = vsub.f32 0.0, %v5081_v57  ;;  %2018 = vst.msk [vmem:[%s5597_s15 + $0x8] sm:$0xff] %vm233_vm0, %v2014_v29  ;;  %vm2262_vm13 = vcmp.ge.f32.partialorder %v5122_v59, 0.0  ;;  %v2189_v51 = vand.u32 2147483647, %v5081_v57  ;;  %v5148_v58 = vadd.f32 %v1712_v33, %v5003_v44  ;;  %v2870_v29 = vld [vmem:[%s5597_s15 + $0x20] sm:$0xff] }
 0x648   :  { %v1882_v1 = vadd.f32 1.0, %v3046_v24  ;;  %v3048_v15 = vpop.eup %3047  ;;  %3055 = vlog2.f32 %v1922_v62  ;;  %v2148_v52 = vand.u32 2147483647, %v2140_v49  ;;  %v2192_v53 = vsub.f32 0.0, %v2188_v32 }
 0x649   :  { %v3050_v31 = vpop.eup %3049  ;;  %v1920_v27 = vadd.f32 1.0, %v3048_v15  ;;  %v2266_v55 = vsel %vm2262_vm13, %v5003_v44, 0.0  ;;  %vm1724_vm14 = vcmp.gt.f32.partialorder %v5130_v48, 0.0  ;;  %v2149_v2 = vand.u32 2147483647, %v2141_v38 }
 0x64a   :  { %3057 = vlog2.f32 %v1882_v1  ;;  %v1880_v41 = vadd.f32 1.0, %v3050_v31  ;;  %v2152_v63 = vsub.f32 0.0, %v2148_v52  ;;  %v2270_v0 = vadd.f32 %v2864_v39, %v2266_v55 }
 0x64b   :  { %3059 = vpow2.f32 %v1874_v18  ;;  %v2198_v54 = vmul.f32 1.442695, %v2192_v53  ;;  %vm1725_vm15 = vcmp.gt.f32.partialorder %v5148_v58, 0.0  ;;  %v1728_v42 = vsel %vm1724_vm14, %v5130_v48, 1.0 }
 0x64c   :  { %v3052_v30 = vpop.eup %3051  ;;  %3061 = vpow2.f32 %v1914_v28  ;;  %v2158_v9 = vmul.f32 1.442695, %v2152_v63  ;;  %2868 = vst.msk [vmem:[%s5596_s3 + $0x30] sm:$0xff] %vm233_vm0, %v2270_v0  ;;  %v1729_v24 = vsel %vm1725_vm15, %v5148_v58, 1.0  ;;  %v2011_v62 = vsel %vm2007_vm1, %v1712_v33, 0.0 }
 0x64d   :  { %v3054_v50 = vpop.eup %3053  ;;  %v2202_v34 = vadd.f32 1.0, %v3052_v30  ;;  %3063 = vlog2.f32 %v1920_v27  ;;  %vm2283_vm2 = vcmp.lt.f32.partialorder %v5122_v59, 0.0  ;;  %v1902_v3 = vmax.f32 %v5022_v11, 0.0 }
 0x64e   :  { %v2162_v47 = vadd.f32 1.0, %v3054_v50  ;;  %3065 = vlog2.f32 %v1880_v41  ;;  %v1862_v12 = vmax.f32 %v1858_v56, 0.0  ;;  %v1878_v13 = vmul.f32 1.442695, %v1871_v36  ;;  %v2001_v56 = vld [vmem:[%s5597_s15] sm:$0xff] }
 0x64f   :  { %3067 = vlog2.f32 %v2202_v34  ;;  %v2015_v15 = vadd.f32 %v2011_v62, %v2003_v23  ;;  %v2153_v16 = vsub.f32 0.0, %v2149_v2  ;;  %v2287_v19 = vsel %vm2283_vm2, %v1712_v33, 0.0 }
 0x650   :  { %3069 = vlog2.f32 %v2162_v47  ;;  %v2193_v21 = vsub.f32 0.0, %v2189_v51  ;;  %v2291_v11 = vadd.f32 %v2872_v6, %v2287_v19  ;;  %v5182_v26 = vadd.f32 %v1708_v20, %v5009_v45 }
 0x651   :  { %3071 = vpow2.f32 %v2198_v54  ;;  %2019 = vst.msk [vmem:[%s5597_s15 + $0x10] sm:$0xff] %vm233_vm0, %v2015_v15  ;;  %vm2281_vm4 = vcmp.lt.f32.partialorder %v5056_v46, 0.0  ;;  %v2009_v30 = vsel %vm2005_vm3, %v1708_v20, 0.0  ;;  %v2160_v32 = vmul.f32 1.442695, %v2153_v16 }
 0x652   :  { %v3056_v25 = vpop.eup %3055  ;;  %3073 = vpow2.f32 %v2158_v9  ;;  %2876 = vst.msk [vmem:[%s5597_s15 + $0x30] sm:$0xff] %vm233_vm0, %v2291_v11  ;;  %vm1723_vm5 = vcmp.gt.f32.partialorder %v5182_v26, 0.0  ;;  %v2013_v33 = vadd.f32 %v2009_v30, %v2001_v56  ;;  %v2285_v50 = vsel %vm2281_vm4, %v1708_v20, 0.0 }
 0x653   :  { %3075 = vrcp.f32 %v1729_v24  ;;  %v1929_v31 = vmul.f32 0.6931472, %v3056_v25  ;;  %v2200_v39 = vmul.f32 1.442695, %v2193_v21  ;;  %v1727_v52 = vsel %vm1723_vm5, %v5182_v26, 1.0 }
 0x654   :  { %v3058_v1 = vpop.eup %3057  ;;  %3077 = vrcp.f32 %v1728_v42  ;;  %2017 = vst.msk [vmem:[%s5597_s15] sm:$0xff] %vm233_vm0, %v2013_v33  ;;  %v2289_v53 = vadd.f32 %v2870_v29, %v2285_v50  ;;  %v1900_v0 = vmax.f32 %v5027_v14, 0.0  ;;  %v5200_v2 = vstv %s5171_s11 }
 0x655   :  { %v3060_v8 = vpop.eup %3059  ;;  %3079 = vpow2.f32 %v1918_v60  ;;  %v1889_v36 = vmul.f32 0.6931472, %v3058_v1  ;;  %v1934_v34 = vadd.f32 %v1929_v31, %v1902_v3  ;;  %v2142_v16 = vmax.f32 %v2138_v37, 0.0 }
 0x656   :  { %v1881_v18 = vadd.f32 1.0, %v3060_v8  ;;  %v3062_v22 = vpop.eup %3061  ;;  %2874 = vst.msk [vmem:[%s5597_s15 + $0x20] sm:$0xff] %vm233_vm0, %v2289_v53  ;;  %v1860_v8 = vmax.f32 %v1856_v17, 0.0  ;;  %v1861_v14 = vmax.f32 %v1857_v4, 0.0  ;;  %v1901_v29 = vmax.f32 %v5083_v61, 0.0 }
 0x657   :  { %v3064_v27 = vpop.eup %3063  ;;  %v1921_v28 = vadd.f32 1.0, %v3062_v22  ;;  %v1894_v51 = vadd.f32 %v1889_v36, %v1862_v12  ;;  %v1938_v23 = vsub.f32 0.0, %v1934_v34  ;;  %vm2008_vm6 = vcmp.lt.f32.partialorder %v5053_v40, 0.0 }
 0x658   :  { %3081 = vlog2.f32 %v1881_v18  ;;  %v3066_v41 = vpop.eup %3065  ;;  %v1925_v24 = vmul.f32 0.6931472, %v3064_v27  ;;  %v2182_v18 = vmax.f32 %v5056_v46, 0.0  ;;  %vm2284_vm8 = vcmp.lt.f32.partialorder %v5081_v57, 0.0 }
 0x659   :  { %3083 = vpow2.f32 %v1878_v13  ;;  %v3068_v60 = vpop.eup %3067  ;;  %v1898_v62 = vsub.f32 0.0, %v1894_v51  ;;  %v1885_v3 = vmul.f32 0.6931472, %v3066_v41 }
 0x65a   :  { %3085 = vlog2.f32 %v1921_v28  ;;  %v3070_v47 = vpop.eup %3069  ;;  %v2207_v12 = vmul.f32 0.6931472, %v3068_v60  ;;  %v1932_v31 = vadd.f32 %v1925_v24, %v1900_v0  ;;  %v1967_v0 = vld [vmem:[%s5598_s19 + $0x10] sm:$0xff] }
 0x65b   :  { %v3072_v55 = vpop.eup %3071  ;;  %3087 = vrcp.f32 %v1727_v52  ;;  %v2167_v13 = vmul.f32 0.6931472, %v3070_v47  ;;  %v1892_v37 = vadd.f32 %v1885_v3, %v1860_v8  ;;  %v2144_v3 = vmax.f32 %v2140_v49, 0.0 }
 0x65c   :  { %v3074_v63 = vpop.eup %3073  ;;  %3089 = vpow2.f32 %v2160_v32  ;;  %v2204_v54 = vadd.f32 1.0, %v3072_v55  ;;  %v2214_v22 = vadd.f32 %v2207_v12, %v2182_v18  ;;  %v1936_v32 = vsub.f32 0.0, %v1932_v31 }
 0x65d   :  { %v3076_v9 = vpop.eup %3075  ;;  %3091 = vpow2.f32 %v2200_v39  ;;  %v2164_v25 = vadd.f32 1.0, %v3074_v63  ;;  %v2174_v27 = vadd.f32 %v2167_v13, %v2142_v16  ;;  %v1896_v51 = vsub.f32 0.0, %v1892_v37 }
 0x65e   :  { %v3078_v42 = vpop.eup %3077  ;;  %3093 = vlog2.f32 %v2204_v54  ;;  %v5207_v1 = vmul.f32 %v3076_v9, %v5003_v44  ;;  %v2218_v55 = vsub.f32 0.0, %v2214_v22 }
 0x65f   :  { %v3080_v6 = vpop.eup %3079  ;;  %3095 = vlog2.f32 %v2164_v25  ;;  %v5222_v21 = vmul.f32 %v3078_v42, %v4997_v43  ;;  %v2178_v54 = vsub.f32 0.0, %v2174_v27  ;;  %v1966_v27 = vld [vmem:[%s5598_s19 + $0x8] sm:$0xff] }
 0x660   :  { %v5216_v19 = vmul.f32 %v5200_v2, %v5207_v1  ;;  %v1951_v44 = vsub.f32 1.0, %v5207_v1  ;;  %v1923_v28 = vadd.f32 1.0, %v3080_v6  ;;  %v2184_v6 = vmax.f32 %v5122_v59, 0.0  ;;  %v2863_v1 = vld [vmem:[%s5596_s3 + $0x28] sm:$0xff] }
 0x661   :  { %v5230_v60 = vmul.f32 %v5200_v2, %v5222_v21  ;;  %v1950_v63 = vsub.f32 1.0, %v5222_v21 }
 0x662   :  { %v3082_v15 = vpop.eup %3081  ;;  %v1947_v11 = vmul.f32 %v5216_v19, %v1898_v62  ;;  %v1955_v46 = vmul.f32 %v1951_v44, %v1938_v23  ;;  %3097 = vlog2.f32 %v1923_v28 }
 0x663   :  { %v3084_v20 = vpop.eup %3083  ;;  %v1887_v17 = vmul.f32 0.6931472, %v3082_v15 }
 0x664   :  { %v3086_v56 = vpop.eup %3085  ;;  %v1959_v41 = vadd.f32 %v1955_v46, %v1947_v11  ;;  %v1883_v33 = vadd.f32 1.0, %v3084_v20 }
 0x665   :  { %v1893_v36 = vadd.f32 %v1887_v17, %v1861_v14  ;;  %v1927_v30 = vmul.f32 0.6931472, %v3086_v56  ;;  %v3088_v4 = vpop.eup %3087 }
 0x666   :  { %v3090_v34 = vpop.eup %3089  ;;  %v1963_v47 = vsub.f32 0.0, %v1959_v41  ;;  %v1732_v52 = vmul.f32 %v3088_v4, %v5009_v45  ;;  %3099 = vlog2.f32 %v1883_v33  ;;  %v1965_v33 = vld [vmem:[%s5598_s19] sm:$0xff] }
 0x667   :  { %v1897_v50 = vsub.f32 0.0, %v1893_v36  ;;  %v1933_v39 = vadd.f32 %v1927_v30, %v1901_v29  ;;  %v3092_v53 = vpop.eup %3091  ;;  %v2165_v45 = vadd.f32 1.0, %v3090_v34 }
 0x668   :  { %v3094_v9 = vpop.eup %3093  ;;  %v1971_v24 = vmul.f32 %v1963_v47, %v5148_v58  ;;  %v1941_v25 = vmul.f32 %v5200_v2, %v1732_v52  ;;  %v1949_v42 = vsub.f32 1.0, %v1732_v52  ;;  %v2205_v17 = vadd.f32 1.0, %v3092_v53 }
 0x669   :  { %v1946_v61 = vmul.f32 %v5230_v60, %v1897_v50  ;;  %v1937_v23 = vsub.f32 0.0, %v1933_v39  ;;  %v3096_v62 = vpop.eup %3095  ;;  %v2211_v8 = vmul.f32 0.6931472, %v3094_v9  ;;  %3101 = vlog2.f32 %v2165_v45  ;;  %v2854_v50 = vld [vmem:[%s5598_s19 + $0x20] sm:$0xff]  ;;  %v2004_v9 = vld [vmem:[%s5597_s15 + $0x18] sm:$0xff] }
 0x66a   :  { %v2171_v13 = vmul.f32 0.6931472, %v3096_v62  ;;  %v1975_v15 = vadd.f32 %v1971_v24, %v1967_v0  ;;  %v1945_v16 = vmul.f32 %v1941_v25, %v1896_v51  ;;  %v1953_v20 = vmul.f32 %v1949_v42, %v1936_v32 }
 0x66b   :  { %v1954_v12 = vmul.f32 %v1950_v63, %v1937_v23  ;;  %v2216_v18 = vadd.f32 %v2211_v8, %v2184_v6  ;;  %v2222_v31 = vmul.f32 %v2178_v54, %v1941_v25  ;;  %v2226_v14 = vmul.f32 %v2218_v55, %v1949_v42  ;;  %v2856_v23 = vld [vmem:[%s5598_s19 + $0x30] sm:$0xff]  ;;  %v2873_v42 = vld [vmem:[%s5597_s15 + $0x38] sm:$0xff] }
 0x66c   :  { %v2176_v46 = vadd.f32 %v2171_v13, %v2144_v3  ;;  %1979 = vst.msk [vmem:[%s5598_s19 + $0x10] sm:$0xff] %vm233_vm0, %v1975_v15  ;;  %v1957_v49 = vadd.f32 %v1953_v20, %v1945_v16  ;;  %3103 = vlog2.f32 %v2205_v17 }
 0x66d   :  { %v1958_v11 = vadd.f32 %v1954_v12, %v1946_v61  ;;  %v2220_v59 = vsub.f32 0.0, %v2216_v18  ;;  %v2230_v37 = vadd.f32 %v2226_v14, %v2222_v31  ;;  %v3098_v12 = vpop.eup %3097 }
 0x66e   :  { %v2180_v22 = vsub.f32 0.0, %v2176_v46  ;;  %v1961_v29 = vsub.f32 0.0, %v1957_v49  ;;  %v1931_v17 = vmul.f32 0.6931472, %v3098_v12  ;;  %v1863_v49 = vmax.f32 %v1859_v5, 0.0 }
 0x66f   :  { %v1962_v56 = vsub.f32 0.0, %v1958_v11  ;;  %v2234_v30 = vsub.f32 0.0, %v2230_v37  ;;  %v2228_v32 = vmul.f32 %v2220_v59, %v1951_v44  ;;  %v1903_v37 = vmax.f32 %v5053_v40, 0.0 }
 0x670   :  { %v2224_v4 = vmul.f32 %v2180_v22, %v5216_v19  ;;  %v1969_v34 = vmul.f32 %v1961_v29, %v5182_v26  ;;  %v3100_v16 = vpop.eup %3099  ;;  %v2185_v22 = vmax.f32 %v5081_v57, 0.0 }
 0x671   :  { %v1970_v28 = vmul.f32 %v1962_v56, %v5130_v48  ;;  %v1891_v11 = vmul.f32 0.6931472, %v3100_v16  ;;  %v2145_v56 = vmax.f32 %v2141_v38, 0.0 }
 0x672   :  { %v2232_v47 = vadd.f32 %v2228_v32, %v2224_v4  ;;  %v1973_v52 = vadd.f32 %v1969_v34, %v1965_v33 }
 0x673   :  { %v2122_v36 = vpop.xlane.xlu1 %2121  ;;  %v1974_v19 = vadd.f32 %v1970_v28, %v1966_v27  ;;  %v3102_v31 = vpop.eup %3101  ;;  %v1935_v27 = vadd.f32 %v1931_v17, %v1903_v37  ;;  %v1895_v29 = vadd.f32 %v1891_v11, %v1863_v49 }
 0x674   :  { %v5253_v41 = vadd.f32 %v5043_v35, %v2122_v36  ;;  %v2243_v35 = vmul.f32 %v2234_v30, %v5182_v26  ;;  %v2871_v26 = vld [vmem:[%s5597_s15 + $0x28] sm:$0xff]  ;;  %v2236_v61 = vsub.f32 0.0, %v2232_v47  ;;  %1977 = vst.msk [vmem:[%s5598_s19] sm:$0xff] %vm233_vm0, %v1973_v52  ;;  %v2173_v59 = vmul.f32 0.6931472, %v3102_v31 }
 0x675   :  { %1978 = vst.msk [vmem:[%s5598_s19 + $0x8] sm:$0xff] %vm233_vm0, %v1974_v19  ;;  %v1939_v5 = vsub.f32 0.0, %v1935_v27  ;;  %v1899_v40 = vsub.f32 0.0, %v1895_v29 }
 0x676   :  { %v2139_v39 = vsub.f32 0.0, %v5253_v41  ;;  %v2187_v44 = vand.u32 2147483647, %v5253_v41  ;;  %vm2261_vm7 = vcmp.ge.f32.partialorder %v5253_v41, 0.0  ;;  %v2247_v53 = vadd.f32 %v2854_v50, %v2243_v35  ;;  %v3104_v14 = vpop.eup %3103 }
 0x677   :  { %v1714_v51 = vpop.permute.xlu1 %1713  ;;  %v2265_v54 = vsel %vm2261_vm7, %v4997_v43, 0.0  ;;  %vm2282_vm9 = vcmp.lt.f32.partialorder %v5253_v41, 0.0  ;;  %v2245_v45 = vmul.f32 %v2236_v61, %v5148_v58  ;;  %v2213_v46 = vmul.f32 0.6931472, %v3104_v14  ;;  %v2857_v61 = vld [vmem:[%s5598_s19 + $0x38] sm:$0xff] }
 0x678   :  { %v2147_v55 = vand.u32 2147483647, %v2139_v39  ;;  %v2191_v0 = vsub.f32 0.0, %v2187_v44  ;;  %2858 = vst.msk [vmem:[%s5598_s19 + $0x20] sm:$0xff] %vm233_vm0, %v2247_v53  ;;  %v2269_v24 = vadd.f32 %v2863_v1, %v2265_v54  ;;  %v2286_v25 = vsel %vm2282_vm9, %v5110_v10, 0.0 }
 0x679   :  { %v1722_v62 = vadd.f32 %v1714_v51, %v5016_v7  ;;  %v2290_v6 = vadd.f32 %v2871_v26, %v2286_v25  ;;  %v2012_v8 = vsel %vm2008_vm6, %v1714_v51, 0.0  ;;  %v2288_v15 = vsel %vm2284_vm8, %v1714_v51, 0.0 }
 0x67a   :  { %v2151_v43 = vsub.f32 0.0, %v2147_v55  ;;  %v2196_v3 = vmul.f32 1.442695, %v2191_v0  ;;  %2867 = vst.msk [vmem:[%s5596_s3 + $0x28] sm:$0xff] %vm233_vm0, %v2269_v24  ;;  %v2016_v10 = vadd.f32 %v2012_v8, %v2004_v9  ;;  %v2249_v18 = vadd.f32 %v2856_v23, %v2245_v45 }
 0x67b   :  { %vm1726_vm10 = vcmp.gt.f32.partialorder %v1722_v62, 0.0  ;;  %2875 = vst.msk [vmem:[%s5597_s15 + $0x28] sm:$0xff] %vm233_vm0, %v2290_v6  ;;  %v2292_v20 = vadd.f32 %v2873_v42, %v2288_v15  ;;  %v2217_v28 = vadd.f32 %v2213_v46, %v2185_v22  ;;  %v2177_v32 = vadd.f32 %v2173_v59, %v2145_v56 }
 0x67c   :  { %v2156_v13 = vmul.f32 1.442695, %v2151_v43  ;;  %3105 = vpow2.f32 %v2196_v3  ;;  %v1730_v58 = vsel %vm1726_vm10, %v1722_v62, 1.0  ;;  %2020 = vst.msk [vmem:[%s5597_s15 + $0x18] sm:$0xff] %vm233_vm0, %v2016_v10  ;;  %2860 = vst.msk [vmem:[%s5598_s19 + $0x30] sm:$0xff] %vm233_vm0, %v2249_v18  ;;  %v2183_v23 = vmax.f32 %v5253_v41, 0.0 }
 0x67d   :  { %2877 = vst.msk [vmem:[%s5597_s15 + $0x38] sm:$0xff] %vm233_vm0, %v2292_v20  ;;  %v2221_v35 = vsub.f32 0.0, %v2217_v28  ;;  %v2181_v19 = vsub.f32 0.0, %v2177_v32  ;;  %v2143_v24 = vmax.f32 %v2139_v39, 0.0  ;;  %v2855_v10 = vld [vmem:[%s5598_s19 + $0x28] sm:$0xff] }
 0x67e   :  { %3107 = vpow2.f32 %v2156_v13 }
 0x67f   :  { %3109 = vrcp.f32 %v1730_v58 }
 0x686   :  { %v3106_v36 = vpop.eup %3105 }
 0x687   :  { %v2203_v4 = vadd.f32 1.0, %v3106_v36 }
 0x688   :  { %v3108_v30 = vpop.eup %3107 }
 0x689   :  { %v3110_v33 = vpop.eup %3109  ;;  %v2163_v50 = vadd.f32 1.0, %v3108_v30  ;;  %3111 = vlog2.f32 %v2203_v4 }
 0x68a   :  { %v1738_v34 = vmul.f32 %v3110_v33, %v5016_v7  ;;  %v1968_v7 = vld [vmem:[%s5598_s19 + $0x18] sm:$0xff] }
 0x68b   :  { %3113 = vlog2.f32 %v2163_v50 }
 0x68c   :  { %v1944_v38 = vmul.f32 %v5200_v2, %v1738_v34  ;;  %v1952_v57 = vsub.f32 1.0, %v1738_v34 }
 0x68e   :  { %v1948_v47 = vmul.f32 %v1944_v38, %v1899_v40  ;;  %v1956_v1 = vmul.f32 %v1952_v57, %v1939_v5  ;;  %v2225_v44 = vmul.f32 %v2181_v19, %v1944_v38  ;;  %v2229_v51 = vmul.f32 %v2221_v35, %v1952_v57 }
 0x690   :  { %v1960_v52 = vadd.f32 %v1956_v1, %v1948_v47  ;;  %v2233_v53 = vadd.f32 %v2229_v51, %v2225_v44 }
 0x692   :  { %v1964_v26 = vsub.f32 0.0, %v1960_v52  ;;  %v2237_v55 = vsub.f32 0.0, %v2233_v53 }
 0x693   :  { %v3112_v0 = vpop.eup %3111 }
 0x694   :  { %v1972_v54 = vmul.f32 %v1964_v26, %v1722_v62  ;;  %v2246_v2 = vmul.f32 %v2237_v55, %v1722_v62  ;;  %v2209_v43 = vmul.f32 0.6931472, %v3112_v0 }
 0x695   :  { %v3114_v9 = vpop.eup %3113 }
 0x696   :  { %v2169_v25 = vmul.f32 0.6931472, %v3114_v9  ;;  %v1976_v42 = vadd.f32 %v1972_v54, %v1968_v7  ;;  %v2250_v45 = vadd.f32 %v2857_v61, %v2246_v2  ;;  %v2215_v3 = vadd.f32 %v2209_v43, %v2183_v23 }
 0x698   :  { %v2175_v6 = vadd.f32 %v2169_v25, %v2143_v24  ;;  %1980 = vst.msk [vmem:[%s5598_s19 + $0x18] sm:$0xff] %vm233_vm0, %v1976_v42  ;;  %2861 = vst.msk [vmem:[%s5598_s19 + $0x38] sm:$0xff] %vm233_vm0, %v2250_v45  ;;  %v2219_v62 = vsub.f32 0.0, %v2215_v3 }
 0x69a   :  { %v2179_v8 = vsub.f32 0.0, %v2175_v6  ;;  %v2227_v39 = vmul.f32 %v2219_v62, %v1950_v63 }
 0x69c   :  { %v2223_v41 = vmul.f32 %v2179_v8, %v5230_v60 }
 0x69e   :  { %v2231_v12 = vadd.f32 %v2227_v39, %v2223_v41 }
 0x6a0   :  { %v2235_v13 = vsub.f32 0.0, %v2231_v12 }
 0x6a2   :  { %v2244_v15 = vmul.f32 %v2235_v13, %v5130_v48 }
 0x6a4   :  { %v2248_v16 = vadd.f32 %v2855_v10, %v2244_v15 }
 0x6a6   :  { %2859 = vst.msk [vmem:[%s5598_s19 + $0x28] sm:$0xff] %vm233_vm0, %v2248_v16 }
 0x6a7   :  { %2309 = vsyncpa [#allocation9], 1 }
 0x6a8   :  { %2310 = vsyncpa [#allocation24], 1 }
 0x6a9   :  { %2311 = vsyncpa [#allocation27], 1 }
 0x6aa   :  { %2312 = vsyncpa [#allocation30], 1 }
 0x6ab   :  { %2313 = vsyncpa [#allocation10], 1 }
 0x6ac   :  { %2314 = vsyncpa [#allocation12], 1 }
 0x6ad   :  { %2315 = vsyncpa [#allocation15], 1 }
 0x6ae   :  { %2316 = vsyncpa [#allocation18], 1 }
 0x6af   :  { %2317 = vsyncpa [#allocation21], 1 }

</bundles_post_ra>
